<compile_context>
chip_gen: v6e
topology: v6e:2x2x1
jax: 0.10.0
libtpu: 0.0.40
codegen_flags: <defaults>
</compile_context>

<pallas_src>
import functools

import jax
import jax.numpy as jnp
from jax.experimental import pallas as pl
from jax.experimental.pallas import tpu as pltpu

_PREC = jax.lax.Precision.HIGHEST  # ref-check only; drop for production


def _block_roll(x, amount, block):
    """y[..., i] = x[..., (i - i%block) + (i%block + amount) % block].

    Cyclic roll *within* consecutive blocks of size `block` along the last
    axis (static `amount`, 0 < amount < block).  Built from two full-axis
    jnp.rolls (known direction) + a lane select: a global roll by `amount`
    is already correct except at the last `amount` offsets of every block,
    where the element must come from `amount - block` away instead.
    """
    s_len = x.shape[-1]
    a = jnp.roll(x, -amount, axis=-1)           # x[i + amount]          (no block wrap)
    b = jnp.roll(x, block - amount, axis=-1)    # x[i + amount - block]  (block wrapped)
    off = jax.lax.broadcasted_iota(jnp.int32, (1, s_len), 1) % block
    return jnp.where(off < block - amount, a, b)


# ----------------------------------------------------------------------------
# Fused kernel: per-batch projection (MXU) + criss-cross attention (VPU/XLU).
#   x_ref : (C, S)        input slab, channel-major, S = H*W*D on lanes
#   w_ref : (2*Cq+C, C)   fused [wq; wk; wv] (channel-major)
#   b_ref : (2*Cq+C, 1)   fused biases
#   gamma : (1, 1)        scalar in SMEM
#   o_ref : (C, S)        output slab (lane-dense store)
# ----------------------------------------------------------------------------
def _cc_kernel(H, W, D, Cq, C, x_ref, w_ref, b_ref, gamma_ref, o_ref):
    WD = W * D
    S = H * WD

    # --- fused 1x1x1 q/k/v projection: one MXU matmul, S stays on lanes ----
    qkv = jnp.dot(w_ref[...], x_ref[...],
                  preferred_element_type=jnp.float32, precision=_PREC)
    qkv = qkv + b_ref[...]                       # (2*Cq + C, S)
    q = qkv[:Cq, :]                              # (Cq, S)
    k = qkv[Cq:2 * Cq, :]                        # (Cq, S)
    v = qkv[2 * Cq:, :]                          # (C,  S)

    # --- enumerate criss-cross keys as relative shifts of the flat axis ----
    # flat index i = h*W*D + w*D + d:
    #   H branch: shift s*W*D   (s=1..H-1; query row itself excluded)
    #   W branch: shift s*D  within blocks of W*D (s=1..W-1; diag excluded)
    #   D branch: shift s    within blocks of D   (s=0..D-1; diag kept)
    shifts = ([(s * WD, S) for s in range(1, H)]        # H branch
              + [(s * D, WD) for s in range(1, W)]      # W branch
              + [(s, D) for s in range(D)])             # D branch

    def shift_one(arr, amount, block):
        if amount == 0:
            return arr
        if block == S:
            # Full-axis cyclic roll: either roll direction enumerates the same
            # key set and is applied identically to k and v -> direction-safe.
            return pltpu.roll(arr, amount, axis=1)
        return _block_roll(arr, amount, block)

    # pass 1: energies (tiny-Cq contraction on the VPU) + running max
    e_list = []
    m = None
    for amount, block in shifts:
        k_sh = shift_one(k, amount, block)
        e = jnp.sum(q * k_sh, axis=0, keepdims=True)     # (1, S)
        e_list.append(e)
        m = e if m is None else jnp.maximum(m, e)

    # pass 2: joint softmax numerators, denominator, value aggregation
    denom = jnp.zeros((1, S), jnp.float32)
    out = jnp.zeros((C, S), jnp.float32)
    for (amount, block), e in zip(shifts, e_list):
        p = jnp.exp(e - m)                               # (1, S)
        denom = denom + p
        v_sh = shift_one(v, amount, block)
        out = out + p * v_sh                             # (C, S)

    # normalization: EUP reciprocal seed + one Newton step (full f32 accuracy)
    inv = pl.reciprocal(denom, approx=True)
    inv = inv * (2.0 - denom * inv)

    gamma = gamma_ref[0, 0]
    o_ref[...] = gamma * (out * inv) + x_ref[...]


# ----------------------------------------------------------------------------
# Wrapper: no HBM transposes, only free reshapes.
# ----------------------------------------------------------------------------
def criss_cross_attention_3d(x, wq, bq, wk, bk, wv, bv, gamma):
    """x: (B, C, H, W, D) float32 (PyTorch conv layout). Returns same layout."""
    B, C, H, W, D = x.shape
    Cq = wq.shape[1]
    S = H * W * D
    Ctot = 2 * Cq + C

    x2 = x.reshape(B, C, S).astype(jnp.float32)                    # free view

    # fused channel-major projection parameters: qkv = W_all @ x + b
    w_all = jnp.concatenate([wq.T, wk.T, wv.T], axis=0).astype(jnp.float32)  # (Ctot, C)
    b_all = jnp.concatenate(
        [bq.reshape(-1), bk.reshape(-1), bv.reshape(-1)]).reshape(Ctot, 1)
    b_all = b_all.astype(jnp.float32)
    gamma2 = jnp.asarray(gamma, jnp.float32).reshape(1, 1)

    kernel = functools.partial(_cc_kernel, H, W, D, Cq, C)

    out2 = pl.pallas_call(
        kernel,
        grid=(B,),
        in_specs=[
            pl.BlockSpec((None, C, S), lambda b: (b, 0, 0)),        # x slab
            pl.BlockSpec((Ctot, C), lambda b: (0, 0)),              # fused weights
            pl.BlockSpec((Ctot, 1), lambda b: (0, 0)),              # fused bias
            pl.BlockSpec(memory_space=pltpu.MemorySpace.SMEM),      # gamma scalar
        ],
        out_specs=pl.BlockSpec((None, C, S), lambda b: (b, 0, 0)),
        out_shape=jax.ShapeDtypeStruct((B, C, S), jnp.float32),
        compiler_params=pltpu.CompilerParams(
            dimension_semantics=("parallel",)),
    )(x2, w_all, b_all, gamma2)

    return out2.reshape(B, C, H, W, D)


# ----------------------------------------------------------------------------
# Pure-JAX reference (mirrors the PyTorch CrissCrossAttention3D1 forward)
# ----------------------------------------------------------------------------
def reference(x, wq, bq, wk, bk, wv, bv, gamma):
    B, C, H, W, D = x.shape
    xcl = jnp.transpose(x, (0, 2, 3, 4, 1)).astype(jnp.float32)     # (B,H,W,D,C)
    q = jnp.einsum('bhwdc,ce->bhwde', xcl, wq, precision=_PREC) + bq.reshape(-1)
    k = jnp.einsum('bhwdc,ce->bhwde', xcl, wk, precision=_PREC) + bk.reshape(-1)
    v = jnp.einsum('bhwdc,ce->bhwde', xcl, wv, precision=_PREC) + bv.reshape(-1)

    eH = jnp.einsum('bhwdc,biwdc->bhwdi', q, k, precision=_PREC)
    eH = jnp.where(jnp.eye(H, dtype=bool)[None, :, None, None, :], -1e30, eH)
    eW = jnp.einsum('bhwdc,bhjdc->bhwdj', q, k, precision=_PREC)
    eW = jnp.where(jnp.eye(W, dtype=bool)[None, None, :, None, :], -1e30, eW)
    eD = jnp.einsum('bhwdc,bhwec->bhwde', q, k, precision=_PREC)     # unmasked

    attn = jax.nn.softmax(jnp.concatenate([eH, eW, eD], axis=-1), axis=-1)
    aH, aW, aD = attn[..., :H], attn[..., H:H + W], attn[..., H + W:]

    oH = jnp.einsum('bhwdi,biwdc->bhwdc', aH, v, precision=_PREC)
    oW = jnp.einsum('bhwdj,bhjdc->bhwdc', aW, v, precision=_PREC)
    oD = jnp.einsum('bhwde,bhwec->bhwdc', aD, v, precision=_PREC)

    out_cl = gamma.reshape(()) * (oH + oW + oD) + xcl
    return jnp.transpose(out_cl, (0, 4, 1, 2, 3))


# ----------------------------------------------------------------------------
if __name__ == "__main__":
    B, C, H, W, D = 2, 16, 8, 8, 8
    Cq = C // 8

    key = jax.random.PRNGKey(0)
    kx, kwq, kwk, kwv, kbq, kbk, kbv = jax.random.split(key, 7)

    # deterministic synthetic parameters (Conv3d 1x1 weights stored as (Cin, Cout))
    scale = 1.0 / (C ** 0.5)
    wq = jax.random.normal(kwq, (C, Cq), jnp.float32) * scale
    wk = jax.random.normal(kwk, (C, Cq), jnp.float32) * scale
    wv = jax.random.normal(kwv, (C, C), jnp.float32) * scale
    bq = jax.random.normal(kbq, (1, Cq), jnp.float32) * 0.1
    bk = jax.random.normal(kbk, (1, Cq), jnp.float32) * 0.1
    bv = jax.random.normal(kbv, (1, C), jnp.float32) * 0.1
    # The PyTorch module initializes gamma = 0 (output == x); use a nonzero
    # deterministic value so the attention path is actually exercised.
    gamma = jnp.full((1, 1), 0.5, jnp.float32)

    x = jax.random.normal(kx, (B, C, H, W, D), jnp.float32)

    out = jax.jit(criss_cross_attention_3d)(x, wq, bq, wk, bk, wv, bv, gamma)
    out = jax.block_until_ready(out)

    out_ref = reference(x, wq, bq, wk, bk, wv, bv, gamma)
    assert out.shape == (B, C, H, W, D)
    assert bool(jnp.allclose(out, out_ref, atol=1e-4, rtol=1e-4)), "mismatch vs reference"

    print("KERNEL_OK")
</pallas_src>

<mosaic_0001>
module attributes {stable_mosaic.version = 11 : i64} {
  func.func @_cc_kernel(%arg0: i32, %arg1: memref<1x16x512xf32, #tpu.memory_space<vmem>>, %arg2: memref<20x16xf32, #tpu.memory_space<vmem>>, %arg3: memref<20x1xf32, #tpu.memory_space<vmem>>, %arg4: memref<1x1xf32, #tpu.memory_space<smem>>, %arg5: memref<1x16x512xf32, #tpu.memory_space<vmem>>) attributes {dimension_semantics = [#tpu.dimension_semantics<parallel>], iteration_bounds = array<i64: 2>, scalar_prefetch = 0 : i64, scratch_operands = 0 : i64, tpu.core_type = #tpu.core_type<tc>, window_params = [{transform_indices = @transform_0, window_bounds = array<i64: 1, 16, 512>}, {pipeline_mode = #tpu.pipeline_mode<synchronous>, transform_indices = @transform_1, window_bounds = array<i64: 20, 16>}, {pipeline_mode = #tpu.pipeline_mode<synchronous>, transform_indices = @transform_2, window_bounds = array<i64: 20, 1>}, {transform_indices = @transform_3, window_bounds = array<i64: 1, 1>}, {transform_indices = @transform_4, window_bounds = array<i64: 1, 16, 512>}]} {
    %c0 = arith.constant 0 : index
    %c0_0 = arith.constant 0 : index
    %0 = vector.load %arg2[%c0, %c0_0] : memref<20x16xf32, #tpu.memory_space<vmem>>, vector<20x16xf32>
    %c0_1 = arith.constant 0 : index
    %c0_2 = arith.constant 0 : index
    %c0_3 = arith.constant 0 : index
    %1 = vector.load %arg1[%c0_1, %c0_2, %c0_3] : memref<1x16x512xf32, #tpu.memory_space<vmem>>, vector<1x16x512xf32>
    %2 = vector.shape_cast %1 : vector<1x16x512xf32> to vector<16x512xf32>
    %cst = arith.constant dense<0.000000e+00> : vector<20x512xf32>
    %3 = tpu.matmul %0, %2, %cst {dimension_numbers = #tpu.dot_dimension_numbers<[1], [0], [0], [1], [0, 0, 1, 1], [], []>, precision = #tpu.contract_precision<fp32>} : vector<20x16xf32>, vector<16x512xf32>, vector<20x512xf32> -> vector<20x512xf32>
    %c0_4 = arith.constant 0 : index
    %c0_5 = arith.constant 0 : index
    %4 = vector.load %arg3[%c0_4, %c0_5] : memref<20x1xf32, #tpu.memory_space<vmem>>, vector<20x1xf32>
    %5 = vector.broadcast %4 : vector<20x1xf32> to vector<20x512xf32>
    %6 = arith.addf %3, %5 : vector<20x512xf32>
    %7 = vector.extract_strided_slice %6 {offsets = [0, 0], sizes = [2, 512], strides = [1, 1]} : vector<20x512xf32> to vector<2x512xf32>
    %8 = vector.extract_strided_slice %6 {offsets = [2, 0], sizes = [2, 512], strides = [1, 1]} : vector<20x512xf32> to vector<2x512xf32>
    %9 = vector.extract_strided_slice %6 {offsets = [4, 0], sizes = [16, 512], strides = [1, 1]} : vector<20x512xf32> to vector<16x512xf32>
    %c64_i32 = arith.constant 64 : i32
    %10 = tpu.dynamic_rotate %8 by %c64_i32 dim 1 : vector<2x512xf32>, i32 -> vector<2x512xf32>
    %11 = arith.mulf %7, %10 : vector<2x512xf32>
    %cst_6 = arith.constant dense<0.000000e+00> : vector<512xf32>
    %12 = vector.multi_reduction <add>, %11, %cst_6 [0] : vector<2x512xf32> to vector<512xf32>
    %13 = vector.shape_cast %12 : vector<512xf32> to vector<1x512xf32>
    %c128_i32 = arith.constant 128 : i32
    %14 = tpu.dynamic_rotate %8 by %c128_i32 dim 1 : vector<2x512xf32>, i32 -> vector<2x512xf32>
    %15 = arith.mulf %7, %14 : vector<2x512xf32>
    %cst_7 = arith.constant dense<0.000000e+00> : vector<512xf32>
    %16 = vector.multi_reduction <add>, %15, %cst_7 [0] : vector<2x512xf32> to vector<512xf32>
    %17 = vector.shape_cast %16 : vector<512xf32> to vector<1x512xf32>
    %18 = arith.maximumf %13, %17 : vector<1x512xf32>
    %c192_i32 = arith.constant 192 : i32
    %19 = tpu.dynamic_rotate %8 by %c192_i32 dim 1 : vector<2x512xf32>, i32 -> vector<2x512xf32>
    %20 = arith.mulf %7, %19 : vector<2x512xf32>
    %cst_8 = arith.constant dense<0.000000e+00> : vector<512xf32>
    %21 = vector.multi_reduction <add>, %20, %cst_8 [0] : vector<2x512xf32> to vector<512xf32>
    %22 = vector.shape_cast %21 : vector<512xf32> to vector<1x512xf32>
    %23 = arith.maximumf %18, %22 : vector<1x512xf32>
    %c256_i32 = arith.constant 256 : i32
    %24 = tpu.dynamic_rotate %8 by %c256_i32 dim 1 : vector<2x512xf32>, i32 -> vector<2x512xf32>
    %25 = arith.mulf %7, %24 : vector<2x512xf32>
    %cst_9 = arith.constant dense<0.000000e+00> : vector<512xf32>
    %26 = vector.multi_reduction <add>, %25, %cst_9 [0] : vector<2x512xf32> to vector<512xf32>
    %27 = vector.shape_cast %26 : vector<512xf32> to vector<1x512xf32>
    %28 = arith.maximumf %23, %27 : vector<1x512xf32>
    %c320_i32 = arith.constant 320 : i32
    %29 = tpu.dynamic_rotate %8 by %c320_i32 dim 1 : vector<2x512xf32>, i32 -> vector<2x512xf32>
    %30 = arith.mulf %7, %29 : vector<2x512xf32>
    %cst_10 = arith.constant dense<0.000000e+00> : vector<512xf32>
    %31 = vector.multi_reduction <add>, %30, %cst_10 [0] : vector<2x512xf32> to vector<512xf32>
    %32 = vector.shape_cast %31 : vector<512xf32> to vector<1x512xf32>
    %33 = arith.maximumf %28, %32 : vector<1x512xf32>
    %c384_i32 = arith.constant 384 : i32
    %34 = tpu.dynamic_rotate %8 by %c384_i32 dim 1 : vector<2x512xf32>, i32 -> vector<2x512xf32>
    %35 = arith.mulf %7, %34 : vector<2x512xf32>
    %cst_11 = arith.constant dense<0.000000e+00> : vector<512xf32>
    %36 = vector.multi_reduction <add>, %35, %cst_11 [0] : vector<2x512xf32> to vector<512xf32>
    %37 = vector.shape_cast %36 : vector<512xf32> to vector<1x512xf32>
    %38 = arith.maximumf %33, %37 : vector<1x512xf32>
    %c448_i32 = arith.constant 448 : i32
    %39 = tpu.dynamic_rotate %8 by %c448_i32 dim 1 : vector<2x512xf32>, i32 -> vector<2x512xf32>
    %40 = arith.mulf %7, %39 : vector<2x512xf32>
    %cst_12 = arith.constant dense<0.000000e+00> : vector<512xf32>
    %41 = vector.multi_reduction <add>, %40, %cst_12 [0] : vector<2x512xf32> to vector<512xf32>
    %42 = vector.shape_cast %41 : vector<512xf32> to vector<1x512xf32>
    %43 = arith.maximumf %38, %42 : vector<1x512xf32>
    %44 = vector.extract_strided_slice %8 {offsets = [0, 8], sizes = [2, 504], strides = [1, 1]} : vector<2x512xf32> to vector<2x504xf32>
    %45 = vector.extract_strided_slice %8 {offsets = [0, 0], sizes = [2, 8], strides = [1, 1]} : vector<2x512xf32> to vector<2x8xf32>
    %46 = tpu.concatenate %44, %45 in 1 : vector<2x504xf32>, vector<2x8xf32> -> vector<2x512xf32>
    %47 = vector.extract_strided_slice %8 {offsets = [0, 456], sizes = [2, 56], strides = [1, 1]} : vector<2x512xf32> to vector<2x56xf32>
    %48 = vector.extract_strided_slice %8 {offsets = [0, 0], sizes = [2, 456], strides = [1, 1]} : vector<2x512xf32> to vector<2x456xf32>
    %49 = tpu.concatenate %47, %48 in 1 : vector<2x56xf32>, vector<2x456xf32> -> vector<2x512xf32>
    %50 = tpu.iota {dimensions = array<i32: 1>} : vector<1x512xi32>
    %c64_i32_13 = arith.constant 64 : i32
    %c0_i32 = arith.constant 0 : i32
    %51 = arith.cmpi eq, %c64_i32_13, %c0_i32 : i32
    %c1_i32 = arith.constant 1 : i32
    %52 = arith.select %51, %c1_i32, %c64_i32_13 : i32
    %53 = vector.broadcast %52 : i32 to vector<1x512xi32>
    %54 = arith.remsi %50, %53 : vector<1x512xi32>
    %c0_i32_14 = arith.constant 0 : i32
    %55 = vector.broadcast %c0_i32_14 : i32 to vector<1x512xi32>
    %56 = arith.cmpi ne, %54, %55 : vector<1x512xi32>
    %c0_i32_15 = arith.constant 0 : i32
    %57 = vector.broadcast %c0_i32_15 : i32 to vector<1x512xi32>
    %58 = arith.cmpi slt, %54, %57 : vector<1x512xi32>
    %c0_i32_16 = arith.constant 0 : i32
    %59 = arith.cmpi slt, %52, %c0_i32_16 : i32
    %60 = vector.broadcast %59 : i1 to vector<1x512xi1>
    %61 = vector.broadcast %60 : vector<1x512xi1> to vector<1x512xi1>
    %62 = arith.xori %58, %61 : vector<1x512xi1>
    %63 = arith.andi %62, %56 : vector<1x512xi1>
    %64 = vector.broadcast %52 : i32 to vector<1x512xi32>
    %65 = arith.addi %54, %64 : vector<1x512xi32>
    %66 = arith.select %63, %65, %54 : vector<1x512xi1>, vector<1x512xi32>
    %c56_i32 = arith.constant 56 : i32
    %67 = vector.broadcast %c56_i32 : i32 to vector<1x512xi32>
    %68 = arith.cmpi slt, %66, %67 : vector<1x512xi32>
    %69 = vector.shape_cast %68 : vector<1x512xi1> to vector<1x512xi1>
    %70 = vector.broadcast %69 : vector<1x512xi1> to vector<2x512xi1>
    %71 = arith.select %70, %46, %49 : vector<2x512xi1>, vector<2x512xf32>
    %72 = arith.mulf %7, %71 : vector<2x512xf32>
    %cst_17 = arith.constant dense<0.000000e+00> : vector<512xf32>
    %73 = vector.multi_reduction <add>, %72, %cst_17 [0] : vector<2x512xf32> to vector<512xf32>
    %74 = vector.shape_cast %73 : vector<512xf32> to vector<1x512xf32>
    %75 = arith.maximumf %43, %74 : vector<1x512xf32>
    %76 = vector.extract_strided_slice %8 {offsets = [0, 16], sizes = [2, 496], strides = [1, 1]} : vector<2x512xf32> to vector<2x496xf32>
    %77 = vector.extract_strided_slice %8 {offsets = [0, 0], sizes = [2, 16], strides = [1, 1]} : vector<2x512xf32> to vector<2x16xf32>
    %78 = tpu.concatenate %76, %77 in 1 : vector<2x496xf32>, vector<2x16xf32> -> vector<2x512xf32>
    %79 = vector.extract_strided_slice %8 {offsets = [0, 464], sizes = [2, 48], strides = [1, 1]} : vector<2x512xf32> to vector<2x48xf32>
    %80 = vector.extract_strided_slice %8 {offsets = [0, 0], sizes = [2, 464], strides = [1, 1]} : vector<2x512xf32> to vector<2x464xf32>
    %81 = tpu.concatenate %79, %80 in 1 : vector<2x48xf32>, vector<2x464xf32> -> vector<2x512xf32>
    %82 = tpu.iota {dimensions = array<i32: 1>} : vector<1x512xi32>
    %c64_i32_18 = arith.constant 64 : i32
    %c0_i32_19 = arith.constant 0 : i32
    %83 = arith.cmpi eq, %c64_i32_18, %c0_i32_19 : i32
    %c1_i32_20 = arith.constant 1 : i32
    %84 = arith.select %83, %c1_i32_20, %c64_i32_18 : i32
    %85 = vector.broadcast %84 : i32 to vector<1x512xi32>
    %86 = arith.remsi %82, %85 : vector<1x512xi32>
    %c0_i32_21 = arith.constant 0 : i32
    %87 = vector.broadcast %c0_i32_21 : i32 to vector<1x512xi32>
    %88 = arith.cmpi ne, %86, %87 : vector<1x512xi32>
    %c0_i32_22 = arith.constant 0 : i32
    %89 = vector.broadcast %c0_i32_22 : i32 to vector<1x512xi32>
    %90 = arith.cmpi slt, %86, %89 : vector<1x512xi32>
    %c0_i32_23 = arith.constant 0 : i32
    %91 = arith.cmpi slt, %84, %c0_i32_23 : i32
    %92 = vector.broadcast %91 : i1 to vector<1x512xi1>
    %93 = vector.broadcast %92 : vector<1x512xi1> to vector<1x512xi1>
    %94 = arith.xori %90, %93 : vector<1x512xi1>
    %95 = arith.andi %94, %88 : vector<1x512xi1>
    %96 = vector.broadcast %84 : i32 to vector<1x512xi32>
    %97 = arith.addi %86, %96 : vector<1x512xi32>
    %98 = arith.select %95, %97, %86 : vector<1x512xi1>, vector<1x512xi32>
    %c48_i32 = arith.constant 48 : i32
    %99 = vector.broadcast %c48_i32 : i32 to vector<1x512xi32>
    %100 = arith.cmpi slt, %98, %99 : vector<1x512xi32>
    %101 = vector.shape_cast %100 : vector<1x512xi1> to vector<1x512xi1>
    %102 = vector.broadcast %101 : vector<1x512xi1> to vector<2x512xi1>
    %103 = arith.select %102, %78, %81 : vector<2x512xi1>, vector<2x512xf32>
    %104 = arith.mulf %7, %103 : vector<2x512xf32>
    %cst_24 = arith.constant dense<0.000000e+00> : vector<512xf32>
    %105 = vector.multi_reduction <add>, %104, %cst_24 [0] : vector<2x512xf32> to vector<512xf32>
    %106 = vector.shape_cast %105 : vector<512xf32> to vector<1x512xf32>
    %107 = arith.maximumf %75, %106 : vector<1x512xf32>
    %108 = vector.extract_strided_slice %8 {offsets = [0, 24], sizes = [2, 488], strides = [1, 1]} : vector<2x512xf32> to vector<2x488xf32>
    %109 = vector.extract_strided_slice %8 {offsets = [0, 0], sizes = [2, 24], strides = [1, 1]} : vector<2x512xf32> to vector<2x24xf32>
    %110 = tpu.concatenate %108, %109 in 1 : vector<2x488xf32>, vector<2x24xf32> -> vector<2x512xf32>
    %111 = vector.extract_strided_slice %8 {offsets = [0, 472], sizes = [2, 40], strides = [1, 1]} : vector<2x512xf32> to vector<2x40xf32>
    %112 = vector.extract_strided_slice %8 {offsets = [0, 0], sizes = [2, 472], strides = [1, 1]} : vector<2x512xf32> to vector<2x472xf32>
    %113 = tpu.concatenate %111, %112 in 1 : vector<2x40xf32>, vector<2x472xf32> -> vector<2x512xf32>
    %114 = tpu.iota {dimensions = array<i32: 1>} : vector<1x512xi32>
    %c64_i32_25 = arith.constant 64 : i32
    %c0_i32_26 = arith.constant 0 : i32
    %115 = arith.cmpi eq, %c64_i32_25, %c0_i32_26 : i32
    %c1_i32_27 = arith.constant 1 : i32
    %116 = arith.select %115, %c1_i32_27, %c64_i32_25 : i32
    %117 = vector.broadcast %116 : i32 to vector<1x512xi32>
    %118 = arith.remsi %114, %117 : vector<1x512xi32>
    %c0_i32_28 = arith.constant 0 : i32
    %119 = vector.broadcast %c0_i32_28 : i32 to vector<1x512xi32>
    %120 = arith.cmpi ne, %118, %119 : vector<1x512xi32>
    %c0_i32_29 = arith.constant 0 : i32
    %121 = vector.broadcast %c0_i32_29 : i32 to vector<1x512xi32>
    %122 = arith.cmpi slt, %118, %121 : vector<1x512xi32>
    %c0_i32_30 = arith.constant 0 : i32
    %123 = arith.cmpi slt, %116, %c0_i32_30 : i32
    %124 = vector.broadcast %123 : i1 to vector<1x512xi1>
    %125 = vector.broadcast %124 : vector<1x512xi1> to vector<1x512xi1>
    %126 = arith.xori %122, %125 : vector<1x512xi1>
    %127 = arith.andi %126, %120 : vector<1x512xi1>
    %128 = vector.broadcast %116 : i32 to vector<1x512xi32>
    %129 = arith.addi %118, %128 : vector<1x512xi32>
    %130 = arith.select %127, %129, %118 : vector<1x512xi1>, vector<1x512xi32>
    %c40_i32 = arith.constant 40 : i32
    %131 = vector.broadcast %c40_i32 : i32 to vector<1x512xi32>
    %132 = arith.cmpi slt, %130, %131 : vector<1x512xi32>
    %133 = vector.shape_cast %132 : vector<1x512xi1> to vector<1x512xi1>
    %134 = vector.broadcast %133 : vector<1x512xi1> to vector<2x512xi1>
    %135 = arith.select %134, %110, %113 : vector<2x512xi1>, vector<2x512xf32>
    %136 = arith.mulf %7, %135 : vector<2x512xf32>
    %cst_31 = arith.constant dense<0.000000e+00> : vector<512xf32>
    %137 = vector.multi_reduction <add>, %136, %cst_31 [0] : vector<2x512xf32> to vector<512xf32>
    %138 = vector.shape_cast %137 : vector<512xf32> to vector<1x512xf32>
    %139 = arith.maximumf %107, %138 : vector<1x512xf32>
    %140 = vector.extract_strided_slice %8 {offsets = [0, 32], sizes = [2, 480], strides = [1, 1]} : vector<2x512xf32> to vector<2x480xf32>
    %141 = vector.extract_strided_slice %8 {offsets = [0, 0], sizes = [2, 32], strides = [1, 1]} : vector<2x512xf32> to vector<2x32xf32>
    %142 = tpu.concatenate %140, %141 in 1 : vector<2x480xf32>, vector<2x32xf32> -> vector<2x512xf32>
    %143 = vector.extract_strided_slice %8 {offsets = [0, 480], sizes = [2, 32], strides = [1, 1]} : vector<2x512xf32> to vector<2x32xf32>
    %144 = vector.extract_strided_slice %8 {offsets = [0, 0], sizes = [2, 480], strides = [1, 1]} : vector<2x512xf32> to vector<2x480xf32>
    %145 = tpu.concatenate %143, %144 in 1 : vector<2x32xf32>, vector<2x480xf32> -> vector<2x512xf32>
    %146 = tpu.iota {dimensions = array<i32: 1>} : vector<1x512xi32>
    %c64_i32_32 = arith.constant 64 : i32
    %c0_i32_33 = arith.constant 0 : i32
    %147 = arith.cmpi eq, %c64_i32_32, %c0_i32_33 : i32
    %c1_i32_34 = arith.constant 1 : i32
    %148 = arith.select %147, %c1_i32_34, %c64_i32_32 : i32
    %149 = vector.broadcast %148 : i32 to vector<1x512xi32>
    %150 = arith.remsi %146, %149 : vector<1x512xi32>
    %c0_i32_35 = arith.constant 0 : i32
    %151 = vector.broadcast %c0_i32_35 : i32 to vector<1x512xi32>
    %152 = arith.cmpi ne, %150, %151 : vector<1x512xi32>
    %c0_i32_36 = arith.constant 0 : i32
    %153 = vector.broadcast %c0_i32_36 : i32 to vector<1x512xi32>
    %154 = arith.cmpi slt, %150, %153 : vector<1x512xi32>
    %c0_i32_37 = arith.constant 0 : i32
    %155 = arith.cmpi slt, %148, %c0_i32_37 : i32
    %156 = vector.broadcast %155 : i1 to vector<1x512xi1>
    %157 = vector.broadcast %156 : vector<1x512xi1> to vector<1x512xi1>
    %158 = arith.xori %154, %157 : vector<1x512xi1>
    %159 = arith.andi %158, %152 : vector<1x512xi1>
    %160 = vector.broadcast %148 : i32 to vector<1x512xi32>
    %161 = arith.addi %150, %160 : vector<1x512xi32>
    %162 = arith.select %159, %161, %150 : vector<1x512xi1>, vector<1x512xi32>
    %c32_i32 = arith.constant 32 : i32
    %163 = vector.broadcast %c32_i32 : i32 to vector<1x512xi32>
    %164 = arith.cmpi slt, %162, %163 : vector<1x512xi32>
    %165 = vector.shape_cast %164 : vector<1x512xi1> to vector<1x512xi1>
    %166 = vector.broadcast %165 : vector<1x512xi1> to vector<2x512xi1>
    %167 = arith.select %166, %142, %145 : vector<2x512xi1>, vector<2x512xf32>
    %168 = arith.mulf %7, %167 : vector<2x512xf32>
    %cst_38 = arith.constant dense<0.000000e+00> : vector<512xf32>
    %169 = vector.multi_reduction <add>, %168, %cst_38 [0] : vector<2x512xf32> to vector<512xf32>
    %170 = vector.shape_cast %169 : vector<512xf32> to vector<1x512xf32>
    %171 = arith.maximumf %139, %170 : vector<1x512xf32>
    %172 = vector.extract_strided_slice %8 {offsets = [0, 40], sizes = [2, 472], strides = [1, 1]} : vector<2x512xf32> to vector<2x472xf32>
    %173 = vector.extract_strided_slice %8 {offsets = [0, 0], sizes = [2, 40], strides = [1, 1]} : vector<2x512xf32> to vector<2x40xf32>
    %174 = tpu.concatenate %172, %173 in 1 : vector<2x472xf32>, vector<2x40xf32> -> vector<2x512xf32>
    %175 = vector.extract_strided_slice %8 {offsets = [0, 488], sizes = [2, 24], strides = [1, 1]} : vector<2x512xf32> to vector<2x24xf32>
    %176 = vector.extract_strided_slice %8 {offsets = [0, 0], sizes = [2, 488], strides = [1, 1]} : vector<2x512xf32> to vector<2x488xf32>
    %177 = tpu.concatenate %175, %176 in 1 : vector<2x24xf32>, vector<2x488xf32> -> vector<2x512xf32>
    %178 = tpu.iota {dimensions = array<i32: 1>} : vector<1x512xi32>
    %c64_i32_39 = arith.constant 64 : i32
    %c0_i32_40 = arith.constant 0 : i32
    %179 = arith.cmpi eq, %c64_i32_39, %c0_i32_40 : i32
    %c1_i32_41 = arith.constant 1 : i32
    %180 = arith.select %179, %c1_i32_41, %c64_i32_39 : i32
    %181 = vector.broadcast %180 : i32 to vector<1x512xi32>
    %182 = arith.remsi %178, %181 : vector<1x512xi32>
    %c0_i32_42 = arith.constant 0 : i32
    %183 = vector.broadcast %c0_i32_42 : i32 to vector<1x512xi32>
    %184 = arith.cmpi ne, %182, %183 : vector<1x512xi32>
    %c0_i32_43 = arith.constant 0 : i32
    %185 = vector.broadcast %c0_i32_43 : i32 to vector<1x512xi32>
    %186 = arith.cmpi slt, %182, %185 : vector<1x512xi32>
    %c0_i32_44 = arith.constant 0 : i32
    %187 = arith.cmpi slt, %180, %c0_i32_44 : i32
    %188 = vector.broadcast %187 : i1 to vector<1x512xi1>
    %189 = vector.broadcast %188 : vector<1x512xi1> to vector<1x512xi1>
    %190 = arith.xori %186, %189 : vector<1x512xi1>
    %191 = arith.andi %190, %184 : vector<1x512xi1>
    %192 = vector.broadcast %180 : i32 to vector<1x512xi32>
    %193 = arith.addi %182, %192 : vector<1x512xi32>
    %194 = arith.select %191, %193, %182 : vector<1x512xi1>, vector<1x512xi32>
    %c24_i32 = arith.constant 24 : i32
    %195 = vector.broadcast %c24_i32 : i32 to vector<1x512xi32>
    %196 = arith.cmpi slt, %194, %195 : vector<1x512xi32>
    %197 = vector.shape_cast %196 : vector<1x512xi1> to vector<1x512xi1>
    %198 = vector.broadcast %197 : vector<1x512xi1> to vector<2x512xi1>
    %199 = arith.select %198, %174, %177 : vector<2x512xi1>, vector<2x512xf32>
    %200 = arith.mulf %7, %199 : vector<2x512xf32>
    %cst_45 = arith.constant dense<0.000000e+00> : vector<512xf32>
    %201 = vector.multi_reduction <add>, %200, %cst_45 [0] : vector<2x512xf32> to vector<512xf32>
    %202 = vector.shape_cast %201 : vector<512xf32> to vector<1x512xf32>
    %203 = arith.maximumf %171, %202 : vector<1x512xf32>
    %204 = vector.extract_strided_slice %8 {offsets = [0, 48], sizes = [2, 464], strides = [1, 1]} : vector<2x512xf32> to vector<2x464xf32>
    %205 = vector.extract_strided_slice %8 {offsets = [0, 0], sizes = [2, 48], strides = [1, 1]} : vector<2x512xf32> to vector<2x48xf32>
    %206 = tpu.concatenate %204, %205 in 1 : vector<2x464xf32>, vector<2x48xf32> -> vector<2x512xf32>
    %207 = vector.extract_strided_slice %8 {offsets = [0, 496], sizes = [2, 16], strides = [1, 1]} : vector<2x512xf32> to vector<2x16xf32>
    %208 = vector.extract_strided_slice %8 {offsets = [0, 0], sizes = [2, 496], strides = [1, 1]} : vector<2x512xf32> to vector<2x496xf32>
    %209 = tpu.concatenate %207, %208 in 1 : vector<2x16xf32>, vector<2x496xf32> -> vector<2x512xf32>
    %210 = tpu.iota {dimensions = array<i32: 1>} : vector<1x512xi32>
    %c64_i32_46 = arith.constant 64 : i32
    %c0_i32_47 = arith.constant 0 : i32
    %211 = arith.cmpi eq, %c64_i32_46, %c0_i32_47 : i32
    %c1_i32_48 = arith.constant 1 : i32
    %212 = arith.select %211, %c1_i32_48, %c64_i32_46 : i32
    %213 = vector.broadcast %212 : i32 to vector<1x512xi32>
    %214 = arith.remsi %210, %213 : vector<1x512xi32>
    %c0_i32_49 = arith.constant 0 : i32
    %215 = vector.broadcast %c0_i32_49 : i32 to vector<1x512xi32>
    %216 = arith.cmpi ne, %214, %215 : vector<1x512xi32>
    %c0_i32_50 = arith.constant 0 : i32
    %217 = vector.broadcast %c0_i32_50 : i32 to vector<1x512xi32>
    %218 = arith.cmpi slt, %214, %217 : vector<1x512xi32>
    %c0_i32_51 = arith.constant 0 : i32
    %219 = arith.cmpi slt, %212, %c0_i32_51 : i32
    %220 = vector.broadcast %219 : i1 to vector<1x512xi1>
    %221 = vector.broadcast %220 : vector<1x512xi1> to vector<1x512xi1>
    %222 = arith.xori %218, %221 : vector<1x512xi1>
    %223 = arith.andi %222, %216 : vector<1x512xi1>
    %224 = vector.broadcast %212 : i32 to vector<1x512xi32>
    %225 = arith.addi %214, %224 : vector<1x512xi32>
    %226 = arith.select %223, %225, %214 : vector<1x512xi1>, vector<1x512xi32>
    %c16_i32 = arith.constant 16 : i32
    %227 = vector.broadcast %c16_i32 : i32 to vector<1x512xi32>
    %228 = arith.cmpi slt, %226, %227 : vector<1x512xi32>
    %229 = vector.shape_cast %228 : vector<1x512xi1> to vector<1x512xi1>
    %230 = vector.broadcast %229 : vector<1x512xi1> to vector<2x512xi1>
    %231 = arith.select %230, %206, %209 : vector<2x512xi1>, vector<2x512xf32>
    %232 = arith.mulf %7, %231 : vector<2x512xf32>
    %cst_52 = arith.constant dense<0.000000e+00> : vector<512xf32>
    %233 = vector.multi_reduction <add>, %232, %cst_52 [0] : vector<2x512xf32> to vector<512xf32>
    %234 = vector.shape_cast %233 : vector<512xf32> to vector<1x512xf32>
    %235 = arith.maximumf %203, %234 : vector<1x512xf32>
    %236 = vector.extract_strided_slice %8 {offsets = [0, 56], sizes = [2, 456], strides = [1, 1]} : vector<2x512xf32> to vector<2x456xf32>
    %237 = vector.extract_strided_slice %8 {offsets = [0, 0], sizes = [2, 56], strides = [1, 1]} : vector<2x512xf32> to vector<2x56xf32>
    %238 = tpu.concatenate %236, %237 in 1 : vector<2x456xf32>, vector<2x56xf32> -> vector<2x512xf32>
    %239 = vector.extract_strided_slice %8 {offsets = [0, 504], sizes = [2, 8], strides = [1, 1]} : vector<2x512xf32> to vector<2x8xf32>
    %240 = vector.extract_strided_slice %8 {offsets = [0, 0], sizes = [2, 504], strides = [1, 1]} : vector<2x512xf32> to vector<2x504xf32>
    %241 = tpu.concatenate %239, %240 in 1 : vector<2x8xf32>, vector<2x504xf32> -> vector<2x512xf32>
    %242 = tpu.iota {dimensions = array<i32: 1>} : vector<1x512xi32>
    %c64_i32_53 = arith.constant 64 : i32
    %c0_i32_54 = arith.constant 0 : i32
    %243 = arith.cmpi eq, %c64_i32_53, %c0_i32_54 : i32
    %c1_i32_55 = arith.constant 1 : i32
    %244 = arith.select %243, %c1_i32_55, %c64_i32_53 : i32
    %245 = vector.broadcast %244 : i32 to vector<1x512xi32>
    %246 = arith.remsi %242, %245 : vector<1x512xi32>
    %c0_i32_56 = arith.constant 0 : i32
    %247 = vector.broadcast %c0_i32_56 : i32 to vector<1x512xi32>
    %248 = arith.cmpi ne, %246, %247 : vector<1x512xi32>
    %c0_i32_57 = arith.constant 0 : i32
    %249 = vector.broadcast %c0_i32_57 : i32 to vector<1x512xi32>
    %250 = arith.cmpi slt, %246, %249 : vector<1x512xi32>
    %c0_i32_58 = arith.constant 0 : i32
    %251 = arith.cmpi slt, %244, %c0_i32_58 : i32
    %252 = vector.broadcast %251 : i1 to vector<1x512xi1>
    %253 = vector.broadcast %252 : vector<1x512xi1> to vector<1x512xi1>
    %254 = arith.xori %250, %253 : vector<1x512xi1>
    %255 = arith.andi %254, %248 : vector<1x512xi1>
    %256 = vector.broadcast %244 : i32 to vector<1x512xi32>
    %257 = arith.addi %246, %256 : vector<1x512xi32>
    %258 = arith.select %255, %257, %246 : vector<1x512xi1>, vector<1x512xi32>
    %c8_i32 = arith.constant 8 : i32
    %259 = vector.broadcast %c8_i32 : i32 to vector<1x512xi32>
    %260 = arith.cmpi slt, %258, %259 : vector<1x512xi32>
    %261 = vector.shape_cast %260 : vector<1x512xi1> to vector<1x512xi1>
    %262 = vector.broadcast %261 : vector<1x512xi1> to vector<2x512xi1>
    %263 = arith.select %262, %238, %241 : vector<2x512xi1>, vector<2x512xf32>
    %264 = arith.mulf %7, %263 : vector<2x512xf32>
    %cst_59 = arith.constant dense<0.000000e+00> : vector<512xf32>
    %265 = vector.multi_reduction <add>, %264, %cst_59 [0] : vector<2x512xf32> to vector<512xf32>
    %266 = vector.shape_cast %265 : vector<512xf32> to vector<1x512xf32>
    %267 = arith.maximumf %235, %266 : vector<1x512xf32>
    %268 = arith.mulf %7, %8 : vector<2x512xf32>
    %cst_60 = arith.constant dense<0.000000e+00> : vector<512xf32>
    %269 = vector.multi_reduction <add>, %268, %cst_60 [0] : vector<2x512xf32> to vector<512xf32>
    %270 = vector.shape_cast %269 : vector<512xf32> to vector<1x512xf32>
    %271 = arith.maximumf %267, %270 : vector<1x512xf32>
    %272 = vector.extract_strided_slice %8 {offsets = [0, 1], sizes = [2, 511], strides = [1, 1]} : vector<2x512xf32> to vector<2x511xf32>
    %273 = vector.extract_strided_slice %8 {offsets = [0, 0], sizes = [2, 1], strides = [1, 1]} : vector<2x512xf32> to vector<2x1xf32>
    %274 = tpu.concatenate %272, %273 in 1 : vector<2x511xf32>, vector<2x1xf32> -> vector<2x512xf32>
    %275 = vector.extract_strided_slice %8 {offsets = [0, 505], sizes = [2, 7], strides = [1, 1]} : vector<2x512xf32> to vector<2x7xf32>
    %276 = vector.extract_strided_slice %8 {offsets = [0, 0], sizes = [2, 505], strides = [1, 1]} : vector<2x512xf32> to vector<2x505xf32>
    %277 = tpu.concatenate %275, %276 in 1 : vector<2x7xf32>, vector<2x505xf32> -> vector<2x512xf32>
    %278 = tpu.iota {dimensions = array<i32: 1>} : vector<1x512xi32>
    %c8_i32_61 = arith.constant 8 : i32
    %c0_i32_62 = arith.constant 0 : i32
    %279 = arith.cmpi eq, %c8_i32_61, %c0_i32_62 : i32
    %c1_i32_63 = arith.constant 1 : i32
    %280 = arith.select %279, %c1_i32_63, %c8_i32_61 : i32
    %281 = vector.broadcast %280 : i32 to vector<1x512xi32>
    %282 = arith.remsi %278, %281 : vector<1x512xi32>
    %c0_i32_64 = arith.constant 0 : i32
    %283 = vector.broadcast %c0_i32_64 : i32 to vector<1x512xi32>
    %284 = arith.cmpi ne, %282, %283 : vector<1x512xi32>
    %c0_i32_65 = arith.constant 0 : i32
    %285 = vector.broadcast %c0_i32_65 : i32 to vector<1x512xi32>
    %286 = arith.cmpi slt, %282, %285 : vector<1x512xi32>
    %c0_i32_66 = arith.constant 0 : i32
    %287 = arith.cmpi slt, %280, %c0_i32_66 : i32
    %288 = vector.broadcast %287 : i1 to vector<1x512xi1>
    %289 = vector.broadcast %288 : vector<1x512xi1> to vector<1x512xi1>
    %290 = arith.xori %286, %289 : vector<1x512xi1>
    %291 = arith.andi %290, %284 : vector<1x512xi1>
    %292 = vector.broadcast %280 : i32 to vector<1x512xi32>
    %293 = arith.addi %282, %292 : vector<1x512xi32>
    %294 = arith.select %291, %293, %282 : vector<1x512xi1>, vector<1x512xi32>
    %c7_i32 = arith.constant 7 : i32
    %295 = vector.broadcast %c7_i32 : i32 to vector<1x512xi32>
    %296 = arith.cmpi slt, %294, %295 : vector<1x512xi32>
    %297 = vector.shape_cast %296 : vector<1x512xi1> to vector<1x512xi1>
    %298 = vector.broadcast %297 : vector<1x512xi1> to vector<2x512xi1>
    %299 = arith.select %298, %274, %277 : vector<2x512xi1>, vector<2x512xf32>
    %300 = arith.mulf %7, %299 : vector<2x512xf32>
    %cst_67 = arith.constant dense<0.000000e+00> : vector<512xf32>
    %301 = vector.multi_reduction <add>, %300, %cst_67 [0] : vector<2x512xf32> to vector<512xf32>
    %302 = vector.shape_cast %301 : vector<512xf32> to vector<1x512xf32>
    %303 = arith.maximumf %271, %302 : vector<1x512xf32>
    %304 = vector.extract_strided_slice %8 {offsets = [0, 2], sizes = [2, 510], strides = [1, 1]} : vector<2x512xf32> to vector<2x510xf32>
    %305 = vector.extract_strided_slice %8 {offsets = [0, 0], sizes = [2, 2], strides = [1, 1]} : vector<2x512xf32> to vector<2x2xf32>
    %306 = tpu.concatenate %304, %305 in 1 : vector<2x510xf32>, vector<2x2xf32> -> vector<2x512xf32>
    %307 = vector.extract_strided_slice %8 {offsets = [0, 506], sizes = [2, 6], strides = [1, 1]} : vector<2x512xf32> to vector<2x6xf32>
    %308 = vector.extract_strided_slice %8 {offsets = [0, 0], sizes = [2, 506], strides = [1, 1]} : vector<2x512xf32> to vector<2x506xf32>
    %309 = tpu.concatenate %307, %308 in 1 : vector<2x6xf32>, vector<2x506xf32> -> vector<2x512xf32>
    %310 = tpu.iota {dimensions = array<i32: 1>} : vector<1x512xi32>
    %c8_i32_68 = arith.constant 8 : i32
    %c0_i32_69 = arith.constant 0 : i32
    %311 = arith.cmpi eq, %c8_i32_68, %c0_i32_69 : i32
    %c1_i32_70 = arith.constant 1 : i32
    %312 = arith.select %311, %c1_i32_70, %c8_i32_68 : i32
    %313 = vector.broadcast %312 : i32 to vector<1x512xi32>
    %314 = arith.remsi %310, %313 : vector<1x512xi32>
    %c0_i32_71 = arith.constant 0 : i32
    %315 = vector.broadcast %c0_i32_71 : i32 to vector<1x512xi32>
    %316 = arith.cmpi ne, %314, %315 : vector<1x512xi32>
    %c0_i32_72 = arith.constant 0 : i32
    %317 = vector.broadcast %c0_i32_72 : i32 to vector<1x512xi32>
    %318 = arith.cmpi slt, %314, %317 : vector<1x512xi32>
    %c0_i32_73 = arith.constant 0 : i32
    %319 = arith.cmpi slt, %312, %c0_i32_73 : i32
    %320 = vector.broadcast %319 : i1 to vector<1x512xi1>
    %321 = vector.broadcast %320 : vector<1x512xi1> to vector<1x512xi1>
    %322 = arith.xori %318, %321 : vector<1x512xi1>
    %323 = arith.andi %322, %316 : vector<1x512xi1>
    %324 = vector.broadcast %312 : i32 to vector<1x512xi32>
    %325 = arith.addi %314, %324 : vector<1x512xi32>
    %326 = arith.select %323, %325, %314 : vector<1x512xi1>, vector<1x512xi32>
    %c6_i32 = arith.constant 6 : i32
    %327 = vector.broadcast %c6_i32 : i32 to vector<1x512xi32>
    %328 = arith.cmpi slt, %326, %327 : vector<1x512xi32>
    %329 = vector.shape_cast %328 : vector<1x512xi1> to vector<1x512xi1>
    %330 = vector.broadcast %329 : vector<1x512xi1> to vector<2x512xi1>
    %331 = arith.select %330, %306, %309 : vector<2x512xi1>, vector<2x512xf32>
    %332 = arith.mulf %7, %331 : vector<2x512xf32>
    %cst_74 = arith.constant dense<0.000000e+00> : vector<512xf32>
    %333 = vector.multi_reduction <add>, %332, %cst_74 [0] : vector<2x512xf32> to vector<512xf32>
    %334 = vector.shape_cast %333 : vector<512xf32> to vector<1x512xf32>
    %335 = arith.maximumf %303, %334 : vector<1x512xf32>
    %336 = vector.extract_strided_slice %8 {offsets = [0, 3], sizes = [2, 509], strides = [1, 1]} : vector<2x512xf32> to vector<2x509xf32>
    %337 = vector.extract_strided_slice %8 {offsets = [0, 0], sizes = [2, 3], strides = [1, 1]} : vector<2x512xf32> to vector<2x3xf32>
    %338 = tpu.concatenate %336, %337 in 1 : vector<2x509xf32>, vector<2x3xf32> -> vector<2x512xf32>
    %339 = vector.extract_strided_slice %8 {offsets = [0, 507], sizes = [2, 5], strides = [1, 1]} : vector<2x512xf32> to vector<2x5xf32>
    %340 = vector.extract_strided_slice %8 {offsets = [0, 0], sizes = [2, 507], strides = [1, 1]} : vector<2x512xf32> to vector<2x507xf32>
    %341 = tpu.concatenate %339, %340 in 1 : vector<2x5xf32>, vector<2x507xf32> -> vector<2x512xf32>
    %342 = tpu.iota {dimensions = array<i32: 1>} : vector<1x512xi32>
    %c8_i32_75 = arith.constant 8 : i32
    %c0_i32_76 = arith.constant 0 : i32
    %343 = arith.cmpi eq, %c8_i32_75, %c0_i32_76 : i32
    %c1_i32_77 = arith.constant 1 : i32
    %344 = arith.select %343, %c1_i32_77, %c8_i32_75 : i32
    %345 = vector.broadcast %344 : i32 to vector<1x512xi32>
    %346 = arith.remsi %342, %345 : vector<1x512xi32>
    %c0_i32_78 = arith.constant 0 : i32
    %347 = vector.broadcast %c0_i32_78 : i32 to vector<1x512xi32>
    %348 = arith.cmpi ne, %346, %347 : vector<1x512xi32>
    %c0_i32_79 = arith.constant 0 : i32
    %349 = vector.broadcast %c0_i32_79 : i32 to vector<1x512xi32>
    %350 = arith.cmpi slt, %346, %349 : vector<1x512xi32>
    %c0_i32_80 = arith.constant 0 : i32
    %351 = arith.cmpi slt, %344, %c0_i32_80 : i32
    %352 = vector.broadcast %351 : i1 to vector<1x512xi1>
    %353 = vector.broadcast %352 : vector<1x512xi1> to vector<1x512xi1>
    %354 = arith.xori %350, %353 : vector<1x512xi1>
    %355 = arith.andi %354, %348 : vector<1x512xi1>
    %356 = vector.broadcast %344 : i32 to vector<1x512xi32>
    %357 = arith.addi %346, %356 : vector<1x512xi32>
    %358 = arith.select %355, %357, %346 : vector<1x512xi1>, vector<1x512xi32>
    %c5_i32 = arith.constant 5 : i32
    %359 = vector.broadcast %c5_i32 : i32 to vector<1x512xi32>
    %360 = arith.cmpi slt, %358, %359 : vector<1x512xi32>
    %361 = vector.shape_cast %360 : vector<1x512xi1> to vector<1x512xi1>
    %362 = vector.broadcast %361 : vector<1x512xi1> to vector<2x512xi1>
    %363 = arith.select %362, %338, %341 : vector<2x512xi1>, vector<2x512xf32>
    %364 = arith.mulf %7, %363 : vector<2x512xf32>
    %cst_81 = arith.constant dense<0.000000e+00> : vector<512xf32>
    %365 = vector.multi_reduction <add>, %364, %cst_81 [0] : vector<2x512xf32> to vector<512xf32>
    %366 = vector.shape_cast %365 : vector<512xf32> to vector<1x512xf32>
    %367 = arith.maximumf %335, %366 : vector<1x512xf32>
    %368 = vector.extract_strided_slice %8 {offsets = [0, 4], sizes = [2, 508], strides = [1, 1]} : vector<2x512xf32> to vector<2x508xf32>
    %369 = vector.extract_strided_slice %8 {offsets = [0, 0], sizes = [2, 4], strides = [1, 1]} : vector<2x512xf32> to vector<2x4xf32>
    %370 = tpu.concatenate %368, %369 in 1 : vector<2x508xf32>, vector<2x4xf32> -> vector<2x512xf32>
    %371 = vector.extract_strided_slice %8 {offsets = [0, 508], sizes = [2, 4], strides = [1, 1]} : vector<2x512xf32> to vector<2x4xf32>
    %372 = vector.extract_strided_slice %8 {offsets = [0, 0], sizes = [2, 508], strides = [1, 1]} : vector<2x512xf32> to vector<2x508xf32>
    %373 = tpu.concatenate %371, %372 in 1 : vector<2x4xf32>, vector<2x508xf32> -> vector<2x512xf32>
    %374 = tpu.iota {dimensions = array<i32: 1>} : vector<1x512xi32>
    %c8_i32_82 = arith.constant 8 : i32
    %c0_i32_83 = arith.constant 0 : i32
    %375 = arith.cmpi eq, %c8_i32_82, %c0_i32_83 : i32
    %c1_i32_84 = arith.constant 1 : i32
    %376 = arith.select %375, %c1_i32_84, %c8_i32_82 : i32
    %377 = vector.broadcast %376 : i32 to vector<1x512xi32>
    %378 = arith.remsi %374, %377 : vector<1x512xi32>
    %c0_i32_85 = arith.constant 0 : i32
    %379 = vector.broadcast %c0_i32_85 : i32 to vector<1x512xi32>
    %380 = arith.cmpi ne, %378, %379 : vector<1x512xi32>
    %c0_i32_86 = arith.constant 0 : i32
    %381 = vector.broadcast %c0_i32_86 : i32 to vector<1x512xi32>
    %382 = arith.cmpi slt, %378, %381 : vector<1x512xi32>
    %c0_i32_87 = arith.constant 0 : i32
    %383 = arith.cmpi slt, %376, %c0_i32_87 : i32
    %384 = vector.broadcast %383 : i1 to vector<1x512xi1>
    %385 = vector.broadcast %384 : vector<1x512xi1> to vector<1x512xi1>
    %386 = arith.xori %382, %385 : vector<1x512xi1>
    %387 = arith.andi %386, %380 : vector<1x512xi1>
    %388 = vector.broadcast %376 : i32 to vector<1x512xi32>
    %389 = arith.addi %378, %388 : vector<1x512xi32>
    %390 = arith.select %387, %389, %378 : vector<1x512xi1>, vector<1x512xi32>
    %c4_i32 = arith.constant 4 : i32
    %391 = vector.broadcast %c4_i32 : i32 to vector<1x512xi32>
    %392 = arith.cmpi slt, %390, %391 : vector<1x512xi32>
    %393 = vector.shape_cast %392 : vector<1x512xi1> to vector<1x512xi1>
    %394 = vector.broadcast %393 : vector<1x512xi1> to vector<2x512xi1>
    %395 = arith.select %394, %370, %373 : vector<2x512xi1>, vector<2x512xf32>
    %396 = arith.mulf %7, %395 : vector<2x512xf32>
    %cst_88 = arith.constant dense<0.000000e+00> : vector<512xf32>
    %397 = vector.multi_reduction <add>, %396, %cst_88 [0] : vector<2x512xf32> to vector<512xf32>
    %398 = vector.shape_cast %397 : vector<512xf32> to vector<1x512xf32>
    %399 = arith.maximumf %367, %398 : vector<1x512xf32>
    %400 = vector.extract_strided_slice %8 {offsets = [0, 5], sizes = [2, 507], strides = [1, 1]} : vector<2x512xf32> to vector<2x507xf32>
    %401 = vector.extract_strided_slice %8 {offsets = [0, 0], sizes = [2, 5], strides = [1, 1]} : vector<2x512xf32> to vector<2x5xf32>
    %402 = tpu.concatenate %400, %401 in 1 : vector<2x507xf32>, vector<2x5xf32> -> vector<2x512xf32>
    %403 = vector.extract_strided_slice %8 {offsets = [0, 509], sizes = [2, 3], strides = [1, 1]} : vector<2x512xf32> to vector<2x3xf32>
    %404 = vector.extract_strided_slice %8 {offsets = [0, 0], sizes = [2, 509], strides = [1, 1]} : vector<2x512xf32> to vector<2x509xf32>
    %405 = tpu.concatenate %403, %404 in 1 : vector<2x3xf32>, vector<2x509xf32> -> vector<2x512xf32>
    %406 = tpu.iota {dimensions = array<i32: 1>} : vector<1x512xi32>
    %c8_i32_89 = arith.constant 8 : i32
    %c0_i32_90 = arith.constant 0 : i32
    %407 = arith.cmpi eq, %c8_i32_89, %c0_i32_90 : i32
    %c1_i32_91 = arith.constant 1 : i32
    %408 = arith.select %407, %c1_i32_91, %c8_i32_89 : i32
    %409 = vector.broadcast %408 : i32 to vector<1x512xi32>
    %410 = arith.remsi %406, %409 : vector<1x512xi32>
    %c0_i32_92 = arith.constant 0 : i32
    %411 = vector.broadcast %c0_i32_92 : i32 to vector<1x512xi32>
    %412 = arith.cmpi ne, %410, %411 : vector<1x512xi32>
    %c0_i32_93 = arith.constant 0 : i32
    %413 = vector.broadcast %c0_i32_93 : i32 to vector<1x512xi32>
    %414 = arith.cmpi slt, %410, %413 : vector<1x512xi32>
    %c0_i32_94 = arith.constant 0 : i32
    %415 = arith.cmpi slt, %408, %c0_i32_94 : i32
    %416 = vector.broadcast %415 : i1 to vector<1x512xi1>
    %417 = vector.broadcast %416 : vector<1x512xi1> to vector<1x512xi1>
    %418 = arith.xori %414, %417 : vector<1x512xi1>
    %419 = arith.andi %418, %412 : vector<1x512xi1>
    %420 = vector.broadcast %408 : i32 to vector<1x512xi32>
    %421 = arith.addi %410, %420 : vector<1x512xi32>
    %422 = arith.select %419, %421, %410 : vector<1x512xi1>, vector<1x512xi32>
    %c3_i32 = arith.constant 3 : i32
    %423 = vector.broadcast %c3_i32 : i32 to vector<1x512xi32>
    %424 = arith.cmpi slt, %422, %423 : vector<1x512xi32>
    %425 = vector.shape_cast %424 : vector<1x512xi1> to vector<1x512xi1>
    %426 = vector.broadcast %425 : vector<1x512xi1> to vector<2x512xi1>
    %427 = arith.select %426, %402, %405 : vector<2x512xi1>, vector<2x512xf32>
    %428 = arith.mulf %7, %427 : vector<2x512xf32>
    %cst_95 = arith.constant dense<0.000000e+00> : vector<512xf32>
    %429 = vector.multi_reduction <add>, %428, %cst_95 [0] : vector<2x512xf32> to vector<512xf32>
    %430 = vector.shape_cast %429 : vector<512xf32> to vector<1x512xf32>
    %431 = arith.maximumf %399, %430 : vector<1x512xf32>
    %432 = vector.extract_strided_slice %8 {offsets = [0, 6], sizes = [2, 506], strides = [1, 1]} : vector<2x512xf32> to vector<2x506xf32>
    %433 = vector.extract_strided_slice %8 {offsets = [0, 0], sizes = [2, 6], strides = [1, 1]} : vector<2x512xf32> to vector<2x6xf32>
    %434 = tpu.concatenate %432, %433 in 1 : vector<2x506xf32>, vector<2x6xf32> -> vector<2x512xf32>
    %435 = vector.extract_strided_slice %8 {offsets = [0, 510], sizes = [2, 2], strides = [1, 1]} : vector<2x512xf32> to vector<2x2xf32>
    %436 = vector.extract_strided_slice %8 {offsets = [0, 0], sizes = [2, 510], strides = [1, 1]} : vector<2x512xf32> to vector<2x510xf32>
    %437 = tpu.concatenate %435, %436 in 1 : vector<2x2xf32>, vector<2x510xf32> -> vector<2x512xf32>
    %438 = tpu.iota {dimensions = array<i32: 1>} : vector<1x512xi32>
    %c8_i32_96 = arith.constant 8 : i32
    %c0_i32_97 = arith.constant 0 : i32
    %439 = arith.cmpi eq, %c8_i32_96, %c0_i32_97 : i32
    %c1_i32_98 = arith.constant 1 : i32
    %440 = arith.select %439, %c1_i32_98, %c8_i32_96 : i32
    %441 = vector.broadcast %440 : i32 to vector<1x512xi32>
    %442 = arith.remsi %438, %441 : vector<1x512xi32>
    %c0_i32_99 = arith.constant 0 : i32
    %443 = vector.broadcast %c0_i32_99 : i32 to vector<1x512xi32>
    %444 = arith.cmpi ne, %442, %443 : vector<1x512xi32>
    %c0_i32_100 = arith.constant 0 : i32
    %445 = vector.broadcast %c0_i32_100 : i32 to vector<1x512xi32>
    %446 = arith.cmpi slt, %442, %445 : vector<1x512xi32>
    %c0_i32_101 = arith.constant 0 : i32
    %447 = arith.cmpi slt, %440, %c0_i32_101 : i32
    %448 = vector.broadcast %447 : i1 to vector<1x512xi1>
    %449 = vector.broadcast %448 : vector<1x512xi1> to vector<1x512xi1>
    %450 = arith.xori %446, %449 : vector<1x512xi1>
    %451 = arith.andi %450, %444 : vector<1x512xi1>
    %452 = vector.broadcast %440 : i32 to vector<1x512xi32>
    %453 = arith.addi %442, %452 : vector<1x512xi32>
    %454 = arith.select %451, %453, %442 : vector<1x512xi1>, vector<1x512xi32>
    %c2_i32 = arith.constant 2 : i32
    %455 = vector.broadcast %c2_i32 : i32 to vector<1x512xi32>
    %456 = arith.cmpi slt, %454, %455 : vector<1x512xi32>
    %457 = vector.shape_cast %456 : vector<1x512xi1> to vector<1x512xi1>
    %458 = vector.broadcast %457 : vector<1x512xi1> to vector<2x512xi1>
    %459 = arith.select %458, %434, %437 : vector<2x512xi1>, vector<2x512xf32>
    %460 = arith.mulf %7, %459 : vector<2x512xf32>
    %cst_102 = arith.constant dense<0.000000e+00> : vector<512xf32>
    %461 = vector.multi_reduction <add>, %460, %cst_102 [0] : vector<2x512xf32> to vector<512xf32>
    %462 = vector.shape_cast %461 : vector<512xf32> to vector<1x512xf32>
    %463 = arith.maximumf %431, %462 : vector<1x512xf32>
    %464 = vector.extract_strided_slice %8 {offsets = [0, 7], sizes = [2, 505], strides = [1, 1]} : vector<2x512xf32> to vector<2x505xf32>
    %465 = vector.extract_strided_slice %8 {offsets = [0, 0], sizes = [2, 7], strides = [1, 1]} : vector<2x512xf32> to vector<2x7xf32>
    %466 = tpu.concatenate %464, %465 in 1 : vector<2x505xf32>, vector<2x7xf32> -> vector<2x512xf32>
    %467 = vector.extract_strided_slice %8 {offsets = [0, 511], sizes = [2, 1], strides = [1, 1]} : vector<2x512xf32> to vector<2x1xf32>
    %468 = vector.extract_strided_slice %8 {offsets = [0, 0], sizes = [2, 511], strides = [1, 1]} : vector<2x512xf32> to vector<2x511xf32>
    %469 = tpu.concatenate %467, %468 in 1 : vector<2x1xf32>, vector<2x511xf32> -> vector<2x512xf32>
    %470 = tpu.iota {dimensions = array<i32: 1>} : vector<1x512xi32>
    %c8_i32_103 = arith.constant 8 : i32
    %c0_i32_104 = arith.constant 0 : i32
    %471 = arith.cmpi eq, %c8_i32_103, %c0_i32_104 : i32
    %c1_i32_105 = arith.constant 1 : i32
    %472 = arith.select %471, %c1_i32_105, %c8_i32_103 : i32
    %473 = vector.broadcast %472 : i32 to vector<1x512xi32>
    %474 = arith.remsi %470, %473 : vector<1x512xi32>
    %c0_i32_106 = arith.constant 0 : i32
    %475 = vector.broadcast %c0_i32_106 : i32 to vector<1x512xi32>
    %476 = arith.cmpi ne, %474, %475 : vector<1x512xi32>
    %c0_i32_107 = arith.constant 0 : i32
    %477 = vector.broadcast %c0_i32_107 : i32 to vector<1x512xi32>
    %478 = arith.cmpi slt, %474, %477 : vector<1x512xi32>
    %c0_i32_108 = arith.constant 0 : i32
    %479 = arith.cmpi slt, %472, %c0_i32_108 : i32
    %480 = vector.broadcast %479 : i1 to vector<1x512xi1>
    %481 = vector.broadcast %480 : vector<1x512xi1> to vector<1x512xi1>
    %482 = arith.xori %478, %481 : vector<1x512xi1>
    %483 = arith.andi %482, %476 : vector<1x512xi1>
    %484 = vector.broadcast %472 : i32 to vector<1x512xi32>
    %485 = arith.addi %474, %484 : vector<1x512xi32>
    %486 = arith.select %483, %485, %474 : vector<1x512xi1>, vector<1x512xi32>
    %c1_i32_109 = arith.constant 1 : i32
    %487 = vector.broadcast %c1_i32_109 : i32 to vector<1x512xi32>
    %488 = arith.cmpi slt, %486, %487 : vector<1x512xi32>
    %489 = vector.shape_cast %488 : vector<1x512xi1> to vector<1x512xi1>
    %490 = vector.broadcast %489 : vector<1x512xi1> to vector<2x512xi1>
    %491 = arith.select %490, %466, %469 : vector<2x512xi1>, vector<2x512xf32>
    %492 = arith.mulf %7, %491 : vector<2x512xf32>
    %cst_110 = arith.constant dense<0.000000e+00> : vector<512xf32>
    %493 = vector.multi_reduction <add>, %492, %cst_110 [0] : vector<2x512xf32> to vector<512xf32>
    %494 = vector.shape_cast %493 : vector<512xf32> to vector<1x512xf32>
    %495 = arith.maximumf %463, %494 : vector<1x512xf32>
    %cst_111 = arith.constant 0.000000e+00 : f32
    %496 = vector.broadcast %cst_111 : f32 to vector<1x512xf32>
    %cst_112 = arith.constant 0.000000e+00 : f32
    %497 = vector.broadcast %cst_112 : f32 to vector<16x512xf32>
    %498 = arith.subf %13, %495 : vector<1x512xf32>
    %499 = math.exp %498 : vector<1x512xf32>
    %500 = arith.addf %496, %499 : vector<1x512xf32>
    %c64_i32_113 = arith.constant 64 : i32
    %501 = tpu.dynamic_rotate %9 by %c64_i32_113 dim 1 : vector<16x512xf32>, i32 -> vector<16x512xf32>
    %502 = vector.broadcast %499 : vector<1x512xf32> to vector<16x512xf32>
    %503 = arith.mulf %502, %501 : vector<16x512xf32>
    %504 = arith.addf %497, %503 : vector<16x512xf32>
    %505 = arith.subf %17, %495 : vector<1x512xf32>
    %506 = math.exp %505 : vector<1x512xf32>
    %507 = arith.addf %500, %506 : vector<1x512xf32>
    %c128_i32_114 = arith.constant 128 : i32
    %508 = tpu.dynamic_rotate %9 by %c128_i32_114 dim 1 : vector<16x512xf32>, i32 -> vector<16x512xf32>
    %509 = vector.broadcast %506 : vector<1x512xf32> to vector<16x512xf32>
    %510 = arith.mulf %509, %508 : vector<16x512xf32>
    %511 = arith.addf %504, %510 : vector<16x512xf32>
    %512 = arith.subf %22, %495 : vector<1x512xf32>
    %513 = math.exp %512 : vector<1x512xf32>
    %514 = arith.addf %507, %513 : vector<1x512xf32>
    %c192_i32_115 = arith.constant 192 : i32
    %515 = tpu.dynamic_rotate %9 by %c192_i32_115 dim 1 : vector<16x512xf32>, i32 -> vector<16x512xf32>
    %516 = vector.broadcast %513 : vector<1x512xf32> to vector<16x512xf32>
    %517 = arith.mulf %516, %515 : vector<16x512xf32>
    %518 = arith.addf %511, %517 : vector<16x512xf32>
    %519 = arith.subf %27, %495 : vector<1x512xf32>
    %520 = math.exp %519 : vector<1x512xf32>
    %521 = arith.addf %514, %520 : vector<1x512xf32>
    %c256_i32_116 = arith.constant 256 : i32
    %522 = tpu.dynamic_rotate %9 by %c256_i32_116 dim 1 : vector<16x512xf32>, i32 -> vector<16x512xf32>
    %523 = vector.broadcast %520 : vector<1x512xf32> to vector<16x512xf32>
    %524 = arith.mulf %523, %522 : vector<16x512xf32>
    %525 = arith.addf %518, %524 : vector<16x512xf32>
    %526 = arith.subf %32, %495 : vector<1x512xf32>
    %527 = math.exp %526 : vector<1x512xf32>
    %528 = arith.addf %521, %527 : vector<1x512xf32>
    %c320_i32_117 = arith.constant 320 : i32
    %529 = tpu.dynamic_rotate %9 by %c320_i32_117 dim 1 : vector<16x512xf32>, i32 -> vector<16x512xf32>
    %530 = vector.broadcast %527 : vector<1x512xf32> to vector<16x512xf32>
    %531 = arith.mulf %530, %529 : vector<16x512xf32>
    %532 = arith.addf %525, %531 : vector<16x512xf32>
    %533 = arith.subf %37, %495 : vector<1x512xf32>
    %534 = math.exp %533 : vector<1x512xf32>
    %535 = arith.addf %528, %534 : vector<1x512xf32>
    %c384_i32_118 = arith.constant 384 : i32
    %536 = tpu.dynamic_rotate %9 by %c384_i32_118 dim 1 : vector<16x512xf32>, i32 -> vector<16x512xf32>
    %537 = vector.broadcast %534 : vector<1x512xf32> to vector<16x512xf32>
    %538 = arith.mulf %537, %536 : vector<16x512xf32>
    %539 = arith.addf %532, %538 : vector<16x512xf32>
    %540 = arith.subf %42, %495 : vector<1x512xf32>
    %541 = math.exp %540 : vector<1x512xf32>
    %542 = arith.addf %535, %541 : vector<1x512xf32>
    %c448_i32_119 = arith.constant 448 : i32
    %543 = tpu.dynamic_rotate %9 by %c448_i32_119 dim 1 : vector<16x512xf32>, i32 -> vector<16x512xf32>
    %544 = vector.broadcast %541 : vector<1x512xf32> to vector<16x512xf32>
    %545 = arith.mulf %544, %543 : vector<16x512xf32>
    %546 = arith.addf %539, %545 : vector<16x512xf32>
    %547 = arith.subf %74, %495 : vector<1x512xf32>
    %548 = math.exp %547 : vector<1x512xf32>
    %549 = arith.addf %542, %548 : vector<1x512xf32>
    %550 = vector.extract_strided_slice %9 {offsets = [0, 8], sizes = [16, 504], strides = [1, 1]} : vector<16x512xf32> to vector<16x504xf32>
    %551 = vector.extract_strided_slice %9 {offsets = [0, 0], sizes = [16, 8], strides = [1, 1]} : vector<16x512xf32> to vector<16x8xf32>
    %552 = tpu.concatenate %550, %551 in 1 : vector<16x504xf32>, vector<16x8xf32> -> vector<16x512xf32>
    %553 = vector.extract_strided_slice %9 {offsets = [0, 456], sizes = [16, 56], strides = [1, 1]} : vector<16x512xf32> to vector<16x56xf32>
    %554 = vector.extract_strided_slice %9 {offsets = [0, 0], sizes = [16, 456], strides = [1, 1]} : vector<16x512xf32> to vector<16x456xf32>
    %555 = tpu.concatenate %553, %554 in 1 : vector<16x56xf32>, vector<16x456xf32> -> vector<16x512xf32>
    %556 = tpu.iota {dimensions = array<i32: 1>} : vector<1x512xi32>
    %c64_i32_120 = arith.constant 64 : i32
    %c0_i32_121 = arith.constant 0 : i32
    %557 = arith.cmpi eq, %c64_i32_120, %c0_i32_121 : i32
    %c1_i32_122 = arith.constant 1 : i32
    %558 = arith.select %557, %c1_i32_122, %c64_i32_120 : i32
    %559 = vector.broadcast %558 : i32 to vector<1x512xi32>
    %560 = arith.remsi %556, %559 : vector<1x512xi32>
    %c0_i32_123 = arith.constant 0 : i32
    %561 = vector.broadcast %c0_i32_123 : i32 to vector<1x512xi32>
    %562 = arith.cmpi ne, %560, %561 : vector<1x512xi32>
    %c0_i32_124 = arith.constant 0 : i32
    %563 = vector.broadcast %c0_i32_124 : i32 to vector<1x512xi32>
    %564 = arith.cmpi slt, %560, %563 : vector<1x512xi32>
    %c0_i32_125 = arith.constant 0 : i32
    %565 = arith.cmpi slt, %558, %c0_i32_125 : i32
    %566 = vector.broadcast %565 : i1 to vector<1x512xi1>
    %567 = vector.broadcast %566 : vector<1x512xi1> to vector<1x512xi1>
    %568 = arith.xori %564, %567 : vector<1x512xi1>
    %569 = arith.andi %568, %562 : vector<1x512xi1>
    %570 = vector.broadcast %558 : i32 to vector<1x512xi32>
    %571 = arith.addi %560, %570 : vector<1x512xi32>
    %572 = arith.select %569, %571, %560 : vector<1x512xi1>, vector<1x512xi32>
    %c56_i32_126 = arith.constant 56 : i32
    %573 = vector.broadcast %c56_i32_126 : i32 to vector<1x512xi32>
    %574 = arith.cmpi slt, %572, %573 : vector<1x512xi32>
    %575 = vector.shape_cast %574 : vector<1x512xi1> to vector<1x512xi1>
    %576 = vector.broadcast %575 : vector<1x512xi1> to vector<16x512xi1>
    %577 = arith.select %576, %552, %555 : vector<16x512xi1>, vector<16x512xf32>
    %578 = vector.broadcast %548 : vector<1x512xf32> to vector<16x512xf32>
    %579 = arith.mulf %578, %577 : vector<16x512xf32>
    %580 = arith.addf %546, %579 : vector<16x512xf32>
    %581 = arith.subf %106, %495 : vector<1x512xf32>
    %582 = math.exp %581 : vector<1x512xf32>
    %583 = arith.addf %549, %582 : vector<1x512xf32>
    %584 = vector.extract_strided_slice %9 {offsets = [0, 16], sizes = [16, 496], strides = [1, 1]} : vector<16x512xf32> to vector<16x496xf32>
    %585 = vector.extract_strided_slice %9 {offsets = [0, 0], sizes = [16, 16], strides = [1, 1]} : vector<16x512xf32> to vector<16x16xf32>
    %586 = tpu.concatenate %584, %585 in 1 : vector<16x496xf32>, vector<16x16xf32> -> vector<16x512xf32>
    %587 = vector.extract_strided_slice %9 {offsets = [0, 464], sizes = [16, 48], strides = [1, 1]} : vector<16x512xf32> to vector<16x48xf32>
    %588 = vector.extract_strided_slice %9 {offsets = [0, 0], sizes = [16, 464], strides = [1, 1]} : vector<16x512xf32> to vector<16x464xf32>
    %589 = tpu.concatenate %587, %588 in 1 : vector<16x48xf32>, vector<16x464xf32> -> vector<16x512xf32>
    %590 = tpu.iota {dimensions = array<i32: 1>} : vector<1x512xi32>
    %c64_i32_127 = arith.constant 64 : i32
    %c0_i32_128 = arith.constant 0 : i32
    %591 = arith.cmpi eq, %c64_i32_127, %c0_i32_128 : i32
    %c1_i32_129 = arith.constant 1 : i32
    %592 = arith.select %591, %c1_i32_129, %c64_i32_127 : i32
    %593 = vector.broadcast %592 : i32 to vector<1x512xi32>
    %594 = arith.remsi %590, %593 : vector<1x512xi32>
    %c0_i32_130 = arith.constant 0 : i32
    %595 = vector.broadcast %c0_i32_130 : i32 to vector<1x512xi32>
    %596 = arith.cmpi ne, %594, %595 : vector<1x512xi32>
    %c0_i32_131 = arith.constant 0 : i32
    %597 = vector.broadcast %c0_i32_131 : i32 to vector<1x512xi32>
    %598 = arith.cmpi slt, %594, %597 : vector<1x512xi32>
    %c0_i32_132 = arith.constant 0 : i32
    %599 = arith.cmpi slt, %592, %c0_i32_132 : i32
    %600 = vector.broadcast %599 : i1 to vector<1x512xi1>
    %601 = vector.broadcast %600 : vector<1x512xi1> to vector<1x512xi1>
    %602 = arith.xori %598, %601 : vector<1x512xi1>
    %603 = arith.andi %602, %596 : vector<1x512xi1>
    %604 = vector.broadcast %592 : i32 to vector<1x512xi32>
    %605 = arith.addi %594, %604 : vector<1x512xi32>
    %606 = arith.select %603, %605, %594 : vector<1x512xi1>, vector<1x512xi32>
    %c48_i32_133 = arith.constant 48 : i32
    %607 = vector.broadcast %c48_i32_133 : i32 to vector<1x512xi32>
    %608 = arith.cmpi slt, %606, %607 : vector<1x512xi32>
    %609 = vector.shape_cast %608 : vector<1x512xi1> to vector<1x512xi1>
    %610 = vector.broadcast %609 : vector<1x512xi1> to vector<16x512xi1>
    %611 = arith.select %610, %586, %589 : vector<16x512xi1>, vector<16x512xf32>
    %612 = vector.broadcast %582 : vector<1x512xf32> to vector<16x512xf32>
    %613 = arith.mulf %612, %611 : vector<16x512xf32>
    %614 = arith.addf %580, %613 : vector<16x512xf32>
    %615 = arith.subf %138, %495 : vector<1x512xf32>
    %616 = math.exp %615 : vector<1x512xf32>
    %617 = arith.addf %583, %616 : vector<1x512xf32>
    %618 = vector.extract_strided_slice %9 {offsets = [0, 24], sizes = [16, 488], strides = [1, 1]} : vector<16x512xf32> to vector<16x488xf32>
    %619 = vector.extract_strided_slice %9 {offsets = [0, 0], sizes = [16, 24], strides = [1, 1]} : vector<16x512xf32> to vector<16x24xf32>
    %620 = tpu.concatenate %618, %619 in 1 : vector<16x488xf32>, vector<16x24xf32> -> vector<16x512xf32>
    %621 = vector.extract_strided_slice %9 {offsets = [0, 472], sizes = [16, 40], strides = [1, 1]} : vector<16x512xf32> to vector<16x40xf32>
    %622 = vector.extract_strided_slice %9 {offsets = [0, 0], sizes = [16, 472], strides = [1, 1]} : vector<16x512xf32> to vector<16x472xf32>
    %623 = tpu.concatenate %621, %622 in 1 : vector<16x40xf32>, vector<16x472xf32> -> vector<16x512xf32>
    %624 = tpu.iota {dimensions = array<i32: 1>} : vector<1x512xi32>
    %c64_i32_134 = arith.constant 64 : i32
    %c0_i32_135 = arith.constant 0 : i32
    %625 = arith.cmpi eq, %c64_i32_134, %c0_i32_135 : i32
    %c1_i32_136 = arith.constant 1 : i32
    %626 = arith.select %625, %c1_i32_136, %c64_i32_134 : i32
    %627 = vector.broadcast %626 : i32 to vector<1x512xi32>
    %628 = arith.remsi %624, %627 : vector<1x512xi32>
    %c0_i32_137 = arith.constant 0 : i32
    %629 = vector.broadcast %c0_i32_137 : i32 to vector<1x512xi32>
    %630 = arith.cmpi ne, %628, %629 : vector<1x512xi32>
    %c0_i32_138 = arith.constant 0 : i32
    %631 = vector.broadcast %c0_i32_138 : i32 to vector<1x512xi32>
    %632 = arith.cmpi slt, %628, %631 : vector<1x512xi32>
    %c0_i32_139 = arith.constant 0 : i32
    %633 = arith.cmpi slt, %626, %c0_i32_139 : i32
    %634 = vector.broadcast %633 : i1 to vector<1x512xi1>
    %635 = vector.broadcast %634 : vector<1x512xi1> to vector<1x512xi1>
    %636 = arith.xori %632, %635 : vector<1x512xi1>
    %637 = arith.andi %636, %630 : vector<1x512xi1>
    %638 = vector.broadcast %626 : i32 to vector<1x512xi32>
    %639 = arith.addi %628, %638 : vector<1x512xi32>
    %640 = arith.select %637, %639, %628 : vector<1x512xi1>, vector<1x512xi32>
    %c40_i32_140 = arith.constant 40 : i32
    %641 = vector.broadcast %c40_i32_140 : i32 to vector<1x512xi32>
    %642 = arith.cmpi slt, %640, %641 : vector<1x512xi32>
    %643 = vector.shape_cast %642 : vector<1x512xi1> to vector<1x512xi1>
    %644 = vector.broadcast %643 : vector<1x512xi1> to vector<16x512xi1>
    %645 = arith.select %644, %620, %623 : vector<16x512xi1>, vector<16x512xf32>
    %646 = vector.broadcast %616 : vector<1x512xf32> to vector<16x512xf32>
    %647 = arith.mulf %646, %645 : vector<16x512xf32>
    %648 = arith.addf %614, %647 : vector<16x512xf32>
    %649 = arith.subf %170, %495 : vector<1x512xf32>
    %650 = math.exp %649 : vector<1x512xf32>
    %651 = arith.addf %617, %650 : vector<1x512xf32>
    %652 = vector.extract_strided_slice %9 {offsets = [0, 32], sizes = [16, 480], strides = [1, 1]} : vector<16x512xf32> to vector<16x480xf32>
    %653 = vector.extract_strided_slice %9 {offsets = [0, 0], sizes = [16, 32], strides = [1, 1]} : vector<16x512xf32> to vector<16x32xf32>
    %654 = tpu.concatenate %652, %653 in 1 : vector<16x480xf32>, vector<16x32xf32> -> vector<16x512xf32>
    %655 = vector.extract_strided_slice %9 {offsets = [0, 480], sizes = [16, 32], strides = [1, 1]} : vector<16x512xf32> to vector<16x32xf32>
    %656 = vector.extract_strided_slice %9 {offsets = [0, 0], sizes = [16, 480], strides = [1, 1]} : vector<16x512xf32> to vector<16x480xf32>
    %657 = tpu.concatenate %655, %656 in 1 : vector<16x32xf32>, vector<16x480xf32> -> vector<16x512xf32>
    %658 = tpu.iota {dimensions = array<i32: 1>} : vector<1x512xi32>
    %c64_i32_141 = arith.constant 64 : i32
    %c0_i32_142 = arith.constant 0 : i32
    %659 = arith.cmpi eq, %c64_i32_141, %c0_i32_142 : i32
    %c1_i32_143 = arith.constant 1 : i32
    %660 = arith.select %659, %c1_i32_143, %c64_i32_141 : i32
    %661 = vector.broadcast %660 : i32 to vector<1x512xi32>
    %662 = arith.remsi %658, %661 : vector<1x512xi32>
    %c0_i32_144 = arith.constant 0 : i32
    %663 = vector.broadcast %c0_i32_144 : i32 to vector<1x512xi32>
    %664 = arith.cmpi ne, %662, %663 : vector<1x512xi32>
    %c0_i32_145 = arith.constant 0 : i32
    %665 = vector.broadcast %c0_i32_145 : i32 to vector<1x512xi32>
    %666 = arith.cmpi slt, %662, %665 : vector<1x512xi32>
    %c0_i32_146 = arith.constant 0 : i32
    %667 = arith.cmpi slt, %660, %c0_i32_146 : i32
    %668 = vector.broadcast %667 : i1 to vector<1x512xi1>
    %669 = vector.broadcast %668 : vector<1x512xi1> to vector<1x512xi1>
    %670 = arith.xori %666, %669 : vector<1x512xi1>
    %671 = arith.andi %670, %664 : vector<1x512xi1>
    %672 = vector.broadcast %660 : i32 to vector<1x512xi32>
    %673 = arith.addi %662, %672 : vector<1x512xi32>
    %674 = arith.select %671, %673, %662 : vector<1x512xi1>, vector<1x512xi32>
    %c32_i32_147 = arith.constant 32 : i32
    %675 = vector.broadcast %c32_i32_147 : i32 to vector<1x512xi32>
    %676 = arith.cmpi slt, %674, %675 : vector<1x512xi32>
    %677 = vector.shape_cast %676 : vector<1x512xi1> to vector<1x512xi1>
    %678 = vector.broadcast %677 : vector<1x512xi1> to vector<16x512xi1>
    %679 = arith.select %678, %654, %657 : vector<16x512xi1>, vector<16x512xf32>
    %680 = vector.broadcast %650 : vector<1x512xf32> to vector<16x512xf32>
    %681 = arith.mulf %680, %679 : vector<16x512xf32>
    %682 = arith.addf %648, %681 : vector<16x512xf32>
    %683 = arith.subf %202, %495 : vector<1x512xf32>
    %684 = math.exp %683 : vector<1x512xf32>
    %685 = arith.addf %651, %684 : vector<1x512xf32>
    %686 = vector.extract_strided_slice %9 {offsets = [0, 40], sizes = [16, 472], strides = [1, 1]} : vector<16x512xf32> to vector<16x472xf32>
    %687 = vector.extract_strided_slice %9 {offsets = [0, 0], sizes = [16, 40], strides = [1, 1]} : vector<16x512xf32> to vector<16x40xf32>
    %688 = tpu.concatenate %686, %687 in 1 : vector<16x472xf32>, vector<16x40xf32> -> vector<16x512xf32>
    %689 = vector.extract_strided_slice %9 {offsets = [0, 488], sizes = [16, 24], strides = [1, 1]} : vector<16x512xf32> to vector<16x24xf32>
    %690 = vector.extract_strided_slice %9 {offsets = [0, 0], sizes = [16, 488], strides = [1, 1]} : vector<16x512xf32> to vector<16x488xf32>
    %691 = tpu.concatenate %689, %690 in 1 : vector<16x24xf32>, vector<16x488xf32> -> vector<16x512xf32>
    %692 = tpu.iota {dimensions = array<i32: 1>} : vector<1x512xi32>
    %c64_i32_148 = arith.constant 64 : i32
    %c0_i32_149 = arith.constant 0 : i32
    %693 = arith.cmpi eq, %c64_i32_148, %c0_i32_149 : i32
    %c1_i32_150 = arith.constant 1 : i32
    %694 = arith.select %693, %c1_i32_150, %c64_i32_148 : i32
    %695 = vector.broadcast %694 : i32 to vector<1x512xi32>
    %696 = arith.remsi %692, %695 : vector<1x512xi32>
    %c0_i32_151 = arith.constant 0 : i32
    %697 = vector.broadcast %c0_i32_151 : i32 to vector<1x512xi32>
    %698 = arith.cmpi ne, %696, %697 : vector<1x512xi32>
    %c0_i32_152 = arith.constant 0 : i32
    %699 = vector.broadcast %c0_i32_152 : i32 to vector<1x512xi32>
    %700 = arith.cmpi slt, %696, %699 : vector<1x512xi32>
    %c0_i32_153 = arith.constant 0 : i32
    %701 = arith.cmpi slt, %694, %c0_i32_153 : i32
    %702 = vector.broadcast %701 : i1 to vector<1x512xi1>
    %703 = vector.broadcast %702 : vector<1x512xi1> to vector<1x512xi1>
    %704 = arith.xori %700, %703 : vector<1x512xi1>
    %705 = arith.andi %704, %698 : vector<1x512xi1>
    %706 = vector.broadcast %694 : i32 to vector<1x512xi32>
    %707 = arith.addi %696, %706 : vector<1x512xi32>
    %708 = arith.select %705, %707, %696 : vector<1x512xi1>, vector<1x512xi32>
    %c24_i32_154 = arith.constant 24 : i32
    %709 = vector.broadcast %c24_i32_154 : i32 to vector<1x512xi32>
    %710 = arith.cmpi slt, %708, %709 : vector<1x512xi32>
    %711 = vector.shape_cast %710 : vector<1x512xi1> to vector<1x512xi1>
    %712 = vector.broadcast %711 : vector<1x512xi1> to vector<16x512xi1>
    %713 = arith.select %712, %688, %691 : vector<16x512xi1>, vector<16x512xf32>
    %714 = vector.broadcast %684 : vector<1x512xf32> to vector<16x512xf32>
    %715 = arith.mulf %714, %713 : vector<16x512xf32>
    %716 = arith.addf %682, %715 : vector<16x512xf32>
    %717 = arith.subf %234, %495 : vector<1x512xf32>
    %718 = math.exp %717 : vector<1x512xf32>
    %719 = arith.addf %685, %718 : vector<1x512xf32>
    %720 = vector.extract_strided_slice %9 {offsets = [0, 48], sizes = [16, 464], strides = [1, 1]} : vector<16x512xf32> to vector<16x464xf32>
    %721 = vector.extract_strided_slice %9 {offsets = [0, 0], sizes = [16, 48], strides = [1, 1]} : vector<16x512xf32> to vector<16x48xf32>
    %722 = tpu.concatenate %720, %721 in 1 : vector<16x464xf32>, vector<16x48xf32> -> vector<16x512xf32>
    %723 = vector.extract_strided_slice %9 {offsets = [0, 496], sizes = [16, 16], strides = [1, 1]} : vector<16x512xf32> to vector<16x16xf32>
    %724 = vector.extract_strided_slice %9 {offsets = [0, 0], sizes = [16, 496], strides = [1, 1]} : vector<16x512xf32> to vector<16x496xf32>
    %725 = tpu.concatenate %723, %724 in 1 : vector<16x16xf32>, vector<16x496xf32> -> vector<16x512xf32>
    %726 = tpu.iota {dimensions = array<i32: 1>} : vector<1x512xi32>
    %c64_i32_155 = arith.constant 64 : i32
    %c0_i32_156 = arith.constant 0 : i32
    %727 = arith.cmpi eq, %c64_i32_155, %c0_i32_156 : i32
    %c1_i32_157 = arith.constant 1 : i32
    %728 = arith.select %727, %c1_i32_157, %c64_i32_155 : i32
    %729 = vector.broadcast %728 : i32 to vector<1x512xi32>
    %730 = arith.remsi %726, %729 : vector<1x512xi32>
    %c0_i32_158 = arith.constant 0 : i32
    %731 = vector.broadcast %c0_i32_158 : i32 to vector<1x512xi32>
    %732 = arith.cmpi ne, %730, %731 : vector<1x512xi32>
    %c0_i32_159 = arith.constant 0 : i32
    %733 = vector.broadcast %c0_i32_159 : i32 to vector<1x512xi32>
    %734 = arith.cmpi slt, %730, %733 : vector<1x512xi32>
    %c0_i32_160 = arith.constant 0 : i32
    %735 = arith.cmpi slt, %728, %c0_i32_160 : i32
    %736 = vector.broadcast %735 : i1 to vector<1x512xi1>
    %737 = vector.broadcast %736 : vector<1x512xi1> to vector<1x512xi1>
    %738 = arith.xori %734, %737 : vector<1x512xi1>
    %739 = arith.andi %738, %732 : vector<1x512xi1>
    %740 = vector.broadcast %728 : i32 to vector<1x512xi32>
    %741 = arith.addi %730, %740 : vector<1x512xi32>
    %742 = arith.select %739, %741, %730 : vector<1x512xi1>, vector<1x512xi32>
    %c16_i32_161 = arith.constant 16 : i32
    %743 = vector.broadcast %c16_i32_161 : i32 to vector<1x512xi32>
    %744 = arith.cmpi slt, %742, %743 : vector<1x512xi32>
    %745 = vector.shape_cast %744 : vector<1x512xi1> to vector<1x512xi1>
    %746 = vector.broadcast %745 : vector<1x512xi1> to vector<16x512xi1>
    %747 = arith.select %746, %722, %725 : vector<16x512xi1>, vector<16x512xf32>
    %748 = vector.broadcast %718 : vector<1x512xf32> to vector<16x512xf32>
    %749 = arith.mulf %748, %747 : vector<16x512xf32>
    %750 = arith.addf %716, %749 : vector<16x512xf32>
    %751 = arith.subf %266, %495 : vector<1x512xf32>
    %752 = math.exp %751 : vector<1x512xf32>
    %753 = arith.addf %719, %752 : vector<1x512xf32>
    %754 = vector.extract_strided_slice %9 {offsets = [0, 56], sizes = [16, 456], strides = [1, 1]} : vector<16x512xf32> to vector<16x456xf32>
    %755 = vector.extract_strided_slice %9 {offsets = [0, 0], sizes = [16, 56], strides = [1, 1]} : vector<16x512xf32> to vector<16x56xf32>
    %756 = tpu.concatenate %754, %755 in 1 : vector<16x456xf32>, vector<16x56xf32> -> vector<16x512xf32>
    %757 = vector.extract_strided_slice %9 {offsets = [0, 504], sizes = [16, 8], strides = [1, 1]} : vector<16x512xf32> to vector<16x8xf32>
    %758 = vector.extract_strided_slice %9 {offsets = [0, 0], sizes = [16, 504], strides = [1, 1]} : vector<16x512xf32> to vector<16x504xf32>
    %759 = tpu.concatenate %757, %758 in 1 : vector<16x8xf32>, vector<16x504xf32> -> vector<16x512xf32>
    %760 = tpu.iota {dimensions = array<i32: 1>} : vector<1x512xi32>
    %c64_i32_162 = arith.constant 64 : i32
    %c0_i32_163 = arith.constant 0 : i32
    %761 = arith.cmpi eq, %c64_i32_162, %c0_i32_163 : i32
    %c1_i32_164 = arith.constant 1 : i32
    %762 = arith.select %761, %c1_i32_164, %c64_i32_162 : i32
    %763 = vector.broadcast %762 : i32 to vector<1x512xi32>
    %764 = arith.remsi %760, %763 : vector<1x512xi32>
    %c0_i32_165 = arith.constant 0 : i32
    %765 = vector.broadcast %c0_i32_165 : i32 to vector<1x512xi32>
    %766 = arith.cmpi ne, %764, %765 : vector<1x512xi32>
    %c0_i32_166 = arith.constant 0 : i32
    %767 = vector.broadcast %c0_i32_166 : i32 to vector<1x512xi32>
    %768 = arith.cmpi slt, %764, %767 : vector<1x512xi32>
    %c0_i32_167 = arith.constant 0 : i32
    %769 = arith.cmpi slt, %762, %c0_i32_167 : i32
    %770 = vector.broadcast %769 : i1 to vector<1x512xi1>
    %771 = vector.broadcast %770 : vector<1x512xi1> to vector<1x512xi1>
    %772 = arith.xori %768, %771 : vector<1x512xi1>
    %773 = arith.andi %772, %766 : vector<1x512xi1>
    %774 = vector.broadcast %762 : i32 to vector<1x512xi32>
    %775 = arith.addi %764, %774 : vector<1x512xi32>
    %776 = arith.select %773, %775, %764 : vector<1x512xi1>, vector<1x512xi32>
    %c8_i32_168 = arith.constant 8 : i32
    %777 = vector.broadcast %c8_i32_168 : i32 to vector<1x512xi32>
    %778 = arith.cmpi slt, %776, %777 : vector<1x512xi32>
    %779 = vector.shape_cast %778 : vector<1x512xi1> to vector<1x512xi1>
    %780 = vector.broadcast %779 : vector<1x512xi1> to vector<16x512xi1>
    %781 = arith.select %780, %756, %759 : vector<16x512xi1>, vector<16x512xf32>
    %782 = vector.broadcast %752 : vector<1x512xf32> to vector<16x512xf32>
    %783 = arith.mulf %782, %781 : vector<16x512xf32>
    %784 = arith.addf %750, %783 : vector<16x512xf32>
    %785 = arith.subf %270, %495 : vector<1x512xf32>
    %786 = math.exp %785 : vector<1x512xf32>
    %787 = arith.addf %753, %786 : vector<1x512xf32>
    %788 = vector.broadcast %786 : vector<1x512xf32> to vector<16x512xf32>
    %789 = arith.mulf %788, %9 : vector<16x512xf32>
    %790 = arith.addf %784, %789 : vector<16x512xf32>
    %791 = arith.subf %302, %495 : vector<1x512xf32>
    %792 = math.exp %791 : vector<1x512xf32>
    %793 = arith.addf %787, %792 : vector<1x512xf32>
    %794 = vector.extract_strided_slice %9 {offsets = [0, 1], sizes = [16, 511], strides = [1, 1]} : vector<16x512xf32> to vector<16x511xf32>
    %795 = vector.extract_strided_slice %9 {offsets = [0, 0], sizes = [16, 1], strides = [1, 1]} : vector<16x512xf32> to vector<16x1xf32>
    %796 = tpu.concatenate %794, %795 in 1 : vector<16x511xf32>, vector<16x1xf32> -> vector<16x512xf32>
    %797 = vector.extract_strided_slice %9 {offsets = [0, 505], sizes = [16, 7], strides = [1, 1]} : vector<16x512xf32> to vector<16x7xf32>
    %798 = vector.extract_strided_slice %9 {offsets = [0, 0], sizes = [16, 505], strides = [1, 1]} : vector<16x512xf32> to vector<16x505xf32>
    %799 = tpu.concatenate %797, %798 in 1 : vector<16x7xf32>, vector<16x505xf32> -> vector<16x512xf32>
    %800 = tpu.iota {dimensions = array<i32: 1>} : vector<1x512xi32>
    %c8_i32_169 = arith.constant 8 : i32
    %c0_i32_170 = arith.constant 0 : i32
    %801 = arith.cmpi eq, %c8_i32_169, %c0_i32_170 : i32
    %c1_i32_171 = arith.constant 1 : i32
    %802 = arith.select %801, %c1_i32_171, %c8_i32_169 : i32
    %803 = vector.broadcast %802 : i32 to vector<1x512xi32>
    %804 = arith.remsi %800, %803 : vector<1x512xi32>
    %c0_i32_172 = arith.constant 0 : i32
    %805 = vector.broadcast %c0_i32_172 : i32 to vector<1x512xi32>
    %806 = arith.cmpi ne, %804, %805 : vector<1x512xi32>
    %c0_i32_173 = arith.constant 0 : i32
    %807 = vector.broadcast %c0_i32_173 : i32 to vector<1x512xi32>
    %808 = arith.cmpi slt, %804, %807 : vector<1x512xi32>
    %c0_i32_174 = arith.constant 0 : i32
    %809 = arith.cmpi slt, %802, %c0_i32_174 : i32
    %810 = vector.broadcast %809 : i1 to vector<1x512xi1>
    %811 = vector.broadcast %810 : vector<1x512xi1> to vector<1x512xi1>
    %812 = arith.xori %808, %811 : vector<1x512xi1>
    %813 = arith.andi %812, %806 : vector<1x512xi1>
    %814 = vector.broadcast %802 : i32 to vector<1x512xi32>
    %815 = arith.addi %804, %814 : vector<1x512xi32>
    %816 = arith.select %813, %815, %804 : vector<1x512xi1>, vector<1x512xi32>
    %c7_i32_175 = arith.constant 7 : i32
    %817 = vector.broadcast %c7_i32_175 : i32 to vector<1x512xi32>
    %818 = arith.cmpi slt, %816, %817 : vector<1x512xi32>
    %819 = vector.shape_cast %818 : vector<1x512xi1> to vector<1x512xi1>
    %820 = vector.broadcast %819 : vector<1x512xi1> to vector<16x512xi1>
    %821 = arith.select %820, %796, %799 : vector<16x512xi1>, vector<16x512xf32>
    %822 = vector.broadcast %792 : vector<1x512xf32> to vector<16x512xf32>
    %823 = arith.mulf %822, %821 : vector<16x512xf32>
    %824 = arith.addf %790, %823 : vector<16x512xf32>
    %825 = arith.subf %334, %495 : vector<1x512xf32>
    %826 = math.exp %825 : vector<1x512xf32>
    %827 = arith.addf %793, %826 : vector<1x512xf32>
    %828 = vector.extract_strided_slice %9 {offsets = [0, 2], sizes = [16, 510], strides = [1, 1]} : vector<16x512xf32> to vector<16x510xf32>
    %829 = vector.extract_strided_slice %9 {offsets = [0, 0], sizes = [16, 2], strides = [1, 1]} : vector<16x512xf32> to vector<16x2xf32>
    %830 = tpu.concatenate %828, %829 in 1 : vector<16x510xf32>, vector<16x2xf32> -> vector<16x512xf32>
    %831 = vector.extract_strided_slice %9 {offsets = [0, 506], sizes = [16, 6], strides = [1, 1]} : vector<16x512xf32> to vector<16x6xf32>
    %832 = vector.extract_strided_slice %9 {offsets = [0, 0], sizes = [16, 506], strides = [1, 1]} : vector<16x512xf32> to vector<16x506xf32>
    %833 = tpu.concatenate %831, %832 in 1 : vector<16x6xf32>, vector<16x506xf32> -> vector<16x512xf32>
    %834 = tpu.iota {dimensions = array<i32: 1>} : vector<1x512xi32>
    %c8_i32_176 = arith.constant 8 : i32
    %c0_i32_177 = arith.constant 0 : i32
    %835 = arith.cmpi eq, %c8_i32_176, %c0_i32_177 : i32
    %c1_i32_178 = arith.constant 1 : i32
    %836 = arith.select %835, %c1_i32_178, %c8_i32_176 : i32
    %837 = vector.broadcast %836 : i32 to vector<1x512xi32>
    %838 = arith.remsi %834, %837 : vector<1x512xi32>
    %c0_i32_179 = arith.constant 0 : i32
    %839 = vector.broadcast %c0_i32_179 : i32 to vector<1x512xi32>
    %840 = arith.cmpi ne, %838, %839 : vector<1x512xi32>
    %c0_i32_180 = arith.constant 0 : i32
    %841 = vector.broadcast %c0_i32_180 : i32 to vector<1x512xi32>
    %842 = arith.cmpi slt, %838, %841 : vector<1x512xi32>
    %c0_i32_181 = arith.constant 0 : i32
    %843 = arith.cmpi slt, %836, %c0_i32_181 : i32
    %844 = vector.broadcast %843 : i1 to vector<1x512xi1>
    %845 = vector.broadcast %844 : vector<1x512xi1> to vector<1x512xi1>
    %846 = arith.xori %842, %845 : vector<1x512xi1>
    %847 = arith.andi %846, %840 : vector<1x512xi1>
    %848 = vector.broadcast %836 : i32 to vector<1x512xi32>
    %849 = arith.addi %838, %848 : vector<1x512xi32>
    %850 = arith.select %847, %849, %838 : vector<1x512xi1>, vector<1x512xi32>
    %c6_i32_182 = arith.constant 6 : i32
    %851 = vector.broadcast %c6_i32_182 : i32 to vector<1x512xi32>
    %852 = arith.cmpi slt, %850, %851 : vector<1x512xi32>
    %853 = vector.shape_cast %852 : vector<1x512xi1> to vector<1x512xi1>
    %854 = vector.broadcast %853 : vector<1x512xi1> to vector<16x512xi1>
    %855 = arith.select %854, %830, %833 : vector<16x512xi1>, vector<16x512xf32>
    %856 = vector.broadcast %826 : vector<1x512xf32> to vector<16x512xf32>
    %857 = arith.mulf %856, %855 : vector<16x512xf32>
    %858 = arith.addf %824, %857 : vector<16x512xf32>
    %859 = arith.subf %366, %495 : vector<1x512xf32>
    %860 = math.exp %859 : vector<1x512xf32>
    %861 = arith.addf %827, %860 : vector<1x512xf32>
    %862 = vector.extract_strided_slice %9 {offsets = [0, 3], sizes = [16, 509], strides = [1, 1]} : vector<16x512xf32> to vector<16x509xf32>
    %863 = vector.extract_strided_slice %9 {offsets = [0, 0], sizes = [16, 3], strides = [1, 1]} : vector<16x512xf32> to vector<16x3xf32>
    %864 = tpu.concatenate %862, %863 in 1 : vector<16x509xf32>, vector<16x3xf32> -> vector<16x512xf32>
    %865 = vector.extract_strided_slice %9 {offsets = [0, 507], sizes = [16, 5], strides = [1, 1]} : vector<16x512xf32> to vector<16x5xf32>
    %866 = vector.extract_strided_slice %9 {offsets = [0, 0], sizes = [16, 507], strides = [1, 1]} : vector<16x512xf32> to vector<16x507xf32>
    %867 = tpu.concatenate %865, %866 in 1 : vector<16x5xf32>, vector<16x507xf32> -> vector<16x512xf32>
    %868 = tpu.iota {dimensions = array<i32: 1>} : vector<1x512xi32>
    %c8_i32_183 = arith.constant 8 : i32
    %c0_i32_184 = arith.constant 0 : i32
    %869 = arith.cmpi eq, %c8_i32_183, %c0_i32_184 : i32
    %c1_i32_185 = arith.constant 1 : i32
    %870 = arith.select %869, %c1_i32_185, %c8_i32_183 : i32
    %871 = vector.broadcast %870 : i32 to vector<1x512xi32>
    %872 = arith.remsi %868, %871 : vector<1x512xi32>
    %c0_i32_186 = arith.constant 0 : i32
    %873 = vector.broadcast %c0_i32_186 : i32 to vector<1x512xi32>
    %874 = arith.cmpi ne, %872, %873 : vector<1x512xi32>
    %c0_i32_187 = arith.constant 0 : i32
    %875 = vector.broadcast %c0_i32_187 : i32 to vector<1x512xi32>
    %876 = arith.cmpi slt, %872, %875 : vector<1x512xi32>
    %c0_i32_188 = arith.constant 0 : i32
    %877 = arith.cmpi slt, %870, %c0_i32_188 : i32
    %878 = vector.broadcast %877 : i1 to vector<1x512xi1>
    %879 = vector.broadcast %878 : vector<1x512xi1> to vector<1x512xi1>
    %880 = arith.xori %876, %879 : vector<1x512xi1>
    %881 = arith.andi %880, %874 : vector<1x512xi1>
    %882 = vector.broadcast %870 : i32 to vector<1x512xi32>
    %883 = arith.addi %872, %882 : vector<1x512xi32>
    %884 = arith.select %881, %883, %872 : vector<1x512xi1>, vector<1x512xi32>
    %c5_i32_189 = arith.constant 5 : i32
    %885 = vector.broadcast %c5_i32_189 : i32 to vector<1x512xi32>
    %886 = arith.cmpi slt, %884, %885 : vector<1x512xi32>
    %887 = vector.shape_cast %886 : vector<1x512xi1> to vector<1x512xi1>
    %888 = vector.broadcast %887 : vector<1x512xi1> to vector<16x512xi1>
    %889 = arith.select %888, %864, %867 : vector<16x512xi1>, vector<16x512xf32>
    %890 = vector.broadcast %860 : vector<1x512xf32> to vector<16x512xf32>
    %891 = arith.mulf %890, %889 : vector<16x512xf32>
    %892 = arith.addf %858, %891 : vector<16x512xf32>
    %893 = arith.subf %398, %495 : vector<1x512xf32>
    %894 = math.exp %893 : vector<1x512xf32>
    %895 = arith.addf %861, %894 : vector<1x512xf32>
    %896 = vector.extract_strided_slice %9 {offsets = [0, 4], sizes = [16, 508], strides = [1, 1]} : vector<16x512xf32> to vector<16x508xf32>
    %897 = vector.extract_strided_slice %9 {offsets = [0, 0], sizes = [16, 4], strides = [1, 1]} : vector<16x512xf32> to vector<16x4xf32>
    %898 = tpu.concatenate %896, %897 in 1 : vector<16x508xf32>, vector<16x4xf32> -> vector<16x512xf32>
    %899 = vector.extract_strided_slice %9 {offsets = [0, 508], sizes = [16, 4], strides = [1, 1]} : vector<16x512xf32> to vector<16x4xf32>
    %900 = vector.extract_strided_slice %9 {offsets = [0, 0], sizes = [16, 508], strides = [1, 1]} : vector<16x512xf32> to vector<16x508xf32>
    %901 = tpu.concatenate %899, %900 in 1 : vector<16x4xf32>, vector<16x508xf32> -> vector<16x512xf32>
    %902 = tpu.iota {dimensions = array<i32: 1>} : vector<1x512xi32>
    %c8_i32_190 = arith.constant 8 : i32
    %c0_i32_191 = arith.constant 0 : i32
    %903 = arith.cmpi eq, %c8_i32_190, %c0_i32_191 : i32
    %c1_i32_192 = arith.constant 1 : i32
    %904 = arith.select %903, %c1_i32_192, %c8_i32_190 : i32
    %905 = vector.broadcast %904 : i32 to vector<1x512xi32>
    %906 = arith.remsi %902, %905 : vector<1x512xi32>
    %c0_i32_193 = arith.constant 0 : i32
    %907 = vector.broadcast %c0_i32_193 : i32 to vector<1x512xi32>
    %908 = arith.cmpi ne, %906, %907 : vector<1x512xi32>
    %c0_i32_194 = arith.constant 0 : i32
    %909 = vector.broadcast %c0_i32_194 : i32 to vector<1x512xi32>
    %910 = arith.cmpi slt, %906, %909 : vector<1x512xi32>
    %c0_i32_195 = arith.constant 0 : i32
    %911 = arith.cmpi slt, %904, %c0_i32_195 : i32
    %912 = vector.broadcast %911 : i1 to vector<1x512xi1>
    %913 = vector.broadcast %912 : vector<1x512xi1> to vector<1x512xi1>
    %914 = arith.xori %910, %913 : vector<1x512xi1>
    %915 = arith.andi %914, %908 : vector<1x512xi1>
    %916 = vector.broadcast %904 : i32 to vector<1x512xi32>
    %917 = arith.addi %906, %916 : vector<1x512xi32>
    %918 = arith.select %915, %917, %906 : vector<1x512xi1>, vector<1x512xi32>
    %c4_i32_196 = arith.constant 4 : i32
    %919 = vector.broadcast %c4_i32_196 : i32 to vector<1x512xi32>
    %920 = arith.cmpi slt, %918, %919 : vector<1x512xi32>
    %921 = vector.shape_cast %920 : vector<1x512xi1> to vector<1x512xi1>
    %922 = vector.broadcast %921 : vector<1x512xi1> to vector<16x512xi1>
    %923 = arith.select %922, %898, %901 : vector<16x512xi1>, vector<16x512xf32>
    %924 = vector.broadcast %894 : vector<1x512xf32> to vector<16x512xf32>
    %925 = arith.mulf %924, %923 : vector<16x512xf32>
    %926 = arith.addf %892, %925 : vector<16x512xf32>
    %927 = arith.subf %430, %495 : vector<1x512xf32>
    %928 = math.exp %927 : vector<1x512xf32>
    %929 = arith.addf %895, %928 : vector<1x512xf32>
    %930 = vector.extract_strided_slice %9 {offsets = [0, 5], sizes = [16, 507], strides = [1, 1]} : vector<16x512xf32> to vector<16x507xf32>
    %931 = vector.extract_strided_slice %9 {offsets = [0, 0], sizes = [16, 5], strides = [1, 1]} : vector<16x512xf32> to vector<16x5xf32>
    %932 = tpu.concatenate %930, %931 in 1 : vector<16x507xf32>, vector<16x5xf32> -> vector<16x512xf32>
    %933 = vector.extract_strided_slice %9 {offsets = [0, 509], sizes = [16, 3], strides = [1, 1]} : vector<16x512xf32> to vector<16x3xf32>
    %934 = vector.extract_strided_slice %9 {offsets = [0, 0], sizes = [16, 509], strides = [1, 1]} : vector<16x512xf32> to vector<16x509xf32>
    %935 = tpu.concatenate %933, %934 in 1 : vector<16x3xf32>, vector<16x509xf32> -> vector<16x512xf32>
    %936 = tpu.iota {dimensions = array<i32: 1>} : vector<1x512xi32>
    %c8_i32_197 = arith.constant 8 : i32
    %c0_i32_198 = arith.constant 0 : i32
    %937 = arith.cmpi eq, %c8_i32_197, %c0_i32_198 : i32
    %c1_i32_199 = arith.constant 1 : i32
    %938 = arith.select %937, %c1_i32_199, %c8_i32_197 : i32
    %939 = vector.broadcast %938 : i32 to vector<1x512xi32>
    %940 = arith.remsi %936, %939 : vector<1x512xi32>
    %c0_i32_200 = arith.constant 0 : i32
    %941 = vector.broadcast %c0_i32_200 : i32 to vector<1x512xi32>
    %942 = arith.cmpi ne, %940, %941 : vector<1x512xi32>
    %c0_i32_201 = arith.constant 0 : i32
    %943 = vector.broadcast %c0_i32_201 : i32 to vector<1x512xi32>
    %944 = arith.cmpi slt, %940, %943 : vector<1x512xi32>
    %c0_i32_202 = arith.constant 0 : i32
    %945 = arith.cmpi slt, %938, %c0_i32_202 : i32
    %946 = vector.broadcast %945 : i1 to vector<1x512xi1>
    %947 = vector.broadcast %946 : vector<1x512xi1> to vector<1x512xi1>
    %948 = arith.xori %944, %947 : vector<1x512xi1>
    %949 = arith.andi %948, %942 : vector<1x512xi1>
    %950 = vector.broadcast %938 : i32 to vector<1x512xi32>
    %951 = arith.addi %940, %950 : vector<1x512xi32>
    %952 = arith.select %949, %951, %940 : vector<1x512xi1>, vector<1x512xi32>
    %c3_i32_203 = arith.constant 3 : i32
    %953 = vector.broadcast %c3_i32_203 : i32 to vector<1x512xi32>
    %954 = arith.cmpi slt, %952, %953 : vector<1x512xi32>
    %955 = vector.shape_cast %954 : vector<1x512xi1> to vector<1x512xi1>
    %956 = vector.broadcast %955 : vector<1x512xi1> to vector<16x512xi1>
    %957 = arith.select %956, %932, %935 : vector<16x512xi1>, vector<16x512xf32>
    %958 = vector.broadcast %928 : vector<1x512xf32> to vector<16x512xf32>
    %959 = arith.mulf %958, %957 : vector<16x512xf32>
    %960 = arith.addf %926, %959 : vector<16x512xf32>
    %961 = arith.subf %462, %495 : vector<1x512xf32>
    %962 = math.exp %961 : vector<1x512xf32>
    %963 = arith.addf %929, %962 : vector<1x512xf32>
    %964 = vector.extract_strided_slice %9 {offsets = [0, 6], sizes = [16, 506], strides = [1, 1]} : vector<16x512xf32> to vector<16x506xf32>
    %965 = vector.extract_strided_slice %9 {offsets = [0, 0], sizes = [16, 6], strides = [1, 1]} : vector<16x512xf32> to vector<16x6xf32>
    %966 = tpu.concatenate %964, %965 in 1 : vector<16x506xf32>, vector<16x6xf32> -> vector<16x512xf32>
    %967 = vector.extract_strided_slice %9 {offsets = [0, 510], sizes = [16, 2], strides = [1, 1]} : vector<16x512xf32> to vector<16x2xf32>
    %968 = vector.extract_strided_slice %9 {offsets = [0, 0], sizes = [16, 510], strides = [1, 1]} : vector<16x512xf32> to vector<16x510xf32>
    %969 = tpu.concatenate %967, %968 in 1 : vector<16x2xf32>, vector<16x510xf32> -> vector<16x512xf32>
    %970 = tpu.iota {dimensions = array<i32: 1>} : vector<1x512xi32>
    %c8_i32_204 = arith.constant 8 : i32
    %c0_i32_205 = arith.constant 0 : i32
    %971 = arith.cmpi eq, %c8_i32_204, %c0_i32_205 : i32
    %c1_i32_206 = arith.constant 1 : i32
    %972 = arith.select %971, %c1_i32_206, %c8_i32_204 : i32
    %973 = vector.broadcast %972 : i32 to vector<1x512xi32>
    %974 = arith.remsi %970, %973 : vector<1x512xi32>
    %c0_i32_207 = arith.constant 0 : i32
    %975 = vector.broadcast %c0_i32_207 : i32 to vector<1x512xi32>
    %976 = arith.cmpi ne, %974, %975 : vector<1x512xi32>
    %c0_i32_208 = arith.constant 0 : i32
    %977 = vector.broadcast %c0_i32_208 : i32 to vector<1x512xi32>
    %978 = arith.cmpi slt, %974, %977 : vector<1x512xi32>
    %c0_i32_209 = arith.constant 0 : i32
    %979 = arith.cmpi slt, %972, %c0_i32_209 : i32
    %980 = vector.broadcast %979 : i1 to vector<1x512xi1>
    %981 = vector.broadcast %980 : vector<1x512xi1> to vector<1x512xi1>
    %982 = arith.xori %978, %981 : vector<1x512xi1>
    %983 = arith.andi %982, %976 : vector<1x512xi1>
    %984 = vector.broadcast %972 : i32 to vector<1x512xi32>
    %985 = arith.addi %974, %984 : vector<1x512xi32>
    %986 = arith.select %983, %985, %974 : vector<1x512xi1>, vector<1x512xi32>
    %c2_i32_210 = arith.constant 2 : i32
    %987 = vector.broadcast %c2_i32_210 : i32 to vector<1x512xi32>
    %988 = arith.cmpi slt, %986, %987 : vector<1x512xi32>
    %989 = vector.shape_cast %988 : vector<1x512xi1> to vector<1x512xi1>
    %990 = vector.broadcast %989 : vector<1x512xi1> to vector<16x512xi1>
    %991 = arith.select %990, %966, %969 : vector<16x512xi1>, vector<16x512xf32>
    %992 = vector.broadcast %962 : vector<1x512xf32> to vector<16x512xf32>
    %993 = arith.mulf %992, %991 : vector<16x512xf32>
    %994 = arith.addf %960, %993 : vector<16x512xf32>
    %995 = arith.subf %494, %495 : vector<1x512xf32>
    %996 = math.exp %995 : vector<1x512xf32>
    %997 = arith.addf %963, %996 : vector<1x512xf32>
    %998 = vector.extract_strided_slice %9 {offsets = [0, 7], sizes = [16, 505], strides = [1, 1]} : vector<16x512xf32> to vector<16x505xf32>
    %999 = vector.extract_strided_slice %9 {offsets = [0, 0], sizes = [16, 7], strides = [1, 1]} : vector<16x512xf32> to vector<16x7xf32>
    %1000 = tpu.concatenate %998, %999 in 1 : vector<16x505xf32>, vector<16x7xf32> -> vector<16x512xf32>
    %1001 = vector.extract_strided_slice %9 {offsets = [0, 511], sizes = [16, 1], strides = [1, 1]} : vector<16x512xf32> to vector<16x1xf32>
    %1002 = vector.extract_strided_slice %9 {offsets = [0, 0], sizes = [16, 511], strides = [1, 1]} : vector<16x512xf32> to vector<16x511xf32>
    %1003 = tpu.concatenate %1001, %1002 in 1 : vector<16x1xf32>, vector<16x511xf32> -> vector<16x512xf32>
    %1004 = tpu.iota {dimensions = array<i32: 1>} : vector<1x512xi32>
    %c8_i32_211 = arith.constant 8 : i32
    %c0_i32_212 = arith.constant 0 : i32
    %1005 = arith.cmpi eq, %c8_i32_211, %c0_i32_212 : i32
    %c1_i32_213 = arith.constant 1 : i32
    %1006 = arith.select %1005, %c1_i32_213, %c8_i32_211 : i32
    %1007 = vector.broadcast %1006 : i32 to vector<1x512xi32>
    %1008 = arith.remsi %1004, %1007 : vector<1x512xi32>
    %c0_i32_214 = arith.constant 0 : i32
    %1009 = vector.broadcast %c0_i32_214 : i32 to vector<1x512xi32>
    %1010 = arith.cmpi ne, %1008, %1009 : vector<1x512xi32>
    %c0_i32_215 = arith.constant 0 : i32
    %1011 = vector.broadcast %c0_i32_215 : i32 to vector<1x512xi32>
    %1012 = arith.cmpi slt, %1008, %1011 : vector<1x512xi32>
    %c0_i32_216 = arith.constant 0 : i32
    %1013 = arith.cmpi slt, %1006, %c0_i32_216 : i32
    %1014 = vector.broadcast %1013 : i1 to vector<1x512xi1>
    %1015 = vector.broadcast %1014 : vector<1x512xi1> to vector<1x512xi1>
    %1016 = arith.xori %1012, %1015 : vector<1x512xi1>
    %1017 = arith.andi %1016, %1010 : vector<1x512xi1>
    %1018 = vector.broadcast %1006 : i32 to vector<1x512xi32>
    %1019 = arith.addi %1008, %1018 : vector<1x512xi32>
    %1020 = arith.select %1017, %1019, %1008 : vector<1x512xi1>, vector<1x512xi32>
    %c1_i32_217 = arith.constant 1 : i32
    %1021 = vector.broadcast %c1_i32_217 : i32 to vector<1x512xi32>
    %1022 = arith.cmpi slt, %1020, %1021 : vector<1x512xi32>
    %1023 = vector.shape_cast %1022 : vector<1x512xi1> to vector<1x512xi1>
    %1024 = vector.broadcast %1023 : vector<1x512xi1> to vector<16x512xi1>
    %1025 = arith.select %1024, %1000, %1003 : vector<16x512xi1>, vector<16x512xf32>
    %1026 = vector.broadcast %996 : vector<1x512xf32> to vector<16x512xf32>
    %1027 = arith.mulf %1026, %1025 : vector<16x512xf32>
    %1028 = arith.addf %994, %1027 : vector<16x512xf32>
    %1029 = tpu.reciprocal %997 {approx = true} : vector<1x512xf32> -> vector<1x512xf32>
    %1030 = arith.mulf %997, %1029 : vector<1x512xf32>
    %cst_218 = arith.constant 2.000000e+00 : f32
    %1031 = vector.broadcast %cst_218 : f32 to vector<1x512xf32>
    %1032 = arith.subf %1031, %1030 : vector<1x512xf32>
    %1033 = arith.mulf %1029, %1032 : vector<1x512xf32>
    %c0_219 = arith.constant 0 : index
    %c0_220 = arith.constant 0 : index
    %1034 = memref.load %arg4[%c0_219, %c0_220] : memref<1x1xf32, #tpu.memory_space<smem>>
    %1035 = vector.broadcast %1033 : vector<1x512xf32> to vector<16x512xf32>
    %1036 = arith.mulf %1028, %1035 : vector<16x512xf32>
    %1037 = vector.broadcast %1034 : f32 to vector<16x512xf32>
    %1038 = arith.mulf %1037, %1036 : vector<16x512xf32>
    %c0_221 = arith.constant 0 : index
    %c0_222 = arith.constant 0 : index
    %c0_223 = arith.constant 0 : index
    %1039 = vector.load %arg1[%c0_221, %c0_222, %c0_223] : memref<1x16x512xf32, #tpu.memory_space<vmem>>, vector<1x16x512xf32>
    %1040 = vector.shape_cast %1039 : vector<1x16x512xf32> to vector<16x512xf32>
    %1041 = arith.addf %1038, %1040 : vector<16x512xf32>
    %c0_224 = arith.constant 0 : index
    %c0_225 = arith.constant 0 : index
    %c0_226 = arith.constant 0 : index
    %1042 = vector.load %arg5[%c0_224, %c0_225, %c0_226] : memref<1x16x512xf32, #tpu.memory_space<vmem>>, vector<1x16x512xf32>
    %1043 = vector.shape_cast %1042 : vector<1x16x512xf32> to vector<16x512xf32>
    %1044 = vector.shape_cast %1041 : vector<16x512xf32> to vector<1x16x512xf32>
    tpu.vector_store %arg5[%c0_224, %c0_225, %c0_226], %1044 {strides = array<i32>} : memref<1x16x512xf32, #tpu.memory_space<vmem>>, vector<1x16x512xf32>,
    return
  }
  func.func @transform_0(%arg0: i32) -> (i32, i32, i32) {
    %c0_i32 = arith.constant 0 : i32
    %c0_i32_0 = arith.constant 0 : i32
    %c0_i32_1 = arith.constant 0 : i32
    return %arg0, %c0_i32, %c0_i32_0 : i32, i32, i32
  }
  func.func @transform_1(%arg0: i32) -> (i32, i32) {
    %c0_i32 = arith.constant 0 : i32
    %c0_i32_0 = arith.constant 0 : i32
    %c0_i32_1 = arith.constant 0 : i32
    return %c0_i32, %c0_i32_0 : i32, i32
  }
  func.func @transform_2(%arg0: i32) -> (i32, i32) {
    %c0_i32 = arith.constant 0 : i32
    %c0_i32_0 = arith.constant 0 : i32
    %c0_i32_1 = arith.constant 0 : i32
    return %c0_i32, %c0_i32_0 : i32, i32
  }
  func.func @transform_3(%arg0: i32) -> (i32, i32) {
    %c0_i32 = arith.constant 0 : i32
    %c0_i32_0 = arith.constant 0 : i32
    %c0_i32_1 = arith.constant 0 : i32
    return %c0_i32, %c0_i32_0 : i32, i32
  }
  func.func @transform_4(%arg0: i32) -> (i32, i32, i32) {
    %c0_i32 = arith.constant 0 : i32
    %c0_i32_0 = arith.constant 0 : i32
    %c0_i32_1 = arith.constant 0 : i32
    return %arg0, %c0_i32, %c0_i32_0 : i32, i32, i32
  }
}

</mosaic_0001>

<bundles_post_ra>
// kernel: criss_cross_attention_3d.1
= control target key start
LH: loop header
LB: loop body
LE: loop exit
PB: predicated region body
PF: predicated region fallthrough
CT: control target
= control target key end

     0   :  { %s6133_s17 = smov 0   ;;  %s11721_s0 = inlined_call_operand.vmem [shape: f32[2,16,512], index: 0, kind: input, shape index: {}]   ;;  %s11722_s1 = inlined_call_operand.vmem [shape: f32[20,16], index: 1, kind: input, shape index: {}]   ;;  %s11723_s2 = inlined_call_operand.vmem [shape: f32[20,1], index: 2, kind: input, shape index: {}]   ;;  %s11724_s3 = inlined_call_operand.<no memory space> [shape: f32[1,1], index: 3, kind: input, shape index: {}]   ;;  %s11725_s4 = inlined_call_operand.vmem [shape: f32[2,16,512], index: 4, kind: output, shape index: {}]  }
   0x1   :  { %9 = sst [smem:[#allocation2]] %s11724_s3 }
   0x2 LB: > { %s5820_s18 = sadd.s32 4294967295, %s6072_s17   ;;  %p5824_p0 = scmp.ge.s32.totalorder %s6072_s17, 1  ;;  %s6072_s17 = sphi %s6133_s17, %s15_s17  }
   0x3   : > { %p163_p1 = scmp.lt.s32.totalorder %s6072_s17, 3 }
   0x5   : > { %p164_p2 = pnand %p5824_p0, %p163_p1 }
   0x7   : > { %167 = sbr.rel (%p164_p2) target bundleno = 1179 (0x49b), region = 36 }
   0xc   : > { %p189_p3 = scmp.lt.s32.totalorder %s5820_s18, 1  ;;  %v199_v0 = vld [vmem:[%s11722_s1] sm:$0xff]  ;;  %vm11841_vm0 = vcmask 130048   ;;  %v200_v1 = vld [vmem:[%s11722_s1 + $0x8] sm:$0xff]  ;;  %v6074_v2 = vmov 0.0   ;;  %v6075_v10 = vmov 0  }
   0xd   : > { %306 = vmatprep.mubr.f32.mxu0 %v6074_v2  ;;  %v230_v3 = vsel %vm11841_vm0, %v199_v0, 0  ;;  %v233_v4 = vsel %vm11841_vm0, %v200_v1, 0  ;;  %424 = vmatprep.mubr.f32.mxu1 %v6074_v2  ;;  %v201_v5 = vld [vmem:[%s11722_s1 + $0x10] sm:$0xf]  ;;  %v210_v6 = vld [vmem:[%s11723_s2] sm:$0xff]  ;;  %v211_v15 = vld [vmem:[%s11723_s2 + $0x8] sm:$0xff] }
   0xe   : > { %s13780_s18 = smov (!%p189_p3, %s5820_s18), 1  ;;  %v6159_v7 = vand.u32 4294901760, %v230_v3  ;;  %v6161_v8 = vand.u32 4294901760, %v233_v4  ;;  %v236_v9 = vsel %vm11841_vm0, %v201_v5, 0  ;;  %5872 = vset.pattern.permute.xlu0 %v6075_v10  ;;  %5873 = vset.pattern.permute.xlu1 %v6075_v10  ;;  %v212_v11 = vld [vmem:[%s11723_s2 + $0x10] sm:$0xf] }
   0xf   : > { %v6167_v12 = vand.u32 4294901760, %v236_v9  ;;  %215 = vperm.xlu0 %5872, %v210_v6   ;;  %225 = vperm.xlu1 %5873, %v212_v11   ;;  %s11726_s28 = sshll.u32 %s13780_s18, 6  ;;  %s6076_s8 = smov 56   ;;  %vm11838_vm1 = vcmask 1043456   ;;  %vm1447_vm2 = vcmask 1041408   ;;  %vm11859_vm3 = vcmask 982016  }
  0x10   : > { %v6171_v13 = vsub.f32 %v230_v3, %v6159_v7  ;;  %v6174_v14 = vsub.f32 %v233_v4, %v6161_v8  ;;  %s6184_s7 = scalar_lea.vmem %s11721_s0, %s11726_s28  ;;  %s6077_s9 = smov 120   ;;  %vm11867_vm4 = vcmask 916480   ;;  %vm11843_vm6 = vcmask 457728  }
  0x11   : > { %v6187_v16 = vsub.f32 %v236_v9, %v6167_v12  ;;  %v207_v17 = vld [vmem:[%s6184_s7 + $0x28] sm:$0xff]  ;;  %v206_v18 = vld [vmem:[%s6184_s7 + $0x20] sm:$0xff]  ;;  %v209_v49 = vld [vmem:[%s6184_s7 + $0x38] sm:$0xff]  ;;  %s11820_s10 = smov 48   ;;  %s6079_s11 = smov 112   ;;  %vm11889_vm7 = vcmask 850944  }
  0x12   : > { %v203_v19 = vld [vmem:[%s6184_s7 + $0x8] sm:$0xff]  ;;  %v6193_v20 = vand.u32 4294901760, %v6171_v13  ;;  %v6196_v21 = vand.u32 4294901760, %v6174_v14  ;;  %v6198_v22 = vand.u32 4294901760, %v207_v17  ;;  %v6200_v23 = vand.u32 4294901760, %v206_v18  ;;  %v202_v25 = vld [vmem:[%s6184_s7] sm:$0xff] }
  0x13   : > { %v6202_v24 = vand.u32 4294901760, %v203_v19  ;;  %220 = vperm.xlu0 %5872, %v211_v15   ;;  %v6205_v26 = vand.u32 4294901760, %v202_v25  ;;  %v6210_v28 = vand.u32 4294901760, %v6187_v16  ;;  %v6235_v51 = vand.u32 4294901760, %v209_v49  ;;  %v208_v53 = vld [vmem:[%s6184_s7 + $0x30] sm:$0xff]  ;;  %v205_v54 = vld [vmem:[%s6184_s7 + $0x18] sm:$0xff] }
  0x14   : > { %v310_v27 = vsub.f32 %v6171_v13, %v6193_v20  ;;  %267 = vmatprep.subr.mxu0 %v6198_v22  ;;  %v321_v29 = vsub.f32 %v6174_v14, %v6196_v21  ;;  %v369_v30 = vsub.f32 %v207_v17, %v6198_v22  ;;  %v375_v31 = vsub.f32 %v206_v18, %v6200_v23  ;;  %v204_v58 = vld [vmem:[%s6184_s7 + $0x10] sm:$0xff]  ;;  %s11795_s12 = smov 40   ;;  %s11784_s13 = smov 104  }
  0x15   : > { %v381_v32 = vsub.f32 %v203_v19, %v6202_v24  ;;  %269 = vmatpush1.msra.mxu0 %v6200_v23  ;;  %v387_v34 = vsub.f32 %v202_v25, %v6205_v26  ;;  %v332_v39 = vsub.f32 %v6187_v16, %v6210_v28  ;;  %v6244_v52 = vsub.f32 %v209_v49, %v6235_v51  ;;  %s11747_s14 = smov 32   ;;  %s11793_s15 = smov 96  }
  0x16   : > { %v6219_v33 = vand.u32 4294901760, %v310_v27  ;;  %271 = vmatprep.subr.mxu0 %v6202_v24  ;;  %v370_v35 = vand.u32 4294901760, %v369_v30  ;;  %v376_v36 = vand.u32 4294901760, %v375_v31  ;;  %v6227_v40 = vand.u32 4294901760, %v321_v29  ;;  %s11749_s16 = smov 24   ;;  %s11801_s19 = smov 88  }
  0x17   : > { %v382_v37 = vand.u32 4294901760, %v381_v32  ;;  %273 = vmatpush1.msra.mxu0 %v6205_v26  ;;  %v388_v38 = vand.u32 4294901760, %v387_v34  ;;  %v6232_v50 = vand.u32 4294901760, %v332_v39  ;;  %v6254_v55 = vand.u32 4294901760, %v208_v53  ;;  %s11751_s20 = smov 16   ;;  %s11753_s3 = smov 80  }
  0x18   : > { %312 = vmatmul.mubr.f32.vlgmr.msra.gmra.mxu0 %v6219_v33  ;;  %v371_v41 = vsub.f32 %v369_v30, %v370_v35  ;;  %v377_v42 = vsub.f32 %v375_v31, %v376_v36  ;;  %476 = vmatprep.subr.mxu0 %v369_v30  ;;  %v959_v56 = vand.u32 4294901760, %v6244_v52  ;;  %v6258_v57 = vand.u32 4294901760, %v205_v54  ;;  %s11741_s21 = smov 8   ;;  %s11737_s22 = smov 72  }
  0x19   : > { %v383_v43 = vsub.f32 %v381_v32, %v382_v37  ;;  %317 = vmatprep.mubr.f32.mxu0 %v6074_v2  ;;  %v389_v44 = vsub.f32 %v387_v34, %v388_v38  ;;  %479 = vmatpush1.msra.mxu0 %v375_v31  ;;  %v6266_v59 = vsub.f32 %v208_v53, %v6254_v55  ;;  %v6268_v60 = vand.u32 4294901760, %v204_v58  ;;  %s11755_s23 = smov 7   ;;  %s11739_s24 = smov 127  }
  0x1a   : > { %v372_v45 = vand.u32 4294901760, %v371_v41  ;;  %v378_v46 = vand.u32 4294901760, %v377_v42  ;;  %482 = vmatprep.subr.mxu0 %v381_v32  ;;  %v960_v61 = vsub.f32 %v6244_v52, %v959_v56  ;;  %v6275_v62 = vsub.f32 %v205_v54, %v6258_v57  ;;  %s6092_s25 = smov 6   ;;  %s11743_s26 = smov 126  }
  0x1b   : > { %v384_v47 = vand.u32 4294901760, %v383_v43  ;;  %v390_v48 = vand.u32 4294901760, %v389_v44  ;;  %485 = vmatpush1.msra.mxu0 %v387_v34  ;;  %v6284_v63 = vsub.f32 %v204_v58, %v6268_v60  ;;  %v965_v1 = vand.u32 4294901760, %v6266_v59  ;;  %s11727_s27 = smov 5   ;;  %s11745_s29 = smov 125  }
  0x1c   : > { %323 = vmatmul.mubr.f32.gmra.mxu0 %v6227_v40  ;;  %373 = vmatprep.subr.mxu1 %v372_v45  ;;  %v961_v0 = vand.u32 4294901760, %v960_v61  ;;  %v971_v3 = vand.u32 4294901760, %v6275_v62  ;;  %s11729_s30 = smov 4   ;;  %s6097_s5 = smov 124   ;;  %vm11842_vm8 = vcmask 392192   ;;  %vm11888_vm9 = vcmask 785408  }
  0x1d   : > { %379 = vmatpush1.msra.mxu1 %v378_v46  ;;  %328 = vmatprep.mubr.f32.mxu0 %v6074_v2  ;;  %v966_v4 = vsub.f32 %v6266_v59, %v965_v1  ;;  %v977_v5 = vand.u32 4294901760, %v6284_v63  ;;  %s11731_s6 = smov 3   ;;  %s11733_s28 = smov 123   ;;  %vm11857_vm10 = vcmask 326656   ;;  %vm11863_vm11 = vcmask 719872  }
  0x1e   : > { %385 = vmatprep.subr.mxu1 %v384_v47  ;;  %670 = vmatprep.subr.mxu0 %v370_v35  ;;  %v972_v6 = vsub.f32 %v6275_v62, %v971_v3  ;;  %vm11858_vm12 = vcmask 261120   ;;  %vm11865_vm13 = vcmask 654336   ;;  %vm12044_vm0 = vcmask 56320  }
  0x1f   : > { %391 = vmatpush1.msra.mxu1 %v390_v48  ;;  %v967_v9 = vand.u32 4294901760, %v966_v4  ;;  %v978_v10 = vsub.f32 %v6284_v63, %v977_v5  ;;  %vm12054_vm14 = vcmask 1014784  }
  0x20   : > { %334 = vmatmul.mubr.f32.gmra.mxu0 %v6232_v50  ;;  %426 = vmatmul.mubr.f32.vlgmr.msra.gmra.mxu1 %v6159_v7  ;;  %v973_v11 = vand.u32 4294901760, %v972_v6 }
  0x21   : > { %572 = vmatprep.subr.mxu1 %v6198_v22  ;;  %431 = vmatprep.mubr.f32.mxu1 %v6074_v2  ;;  %v979_v15 = vand.u32 4294901760, %v978_v10 }
  0x22   : > { %574 = vmatpush1.msra.mxu1 %v6200_v23  ;;  %518 = vmatprep.mubr.f32.mxu0 %v6074_v2 }
  0x23   : > { %576 = vmatprep.subr.mxu1 %v6202_v24 }
  0x24   : > { %433 = vmatmul.mubr.f32.gmra.mxu1 %v6161_v8  ;;  %521 = vmatmul.mubr.f32.vlgmr.msra.gmra.mxu0 %v6171_v13 }
  0x25   : > { %438 = vmatprep.mubr.f32.mxu1 %v6074_v2  ;;  %526 = vmatprep.mubr.f32.mxu0 %v6074_v2 }
  0x26   : > { %578 = vmatpush1.msra.mxu1 %v6205_v26  ;;  %674 = vmatpush1.msra.mxu0 %v376_v36 }
  0x27   : > { %766 = vmatprep.subr.mxu1 %v6198_v22  ;;  %678 = vmatprep.subr.mxu0 %v382_v37 }
  0x28   : > { %440 = vmatmul.mubr.f32.gmra.mxu1 %v6167_v12  ;;  %529 = vmatmul.mubr.f32.gmra.mxu0 %v6174_v14 }
  0x29   : > { %534 = vmatprep.mubr.f32.mxu0 %v6074_v2  ;;  %611 = vmatprep.mubr.f32.mxu1 %v6074_v2 }
  0x2a   : > { %682 = vmatpush1.msra.mxu0 %v388_v38 }
  0x2b   : > { %856 = vmatprep.subr.mxu0 %v6235_v51 }
  0x2c   : > { %537 = vmatmul.mubr.f32.gmra.mxu0 %v6187_v16  ;;  %615 = vmatmul.mubr.f32.vlgmr.msra.gmra.mxu1 %v6193_v20 }
  0x2d   : > { %768 = vmatpush1.msra.mxu1 %v6200_v23  ;;  %620 = vmatprep.mubr.f32.mxu1 %v6074_v2 }
  0x2e   : > { %715 = vmatprep.mubr.f32.mxu0 %v6074_v2  ;;  %770 = vmatprep.subr.mxu1 %v6202_v24 }
  0x2f   : > { %772 = vmatpush1.msra.mxu1 %v6205_v26 }
  0x30   : > { %624 = vmatmul.mubr.f32.gmra.mxu1 %v6196_v21  ;;  %717 = vmatmul.mubr.f32.vlgmr.msra.gmra.mxu0 %v6159_v7 }
  0x31   : > { %629 = vmatprep.mubr.f32.mxu1 %v6074_v2  ;;  %722 = vmatprep.mubr.f32.mxu0 %v6074_v2 }
  0x32   : > { %858 = vmatpush1.msra.mxu0 %v6254_v55  ;;  %962 = vmatprep.subr.mxu1 %v961_v0 }
  0x33   : > { %860 = vmatprep.subr.mxu0 %v6258_v57 }
  0x34   : > { %633 = vmatmul.mubr.f32.gmra.mxu1 %v6210_v28  ;;  %724 = vmatmul.mubr.f32.gmra.mxu0 %v6161_v8 }
  0x35   : > { %729 = vmatprep.mubr.f32.mxu0 %v6074_v2  ;;  %805 = vmatprep.mubr.f32.mxu1 %v6074_v2 }
  0x36   : > { %862 = vmatpush1.msra.mxu0 %v6268_v60 }
  0x37   : > { %1065 = vmatprep.subr.mxu0 %v6244_v52 }
  0x38   : > { %731 = vmatmul.mubr.f32.gmra.mxu0 %v6167_v12  ;;  %807 = vmatmul.mubr.f32.vlgmr.msra.gmra.mxu1 %v6159_v7 }
  0x39   : > { %812 = vmatprep.mubr.f32.mxu1 %v6074_v2  ;;  %895 = vmatprep.mubr.f32.mxu0 %v6074_v2 }
  0x3a   : > { %968 = vmatpush1.msra.mxu1 %v967_v9 }
  0x3b   : > { %974 = vmatprep.subr.mxu1 %v973_v11 }
  0x3c   : > { %814 = vmatmul.mubr.f32.gmra.mxu1 %v6161_v8  ;;  %901 = vmatmul.mubr.f32.vlgmr.msra.gmra.mxu0 %v6219_v33 }
  0x3d   : > { %819 = vmatprep.mubr.f32.mxu1 %v6074_v2  ;;  %906 = vmatprep.mubr.f32.mxu0 %v6074_v2 }
  0x3e   : > { %980 = vmatpush1.msra.mxu1 %v979_v15  ;;  %1068 = vmatpush1.msra.mxu0 %v6266_v59 }
  0x3f   : > { %1071 = vmatprep.subr.mxu0 %v6275_v62  ;;  %1161 = vmatprep.subr.mxu1 %v6235_v51 }
  0x40   : > { %821 = vmatmul.mubr.f32.gmra.mxu1 %v6167_v12  ;;  %912 = vmatmul.mubr.f32.gmra.mxu0 %v6227_v40 }
  0x41   : > { %917 = vmatprep.mubr.f32.mxu0 %v6074_v2  ;;  %1013 = vmatprep.mubr.f32.mxu1 %v6074_v2 }
  0x42   : > { %1074 = vmatpush1.msra.mxu0 %v6284_v63 }
  0x43   : > { %1259 = vmatprep.subr.mxu0 %v959_v56 }
  0x44   : > { %923 = vmatmul.mubr.f32.gmra.mxu0 %v6232_v50  ;;  %1015 = vmatmul.mubr.f32.vlgmr.msra.gmra.mxu1 %v6159_v7 }
  0x45   : > { %1020 = vmatprep.mubr.f32.mxu1 %v6074_v2  ;;  %1107 = vmatprep.mubr.f32.mxu0 %v6074_v2 }
  0x46   : > { %1163 = vmatpush1.msra.mxu1 %v6254_v55 }
  0x47   : > { %1165 = vmatprep.subr.mxu1 %v6258_v57 }
  0x48   : > { %1022 = vmatmul.mubr.f32.gmra.mxu1 %v6161_v8  ;;  %1110 = vmatmul.mubr.f32.vlgmr.msra.gmra.mxu0 %v6171_v13 }
  0x49   : > { %1027 = vmatprep.mubr.f32.mxu1 %v6074_v2  ;;  %1115 = vmatprep.mubr.f32.mxu0 %v6074_v2 }
  0x4a   : > { %1167 = vmatpush1.msra.mxu1 %v6268_v60  ;;  %1263 = vmatpush1.msra.mxu0 %v965_v1 }
  0x4b   : > { %1267 = vmatprep.subr.mxu0 %v971_v3  ;;  %1355 = vmatprep.subr.mxu1 %v6235_v51 }
  0x4c   : > { %1029 = vmatmul.mubr.f32.gmra.mxu1 %v6167_v12  ;;  %1118 = vmatmul.mubr.f32.gmra.mxu0 %v6174_v14 }
  0x4d   : > { %1123 = vmatprep.mubr.f32.mxu0 %v6074_v2  ;;  %1200 = vmatprep.mubr.f32.mxu1 %v6074_v2 }
  0x4e   : > { %1271 = vmatpush1.msra.mxu0 %v977_v5 }
  0x50   : > { %1126 = vmatmul.mubr.f32.gmra.mxu0 %v6187_v16  ;;  %1204 = vmatmul.mubr.f32.vlgmr.msra.gmra.mxu1 %v6193_v20 }
  0x51   : > { %1209 = vmatprep.mubr.f32.mxu1 %v6074_v2  ;;  %1304 = vmatprep.mubr.f32.mxu0 %v6074_v2 }
  0x52   : > { %1357 = vmatpush1.msra.mxu1 %v6254_v55 }
  0x53   : > { %1359 = vmatprep.subr.mxu1 %v6258_v57 }
  0x54   : > { %1213 = vmatmul.mubr.f32.gmra.mxu1 %v6196_v21  ;;  %1306 = vmatmul.mubr.f32.vlgmr.msra.gmra.mxu0 %v6159_v7 }
  0x55   : > { %1218 = vmatprep.mubr.f32.mxu1 %v6074_v2  ;;  %1311 = vmatprep.mubr.f32.mxu0 %v6074_v2 }
  0x56   : > { %1361 = vmatpush1.msra.mxu1 %v6268_v60 }
  0x58   : > { %1222 = vmatmul.mubr.f32.gmra.mxu1 %v6210_v28  ;;  %1313 = vmatmul.mubr.f32.gmra.mxu0 %v6161_v8 }
  0x59   : > { %1394 = vmatprep.mubr.f32.mxu1 %v6074_v2  ;;  %1318 = vmatprep.mubr.f32.mxu0 %v6074_v2 }
  0x5c   : > { %1396 = vmatmul.mubr.f32.vlgmr.msra.gmra.mxu1 %v6159_v7  ;;  %1320 = vmatmul.mubr.f32.gmra.mxu0 %v6167_v12 }
  0x5d   : > { %1401 = vmatprep.mubr.f32.mxu1 %v6074_v2 }
  0x60   : > { %1403 = vmatmul.mubr.f32.gmra.mxu1 %v6161_v8 }
  0x61   : > { %1408 = vmatprep.mubr.f32.mxu1 %v6074_v2 }
  0x64   : > { %1410 = vmatmul.mubr.f32.gmra.mxu1 %v6167_v12 }
  0x8a   : > { %v6360_v14 = vpop.permute.xlu0 %215  ;;  %v6366_v23 = vpop.permute.xlu1 %225 }
  0x8e   : > { %v6362_v19 = vpop.permute.xlu0 %220 }
  0xd8   : > { %v313_v13 = vpop.f32.mrf.mxu0 }
  0xd9   : > { %v314_v43 = vadd.f32 %v313_v13, %v6360_v14 }
  0xda   : > { %v315_v16 = vpop.f32.mrf.mxu0 }
  0xdb   : > { %v316_v21 = vadd.f32 %v315_v16, %v6360_v14 }
  0xdc   : > { %v324_v17 = vpop.f32.mrf.mxu0 }
  0xdd   : > { %v325_v22 = vadd.f32 %v324_v17, %v6362_v19 }
  0xde   : > { %v326_v18 = vpop.f32.mrf.mxu0 }
  0xdf   : > { %v327_v27 = vadd.f32 %v326_v18, %v6362_v19 }
  0xe0   : > { %v335_v20 = vpop.f32.mrf.mxu0  ;;  %v427_v7 = vpop.f32.mrf.mxu1 }
  0xe1   : > { %v336_v28 = vadd.f32 %v335_v20, %v6366_v23  ;;  %v428_v50 = vadd.f32 %v427_v7, %v314_v43 }
  0xe2   : > { %v337_v8 = vpop.f32.mrf.mxu0  ;;  %v429_v2 = vpop.f32.mrf.mxu1 }
  0xe3   : > { %v6368_v24 = vadd.f32 %v429_v2, %v316_v21  ;;  %v338_v36 = vadd.f32 %v337_v8, %v6366_v23 }
  0xe4   : > { %v434_v12 = vpop.f32.mrf.mxu1  ;;  %v522_v25 = vpop.f32.mrf.mxu0 }
  0xe5   : > { %v435_v26 = vadd.f32 %v434_v12, %v325_v22  ;;  %v523_v54 = vadd.f32 %v522_v25, %v428_v50 }
  0xe6   : > { %v436_v29 = vpop.f32.mrf.mxu1  ;;  %v6372_v30 = vpop.f32.mrf.mxu0 }
  0xe7   : > { %v437_v31 = vadd.f32 %v436_v29, %v327_v27 }
  0xe8   : > { %v441_v32 = vpop.f32.mrf.mxu1  ;;  %v530_v33 = vpop.f32.mrf.mxu0 }
  0xe9   : > { %v442_v34 = vadd.f32 %v441_v32, %v336_v28  ;;  %v531_v35 = vadd.f32 %v530_v33, %v435_v26 }
  0xea   : > { %v443_v37 = vpop.f32.mrf.mxu1  ;;  %v532_v38 = vpop.f32.mrf.mxu0 }
  0xeb   : > { %v444_v39 = vadd.f32 %v443_v37, %v338_v36  ;;  %v533_v40 = vadd.f32 %v532_v38, %v437_v31 }
  0xec   : > { %v538_v41 = vpop.f32.mrf.mxu0  ;;  %v616_v42 = vpop.f32.mrf.mxu1 }
  0xed   : > { %v539_v44 = vadd.f32 %v538_v41, %v442_v34  ;;  %v617_v58 = vadd.f32 %v616_v42, %v523_v54 }
  0xee   : > { %v540_v45 = vpop.f32.mrf.mxu0  ;;  %v6376_v46 = vpop.f32.mrf.mxu1 }
  0xef   : > { %v541_v47 = vadd.f32 %v540_v45, %v444_v39 }
  0xf0   : > { %v625_v48 = vpop.f32.mrf.mxu1  ;;  %v718_v49 = vpop.f32.mrf.mxu0 }
  0xf1   : > { %v6378_v51 = vadd.f32 %v625_v48, %v531_v35  ;;  %v719_v62 = vadd.f32 %v718_v49, %v617_v58 }
  0xf2   : > { %v627_v52 = vpop.f32.mrf.mxu1  ;;  %v6380_v53 = vpop.f32.mrf.mxu0 }
  0xf3   : > { %v6382_v55 = vadd.f32 %v627_v52, %v533_v40 }
  0xf4   : > { %v634_v56 = vpop.f32.mrf.mxu1  ;;  %v6384_v57 = vpop.f32.mrf.mxu0 }
  0xf5   : > { %v6386_v59 = vadd.f32 %v634_v56, %v539_v44 }
  0xf6   : > { %v636_v60 = vpop.f32.mrf.mxu1  ;;  %v6388_v61 = vpop.f32.mrf.mxu0 }
  0xf7   : > { %v6390_v63 = vadd.f32 %v636_v60, %v541_v47  ;;  %v525_v60 = vadd.f32 %v6372_v30, %v6368_v24 }
  0xf8   : > { %v6392_v0 = vpop.f32.mrf.mxu0  ;;  %v808_v1 = vpop.f32.mrf.mxu1 }
  0xf9   : > { %v6394_v3 = vadd.f32 %v808_v1, %v719_v62  ;;  %v619_v62 = vadd.f32 %v6376_v46, %v525_v60 }
  0xfa   : > { %v6396_v4 = vpop.f32.mrf.mxu0  ;;  %v6398_v5 = vpop.f32.mrf.mxu1 }
  0xfb   : > { %12296 = vst [vmem:[#allocation3_spill] sm:$0xff] %v6394_v3  ;;  %1713 = vrot.lane.b32.xlu0 %v6394_v3, %s6076_s8  ;;  %1692 = vrot.lane.b32.xlu1 %v6394_v3, %s6077_s9  ;;  %v721_v1 = vadd.f32 %v6380_v53, %v619_v62  ;;  %v6499_v30 = vrot.slane %v6394_v3, 2  ;;  %v726_v53 = vadd.f32 %v6384_v57, %v6378_v51 }
  0xfc   : > { %v6404_v6 = vpop.f32.mrf.mxu1  ;;  %v6406_v9 = vpop.f32.mrf.mxu0 }
  0xfd   : > { %v6496_v24 = vadd.f32 %v6398_v5, %v721_v1  ;;  %v728_v5 = vadd.f32 %v6388_v61, %v6382_v55 }
  0xfe   : > { %v6408_v10 = vpop.f32.mrf.mxu1  ;;  %v904_v11 = vpop.f32.mrf.mxu0 }
  0xff   : > { %1864 = vrot.lane.b32.xlu0 %v6394_v3, %s11820_s10  ;;  %1843 = vrot.lane.b32.xlu1 %v6394_v3, %s6079_s11  ;;  %v905_v7 = vadd.f32 %v904_v11, %v6360_v14  ;;  %12297 = vst [vmem:[#allocation4_spill] sm:$0xff] %v6496_v24  ;;  %v6558_v46 = vrot.slane %v6496_v24, 2  ;;  %v6569_v11 = vadd.f32 %v6404_v6, %v726_v53 }
 0x100   : > { %v6414_v15 = vpop.f32.mrf.mxu1  ;;  %v913_v13 = vpop.f32.mrf.mxu0 }
 0x101   : > { %v914_v8 = vadd.f32 %v913_v13, %v6362_v19  ;;  %12303 = vst [vmem:[#allocation5_spill] sm:$0xff] %v6569_v11  ;;  %v6572_v13 = vadd.f32 %v6408_v10, %v728_v5  ;;  %v3252_v6 = vrot.slane %v6569_v11, 4  ;;  %v733_v10 = vadd.f32 %v6392_v0, %v6386_v59 }
 0x102   : > { %v6416_v16 = vpop.f32.mrf.mxu1  ;;  %v915_v17 = vpop.f32.mrf.mxu0  ;;  %v735_v59 = vadd.f32 %v6396_v4, %v6390_v63  ;;  %v903_v63 = vadd.f32 %v6406_v9, %v6360_v14  ;;  %v3254_v4 = vrot.slane %v6496_v24, 4 }
 0x103   : > { %1964 = vrot.lane.b32.xlu0 %v6394_v3, %s11795_s12  ;;  %1943 = vrot.lane.b32.xlu1 %v6394_v3, %s11784_s13  ;;  %v916_v26 = vadd.f32 %v915_v17, %v6362_v19  ;;  %12304 = vst [vmem:[#allocation6_spill] sm:$0xff] %v6572_v13 }
 0x104   : > { %v924_v18 = vpop.f32.mrf.mxu0  ;;  %v6422_v20 = vpop.f32.mrf.mxu1  ;;  %v6619_v0 = vadd.f32 %v6416_v16, %v735_v59 }
 0x105   : > { %v925_v27 = vadd.f32 %v924_v18, %v6366_v23  ;;  %v1017_v16 = vadd.f32 %v6422_v20, %v903_v63 }
 0x106   : > { %v926_v21 = vpop.f32.mrf.mxu0  ;;  %v1018_v22 = vpop.f32.mrf.mxu1  ;;  %12315 = vst [vmem:[#allocation17_spill] sm:$0xff] %v6619_v0  ;;  %v3265_v14 = vrot.slane %v6619_v0, 4 }
 0x107   : > { %v6426_v2 = vadd.f32 %v1018_v22, %v905_v7  ;;  %2064 = vrot.lane.b32.xlu0 %v6394_v3, %s11747_s14  ;;  %2043 = vrot.lane.b32.xlu1 %v6394_v3, %s11793_s15  ;;  %v927_v32 = vadd.f32 %v926_v21, %v6366_v23  ;;  %v3251_v7 = vrot.slane %v6394_v3, 4  ;;  %v6603_v21 = vadd.f32 %v6414_v15, %v733_v10 }
 0x108   : > { %v1023_v12 = vpop.f32.mrf.mxu1  ;;  %v6432_v25 = vpop.f32.mrf.mxu0 }
 0x109   : > { %v1024_v28 = vadd.f32 %v1023_v12, %v914_v8  ;;  %12311 = vst [vmem:[#allocation13_spill] sm:$0xff] %v6603_v21  ;;  %v6610_v12 = vsel %vm11838_vm1, %v3251_v7, %v3252_v6  ;;  %v1112_v9 = vadd.f32 %v6432_v25, %v1017_v16 }
 0x10a   : > { %v1025_v29 = vpop.f32.mrf.mxu1  ;;  %v6436_v31 = vpop.f32.mrf.mxu0  ;;  %12314 = vst [vmem:[#allocation16_spill] sm:$0xff] %v6610_v12 }
 0x10b   : > { %v1026_v33 = vadd.f32 %v1025_v29, %v916_v26  ;;  %2164 = vrot.lane.b32.xlu0 %v6394_v3, %s11749_s16  ;;  %2143 = vrot.lane.b32.xlu1 %v6394_v3, %s11801_s19 }
 0x10c   : > { %v1030_v34 = vpop.f32.mrf.mxu1  ;;  %v1119_v35 = vpop.f32.mrf.mxu0 }
 0x10d   : > { %v1031_v19 = vadd.f32 %v1030_v34, %v925_v27  ;;  %v1120_v36 = vadd.f32 %v1119_v35, %v1024_v28  ;;  %v3263_v27 = vrot.slane %v6603_v21, 4  ;;  %v3255_v28 = vrot.slane %v6572_v13, 4 }
 0x10e   : > { %v1032_v37 = vpop.f32.mrf.mxu1  ;;  %v1121_v38 = vpop.f32.mrf.mxu0 }
 0x10f   : > { %v1033_v39 = vadd.f32 %v1032_v37, %v927_v32  ;;  %v1122_v40 = vadd.f32 %v1121_v38, %v1026_v33  ;;  %2264 = vrot.lane.b32.xlu0 %v6394_v3, %s11751_s20  ;;  %2243 = vrot.lane.b32.xlu1 %v6394_v3, %s11753_s3  ;;  %v6640_v33 = vsel %vm11838_vm1, %v3252_v6, %v3263_v27 }
 0x110   : > { %v1127_v23 = vpop.f32.mrf.mxu0  ;;  %v6447_v41 = vpop.f32.mrf.mxu1  ;;  %12320 = vst [vmem:[#allocation22_spill] sm:$0xff] %v6640_v33  ;;  %v6643_v34 = vsel %vm11838_vm1, %v3254_v4, %v3255_v28  ;;  %v6657_v38 = vsel %vm11838_vm1, %v3255_v28, %v3265_v14 }
 0x111   : > { %v1128_v42 = vadd.f32 %v1127_v23, %v1031_v19  ;;  %12321 = vst [vmem:[#allocation23_spill] sm:$0xff] %v6643_v34  ;;  %v1206_v35 = vadd.f32 %v6447_v41, %v1112_v9  ;;  %12324 = vst [vmem:[#allocation26_spill] sm:$0xff] %v6657_v38 }
 0x112   : > { %v1129_v43 = vpop.f32.mrf.mxu0  ;;  %v6449_v44 = vpop.f32.mrf.mxu1 }
 0x113   : > { %v1130_v45 = vadd.f32 %v1129_v43, %v1033_v39  ;;  %2363 = vrot.lane.b32.xlu0 %v6394_v3, %s11741_s21  ;;  %2342 = vrot.lane.b32.xlu1 %v6394_v3, %s11737_s22 }
 0x114   : > { %v1214_v47 = vpop.f32.mrf.mxu1  ;;  %v1307_v20 = vpop.f32.mrf.mxu0 }
 0x115   : > { %v6455_v48 = vadd.f32 %v1214_v47, %v1120_v36  ;;  %v1308_v39 = vadd.f32 %v1307_v20, %v1206_v35  ;;  %v1114_v20 = vadd.f32 %v6436_v31, %v6426_v2  ;;  %v1477_v2 = vmul.f32 %v6499_v30, %v6496_v24 }
 0x116   : > { %v1216_v49 = vpop.f32.mrf.mxu1  ;;  %v1309_v35 = vpop.f32.mrf.mxu0  ;;  %v2442_v31 = vmul.f32 %v6499_v30, %v6394_v3 }
 0x117   : > { %v6457_v50 = vadd.f32 %v1216_v49, %v1122_v40  ;;  %2499 = vrot.lane.b32.xlu0 %v6394_v3, %s11755_s23  ;;  %2478 = vrot.lane.b32.xlu1 %v6394_v3, %s11739_s24 }
 0x118   : > { %v1223_v52 = vpop.f32.mrf.mxu1 }
 0x119   : > { %v6463_v54 = vadd.f32 %v1223_v52, %v1128_v42 }
 0x11a   : > { %v1225_v56 = vpop.f32.mrf.mxu1 }
 0x11b   : > { %v6465_v58 = vadd.f32 %v1225_v56, %v1130_v45  ;;  %2647 = vrot.lane.b32.xlu0 %v6394_v3, %s6092_s25  ;;  %2626 = vrot.lane.b32.xlu1 %v6394_v3, %s11743_s26 }
 0x11c   : > { %v1397_v37 = vpop.f32.mrf.mxu1 }
 0x11d   : > { %v6663_v25 = vadd.f32 %v1397_v37, %v1308_v39  ;;  %v1208_v37 = vadd.f32 %v6449_v44, %v1114_v20  ;;  %v2443_v44 = vmul.f32 %v6558_v46, %v6496_v24  ;;  %v1620_v20 = vmul.f32 %v6558_v46, %v6394_v3 }
 0x11f   : > { %2747 = vrot.lane.b32.xlu0 %v6394_v3, %s11727_s27  ;;  %2726 = vrot.lane.b32.xlu1 %v6394_v3, %s11745_s29  ;;  %s11735_s27 = smov 2   ;;  %12325 = vst [vmem:[#allocation27_spill] sm:$0xff] %v6663_v25 }
 0x123   : > { %2847 = vrot.lane.b32.xlu0 %v6394_v3, %s11729_s30  ;;  %2826 = vrot.lane.b32.xlu1 %v6394_v3, %s6097_s5  ;;  %s6101_s30 = smov 122  }
 0x127   : > { %2947 = vrot.lane.b32.xlu0 %v6394_v3, %s11731_s6  ;;  %2926 = vrot.lane.b32.xlu1 %v6394_v3, %s11733_s28  ;;  %s6102_s6 = smov 1   ;;  %s6103_s28 = smov 121  }
 0x12b   : > { %3047 = vrot.lane.b32.xlu0 %v6394_v3, %s11735_s27  ;;  %3026 = vrot.lane.b32.xlu1 %v6394_v3, %s6101_s30  ;;  %s6104_s27 = smov 64  }
 0x12f   : > { %3147 = vrot.lane.b32.xlu0 %v6394_v3, %s6102_s6  ;;  %3126 = vrot.lane.b32.xlu1 %v6394_v3, %s6103_s28 }
 0x133   : > { %1694 = vrot.lane.b32.xlu0 %v6496_v24, %s6077_s9  ;;  %1428 = vrot.lane.b32.xlu1 %v6499_v30, %s6104_s27 }
 0x137   : > { %1845 = vrot.lane.b32.xlu0 %v6496_v24, %s6079_s11  ;;  %1715 = vrot.lane.b32.xlu1 %v6496_v24, %s6076_s8 }
 0x13b   : > { %1945 = vrot.lane.b32.xlu0 %v6496_v24, %s11784_s13  ;;  %1866 = vrot.lane.b32.xlu1 %v6496_v24, %s11820_s10 }
 0x13f   : > { %2045 = vrot.lane.b32.xlu0 %v6496_v24, %s11793_s15  ;;  %1966 = vrot.lane.b32.xlu1 %v6496_v24, %s11795_s12 }
 0x143   : > { %2145 = vrot.lane.b32.xlu0 %v6496_v24, %s11801_s19  ;;  %2066 = vrot.lane.b32.xlu1 %v6496_v24, %s11747_s14 }
 0x147   : > { %2245 = vrot.lane.b32.xlu0 %v6496_v24, %s11753_s3  ;;  %2166 = vrot.lane.b32.xlu1 %v6496_v24, %s11749_s16 }
 0x14b   : > { %2344 = vrot.lane.b32.xlu0 %v6496_v24, %s11737_s22  ;;  %2266 = vrot.lane.b32.xlu1 %v6496_v24, %s11751_s20  ;;  %s12298_s22 = smov 5  }
 0x14f   : > { %2480 = vrot.lane.b32.xlu0 %v6496_v24, %s11739_s24  ;;  %2365 = vrot.lane.b32.xlu1 %v6496_v24, %s11741_s21  ;;  %s12299_s24 = smov 123   ;;  %s12300_s21 = smov 4  }
 0x153   : > { %2628 = vrot.lane.b32.xlu0 %v6496_v24, %s11743_s26  ;;  %2501 = vrot.lane.b32.xlu1 %v6496_v24, %s11755_s23  ;;  %s12301_s26 = smov 3  }
 0x157   : > { %2728 = vrot.lane.b32.xlu0 %v6496_v24, %s11745_s29  ;;  %2649 = vrot.lane.b32.xlu1 %v6496_v24, %s6092_s25  ;;  %s12302_s29 = smov 2  }
 0x15b   : > { %2828 = vrot.lane.b32.xlu0 %v6496_v24, %s6097_s5  ;;  %2749 = vrot.lane.b32.xlu1 %v6496_v24, %s12298_s22 }
 0x15f   : > { %2928 = vrot.lane.b32.xlu0 %v6496_v24, %s12299_s24  ;;  %2849 = vrot.lane.b32.xlu1 %v6496_v24, %s12300_s21 }
 0x163   : > { %3028 = vrot.lane.b32.xlu0 %v6496_v24, %s6101_s30  ;;  %2949 = vrot.lane.b32.xlu1 %v6496_v24, %s12301_s26 }
 0x167   : > { %3128 = vrot.lane.b32.xlu0 %v6496_v24, %s6103_s28  ;;  %3049 = vrot.lane.b32.xlu1 %v6496_v24, %s12302_s29 }
 0x16b   : > { %1430 = vrot.lane.b32.xlu0 %v6558_v46, %s6104_s27  ;;  %3149 = vrot.lane.b32.xlu1 %v6496_v24, %s6102_s6 }
 0x16d   : > { %v6574_v17 = vpop.permute.xlu0 %1713  ;;  %v6576_v18 = vpop.permute.xlu1 %1692 }
 0x16e   : > { %12305 = vst [vmem:[#allocation7_spill] sm:$0xff] %v6574_v17  ;;  %12306 = vst [vmem:[#allocation8_spill] sm:$0xff] %v6576_v18 }
 0x16f   : > { %3529 = vrot.lane.b32.xlu0 %v6572_v13, %s6077_s9  ;;  %3527 = vrot.lane.b32.xlu1 %v6569_v11, %s6077_s9 }
 0x171   : > { %v6582_v51 = vpop.permute.xlu0 %1864  ;;  %v6584_v55 = vpop.permute.xlu1 %1843 }
 0x172   : > { %12307 = vst [vmem:[#allocation9_spill] sm:$0xff] %v6582_v51  ;;  %12308 = vst [vmem:[#allocation10_spill] sm:$0xff] %v6584_v55 }
 0x173   : > { %3569 = vrot.lane.b32.xlu0 %v6572_v13, %s6076_s8  ;;  %3567 = vrot.lane.b32.xlu1 %v6569_v11, %s6076_s8 }
 0x175   : > { %v6590_v57 = vpop.permute.xlu0 %1964  ;;  %v6592_v61 = vpop.permute.xlu1 %1943 }
 0x176   : > { %12309 = vst [vmem:[#allocation11_spill] sm:$0xff] %v6590_v57  ;;  %12310 = vst [vmem:[#allocation12_spill] sm:$0xff] %v6592_v61 }
 0x177   : > { %3681 = vrot.lane.b32.xlu0 %v6572_v13, %s6079_s11  ;;  %3679 = vrot.lane.b32.xlu1 %v6569_v11, %s6079_s11  ;;  %v6795_v11 = vrot.slane %v6663_v25, 2  ;;  %v1487_v13 = vsel %vm1447_vm2, %v1477_v2, 0.0 }
 0x179   : > { %v6605_v22 = vpop.permute.xlu0 %2064  ;;  %v6607_v8 = vpop.permute.xlu1 %2043 }
 0x17a   : > { %12312 = vst [vmem:[#allocation14_spill] sm:$0xff] %v6605_v22  ;;  %12313 = vst [vmem:[#allocation15_spill] sm:$0xff] %v6607_v8 }
 0x17b   : > { %3573 = vrot.lane.b32.xlu0 %v6603_v21, %s6076_s8  ;;  %3279 = vrot.lane.b32.xlu1 %v6610_v12, %s6104_s27 }
 0x17d   : > { %v6621_v15 = vpop.permute.xlu0 %2164  ;;  %v6623_v26 = vpop.permute.xlu1 %2143 }
 0x17e   : > { %12316 = vst [vmem:[#allocation18_spill] sm:$0xff] %v6621_v15  ;;  %12317 = vst [vmem:[#allocation19_spill] sm:$0xff] %v6623_v26 }
 0x17f   : > { %3537 = vrot.lane.b32.xlu0 %v6619_v0, %s6077_s9  ;;  %3535 = vrot.lane.b32.xlu1 %v6603_v21, %s6077_s9  ;;  %v2446_v21 = vsel %vm1447_vm2, %v2442_v31, 0.0 }
 0x181   : > { %v6635_v29 = vpop.permute.xlu0 %2264  ;;  %v6637_v32 = vpop.permute.xlu1 %2243 }
 0x182   : > { %12318 = vst [vmem:[#allocation20_spill] sm:$0xff] %v6635_v29  ;;  %12319 = vst [vmem:[#allocation21_spill] sm:$0xff] %v6637_v32 }
 0x183   : > { %3281 = vrot.lane.b32.xlu0 %v6640_v33, %s6104_s27  ;;  %3283 = vrot.lane.b32.xlu1 %v6643_v34, %s6104_s27  ;;  %v1399_v33 = vpop.f32.mrf.mxu1 }
 0x185   : > { %v6652_v19 = vpop.permute.xlu0 %2363  ;;  %v6654_v36 = vpop.permute.xlu1 %2342 }
 0x186   : > { %12322 = vst [vmem:[#allocation24_spill] sm:$0xff] %v6652_v19  ;;  %12323 = vst [vmem:[#allocation25_spill] sm:$0xff] %v6654_v36 }
 0x187   : > { %3285 = vrot.lane.b32.xlu0 %v6657_v38, %s6104_s27  ;;  %3575 = vrot.lane.b32.xlu1 %v6619_v0, %s6076_s8  ;;  %v1310_v38 = vadd.f32 %v1309_v35, %v1208_v37 }
 0x189   : > { %v6665_v40 = vpop.permute.xlu0 %2499  ;;  %v6667_v23 = vpop.permute.xlu1 %2478  ;;  %v6788_v35 = vadd.f32 %v1399_v33, %v1310_v38  ;;  %v2453_v33 = vsel %vm1447_vm2, %v2443_v44, 0.0  ;;  %v1624_v38 = vsel %vm1447_vm2, %v1620_v20, 0.0 }
 0x18a   : > { %12326 = vst [vmem:[#allocation28_spill] sm:$0xff] %v6665_v40  ;;  %12327 = vst [vmem:[#allocation29_spill] sm:$0xff] %v6667_v23  ;;  %v1625_v2 = vrot.slane %v1624_v38, 4 }
 0x18b   : > { %1717 = vrot.lane.b32.xlu0 %v6663_v25, %s6076_s8  ;;  %1696 = vrot.lane.b32.xlu1 %v6663_v25, %s6077_s9  ;;  %12351 = vst [vmem:[#allocation48_spill] sm:$0xff] %v6788_v35 }
 0x18d   : > { %v6673_v41 = vpop.permute.xlu0 %2647  ;;  %v6675_v42 = vpop.permute.xlu1 %2626 }
 0x18e   : > { %12328 = vst [vmem:[#allocation30_spill] sm:$0xff] %v6673_v41  ;;  %12329 = vst [vmem:[#allocation31_spill] sm:$0xff] %v6675_v42 }
 0x18f   : > { %1868 = vrot.lane.b32.xlu0 %v6663_v25, %s11820_s10  ;;  %1847 = vrot.lane.b32.xlu1 %v6663_v25, %s6079_s11 }
 0x191   : > { %v6681_v43 = vpop.permute.xlu0 %2747  ;;  %v6683_v45 = vpop.permute.xlu1 %2726 }
 0x192   : > { %12330 = vst [vmem:[#allocation32_spill] sm:$0xff] %v6681_v43  ;;  %12331 = vst [vmem:[#allocation33_spill] sm:$0xff] %v6683_v45 }
 0x193   : > { %1968 = vrot.lane.b32.xlu0 %v6663_v25, %s11795_s12  ;;  %1947 = vrot.lane.b32.xlu1 %v6663_v25, %s11784_s13 }
 0x195   : > { %v6689_v47 = vpop.permute.xlu0 %2847  ;;  %v6691_v49 = vpop.permute.xlu1 %2826 }
 0x196   : > { %12332 = vst [vmem:[#allocation34_spill] sm:$0xff] %v6689_v47  ;;  %12333 = vst [vmem:[#allocation35_spill] sm:$0xff] %v6691_v49 }
 0x197   : > { %2068 = vrot.lane.b32.xlu0 %v6663_v25, %s11747_s14  ;;  %2047 = vrot.lane.b32.xlu1 %v6663_v25, %s11793_s15  ;;  %s12340_s14 = smov 8  }
 0x199   : > { %v6697_v52 = vpop.permute.xlu0 %2947  ;;  %v6699_v56 = vpop.permute.xlu1 %2926 }
 0x19a   : > { %12334 = vst [vmem:[#allocation36_spill] sm:$0xff] %v6697_v52  ;;  %12335 = vst [vmem:[#allocation37_spill] sm:$0xff] %v6699_v56  ;;  %v2454_v52 = vrot.slane %v2453_v33, 4  ;;  %v1626_v56 = vadd.f32 %v1625_v2, %v1624_v38 }
 0x19b   : > { %2168 = vrot.lane.b32.xlu0 %v6663_v25, %s11749_s16  ;;  %2147 = vrot.lane.b32.xlu1 %v6663_v25, %s11801_s19  ;;  %s12341_s16 = smov 72  }
 0x19c   : > { %v2455_v47 = vadd.f32 %v2454_v52, %v2453_v33  ;;  %v1314_v52 = vpop.f32.mrf.mxu0 }
 0x19d   : > { %v6705_v60 = vpop.permute.xlu0 %3047  ;;  %v6707_v62 = vpop.permute.xlu1 %3026 }
 0x19e   : > { %12336 = vst [vmem:[#allocation38_spill] sm:$0xff] %v6705_v60  ;;  %12337 = vst [vmem:[#allocation39_spill] sm:$0xff] %v6707_v62  ;;  %v1488_v60 = vrot.slane %v1487_v13, 4 }
 0x19f   : > { %2268 = vrot.lane.b32.xlu0 %v6663_v25, %s11751_s20  ;;  %2247 = vrot.lane.b32.xlu1 %v6663_v25, %s11753_s3  ;;  %s12343_s20 = smov 127   ;;  %s12344_s3 = smov 126  }
 0x1a0   : > { %v1489_v44 = vadd.f32 %v1488_v60, %v1487_v13  ;;  %v2456_v13 = vrot.slane %v2455_v47, 2 }
 0x1a1   : > { %v6713_v1 = vpop.permute.xlu0 %3147  ;;  %v6715_v53 = vpop.permute.xlu1 %3126 }
 0x1a2   : > { %12338 = vst [vmem:[#allocation40_spill] sm:$0xff] %v6713_v1  ;;  %12339 = vst [vmem:[#allocation41_spill] sm:$0xff] %v6715_v53  ;;  %v2447_v53 = vrot.slane %v2446_v21, 4  ;;  %v1490_v41 = vrot.slane %v1489_v44, 2  ;;  %v2457_v2 = vadd.f32 %v2456_v13, %v2455_v47  ;;  %v1551_v13 = vmul.f32 %v6558_v46, %v6788_v35 }
 0x1a3   : > { %2367 = vrot.lane.b32.xlu0 %v6663_v25, %s12340_s14  ;;  %2346 = vrot.lane.b32.xlu1 %v6663_v25, %s12341_s16 }
 0x1a4   : > { %v2448_v20 = vadd.f32 %v2447_v53, %v2446_v21  ;;  %v1627_v21 = vrot.slane %v1626_v56, 2  ;;  %v1491_v33 = vadd.f32 %v1490_v41, %v1489_v44  ;;  %v1478_v41 = vmul.f32 %v6558_v46, %v6663_v25 }
 0x1a5   : > { %v6721_v5 = vpop.permute.xlu0 %1694  ;;  %v6723_v6 = vpop.permute.xlu1 %1428  ;;  %v1621_v46 = vmul.f32 %v6795_v11, %v6496_v24 }
 0x1a6   : > { %12342 = vst [vmem:[#allocation42_spill] sm:$0xff] %v6723_v6  ;;  %v2449_v45 = vrot.slane %v2448_v20, 2  ;;  %v1492_v40 = vrot.slane %v1491_v33, 1 }
 0x1a7   : > { %2503 = vrot.lane.b32.xlu0 %v6663_v25, %s11755_s23  ;;  %2482 = vrot.lane.b32.xlu1 %v6663_v25, %s12343_s20  ;;  %s12345_s23 = smov 125  }
 0x1a8   : > { %v2450_v38 = vadd.f32 %v2449_v45, %v2448_v20  ;;  %v2458_v45 = vrot.slane %v2457_v2, 1  ;;  %v1479_v20 = vmul.f32 %v6795_v11, %v6788_v35 }
 0x1a9   : > { %v6729_v10 = vpop.permute.xlu0 %1845  ;;  %v6731_v7 = vpop.permute.xlu1 %1715 }
 0x1ab   : > { %2651 = vrot.lane.b32.xlu0 %v6663_v25, %s6092_s25  ;;  %2630 = vrot.lane.b32.xlu1 %v6663_v25, %s12344_s3 }
 0x1ad   : > { %v6737_v59 = vpop.permute.xlu0 %1945  ;;  %v6739_v27 = vpop.permute.xlu1 %1866 }
 0x1af   : > { %2751 = vrot.lane.b32.xlu0 %v6663_v25, %s12298_s22  ;;  %2730 = vrot.lane.b32.xlu1 %v6663_v25, %s12345_s23 }
 0x1b1   : > { %v6745_v28 = vpop.permute.xlu0 %2045  ;;  %v6747_v63 = vpop.permute.xlu1 %1966 }
 0x1b3   : > { %2851 = vrot.lane.b32.xlu0 %v6663_v25, %s12300_s21  ;;  %2830 = vrot.lane.b32.xlu1 %v6663_v25, %s6097_s5 }
 0x1b5   : > { %v6753_v4 = vpop.permute.xlu0 %2145  ;;  %v6755_v16 = vpop.permute.xlu1 %2066 }
 0x1b6   : > { %12346 = vst [vmem:[#allocation43_spill] sm:$0xff] %v6755_v16 }
 0x1b7   : > { %2951 = vrot.lane.b32.xlu0 %v6663_v25, %s12301_s26  ;;  %2930 = vrot.lane.b32.xlu1 %v6663_v25, %s12299_s24 }
 0x1b9   : > { %v6761_v14 = vpop.permute.xlu0 %2245  ;;  %v6763_v9 = vpop.permute.xlu1 %2166 }
 0x1ba   : > { %12347 = vst [vmem:[#allocation44_spill] sm:$0xff] %v6761_v14  ;;  %12348 = vst [vmem:[#allocation45_spill] sm:$0xff] %v6763_v9 }
 0x1bb   : > { %3051 = vrot.lane.b32.xlu0 %v6663_v25, %s12302_s29  ;;  %3030 = vrot.lane.b32.xlu1 %v6663_v25, %s6101_s30 }
 0x1bd   : > { %v6772_v39 = vpop.permute.xlu0 %2344  ;;  %v6774_v12 = vpop.permute.xlu1 %2266 }
 0x1be   : > { %12349 = vst [vmem:[#allocation46_spill] sm:$0xff] %v6772_v39  ;;  %12350 = vst [vmem:[#allocation47_spill] sm:$0xff] %v6774_v12 }
 0x1bf   : > { %3151 = vrot.lane.b32.xlu0 %v6663_v25, %s6102_s6  ;;  %3130 = vrot.lane.b32.xlu1 %v6663_v25, %s6103_s28 }
 0x1c1   : > { %v6790_v37 = vpop.permute.xlu0 %2480  ;;  %v6792_v34 = vpop.permute.xlu1 %2365 }
 0x1c2   : > { %12352 = vst [vmem:[#allocation49_spill] sm:$0xff] %v6790_v37  ;;  %12353 = vst [vmem:[#allocation50_spill] sm:$0xff] %v6792_v34 }
 0x1c3   : > { %1698 = vrot.lane.b32.xlu0 %v6788_v35, %s6077_s9  ;;  %1432 = vrot.lane.b32.xlu1 %v6795_v11, %s6104_s27 }
 0x1c5   : > { %v6805_v0 = vpop.permute.xlu0 %2628  ;;  %v6807_v1 = vpop.permute.xlu1 %2501 }
 0x1c6   : > { %12354 = vst [vmem:[#allocation51_spill] sm:$0xff] %v6805_v0  ;;  %12355 = vst [vmem:[#allocation52_spill] sm:$0xff] %v6807_v1  ;;  %v1494_v0 = vsel %vm1447_vm2, %v1478_v41, 0.0 }
 0x1c7   : > { %1849 = vrot.lane.b32.xlu0 %v6788_v35, %s6079_s11  ;;  %1710 = vrot.lane.b32.xlu1 %v6788_v35, %s6076_s8 }
 0x1c9   : > { %v6813_v62 = vpop.permute.xlu0 %2728  ;;  %v6815_v31 = vpop.permute.xlu1 %2649 }
 0x1ca   : > { %12356 = vst [vmem:[#allocation53_spill] sm:$0xff] %v6813_v62  ;;  %12357 = vst [vmem:[#allocation54_spill] sm:$0xff] %v6815_v31  ;;  %v1316_v62 = vpop.f32.mrf.mxu0 }
 0x1cb   : > { %1949 = vrot.lane.b32.xlu0 %v6788_v35, %s11784_s13  ;;  %1861 = vrot.lane.b32.xlu1 %v6788_v35, %s11820_s10  ;;  %s12362_s13 = smov 32   ;;  %s12378_s10 = smov 7  }
 0x1cc   : > { %v1321_v44 = vpop.f32.mrf.mxu0 }
 0x1cd   : > { %v6821_v43 = vpop.permute.xlu0 %2828  ;;  %v6823_v49 = vpop.permute.xlu1 %2749  ;;  %v1322_v19 = vadd.f32 %v1321_v44, %v6463_v54  ;;  %v1631_v44 = vsel %vm1447_vm2, %v1621_v46, 0.0 }
 0x1ce   : > { %12358 = vst [vmem:[#allocation55_spill] sm:$0xff] %v6821_v43  ;;  %12359 = vst [vmem:[#allocation56_spill] sm:$0xff] %v6823_v49  ;;  %v1628_v49 = vadd.f32 %v1627_v21, %v1626_v56  ;;  %v1404_v56 = vpop.f32.mrf.mxu1 }
 0x1cf   : > { %2049 = vrot.lane.b32.xlu0 %v6788_v35, %s11793_s15  ;;  %1961 = vrot.lane.b32.xlu1 %v6788_v35, %s11795_s12  ;;  %s12365_s15 = smov 80   ;;  %s12366_s12 = smov 24  }
 0x1d0   : > { %v1629_v47 = vrot.slane %v1628_v49, 1 }
 0x1d1   : > { %v6829_v60 = vpop.permute.xlu0 %2928  ;;  %v6831_v53 = vpop.permute.xlu1 %2849 }
 0x1d2   : > { %12360 = vst [vmem:[#allocation57_spill] sm:$0xff] %v6829_v60  ;;  %12361 = vst [vmem:[#allocation58_spill] sm:$0xff] %v6831_v53  ;;  %v6842_v60 = vrot.slane %v6788_v35, 2  ;;  %v2451_v53 = vrot.slane %v2450_v38, 1 }
 0x1d3   : > { %2149 = vrot.lane.b32.xlu0 %v6788_v35, %s11801_s19  ;;  %2061 = vrot.lane.b32.xlu1 %v6788_v35, %s12362_s13  ;;  %s12371_s19 = smov 16  }
 0x1d4   : > { %v1549_v1 = vmul.f32 %v6842_v60, %v6496_v24  ;;  %v6862_v42 = vadd.f32 %v2451_v53, %v2450_v38  ;;  %v1317_v53 = vadd.f32 %v1316_v62, %v6457_v50  ;;  %v1406_v38 = vpop.f32.mrf.mxu1  ;;  %v1550_v50 = vmul.f32 %v6499_v30, %v6663_v25 }
 0x1d5   : > { %v6837_v43 = vpop.permute.xlu0 %3028  ;;  %v6839_v31 = vpop.permute.xlu1 %2949  ;;  %v1495_v62 = vrot.slane %v1494_v0, 4  ;;  %v1476_v54 = vmul.f32 %v6842_v60, %v6394_v3 }
 0x1d6   : > { %12363 = vst [vmem:[#allocation59_spill] sm:$0xff] %v6837_v43  ;;  %12364 = vst [vmem:[#allocation60_spill] sm:$0xff] %v6839_v31  ;;  %v6858_v43 = vadd.f32 %v1492_v40, %v1491_v33  ;;  %v6873_v40 = vadd.f32 %v1629_v47, %v1628_v49  ;;  %v1315_v33 = vadd.f32 %v1314_v52, %v6455_v48  ;;  %v1559_v52 = vsel %vm1447_vm2, %v1549_v1, 0.0 }
 0x1d7   : > { %2249 = vrot.lane.b32.xlu0 %v6788_v35, %s12365_s15  ;;  %2161 = vrot.lane.b32.xlu1 %v6788_v35, %s12366_s12  ;;  %12370 = vst [vmem:[#allocation64_spill] sm:$0xff] %v6862_v42  ;;  %v1323_v42 = vpop.f32.mrf.mxu0  ;;  %v1622_v49 = vmul.f32 %v6842_v60, %v6663_v25  ;;  %v2444_v48 = vmul.f32 %v6795_v11, %v6663_v25  ;;  %v1480_v12 = vsel %vm1447_vm2, %v1476_v54, 0.0  ;;  %v1566_v46 = vsel %vm1447_vm2, %v1550_v50, 0.0 }
 0x1d8   : > { %12369 = vst [vmem:[#allocation63_spill] sm:$0xff] %v6858_v43  ;;  %12373 = vst [vmem:[#allocation66_spill] sm:$0xff] %v6873_v40  ;;  %v1501_v43 = vsel %vm1447_vm2, %v1479_v20, 0.0  ;;  %v1548_v20 = vmul.f32 %v6795_v11, %v6394_v3  ;;  %v1324_v1 = vadd.f32 %v1323_v42, %v6465_v58  ;;  %v1411_v40 = vpop.f32.mrf.mxu1  ;;  %v1560_v11 = vrot.slane %v1559_v52, 4 }
 0x1d9   : > { %v6854_v21 = vpop.permute.xlu0 %3128  ;;  %v6856_v31 = vpop.permute.xlu1 %3049  ;;  %v2460_v58 = vsel %vm1447_vm2, %v2444_v48, 0.0  ;;  %v1496_v42 = vadd.f32 %v1495_v62, %v1494_v0  ;;  %v1567_v15 = vrot.slane %v1566_v46, 4  ;;  %v6931_v9 = vadd.f32 %v1411_v40, %v1322_v19 }
 0x1da   : > { %12367 = vst [vmem:[#allocation61_spill] sm:$0xff] %v6854_v21  ;;  %12368 = vst [vmem:[#allocation62_spill] sm:$0xff] %v6856_v31  ;;  %v6871_v21 = vadd.f32 %v2458_v45, %v2457_v2  ;;  %v1573_v31 = vsel %vm1447_vm2, %v1551_v13, 0.0  ;;  %v2445_v2 = vmul.f32 %v6842_v60, %v6788_v35  ;;  %v1502_v45 = vrot.slane %v1501_v43, 4  ;;  %v1413_v36 = vpop.f32.mrf.mxu1 }
 0x1db   : > { %2348 = vrot.lane.b32.xlu0 %v6788_v35, %s12341_s16  ;;  %2261 = vrot.lane.b32.xlu1 %v6788_v35, %s12371_s19  ;;  %v1574_v47 = vrot.slane %v1573_v31, 4  ;;  %v6900_v13 = vadd.f32 %v1404_v56, %v1315_v33  ;;  %v1638_v56 = vsel %vm1447_vm2, %v1622_v49, 0.0  ;;  %v1632_v33 = vrot.slane %v1631_v44, 4 }
 0x1dc   : > { %12372 = vst [vmem:[#allocation65_spill] sm:$0xff] %v6871_v21  ;;  %v3257_v21 = vrot.slane %v6663_v25, 4  ;;  %v2467_v29 = vsel %vm1447_vm2, %v2445_v2, 0.0  ;;  %v1639_v49 = vrot.slane %v1638_v56, 4  ;;  %v2461_v48 = vrot.slane %v2460_v58, 4 }
 0x1dd   : > { %v6880_v41 = vpop.permute.xlu0 %1430  ;;  %v6882_v34 = vpop.permute.xlu1 %3149  ;;  %v3258_v0 = vrot.slane %v6900_v13, 4  ;;  %v6925_v2 = vadd.f32 %v1406_v38, %v1317_v53  ;;  %v1497_v50 = vrot.slane %v1496_v42, 2  ;;  %v6935_v38 = vadd.f32 %v1413_v36, %v1324_v1 }
 0x1de   : > { %12374 = vst [vmem:[#allocation67_spill] sm:$0xff] %v6880_v41  ;;  %12375 = vst [vmem:[#allocation68_spill] sm:$0xff] %v6882_v34  ;;  %v1623_v34 = vmul.f32 %v6499_v30, %v6788_v35  ;;  %v1503_v30 = vadd.f32 %v1502_v45, %v1501_v43  ;;  %v2468_v45 = vrot.slane %v2467_v29, 4  ;;  %v1568_v1 = vadd.f32 %v1567_v15, %v1566_v46 }
 0x1df   : > { %2484 = vrot.lane.b32.xlu0 %v6788_v35, %s12343_s20  ;;  %2360 = vrot.lane.b32.xlu1 %v6788_v35, %s12340_s14  ;;  %v1498_v22 = vadd.f32 %v1497_v50, %v1496_v42 }
 0x1e0   : > { %v1645_v62 = vsel %vm1447_vm2, %v1623_v34, 0.0  ;;  %v1504_v32 = vrot.slane %v1503_v30, 2 }
 0x1e1   : > { %v6908_v23 = vpop.permute.xlu0 %3529  ;;  %v6910_v37 = vpop.permute.xlu1 %3527  ;;  %v1646_v53 = vrot.slane %v1645_v62, 4 }
 0x1e2   : > { %12376 = vst [vmem:[#allocation69_spill] sm:$0xff] %v6908_v23  ;;  %12377 = vst [vmem:[#allocation70_spill] sm:$0xff] %v6910_v37  ;;  %v1575_v23 = vadd.f32 %v1574_v47, %v1573_v31  ;;  %v1552_v37 = vsel %vm1447_vm2, %v1548_v20, 0.0  ;;  %v1561_v31 = vadd.f32 %v1560_v11, %v1559_v52  ;;  %v1481_v47 = vrot.slane %v1480_v12, 4 }
 0x1e3   : > { %2632 = vrot.lane.b32.xlu0 %v6788_v35, %s12344_s3  ;;  %2496 = vrot.lane.b32.xlu1 %v6788_v35, %s12378_s10  ;;  %v1633_v20 = vadd.f32 %v1632_v33, %v1631_v44  ;;  %v1553_v39 = vrot.slane %v1552_v37, 4  ;;  %v6940_v52 = vsel %vm11838_vm1, %v3257_v21, %v3258_v0  ;;  %v1640_v11 = vadd.f32 %v1639_v49, %v1638_v56 }
 0x1e4   : > { %v1576_v34 = vrot.slane %v1575_v23, 2  ;;  %12381 = vst [vmem:[#allocation73_spill] sm:$0xff] %v6940_v52  ;;  %v2462_v44 = vadd.f32 %v2461_v48, %v2460_v58  ;;  %v1436_v33 = vlaneseq  ;;  %v1562_v40 = vrot.slane %v1561_v31, 2 }
 0x1e5   : > { %v6927_v54 = vpop.permute.xlu0 %3569  ;;  %v6929_v43 = vpop.permute.xlu1 %3567  ;;  %v1482_v14 = vadd.f32 %v1481_v47, %v1480_v12  ;;  %v1634_v16 = vrot.slane %v1633_v20, 2  ;;  %v1554_v36 = vadd.f32 %v1553_v39, %v1552_v37  ;;  %v3261_v21 = vrot.slane %v6925_v2, 4 }
 0x1e6   : > { %12379 = vst [vmem:[#allocation71_spill] sm:$0xff] %v6927_v54  ;;  %12380 = vst [vmem:[#allocation72_spill] sm:$0xff] %v6929_v43  ;;  %v2469_v54 = vadd.f32 %v2468_v45, %v2467_v29  ;;  %v1505_v52 = vadd.f32 %v1504_v32, %v1503_v30  ;;  %v1577_v56 = vadd.f32 %v1576_v34, %v1575_v23  ;;  %v3267_v49 = vrot.slane %v6931_v9, 4 }
 0x1e7   : > { %2732 = vrot.lane.b32.xlu0 %v6788_v35, %s12345_s23  ;;  %2644 = vrot.lane.b32.xlu1 %v6788_v35, %s6092_s25  ;;  %v1647_v58 = vadd.f32 %v1646_v53, %v1645_v62  ;;  %v3269_v29 = vrot.slane %v6935_v38, 4  ;;  %v1641_v12 = vrot.slane %v1640_v11, 2  ;;  %v2463_v42 = vrot.slane %v2462_v44, 2 }
 0x1e8   : > { %v6953_v48 = vand.u32 127, %v1436_v33  ;;  %v1563_v37 = vadd.f32 %v1562_v40, %v1561_v31  ;;  %v2470_v46 = vrot.slane %v2469_v54, 2  ;;  %v1483_v32 = vrot.slane %v1482_v14, 2 }
 0x1e9   : > { %v6942_v43 = vpop.permute.xlu0 %3681  ;;  %v6944_v19 = vpop.permute.xlu1 %3679  ;;  %v1499_v23 = vrot.slane %v1498_v22, 1  ;;  %v1635_v30 = vadd.f32 %v1634_v16, %v1633_v20  ;;  %v1555_v62 = vrot.slane %v1554_v36, 2  ;;  %v1569_v45 = vrot.slane %v1568_v1, 2 }
 0x1ea   : > { %12382 = vst [vmem:[#allocation74_spill] sm:$0xff] %v6942_v43  ;;  %12383 = vst [vmem:[#allocation75_spill] sm:$0xff] %v6944_v19  ;;  %v12387_v47 = vrot.slane %v6788_v35, 4  ;;  %v1506_v34 = vrot.slane %v1505_v52, 1  ;;  %v1578_v53 = vrot.slane %v1577_v56, 1  ;;  %v1648_v33 = vrot.slane %v1647_v58, 2 }
 0x1eb   : > { %2832 = vrot.lane.b32.xlu0 %v6788_v35, %s6097_s5  ;;  %2744 = vrot.lane.b32.xlu1 %v6788_v35, %s12298_s22  ;;  %12384 = vst [vmem:[#allocation76_spill] sm:$0xff] %v6953_v48  ;;  %v6969_v31 = vsel %vm11838_vm1, %v3258_v0, %v3267_v49  ;;  %v6972_v16 = vsel %vm11838_vm1, %v3261_v21, %v3269_v29  ;;  %vm11839_vm5 = vcmp.lt.s32.totalorder %v6953_v48, 64  ;;  %v1636_v0 = vrot.slane %v1635_v30, 1 }
 0x1ec   : > { %v6964_v50 = vsel %vm11838_vm1, %v12387_v47, %v3261_v21  ;;  %12389 = vst [vmem:[#allocation80_spill] sm:$0xff] %v6969_v31  ;;  %12390 = vst [vmem:[#allocation81_spill] sm:$0xff] %v6972_v16  ;;  %v1642_v20 = vadd.f32 %v1641_v12, %v1640_v11  ;;  %v2464_v40 = vadd.f32 %v2463_v42, %v2462_v44  ;;  %v1728_v11 = vadd.s32 128, %v6953_v48 }
 0x1ed   : > { %v6955_v15 = vpop.permute.xlu0 %3573  ;;  %v6957_v39 = vpop.permute.xlu1 %3279  ;;  %12388 = vst [vmem:[#allocation79_spill] sm:$0xff] %v6964_v50  ;;  %v2471_v50 = vadd.f32 %v2470_v46, %v2469_v54  ;;  %v1484_v19 = vadd.f32 %v1483_v32, %v1482_v14  ;;  %v6979_v43 = vadd.f32 %v1499_v23, %v1498_v22  ;;  %v1556_v49 = vadd.f32 %v1555_v62, %v1554_v36 }
 0x1ee   : > { %12385 = vst [vmem:[#allocation77_spill] sm:$0xff] %v6955_v15  ;;  %12386 = vst [vmem:[#allocation78_spill] sm:$0xff] %v6957_v39  ;;  %v1564_v39 = vrot.slane %v1563_v37, 1  ;;  %v1570_v21 = vadd.f32 %v1569_v45, %v1568_v1  ;;  %v6984_v44 = vadd.f32 %v1506_v34, %v1505_v52  ;;  %v6986_v29 = vadd.f32 %v1578_v53, %v1577_v56 }
 0x1ef   : > { %2932 = vrot.lane.b32.xlu0 %v6788_v35, %s12299_s24  ;;  %2844 = vrot.lane.b32.xlu1 %v6788_v35, %s12300_s21  ;;  %12393 = vst [vmem:[#allocation84_spill] sm:$0xff] %v6979_v43  ;;  %v1649_v12 = vadd.f32 %v1648_v33, %v1647_v58  ;;  %v1441_v22 = vsel %vm11839_vm5, %v6723_v6, %v6880_v41  ;;  %v1643_v14 = vrot.slane %v1642_v20, 1  ;;  %v2465_v54 = vrot.slane %v2464_v40, 1  ;;  %v12443_v43 = vld [vmem:[#allocation24_spill] sm:$0xff]  ;;  %v12467_v41 = vld [vmem:[#allocation57_spill] sm:$0xff] }
 0x1f0   : > { %12394 = vst [vmem:[#allocation85_spill] sm:$0xff] %v6984_v44  ;;  %12395 = vst [vmem:[#allocation86_spill] sm:$0xff] %v6986_v29  ;;  %v6998_v1 = vadd.f32 %v1564_v39, %v1563_v37  ;;  %v2472_v56 = vrot.slane %v2471_v50, 1  ;;  %v1485_v58 = vrot.slane %v1484_v19, 1  ;;  %v7000_v42 = vadd.f32 %v1636_v0, %v1635_v30 }
 0x1f1   : > { %v6975_v47 = vpop.permute.xlu0 %3537  ;;  %v6977_v15 = vpop.permute.xlu1 %3535  ;;  %v1557_v46 = vrot.slane %v1556_v49, 1  ;;  %v1571_v32 = vrot.slane %v1570_v21, 1  ;;  %v1444_v23 = vmul.f32 %v1441_v22, %v6496_v24  ;;  %v7005_v62 = vand.u32 63, %v1728_v11 }
 0x1f2   : > { %12391 = vst [vmem:[#allocation82_spill] sm:$0xff] %v6975_v47  ;;  %12392 = vst [vmem:[#allocation83_spill] sm:$0xff] %v6977_v15  ;;  %v1650_v45 = vrot.slane %v1649_v12, 1  ;;  %v7009_v39 = vadd.f32 %v1643_v14, %v1642_v20  ;;  %v7011_v37 = vadd.f32 %v2465_v54, %v2464_v40  ;;  %v1514_v30 = vmul.f32 %v1441_v22, %v6663_v25 }
 0x1f3   : > { %3032 = vrot.lane.b32.xlu0 %v6788_v35, %s6101_s30  ;;  %2944 = vrot.lane.b32.xlu1 %v6788_v35, %s12301_s26  ;;  %12398 = vst [vmem:[#allocation89_spill] sm:$0xff] %v6998_v1  ;;  %12399 = vst [vmem:[#allocation90_spill] sm:$0xff] %v7000_v42  ;;  %v1587_v34 = vmul.f32 %v1441_v22, %v6788_v35  ;;  %v7019_v0 = vadd.f32 %v2472_v56, %v2471_v50  ;;  %v1455_v14 = vsel %vm1447_vm2, %v1444_v23, 0.0  ;;  %vm2753_vm1 = vcmask 39936   ;;  %v12423_v1 = vld [vmem:[#allocation21_spill] sm:$0xff] }
 0x1f4   : > { %12400 = vst [vmem:[#allocation91_spill] sm:$0xff] %v7005_v62  ;;  %12401 = vst [vmem:[#allocation92_spill] sm:$0xff] %v7009_v39  ;;  %v7021_v29 = vadd.f32 %v1485_v58, %v1484_v19  ;;  %v1656_v44 = vmul.f32 %v1441_v22, %v6394_v3  ;;  %v7024_v20 = vadd.f32 %v1557_v46, %v1556_v49  ;;  %vm11847_vm15 = vcmp.lt.s32.totalorder %v7005_v62, 56  ;;  %v12454_v3 = vld [vmem:[#allocation33_spill] sm:$0xff] }
 0x1f5   : > { %v6994_v36 = vpop.permute.xlu0 %3281  ;;  %v6996_v52 = vpop.permute.xlu1 %3283  ;;  %12402 = vst [vmem:[#allocation93_spill] sm:$0xff] %v7011_v37  ;;  %12405 = vst [vmem:[#allocation96_spill] sm:$0xff] %v7019_v0  ;;  %v7026_v40 = vadd.f32 %v1571_v32, %v1570_v21  ;;  %v7033_v19 = vadd.f32 %v1650_v45, %v1649_v12  ;;  %v7038_v50 = vsel %vm11859_vm3, %v6576_v18, %v6721_v5  ;;  %v1530_v12 = vsel %vm1447_vm2, %v1514_v30, 0.0  ;;  %v12457_v18 = vld [vmem:[#allocation54_spill] sm:$0xff] }
 0x1f6   : > { %12396 = vst [vmem:[#allocation87_spill] sm:$0xff] %v6994_v36  ;;  %12397 = vst [vmem:[#allocation88_spill] sm:$0xff] %v6996_v52  ;;  %v7043_v49 = vsel %vm11867_vm4, %v6584_v55, %v6729_v10  ;;  %v1720_v21 = vsel %vm11843_vm6, %v6574_v17, %v6731_v7  ;;  %v1609_v22 = vsel %vm1447_vm2, %v1587_v34, 0.0  ;;  %v7060_v58 = vadd.s32 256, %v6953_v48  ;;  %v12448_v55 = vld [vmem:[#allocation31_spill] sm:$0xff] }
 0x1f7   : > { %3132 = vrot.lane.b32.xlu0 %v6788_v35, %s6103_s28  ;;  %3044 = vrot.lane.b32.xlu1 %v6788_v35, %s12302_s29  ;;  %12406 = vst [vmem:[#allocation97_spill] sm:$0xff] %v7021_v29  ;;  %12407 = vst [vmem:[#allocation98_spill] sm:$0xff] %v7024_v20  ;;  %vm12065_vm5 = vcmask 1006592   ;;  %v1456_v46 = vrot.slane %v1455_v14, 4  ;;  %v1660_v32 = vsel %vm1447_vm2, %v1656_v44, 0.0  ;;  %v1871_v45 = vsel %vm11842_vm8, %v6582_v51, %v6739_v27  ;;  %v12432_v51 = vld [vmem:[#allocation47_spill] sm:$0xff] }
 0x1f8   : > { %12408 = vst [vmem:[#allocation99_spill] sm:$0xff] %v7026_v40  ;;  %12409 = vst [vmem:[#allocation100_spill] sm:$0xff] %v7033_v19  ;;  %v7077_v30 = vsel %vm11888_vm9, %v6607_v8, %v6745_v28  ;;  %v1971_v34 = vsel %vm11857_vm10, %v6590_v57, %v6747_v63  ;;  %vm2853_vm8 = vcmask 31744   ;;  %vm12075_vm6 = vcmask 998400   ;;  %v12428_v57 = vld [vmem:[#allocation46_spill] sm:$0xff] }
 0x1f9   : > { %v7015_v53 = vpop.permute.xlu0 %3285  ;;  %v7017_v33 = vpop.permute.xlu1 %3575  ;;  %12410 = vst [vmem:[#allocation101_spill] sm:$0xff] %v7038_v50  ;;  %12411 = vst [vmem:[#allocation102_spill] sm:$0xff] %v7043_v49  ;;  %v1531_v19 = vrot.slane %v1530_v12, 4  ;;  %v1610_v20 = vrot.slane %v1609_v22, 4  ;;  %v1661_v29 = vrot.slane %v1660_v32, 4  ;;  %v7105_v42 = vand.u32 63, %v7060_v58 }
 0x1fa   : > { %12403 = vst [vmem:[#allocation94_spill] sm:$0xff] %v7015_v53  ;;  %12404 = vst [vmem:[#allocation95_spill] sm:$0xff] %v7017_v33  ;;  %v7108_v6 = vadd.s32 384, %v6953_v48  ;;  %vm12427_vm10 = vcmask 195584   ;;  %v1457_v8 = vadd.f32 %v1456_v46, %v1455_v14  ;;  %v12442_v50 = vld [vmem:[#allocation50_spill] sm:$0xff] }
 0x1fb   : > { %1434 = vrot.lane.b32.xlu0 %v6842_v60, %s6104_s27  ;;  %3144 = vrot.lane.b32.xlu1 %v6788_v35, %s6102_s6  ;;  %v7048_v60 = vand.u32 7, %v1728_v11  ;;  %v7065_v11 = vsel %vm11889_vm7, %v6592_v61, %v6737_v59  ;;  %12415 = vst [vmem:[#allocation106_spill] sm:$0xff] %v7077_v30  ;;  %12421 = vst [vmem:[#allocation109_spill] sm:$0xff] %v7105_v42  ;;  %v12425_v30 = vld [vmem:[#allocation45_spill] sm:$0xff]  ;;  %v1532_v14 = vadd.f32 %v1531_v19, %v1530_v12 }
 0x1fc   : > { %12414 = vst [vmem:[#allocation105_spill] sm:$0xff] %v7065_v11  ;;  %v12429_v61 = vld [vmem:[#allocation25_spill] sm:$0xff]  ;;  %v1611_v46 = vadd.f32 %v1610_v20, %v1609_v22  ;;  %v1662_v20 = vadd.f32 %v1661_v29, %v1660_v32  ;;  %v7162_v22 = vand.u32 63, %v7108_v6  ;;  %v12451_v29 = vld [vmem:[#allocation52_spill] sm:$0xff] }
 0x1fd   : > { %12412 = vst [vmem:[#allocation103_spill] sm:$0xff] %v7048_v60  ;;  %v7055_v54 = vpop.permute.xlu0 %1717  ;;  %v7057_v56 = vpop.permute.xlu1 %1696  ;;  %v12452_v32 = vld [vmem:[#allocation28_spill] sm:$0xff] }
 0x1fe   : > { %12413 = vst [vmem:[#allocation104_spill] sm:$0xff] %v7057_v56  ;;  %v1702_v23 = vsel %vm11859_vm3, %v6721_v5, %v7057_v56  ;;  %v7091_v5 = vsel %vm11863_vm11, %v6623_v26, %v6753_v4  ;;  %v12426_v26 = vld [vmem:[#allocation18_spill] sm:$0xff]  ;;  %vm11967_vm3 = vcmask 990208   ;;  %vm12430_vm11 = vcmask 588800   ;;  %12446 = vst [vmem:[#allocation112_spill] sm:$0xff] %v7162_v22  ;;  %v12468_v56 = vld [vmem:[#allocation37_spill] sm:$0xff] }
 0x1ff   : > { %v7084_v44 = vsel %vm11847_vm15, %v1702_v23, %v1720_v21  ;;  %3533 = vrot.lane.b32.xlu0 %v6925_v2, %s6077_s9  ;;  %12417 = vst [vmem:[#allocation108_spill] sm:$0xff] %v7091_v5  ;;  %3531 = vrot.lane.b32.xlu1 %v6900_v13, %s6077_s9  ;;  %v12418_v21 = vld [vmem:[#allocation43_spill] sm:$0xff]  ;;  %v12419_v23 = vld [vmem:[#allocation14_spill] sm:$0xff]  ;;  %v7126_v49 = vsel %vm12430_vm11, %v12429_v61, %v12428_v57  ;;  %vm11966_vm15 = vcmask 15360   ;;  %vm11894_vm11 = vcmask 7168  }
 0x200   : > { %12416 = vst [vmem:[#allocation107_spill] sm:$0xff] %v7084_v44  ;;  %v1800_v0 = vrot.slane %v7084_v44, 2  ;;  %v2071_v40 = vsel %vm11858_vm12, %v12419_v23, %v12418_v21  ;;  %v12422_v44 = vld [vmem:[#allocation44_spill] sm:$0xff]  ;;  %v7118_v23 = vsel %vm12427_vm10, %v12426_v26, %v12425_v30  ;;  %vm2953_vm12 = vcmask 23552   ;;  %12431 = vst [vmem:[#allocation45_spill] sm:$0xff] %v7126_v49 }
 0x201   : > { %v7100_v37 = vpop.permute.xlu0 %1868  ;;  %v7102_v39 = vpop.permute.xlu1 %1847  ;;  %v7113_v5 = vsel %vm11865_vm13, %v12423_v1, %v12422_v44  ;;  %v12433_v1 = vld [vmem:[#allocation20_spill] sm:$0xff]  ;;  %vm12434_vm13 = vcmask 130048   ;;  %vm12435_vm10 = vcmp.lt.s32.totalorder %v7005_v62, 48 }
 0x202   : > { %12420 = vst [vmem:[#allocation43_spill] sm:$0xff] %v7102_v39  ;;  %12424 = vst [vmem:[#allocation44_spill] sm:$0xff] %v7113_v5  ;;  %v1853_v11 = vsel %vm11867_vm4, %v6729_v10, %v7102_v39  ;;  %v7131_v5 = vsel %vm12434_vm13, %v12433_v1, %v12432_v51  ;;  %v7140_v10 = vand.u32 63, %v6953_v48  ;;  %v1808_v49 = vmul.f32 %v1800_v0, %v6496_v24 }
 0x203   : > { %v7135_v26 = vsel %vm12435_vm10, %v1853_v11, %v1871_v45  ;;  %3577 = vrot.lane.b32.xlu0 %v6931_v9, %s6076_s8  ;;  %3571 = vrot.lane.b32.xlu1 %v6900_v13, %s6076_s8  ;;  %v12438_v11 = vld [vmem:[#allocation49_spill] sm:$0xff]  ;;  %vm12440_vm10 = vcmask 1039360   ;;  %vm12444_vm4 = vcmask 64512   ;;  %vm12449_vm13 = vcmask 1031168  }
 0x204   : > { %12436 = vst [vmem:[#allocation46_spill] sm:$0xff] %v7135_v26  ;;  %12437 = vst [vmem:[#allocation110_spill] sm:$0xff] %v7140_v10  ;;  %v1900_v61 = vrot.slane %v7135_v26, 2  ;;  %v12439_v45 = vld [vmem:[#allocation29_spill] sm:$0xff]  ;;  %v7155_v19 = vsel %vm12444_vm4, %v12443_v43, %v12442_v50  ;;  %v12447_v26 = vld [vmem:[#allocation51_spill] sm:$0xff]  ;;  %v7176_v39 = vsel %vm12044_vm0, %v12452_v32, %v12451_v29  ;;  %vm12455_vm4 = vcmask 1022976  }
 0x205   : > { %v7150_v1 = vsel %vm12440_vm10, %v12439_v45, %v12438_v11  ;;  %v7157_v12 = vpop.permute.xlu0 %1968  ;;  %v7159_v0 = vpop.permute.xlu1 %1947  ;;  %v7167_v17 = vsel %vm12449_vm13, %v12448_v55, %v12447_v26  ;;  %v1458_v45 = vrot.slane %v1457_v8, 2  ;;  %v12453_v10 = vld [vmem:[#allocation53_spill] sm:$0xff]  ;;  %v12458_v55 = vld [vmem:[#allocation30_spill] sm:$0xff]  ;;  %vm12459_vm13 = vcmask 48128  }
 0x206   : > { %12441 = vst [vmem:[#allocation49_spill] sm:$0xff] %v7150_v1  ;;  %12445 = vst [vmem:[#allocation111_spill] sm:$0xff] %v7159_v0  ;;  %v1908_v1 = vmul.f32 %v1900_v61, %v6496_v24  ;;  %v1953_v43 = vsel %vm11889_vm7, %v6737_v59, %v7159_v0  ;;  %v7181_v22 = vsel %vm12455_vm4, %v12454_v3, %v12453_v10  ;;  %vm12460_vm10 = vcmp.lt.s32.totalorder %v7005_v62, 40  ;;  %v12463_v3 = vld [vmem:[#allocation35_spill] sm:$0xff] }
 0x207   : > { %12450 = vst [vmem:[#allocation51_spill] sm:$0xff] %v7167_v17  ;;  %12456 = vst [vmem:[#allocation53_spill] sm:$0xff] %v7181_v22  ;;  %v7186_v17 = vsel %vm12459_vm13, %v12458_v55, %v12457_v18  ;;  %v7190_v61 = vsel %vm12460_vm10, %v1953_v43, %v1971_v34  ;;  %3541 = vrot.lane.b32.xlu0 %v6935_v38, %s6077_s9  ;;  %v1533_v59 = vrot.slane %v1532_v14, 2  ;;  %v1612_v32 = vrot.slane %v1611_v46, 2  ;;  %v12462_v22 = vld [vmem:[#allocation55_spill] sm:$0xff]  ;;  %v12465_v43 = vld [vmem:[#allocation56_spill] sm:$0xff] }
 0x208   : > { %12461 = vst [vmem:[#allocation113_spill] sm:$0xff] %v7190_v61  ;;  %v1818_v0 = vsel %vm1447_vm2, %v1808_v49, 0.0  ;;  %v2000_v35 = vrot.slane %v7190_v61, 2  ;;  %3561 = vrot.lane.b32.xlu1 %v6925_v2, %s6076_s8  ;;  %vm11896_vm4 = vcmp.lt.s32.totalorder %v7005_v62, 16  ;;  %v7202_v55 = vsel %vm12054_vm14, %v12463_v3, %v12462_v22  ;;  %v12466_v34 = vld [vmem:[#allocation32_spill] sm:$0xff]  ;;  %v12471_v3 = vld [vmem:[#allocation58_spill] sm:$0xff] }
 0x209   : > { %12464 = vst [vmem:[#allocation114_spill] sm:$0xff] %v7202_v55  ;;  %v7207_v25 = vsel %vm2753_vm1, %v12466_v34, %v12465_v43  ;;  %v7212_v49 = vsel %vm12065_vm5, %v12468_v56, %v12467_v41  ;;  %v1663_v61 = vrot.slane %v1662_v20, 2  ;;  %v7214_v18 = vpop.permute.xlu0 %2068  ;;  %v7216_v29 = vpop.permute.xlu1 %2047  ;;  %v1459_v42 = vadd.f32 %v1458_v45, %v1457_v8  ;;  %v12472_v43 = vld [vmem:[#allocation34_spill] sm:$0xff]  ;;  %v12475_v56 = vld [vmem:[#allocation39_spill] sm:$0xff] }
 0x20a   : > { %12469 = vst [vmem:[#allocation115_spill] sm:$0xff] %v7212_v49  ;;  %12470 = vst [vmem:[#allocation116_spill] sm:$0xff] %v7216_v29  ;;  %v1918_v50 = vsel %vm1447_vm2, %v1908_v1, 0.0  ;;  %v2008_v55 = vmul.f32 %v2000_v35, %v6496_v24  ;;  %v2053_v34 = vsel %vm11888_vm9, %v6745_v28, %v7216_v29  ;;  %v7226_v51 = vsel %vm2853_vm8, %v12472_v43, %v12471_v3  ;;  %v12474_v49 = vld [vmem:[#allocation59_spill] sm:$0xff]  ;;  %v12479_v43 = vld [vmem:[#allocation73_spill] sm:$0xff] }
 0x20b   : > { %12473 = vst [vmem:[#allocation117_spill] sm:$0xff] %v7226_v51  ;;  %v7231_v41 = vsel %vm12075_vm6, %v12475_v56, %v12474_v49  ;;  %v1819_v22 = vrot.slane %v1818_v0, 4  ;;  %vm12477_vm13 = vcmp.lt.s32.totalorder %v7005_v62, 32  ;;  %3563 = vrot.lane.b32.xlu0 %v6935_v38, %s6076_s8  ;;  %v1534_v35 = vadd.f32 %v1533_v59, %v1532_v14  ;;  %v12481_v56 = vld [vmem:[#allocation36_spill] sm:$0xff]  ;;  %v12487_v59 = vld [vmem:[#allocation62_spill] sm:$0xff]  ;;  %s12555_s8 = smov 48  }
 0x20c   : > { %12476 = vst [vmem:[#allocation118_spill] sm:$0xff] %v7231_v41  ;;  %v7235_v8 = vsel %vm12477_vm13, %v2053_v34, %v2071_v40  ;;  %v1613_v28 = vadd.f32 %v1612_v32, %v1611_v46  ;;  %v2018_v1 = vsel %vm1447_vm2, %v2008_v55, 0.0  ;;  %3287 = vrot.lane.b32.xlu1 %v12479_v43, %s6104_s27  ;;  %vm11899_vm10 = vcmp.lt.s32.totalorder %v7005_v62, 8  ;;  %v12480_v41 = vld [vmem:[#allocation60_spill] sm:$0xff]  ;;  %v12483_v40 = vld [vmem:[#allocation61_spill] sm:$0xff] }
 0x20d   : > { %12478 = vst [vmem:[#allocation119_spill] sm:$0xff] %v7235_v8  ;;  %v2100_v45 = vrot.slane %v7235_v8, 2  ;;  %v7247_v29 = vsel %vm2953_vm12, %v12481_v56, %v12480_v41  ;;  %v12484_v34 = vld [vmem:[#allocation41_spill] sm:$0xff]  ;;  %v1664_v14 = vadd.f32 %v1663_v61, %v1662_v20  ;;  %v1919_v46 = vrot.slane %v1918_v50, 4  ;;  %v7254_v55 = vpop.permute.xlu0 %2168  ;;  %v7256_v32 = vpop.permute.xlu1 %2147  ;;  %v12488_v8 = vld [vmem:[#allocation38_spill] sm:$0xff] }
 0x20e   : > { %12482 = vst [vmem:[#allocation120_spill] sm:$0xff] %v7247_v29  ;;  %v7252_v3 = vsel %vm11967_vm3, %v12484_v34, %v12483_v40  ;;  %12486 = vst [vmem:[#allocation122_spill] sm:$0xff] %v7256_v32  ;;  %v7261_v43 = vsel %vm11966_vm15, %v12488_v8, %v12487_v59  ;;  %v1460_v49 = vrot.slane %v1459_v42, 1  ;;  %vm12490_vm13 = vcmask 719872   ;;  %v12491_v34 = vld [vmem:[#allocation68_spill] sm:$0xff] }
 0x20f   : > { %12485 = vst [vmem:[#allocation121_spill] sm:$0xff] %v7252_v3  ;;  %12489 = vst [vmem:[#allocation123_spill] sm:$0xff] %v7261_v43  ;;  %v2108_v56 = vmul.f32 %v2100_v45, %v6496_v24  ;;  %v2153_v41 = vsel %vm12490_vm13, %v6753_v4, %v7256_v32  ;;  %v12492_v3 = vld [vmem:[#allocation40_spill] sm:$0xff]  ;;  %v1820_v61 = vadd.f32 %v1819_v22, %v1818_v0  ;;  %v2019_v40 = vrot.slane %v2018_v1, 4  ;;  %v12496_v22 = vld [vmem:[#allocation69_spill] sm:$0xff] }
 0x210   : > { %v7270_v20 = vsel %vm11894_vm11, %v12492_v3, %v12491_v34  ;;  %vm12494_vm9 = vcmp.lt.s32.totalorder %v7005_v62, 24  ;;  %3289 = vrot.lane.b32.xlu0 %v6969_v31, %s6104_s27  ;;  %v1535_v45 = vrot.slane %v1534_v35, 1  ;;  %v1614_v8 = vrot.slane %v1613_v28, 1  ;;  %3539 = vrot.lane.b32.xlu1 %v6931_v9, %s6077_s9  ;;  %v12497_v3 = vld [vmem:[#allocation70_spill] sm:$0xff]  ;;  %s12601_s9 = smov 104  }
 0x211   : > { %12493 = vst [vmem:[#allocation124_spill] sm:$0xff] %v7270_v20  ;;  %v7275_v29 = vsel %vm12494_vm9, %v2153_v41, %v7118_v23  ;;  %v2118_v59 = vsel %vm1447_vm2, %v2108_v56, 0.0  ;;  %vm11962_vm13 = vcmp.lt.s32.totalorder %v7048_v60, 7  ;;  %v1665_v0 = vrot.slane %v1664_v14, 1  ;;  %v7289_v31 = vpop.permute.xlu0 %2268  ;;  %v7291_v34 = vpop.permute.xlu1 %2247  ;;  %v12503_v20 = vld [vmem:[#allocation72_spill] sm:$0xff] }
 0x212   : > { %12495 = vst [vmem:[#allocation125_spill] sm:$0xff] %v7275_v29  ;;  %v2200_v4 = vrot.slane %v7275_v29, 2  ;;  %vm12498_vm7 = vcmask 982016   ;;  %v1920_v23 = vadd.f32 %v1919_v46, %v1918_v50  ;;  %v2119_v32 = vrot.slane %v2118_v59, 4  ;;  %12500 = vst [vmem:[#allocation127_spill] sm:$0xff] %v7289_v31  ;;  %v12502_v29 = vld [vmem:[#allocation71_spill] sm:$0xff] }
 0x213   : > { %v7287_v41 = vsel %vm12498_vm7, %v12497_v3, %v12496_v22  ;;  %v7293_v56 = vadd.f32 %v1460_v49, %v1459_v42  ;;  %vm12504_vm9 = vcmask 457728   ;;  %vm12506_vm11 = vcmask 654336   ;;  %v12508_v50 = vld [vmem:[#allocation75_spill] sm:$0xff] }
 0x214   : > { %12499 = vst [vmem:[#allocation126_spill] sm:$0xff] %v7287_v41  ;;  %v7298_v43 = vsel %vm12504_vm9, %v12503_v20, %v12502_v29  ;;  %v2208_v51 = vmul.f32 %v2200_v4, %v6496_v24  ;;  %v2253_v22 = vsel %vm12506_vm11, %v12422_v44, %v7291_v34  ;;  %v12507_v41 = vld [vmem:[#allocation74_spill] sm:$0xff]  ;;  %vm12509_vm7 = vcmask 916480   ;;  %3293 = vrot.lane.b32.xlu0 %v6972_v16, %s6104_s27 }
 0x215   : > { %12501 = vst [vmem:[#allocation128_spill] sm:$0xff] %v7293_v56  ;;  %12505 = vst [vmem:[#allocation129_spill] sm:$0xff] %v7298_v43  ;;  %v7307_v46 = vsel %vm12509_vm7, %v12508_v50, %v12507_v41  ;;  %v1821_v3 = vrot.slane %v1820_v61, 2  ;;  %v2020_v31 = vadd.f32 %v2019_v40, %v2018_v1  ;;  %v7312_v42 = vsel %vm11896_vm4, %v2253_v22, %v7131_v5  ;;  %v7327_v41 = vpop.permute.xlu0 %2367 }
 0x216   : > { %12510 = vst [vmem:[#allocation130_spill] sm:$0xff] %v7307_v46  ;;  %12511 = vst [vmem:[#allocation131_spill] sm:$0xff] %v7312_v42  ;;  %v7316_v49 = vadd.f32 %v1535_v45, %v1534_v35  ;;  %v7318_v4 = vadd.f32 %v1614_v8, %v1613_v28  ;;  %v2218_v44 = vsel %vm1447_vm2, %v2208_v51, 0.0  ;;  %v2299_v20 = vrot.slane %v7312_v42, 2  ;;  %v12514_v46 = vld [vmem:[#allocation79_spill] sm:$0xff]  ;;  %v7329_v35 = vpop.permute.xlu1 %2346 }
 0x217   : > { %3291 = vrot.lane.b32.xlu1 %v12514_v46, %s6104_s27  ;;  %vm11909_vm11 = vcmp.lt.s32.totalorder %v7048_v60, 6  ;;  %v7325_v1 = vadd.f32 %v1665_v0, %v1664_v14  ;;  %v1921_v5 = vrot.slane %v1920_v23, 2  ;;  %v2120_v40 = vadd.f32 %v2119_v32, %v2118_v59  ;;  %12516 = vst [vmem:[#allocation135_spill] sm:$0xff] %v7327_v41  ;;  %v12517_v8 = vld [vmem:[#allocation63_spill] sm:$0xff]  ;;  %v12521_v32 = vld [vmem:[#allocation78_spill] sm:$0xff]  ;;  %s12657_s27 = smov 96  }
 0x218   : > { %12512 = vst [vmem:[#allocation132_spill] sm:$0xff] %v7316_v49  ;;  %12513 = vst [vmem:[#allocation133_spill] sm:$0xff] %v7318_v4  ;;  %v2219_v22 = vrot.slane %v2218_v44, 4  ;;  %vm12518_vm9 = vcmask 982016   ;;  %v2307_v45 = vmul.f32 %v2299_v20, %v6496_v24  ;;  %vm12520_vm7 = vcmask 588800   ;;  %3685 = vrot.lane.b32.xlu0 %v6925_v2, %s6079_s11 }
 0x219   : > { %12515 = vst [vmem:[#allocation134_spill] sm:$0xff] %v7325_v1  ;;  %v7336_v51 = vsel %vm12518_vm9, %v6977_v15, %v6975_v47  ;;  %v2352_v14 = vsel %vm12520_vm7, %v12428_v57, %v7329_v35  ;;  %vm12522_vm4 = vcmp.lt.s32.totalorder %v6953_v48, 64  ;;  %v1822_v0 = vadd.f32 %v1821_v3, %v1820_v61 }
 0x21a   : > { %12519 = vst [vmem:[#allocation136_spill] sm:$0xff] %v7336_v51  ;;  %v7346_v59 = vsel %vm12522_vm4, %v12521_v32, %v6996_v52  ;;  %v2021_v42 = vrot.slane %v2020_v31, 2  ;;  %v7351_v28 = vsel %vm11899_vm10, %v2352_v14, %v7155_v19  ;;  %v2220_v20 = vadd.f32 %v2219_v22, %v2218_v44  ;;  %v7371_v14 = vpop.permute.xlu1 %2482 }
 0x21b   : > { %12523 = vst [vmem:[#allocation137_spill] sm:$0xff] %v7346_v59  ;;  %12524 = vst [vmem:[#allocation138_spill] sm:$0xff] %v7351_v28  ;;  %v2317_v50 = vsel %vm1447_vm2, %v2307_v45, 0.0  ;;  %v2399_v57 = vrot.slane %v7351_v28, 2  ;;  %3683 = vrot.lane.b32.xlu1 %v6900_v13, %s6079_s11  ;;  %vm11921_vm4 = vcmp.lt.s32.totalorder %v7048_v60, 5  ;;  %v7361_v3 = vand.u32 7, %v7060_v58  ;;  %v7369_v45 = vpop.permute.xlu0 %2503 }
 0x21c   : > { %vm12526_vm9 = vcmp.lt.s32.totalorder %v6953_v48, 64  ;;  %v1922_v61 = vadd.f32 %v1921_v5, %v1920_v23  ;;  %v2121_v44 = vrot.slane %v2120_v40, 2  ;;  %v2318_v22 = vrot.slane %v2317_v50, 4  ;;  %12528 = vst [vmem:[#allocation141_spill] sm:$0xff] %v7369_v45  ;;  %12529 = vst [vmem:[#allocation142_spill] sm:$0xff] %v7371_v14  ;;  %v12530_v28 = vld [vmem:[#allocation77_spill] sm:$0xff] }
 0x21d   : > { %12525 = vst [vmem:[#allocation139_spill] sm:$0xff] %v7361_v3  ;;  %v7367_v19 = vsel %vm12526_vm9, %v6994_v36, %v7015_v53  ;;  %vm12531_vm7 = vcmask 457728   ;;  %v2407_v32 = vmul.f32 %v2399_v57, %v6496_v24  ;;  %vm12534_vm9 = vcmask 1039360   ;;  %v12536_v36 = vld [vmem:[#allocation17_spill] sm:$0xff] }
 0x21e   : > { %12527 = vst [vmem:[#allocation140_spill] sm:$0xff] %v7367_v19  ;;  %v7376_v46 = vsel %vm12531_vm7, %v12530_v28, %v7017_v33  ;;  %vm12533_vm10 = vmmov %vm12531_vm7  ;;  %v2488_v23 = vsel %vm12534_vm9, %v12438_v11, %v7371_v14  ;;  %v1823_v5 = vrot.slane %v1822_v0, 1  ;;  %v2022_v16 = vadd.f32 %v2021_v42, %v2020_v31  ;;  %3689 = vrot.lane.b32.xlu0 %v12536_v36, %s6079_s11  ;;  %v12623_v14 = vld [vmem:[#allocation43_spill] sm:$0xff] }
 0x21f   : > { %12532 = vst [vmem:[#allocation143_spill] sm:$0xff] %v7376_v46  ;;  %v7381_v58 = vsel %vm12533_vm10, %v6731_v7, %v7055_v54  ;;  %v2319_v19 = vadd.f32 %v2318_v22, %v2317_v50  ;;  %v7390_v59 = vsel %vm11962_vm13, %v2488_v23, %v7176_v39  ;;  %v2221_v53 = vrot.slane %v2220_v20, 2  ;;  %v12537_v46 = vld [vmem:[#allocation13_spill] sm:$0xff]  ;;  %v7402_v42 = vpop.permute.xlu0 %2651  ;;  %v7404_v22 = vpop.permute.xlu1 %2630 }
 0x220   : > { %12535 = vst [vmem:[#allocation144_spill] sm:$0xff] %v7390_v59  ;;  %v2417_v7 = vsel %vm1447_vm2, %v2407_v32, 0.0  ;;  %v2583_v57 = vrot.slane %v7390_v59, 2  ;;  %3687 = vrot.lane.b32.xlu1 %v12537_v46, %s6079_s11  ;;  %vm11917_vm10 = vcmp.lt.s32.totalorder %v7048_v60, 4  ;;  %v7400_v31 = vand.u32 7, %v6953_v48  ;;  %12539 = vst [vmem:[#allocation13_spill] sm:$0xff] %v7402_v42 }
 0x221   : > { %v1923_v11 = vrot.slane %v1922_v61, 1  ;;  %v2122_v50 = vadd.f32 %v2121_v44, %v2120_v40  ;;  %v2418_v39 = vrot.slane %v2417_v7, 4  ;;  %12540 = vst [vmem:[#allocation145_spill] sm:$0xff] %v7404_v22  ;;  %v7407_v23 = vand.u32 7, %v7108_v6 }
 0x222   : > { %12538 = vst [vmem:[#allocation17_spill] sm:$0xff] %v7400_v31  ;;  %vm12542_vm7 = vcmask 392192   ;;  %v2320_v59 = vrot.slane %v2319_v19, 2  ;;  %v2591_v47 = vmul.f32 %v2583_v57, %v6496_v24  ;;  %vm12543_vm9 = vcmask 1031168   ;;  %3693 = vrot.lane.b32.xlu0 %v6935_v38, %s6079_s11 }
 0x223   : > { %12541 = vst [vmem:[#allocation146_spill] sm:$0xff] %v7407_v23  ;;  %v7412_v32 = vsel %vm12542_vm7, %v6739_v27, %v7100_v37  ;;  %v2636_v40 = vsel %vm12543_vm9, %v12447_v26, %v7404_v22  ;;  %v7418_v44 = vadd.f32 %v1823_v5, %v1822_v0  ;;  %v2023_v52 = vrot.slane %v2022_v16, 1  ;;  %v7441_v28 = vpop.permute.xlu1 %2730  ;;  %v12588_v22 = vld [vmem:[#allocation123_spill] sm:$0xff] }
 0x224   : > { %v2419_v51 = vadd.f32 %v2418_v39, %v2417_v7  ;;  %v7423_v6 = vsel %vm11909_vm11, %v2636_v40, %v7186_v17  ;;  %vm12546_vm7 = vcmask 326656   ;;  %v2222_v57 = vadd.f32 %v2221_v53, %v2220_v20  ;;  %3691 = vrot.lane.b32.xlu1 %v6931_v9, %s6079_s11  ;;  %v7439_v40 = vpop.permute.xlu0 %2751  ;;  %12549 = vst [vmem:[#allocation151_spill] sm:$0xff] %v7441_v28  ;;  %s12628_s11 = smov 40  }
 0x225   : > { %12544 = vst [vmem:[#allocation147_spill] sm:$0xff] %v7418_v44  ;;  %12545 = vst [vmem:[#allocation148_spill] sm:$0xff] %v7423_v6  ;;  %v7430_v27 = vsel %vm12546_vm7, %v6747_v63, %v7157_v12  ;;  %v2601_v26 = vsel %vm1447_vm2, %v2591_v47, 0.0  ;;  %v2683_v0 = vrot.slane %v7423_v6, 2  ;;  %vm11961_vm9 = vcmp.lt.s32.totalorder %v7048_v60, 3 }
 0x226   : > { %v7437_v17 = vadd.f32 %v1923_v11, %v1922_v61  ;;  %v2123_v5 = vrot.slane %v2122_v50, 1  ;;  %v2420_v7 = vrot.slane %v2419_v51, 2  ;;  %v2602_v39 = vrot.slane %v2601_v26, 4  ;;  %12548 = vst [vmem:[#allocation150_spill] sm:$0xff] %v7439_v40  ;;  %3715 = vrot.lane.b32.xlu0 %v6935_v38, %s12555_s8 }
 0x227   : > { %vm12550_vm7 = vcmask 261120   ;;  %v2321_v47 = vadd.f32 %v2320_v59, %v2319_v19  ;;  %v2691_v53 = vmul.f32 %v2683_v0, %v6496_v24  ;;  %vm12551_vm11 = vcmask 1022976  }
 0x228   : > { %12547 = vst [vmem:[#allocation149_spill] sm:$0xff] %v7437_v17  ;;  %v7446_v63 = vsel %vm12550_vm7, %v12418_v21, %v7214_v18  ;;  %v2736_v20 = vsel %vm12551_vm11, %v12453_v10, %v7441_v28  ;;  %v12552_v61 = vmax.f32 %v7293_v56, %v12517_v8  ;;  %v7456_v6 = vadd.f32 %v2023_v52, %v2022_v16  ;;  %v12563_v56 = vld [vmem:[#allocation6_spill] sm:$0xff] }
 0x229   : > { %v2603_v15 = vadd.f32 %v2602_v39, %v2601_v26  ;;  %v7461_v21 = vsel %vm11921_vm4, %v2736_v20, %v7207_v25  ;;  %v2223_v59 = vrot.slane %v2222_v57, 1  ;;  %v2421_v19 = vadd.f32 %v2420_v7, %v2419_v51  ;;  %3713 = vrot.lane.b32.xlu1 %v6925_v2, %s12555_s8  ;;  %v7473_v39 = vpop.permute.xlu0 %2851  ;;  %v7475_v20 = vpop.permute.xlu1 %2830 }
 0x22a   : > { %v1545_v11 = vmax.f32 %v12552_v61, %v7418_v44  ;;  %12553 = vst [vmem:[#allocation152_spill] sm:$0xff] %v7456_v6  ;;  %12554 = vst [vmem:[#allocation153_spill] sm:$0xff] %v7461_v21  ;;  %v2701_v10 = vsel %vm1447_vm2, %v2691_v53, 0.0  ;;  %v2783_v0 = vrot.slane %v7461_v21, 2  ;;  %vm11943_vm11 = vcmp.lt.s32.totalorder %v7048_v60, 2  ;;  %v12560_v61 = vld [vmem:[#allocation55_spill] sm:$0xff]  ;;  %3721 = vrot.lane.b32.xlu0 %v12563_v56, %s12555_s8 }
 0x22b   : > { %v7471_v52 = vadd.f32 %v2123_v5, %v2122_v50  ;;  %v2604_v25 = vrot.slane %v2603_v15, 2  ;;  %v2702_v26 = vrot.slane %v2701_v10, 4  ;;  %12557 = vst [vmem:[#allocation155_spill] sm:$0xff] %v7473_v39  ;;  %12558 = vst [vmem:[#allocation156_spill] sm:$0xff] %v7475_v20  ;;  %vm12559_vm7 = vcmask 195584   ;;  %v12575_v44 = vld [vmem:[#allocation120_spill] sm:$0xff] }
 0x22c   : > { %v1581_v16 = vmax.f32 %v1545_v11, %v7437_v17  ;;  %v7480_v51 = vsel %vm12559_vm7, %v12425_v30, %v7254_v55  ;;  %v2322_v7 = vrot.slane %v2321_v47, 1  ;;  %v2791_v53 = vmul.f32 %v2783_v0, %v6496_v24  ;;  %v12561_v17 = vld [vmem:[#allocation117_spill] sm:$0xff] }
 0x22d   : > { %12556 = vst [vmem:[#allocation154_spill] sm:$0xff] %v7471_v52  ;;  %v2836_v11 = vsel %vm12054_vm14, %v12560_v61, %v7475_v20  ;;  %v2605_v5 = vadd.f32 %v2604_v25, %v2603_v15  ;;  %v2703_v21 = vadd.f32 %v2702_v26, %v2701_v10  ;;  %v7494_v30 = vadd.f32 %v2223_v59, %v2222_v57  ;;  %v12565_v61 = vld [vmem:[#allocation5_spill] sm:$0xff]  ;;  %v12566_v10 = vld [vmem:[#allocation127_spill] sm:$0xff]  ;;  %v7507_v59 = vpop.permute.xlu0 %2951  ;;  %v7509_v26 = vpop.permute.xlu1 %2930 }
 0x22e   : > { %v1617_v50 = vmax.f32 %v1581_v16, %v7456_v6  ;;  %v7490_v8 = vsel %vm11917_vm10, %v2836_v11, %v12561_v17  ;;  %v2422_v33 = vrot.slane %v2421_v19, 1  ;;  %v2801_v0 = vsel %vm1447_vm2, %v2791_v53, 0.0  ;;  %3719 = vrot.lane.b32.xlu1 %v12565_v61, %s12555_s8  ;;  %v12567_v17 = vld [vmem:[#allocation47_spill] sm:$0xff]  ;;  %12569 = vst [vmem:[#allocation127_spill] sm:$0xff] %v7507_v59  ;;  %v12572_v6 = vld [vmem:[#allocation57_spill] sm:$0xff]  ;;  %3725 = vrot.lane.b32.xlu0 %v12537_v46, %s12555_s8 }
 0x22f   : > { %12562 = vst [vmem:[#allocation55_spill] sm:$0xff] %v7490_v8  ;;  %12564 = vst [vmem:[#allocation117_spill] sm:$0xff] %v7494_v30  ;;  %v2883_v29 = vrot.slane %v7490_v8, 2  ;;  %vm11939_vm7 = vcmp.lt.s32.totalorder %v7048_v60, 1  ;;  %vm12568_vm10 = vcmask 130048   ;;  %v2704_v25 = vrot.slane %v2703_v21, 2 }
 0x230   : > { %v1653_v15 = vmax.f32 %v1617_v50, %v7471_v52  ;;  %v7505_v16 = vsel %vm12568_vm10, %v12567_v17, %v12566_v10  ;;  %v2802_v57 = vrot.slane %v2801_v0, 4  ;;  %12570 = vst [vmem:[#allocation47_spill] sm:$0xff] %v7509_v26  ;;  %v7511_v53 = vadd.f32 %v2322_v7, %v2321_v47  ;;  %v12573_v52 = vld [vmem:[#allocation50_spill] sm:$0xff]  ;;  %v12612_v60 = vld [vmem:[#allocation67_spill] sm:$0xff] }
 0x231   : > { %v2606_v11 = vrot.slane %v2605_v5, 1  ;;  %v2891_v8 = vmul.f32 %v2883_v29, %v6496_v24  ;;  %v2936_v50 = vsel %vm12065_vm5, %v12572_v6, %v7509_v26  ;;  %vm12574_vm4 = vcmask 64512  }
 0x232   : > { %12571 = vst [vmem:[#allocation157_spill] sm:$0xff] %v7511_v53  ;;  %v7520_v17 = vsel %vm12574_vm4, %v12573_v52, %v7327_v41  ;;  %v2705_v62 = vadd.f32 %v2704_v25, %v2703_v21  ;;  %v2803_v43 = vadd.f32 %v2802_v57, %v2801_v0  ;;  %v7525_v20 = vsel %vm11961_vm9, %v2936_v50, %v12575_v44  ;;  %v12578_v21 = vld [vmem:[#allocation109_spill] sm:$0xff]  ;;  %v12579_v52 = vld [vmem:[#allocation52_spill] sm:$0xff] }
 0x233   : > { %12576 = vst [vmem:[#allocation57_spill] sm:$0xff] %v7525_v20  ;;  %v1689_v29 = vmax.f32 %v1653_v15, %v7494_v30  ;;  %v7530_v47 = vadd.f32 %v2422_v33, %v2421_v19  ;;  %v2901_v6 = vsel %vm1447_vm2, %v2891_v8, 0.0  ;;  %v2983_v7 = vrot.slane %v7525_v20, 2  ;;  %3723 = vrot.lane.b32.xlu1 %v6900_v13, %s12555_s8  ;;  %v7542_v15 = vpop.permute.xlu0 %3051  ;;  %v7544_v33 = vpop.permute.xlu1 %3030  ;;  %v12584_v20 = vld [vmem:[#allocation59_spill] sm:$0xff]  ;;  %3729 = vrot.lane.b32.xlu0 %v6931_v9, %s12555_s8 }
 0x234   : > { %vm11963_vm4 = vcmp.lt.s32.totalorder %v12578_v21, 56  ;;  %v7540_v44 = vsel %vm12044_vm0, %v12579_v52, %v7369_v45  ;;  %v2706_v0 = vrot.slane %v2705_v62, 1  ;;  %v2804_v25 = vrot.slane %v2803_v43, 2  ;;  %12581 = vst [vmem:[#allocation52_spill] sm:$0xff] %v7542_v15  ;;  %12582 = vst [vmem:[#allocation158_spill] sm:$0xff] %v7544_v33  ;;  %v12585_v52 = vld [vmem:[#allocation54_spill] sm:$0xff] }
 0x235   : > { %12577 = vst [vmem:[#allocation50_spill] sm:$0xff] %v7530_v47  ;;  %12580 = vst [vmem:[#allocation120_spill] sm:$0xff] %v7540_v44  ;;  %v2902_v57 = vrot.slane %v2901_v6, 4  ;;  %v1840_v8 = vmax.f32 %v1689_v29, %v7511_v53  ;;  %v7547_v19 = vadd.f32 %v2606_v11, %v2605_v5  ;;  %v2991_v50 = vmul.f32 %v2983_v7, %v6496_v24 }
 0x236   : > { %v3036_v30 = vsel %vm12075_vm6, %v12584_v20, %v7544_v33  ;;  %vm12586_vm10 = vcmask 48128   ;;  %v2805_v28 = vadd.f32 %v2804_v25, %v2803_v43  ;;  %v7566_v11 = vadd.f32 %v2706_v0, %v2705_v62  ;;  %v12591_v43 = vld [vmem:[#allocation56_spill] sm:$0xff]  ;;  %v12595_v0 = vld [vmem:[#allocation58_spill] sm:$0xff] }
 0x237   : > { %12583 = vst [vmem:[#allocation159_spill] sm:$0xff] %v7547_v19  ;;  %v7556_v26 = vsel %vm12586_vm10, %v12585_v52, %v7402_v42  ;;  %v2903_v45 = vadd.f32 %v2902_v57, %v2901_v6  ;;  %v7561_v31 = vsel %vm11943_vm11, %v3036_v30, %v12588_v22  ;;  %v1940_v5 = vmax.f32 %v1840_v8, %v7530_v47  ;;  %v7577_v25 = vpop.permute.xlu0 %3151  ;;  %v7579_v57 = vpop.permute.xlu1 %3130  ;;  %v12597_v52 = vld [vmem:[#allocation61_spill] sm:$0xff]  ;;  %v12599_v33 = vld [vmem:[#allocation124_spill] sm:$0xff] }
 0x238   : > { %12587 = vst [vmem:[#allocation59_spill] sm:$0xff] %v7556_v26  ;;  %12589 = vst [vmem:[#allocation54_spill] sm:$0xff] %v7561_v31  ;;  %v3001_v20 = vsel %vm1447_vm2, %v2991_v50, 0.0  ;;  %v3083_v29 = vrot.slane %v7561_v31, 2  ;;  %3727 = vrot.lane.b32.xlu1 %v12536_v36, %s12555_s8  ;;  %v7575_v6 = vsel %vm2753_vm1, %v12591_v43, %v7439_v40  ;;  %v2806_v22 = vrot.slane %v2805_v28, 1  ;;  %3833 = vrot.lane.b32.xlu0 %v12563_v56, %s12601_s9 }
 0x239   : > { %12590 = vst [vmem:[#allocation123_spill] sm:$0xff] %v7566_v11  ;;  %12592 = vst [vmem:[#allocation56_spill] sm:$0xff] %v7575_v6  ;;  %v2904_v30 = vrot.slane %v2903_v45, 2  ;;  %v3002_v7 = vrot.slane %v3001_v20, 4  ;;  %v2040_v62 = vmax.f32 %v1940_v5, %v7547_v19  ;;  %v7585_v8 = vsel %vm2853_vm8, %v12595_v0, %v7473_v39 }
 0x23a   : > { %12593 = vst [vmem:[#allocation160_spill] sm:$0xff] %v7577_v25  ;;  %12594 = vst [vmem:[#allocation161_spill] sm:$0xff] %v7579_v57  ;;  %v3091_v50 = vmul.f32 %v3083_v29, %v6496_v24  ;;  %v3136_v43 = vsel %vm11967_vm3, %v12597_v52, %v7579_v57  ;;  %v7591_v31 = vadd.f32 %v2806_v22, %v2805_v28  ;;  %v12602_v29 = vld [vmem:[#allocation60_spill] sm:$0xff]  ;;  %vm12607_vm10 = vcmask 7168  }
 0x23b   : > { %12596 = vst [vmem:[#allocation58_spill] sm:$0xff] %v7585_v8  ;;  %v2905_v47 = vadd.f32 %v2904_v30, %v2903_v45  ;;  %v3003_v53 = vadd.f32 %v3002_v7, %v3001_v20  ;;  %v7596_v40 = vsel %vm11939_vm7, %v3136_v43, %v12599_v33  ;;  %v2140_v5 = vmax.f32 %v2040_v62, %v7566_v11  ;;  %v12604_v33 = vld [vmem:[#allocation62_spill] sm:$0xff]  ;;  %v12606_v7 = vld [vmem:[#allocation68_spill] sm:$0xff]  ;;  %v1699_v52 = vpop.permute.xlu0 %1698  ;;  %v7620_v43 = vpop.permute.xlu1 %1432 }
 0x23c   : > { %12598 = vst [vmem:[#allocation61_spill] sm:$0xff] %v7591_v31  ;;  %12600 = vst [vmem:[#allocation124_spill] sm:$0xff] %v7596_v40  ;;  %v7604_v0 = vsel %vm2953_vm12, %v12602_v29, %v7507_v59  ;;  %v3101_v28 = vsel %vm1447_vm2, %v3091_v50, 0.0  ;;  %v3183_v45 = vrot.slane %v7596_v40, 2  ;;  %3831 = vrot.lane.b32.xlu1 %v12565_v61, %s12601_s9  ;;  %v7613_v22 = vsel %vm11966_vm15, %v12604_v33, %v7542_v15  ;;  %v12610_v40 = vld [vmem:[#allocation104_spill] sm:$0xff] }
 0x23d   : > { %12603 = vst [vmem:[#allocation60_spill] sm:$0xff] %v7604_v0  ;;  %v3004_v20 = vrot.slane %v3003_v53, 2  ;;  %12605 = vst [vmem:[#allocation62_spill] sm:$0xff] %v7613_v22  ;;  %v3102_v30 = vrot.slane %v3101_v28, 4  ;;  %v7618_v62 = vsel %vm12607_vm10, %v12606_v7, %v7577_v25  ;;  %v2240_v50 = vmax.f32 %v2140_v5, %v7591_v31  ;;  %3837 = vrot.lane.b32.xlu0 %v6925_v2, %s12601_s9  ;;  %v12616_v25 = vld [vmem:[#allocation48_spill] sm:$0xff] }
 0x23e   : > { %12608 = vst [vmem:[#allocation68_spill] sm:$0xff] %v7618_v62  ;;  %12609 = vst [vmem:[#allocation162_spill] sm:$0xff] %v7620_v43  ;;  %v3191_v29 = vmul.f32 %v3183_v45, %v6496_v24  ;;  %vm12611_vm7 = vcmask 982016   ;;  %vm12613_vm11 = vcmp.lt.s32.totalorder %v6953_v48, 64  ;;  %v2906_v19 = vrot.slane %v2905_v47, 1  ;;  %v12615_v45 = vld [vmem:[#allocation27_spill] sm:$0xff] }
 0x23f   : > { %v1703_v11 = vsel %vm12611_vm7, %v12610_v40, %v1699_v52  ;;  %v1440_v33 = vsel %vm12613_vm11, %v12612_v60, %v7620_v43  ;;  %v3005_v15 = vadd.f32 %v3004_v20, %v3003_v53  ;;  %v3103_v57 = vadd.f32 %v3102_v30, %v3101_v28  ;;  %v7648_v20 = vpop.permute.xlu0 %1849  ;;  %v7650_v30 = vpop.permute.xlu1 %1710  ;;  %v12618_v62 = vld [vmem:[#allocation3_spill] sm:$0xff] }
 0x240   : > { %v7633_v7 = vsel %vm11963_vm4, %v1703_v11, %v7381_v58  ;;  %v3201_v5 = vsel %vm1447_vm2, %v3191_v29, 0.0  ;;  %v1445_v31 = vmul.f32 %v1440_v33, %v12615_v45  ;;  %v1515_v48 = vmul.f32 %v1440_v33, %v12616_v25  ;;  %3835 = vrot.lane.b32.xlu1 %v6900_v13, %s12601_s9  ;;  %v12617_v11 = vld [vmem:[#allocation8_spill] sm:$0xff] }
 0x241   : > { %12614 = vst [vmem:[#allocation104_spill] sm:$0xff] %v7633_v7  ;;  %v1801_v40 = vrot.slane %v7633_v7, 2  ;;  %vm11964_vm11 = vcmp.lt.s32.totalorder %v12578_v21, 48  ;;  %v3006_v60 = vrot.slane %v3005_v15, 1  ;;  %v3104_v53 = vrot.slane %v3103_v57, 2  ;;  %3841 = vrot.lane.b32.xlu0 %v12536_v36, %s12601_s9 }
 0x242   : > { %v3202_v58 = vrot.slane %v3201_v5, 4  ;;  %v7646_v28 = vsel %vm12611_vm7, %v1699_v52, %v12617_v11  ;;  %v1462_v7 = vsel %vm1447_vm2, %v1445_v31, 0.0  ;;  %v1537_v43 = vsel %vm1447_vm2, %v1515_v48, 0.0  ;;  %v12620_v31 = vld [vmem:[#allocation112_spill] sm:$0xff] }
 0x243   : > { %v1809_v29 = vmul.f32 %v1801_v40, %v12615_v45  ;;  %v1584_v59 = vmul.f32 %v1440_v33, %v12618_v62  ;;  %v7656_v22 = vadd.f32 %v2906_v19, %v2905_v47  ;;  %v3105_v39 = vadd.f32 %v3104_v53, %v3103_v57  ;;  %v7670_v53 = vpop.permute.xlu1 %1861 }
 0x244   : > { %v3203_v0 = vadd.f32 %v3202_v58, %v3201_v5  ;;  %v1463_v8 = vrot.slane %v1462_v7, 4  ;;  %v1538_v11 = vrot.slane %v1537_v43, 4  ;;  %v1657_v40 = vmul.f32 %v1440_v33, %v6496_v24  ;;  %3839 = vrot.lane.b32.xlu1 %v12537_v46, %s12601_s9  ;;  %v7668_v5 = vpop.permute.xlu0 %1949  ;;  %v12622_v33 = vld [vmem:[#allocation110_spill] sm:$0xff] }
 0x245   : > { %12619 = vst [vmem:[#allocation67_spill] sm:$0xff] %v7656_v22  ;;  %v1825_v52 = vsel %vm1447_vm2, %v1809_v29, 0.0  ;;  %v1588_v42 = vsel %vm1447_vm2, %v1584_v59, 0.0  ;;  %vm11972_vm10 = vcmp.lt.s32.totalorder %v12620_v31, 56  ;;  %v7666_v48 = vadd.f32 %v3006_v60, %v3005_v15  ;;  %3845 = vrot.lane.b32.xlu0 %v6935_v38, %s12601_s9 }
 0x246   : > { %v3106_v47 = vrot.slane %v3105_v39, 1  ;;  %v3204_v19 = vrot.slane %v3203_v0, 2  ;;  %v1826_v57 = vrot.slane %v1825_v52, 4  ;;  %v1464_v58 = vadd.f32 %v1463_v8, %v1462_v7 }
 0x247   : > { %12621 = vst [vmem:[#allocation8_spill] sm:$0xff] %v7666_v48  ;;  %v1539_v29 = vadd.f32 %v1538_v11, %v1537_v43  ;;  %v1589_v6 = vrot.slane %v1588_v42, 4  ;;  %v1667_v59 = vsel %vm1447_vm2, %v1657_v40, 0.0  ;;  %vm11995_vm7 = vcmp.lt.s32.totalorder %v12622_v33, 56  ;;  %v7687_v11 = vpop.permute.xlu1 %1961 }
 0x248   : > { %v2339_v24 = vmax.f32 %v2240_v50, %v7656_v22  ;;  %v3205_v26 = vadd.f32 %v3204_v19, %v3203_v0  ;;  %v1827_v23 = vadd.f32 %v1826_v57, %v1825_v52  ;;  %v1668_v15 = vrot.slane %v1667_v59, 4  ;;  %3843 = vrot.lane.b32.xlu1 %v6931_v9, %s12601_s9  ;;  %v7685_v52 = vpop.permute.xlu0 %2049 }
 0x249   : > { %v1465_v60 = vrot.slane %v1464_v58, 2  ;;  %v1540_v41 = vrot.slane %v1539_v29, 2  ;;  %v1590_v44 = vadd.f32 %v1589_v6, %v1588_v42  ;;  %vm12624_vm9 = vcmask 916480   ;;  %3867 = vrot.lane.b32.xlu0 %v6935_v38, %s12628_s11 }
 0x24a   : > { %v1854_v8 = vsel %vm12624_vm9, %v12623_v14, %v7648_v20  ;;  %v7682_v43 = vadd.f32 %v3106_v47, %v3105_v39  ;;  %v3206_v7 = vrot.slane %v3205_v26, 1  ;;  %v1828_v50 = vrot.slane %v1827_v23, 2 }
 0x24b   : > { %v1669_v0 = vadd.f32 %v1668_v15, %v1667_v59  ;;  %vm11973_vm13 = vcmp.lt.s32.totalorder %v12578_v21, 40  ;;  %v2439_v42 = vmax.f32 %v2339_v24, %v7666_v48  ;;  %v1466_v6 = vadd.f32 %v1465_v60, %v1464_v58  ;;  %v7710_v60 = vpop.permute.xlu1 %2061 }
 0x24c   : > { %12625 = vst [vmem:[#allocation43_spill] sm:$0xff] %v7682_v43  ;;  %v1541_v40 = vadd.f32 %v1540_v41, %v1539_v29  ;;  %v1591_v19 = vrot.slane %v1590_v44, 2  ;;  %vm11983_vm9 = vcmp.lt.s32.totalorder %v12620_v31, 48  ;;  %v7691_v14 = vadd.f32 %v3206_v7, %v3205_v26  ;;  %3865 = vrot.lane.b32.xlu1 %v6925_v2, %s12628_s11  ;;  %v7708_v15 = vpop.permute.xlu0 %2149 }
 0x24d   : > { %v1829_v39 = vadd.f32 %v1828_v50, %v1827_v23  ;;  %v1670_v47 = vrot.slane %v1669_v0, 2  ;;  %v7696_v57 = vsel %vm11964_vm11, %v1854_v8, %v7412_v32  ;;  %vm11994_vm4 = vcmp.lt.s32.totalorder %v12622_v33, 48  ;;  %3873 = vrot.lane.b32.xlu0 %v12563_v56, %s12628_s11 }
 0x24e   : > { %12626 = vst [vmem:[#allocation163_spill] sm:$0xff] %v7691_v14  ;;  %12627 = vst [vmem:[#allocation164_spill] sm:$0xff] %v7696_v57  ;;  %v1467_v24 = vrot.slane %v1466_v6, 1  ;;  %v1542_v58 = vrot.slane %v1541_v40, 1  ;;  %v1592_v41 = vadd.f32 %v1591_v19, %v1590_v44  ;;  %v1901_v29 = vrot.slane %v7696_v57, 2 }
 0x24f   : > { %v2475_v23 = vmax.f32 %v2439_v42, %v7682_v43  ;;  %v1830_v26 = vrot.slane %v1829_v39, 1  ;;  %v1671_v59 = vadd.f32 %v1670_v47, %v1669_v0  ;;  %vm12629_vm11 = vcmask 457728   ;;  %v12633_v43 = vld [vmem:[#allocation7_spill] sm:$0xff] }
 0x250   : > { %v1722_v32 = vsel %vm12629_vm11, %v7055_v54, %v7650_v30  ;;  %v7712_v8 = vadd.f32 %v1467_v24, %v1466_v6  ;;  %v7714_v44 = vadd.f32 %v1542_v58, %v1541_v40  ;;  %v1593_v7 = vrot.slane %v1592_v41, 1  ;;  %vm12634_vm15 = vmmov %vm12629_vm11  ;;  %3871 = vrot.lane.b32.xlu1 %v12565_v61, %s12628_s11 }
 0x251   : > { %v1909_v50 = vmul.f32 %v1901_v29, %v12615_v45  ;;  %v7717_v19 = vadd.f32 %v1830_v26, %v1829_v39  ;;  %v1672_v42 = vrot.slane %v1671_v59, 1  ;;  %v1727_v0 = vsel %vm12634_vm15, %v7650_v30, %v12633_v43  ;;  %v12637_v39 = vld [vmem:[#allocation10_spill] sm:$0xff]  ;;  %v12639_v43 = vld [vmem:[#allocation84_spill] sm:$0xff]  ;;  %v12640_v29 = vld [vmem:[#allocation101_spill] sm:$0xff]  ;;  %3877 = vrot.lane.b32.xlu0 %v12537_v46, %s12628_s11 }
 0x252   : > { %12630 = vst [vmem:[#allocation165_spill] sm:$0xff] %v7712_v8  ;;  %12631 = vst [vmem:[#allocation166_spill] sm:$0xff] %v7714_v44  ;;  %v7725_v54 = vsel %vm11972_vm10, %v7646_v28, %v1722_v32  ;;  %vm11981_vm11 = vcmp.lt.s32.totalorder %v12578_v21, 32  ;;  %v2623_v6 = vmax.f32 %v2475_v23, %v7691_v14  ;;  %v7731_v40 = vadd.f32 %v1593_v7, %v1592_v41  ;;  %v7748_v23 = vpop.permute.xlu0 %2249 }
 0x253   : > { %12632 = vst [vmem:[#allocation167_spill] sm:$0xff] %v7717_v19  ;;  %12635 = vst [vmem:[#allocation7_spill] sm:$0xff] %v7725_v54  ;;  %vm12638_vm3 = vcmask 916480   ;;  %v1925_v30 = vsel %vm1447_vm2, %v1909_v50, 0.0  ;;  %v1546_v28 = vmax.f32 %v7717_v19, %v7316_v49  ;;  %v1510_v24 = vmax.f32 %v7712_v8, %v12639_v43  ;;  %v12642_v50 = vld [vmem:[#allocation111_spill] sm:$0xff] }
 0x254   : > { %12636 = vst [vmem:[#allocation168_spill] sm:$0xff] %v7731_v40  ;;  %v1860_v47 = vsel %vm12638_vm3, %v7648_v20, %v12637_v39  ;;  %v1926_v58 = vrot.slane %v1925_v30, 4  ;;  %v7746_v41 = vsel %vm11995_vm7, %v12640_v29, %v1727_v0  ;;  %v7750_v20 = vpop.permute.xlu1 %2161  ;;  %v1802_v7 = vrot.slane %v7725_v54, 2  ;;  %3875 = vrot.lane.b32.xlu1 %v6900_v13, %s12628_s11 }
 0x255   : > { %12641 = vst [vmem:[#allocation10_spill] sm:$0xff] %v7746_v41  ;;  %v1799_v32 = vrot.slane %v7746_v41, 2  ;;  %vm12643_vm3 = vcmask 850944   ;;  %v7759_v14 = vmax.f32 %v1546_v28, %v1510_v24  ;;  %v7763_v29 = vadd.f32 %v1672_v42, %v1671_v59  ;;  %3881 = vrot.lane.b32.xlu0 %v6931_v9, %s12628_s11 }
 0x256   : > { %v1954_v39 = vsel %vm12643_vm3, %v12642_v50, %v7668_v5  ;;  %v1927_v48 = vadd.f32 %v1926_v58, %v1925_v30  ;;  %v1810_v22 = vmul.f32 %v1802_v7, %v12616_v25  ;;  %vm12646_vm15 = vcmask 392192   ;;  %v12647_v30 = vld [vmem:[#allocation9_spill] sm:$0xff]  ;;  %v7789_v58 = vpop.permute.xlu0 %2348  ;;  %v12650_v50 = vld [vmem:[#allocation102_spill] sm:$0xff] }
 0x257   : > { %12644 = vst [vmem:[#allocation101_spill] sm:$0xff] %v7763_v29  ;;  %v1807_v26 = vmul.f32 %v1799_v32, %v12618_v62  ;;  %v7772_v57 = vsel %vm11973_vm13, %v1954_v39, %v7430_v27  ;;  %v1873_v28 = vsel %vm12646_vm15, %v7100_v37, %v7670_v53  ;;  %vm11989_vm3 = vcmp.lt.s32.totalorder %v12622_v33, 40  ;;  %vm12648_vm10 = vmmov %vm12646_vm15 }
 0x258   : > { %12645 = vst [vmem:[#allocation111_spill] sm:$0xff] %v7772_v57  ;;  %v1928_v59 = vrot.slane %v1927_v48, 2  ;;  %v2001_v42 = vrot.slane %v7772_v57, 2  ;;  %v1878_v24 = vsel %vm12648_vm10, %v7670_v53, %v12647_v30  ;;  %v7786_v27 = vsel %vm11983_vm9, %v1860_v47, %v1873_v28  ;;  %v7791_v37 = vpop.permute.xlu1 %2261  ;;  %3879 = vrot.lane.b32.xlu1 %v12536_v36, %s12628_s11 }
 0x259   : > { %12649 = vst [vmem:[#allocation9_spill] sm:$0xff] %v7786_v27  ;;  %vm11984_vm13 = vcmp.lt.s32.totalorder %v12620_v31, 40  ;;  %v1811_v32 = vsel %vm1447_vm2, %v1807_v26, 0.0  ;;  %v1832_v7 = vsel %vm1447_vm2, %v1810_v22, 0.0  ;;  %v7798_v39 = vsel %vm11994_vm4, %v12650_v50, %v1878_v24  ;;  %v12652_v24 = vld [vmem:[#allocation116_spill] sm:$0xff]  ;;  %3985 = vrot.lane.b32.xlu0 %v12563_v56, %s12657_s27 }
 0x25a   : > { %12651 = vst [vmem:[#allocation102_spill] sm:$0xff] %v7798_v39  ;;  %v1902_v53 = vrot.slane %v7786_v27, 2  ;;  %v1929_v30 = vadd.f32 %v1928_v59, %v1927_v48  ;;  %v1812_v47 = vrot.slane %v1811_v32, 4  ;;  %v1833_v28 = vrot.slane %v1832_v7, 4  ;;  %v7815_v54 = vpop.permute.xlu0 %2484 }
 0x25b   : > { %v2009_v0 = vmul.f32 %v2001_v42, %v12615_v45  ;;  %v7805_v57 = vmax.f32 %v2623_v6, %v7763_v29  ;;  %v1899_v22 = vrot.slane %v7798_v39, 2  ;;  %vm12653_vm10 = vcmask 785408  }
 0x25c   : > { %v1910_v26 = vmul.f32 %v1902_v53, %v12616_v25  ;;  %v2054_v50 = vsel %vm12653_vm10, %v12652_v24, %v7685_v52  ;;  %v1930_v48 = vrot.slane %v1929_v30, 1  ;;  %v1813_v59 = vadd.f32 %v1812_v47, %v1811_v32  ;;  %v7824_v24 = vpop.permute.xlu1 %2360  ;;  %v12655_v32 = vld [vmem:[#allocation12_spill] sm:$0xff]  ;;  %3983 = vrot.lane.b32.xlu1 %v12565_v61, %s12657_s27 }
 0x25d   : > { %v1834_v42 = vadd.f32 %v1833_v28, %v1832_v7  ;;  %v2025_v27 = vsel %vm1447_vm2, %v2009_v0, 0.0  ;;  %v1907_v41 = vmul.f32 %v1899_v22, %v12618_v62  ;;  %v7822_v53 = vsel %vm11981_vm11, %v2054_v50, %v7446_v63  ;;  %3989 = vrot.lane.b32.xlu0 %v6925_v2, %s12657_s27 }
 0x25e   : > { %v2026_v6 = vrot.slane %v2025_v27, 4  ;;  %v1932_v39 = vsel %vm1447_vm2, %v1910_v26, 0.0  ;;  %12654 = vst [vmem:[#allocation116_spill] sm:$0xff] %v7822_v53  ;;  %v1814_v29 = vrot.slane %v1813_v59, 2  ;;  %vm12656_vm15 = vcmask 850944  }
 0x25f   : > { %v1835_v49 = vrot.slane %v1834_v42, 2  ;;  %v1960_v0 = vsel %vm12656_vm15, %v7668_v5, %v12655_v32  ;;  %v1933_v7 = vrot.slane %v1932_v39, 4  ;;  %v7831_v47 = vadd.f32 %v1930_v48, %v1929_v30  ;;  %v7841_v32 = vpop.permute.xlu0 %2632  ;;  %v12660_v48 = vld [vmem:[#allocation11_spill] sm:$0xff] }
 0x260   : > { %v2027_v28 = vadd.f32 %v2026_v6, %v2025_v27  ;;  %v1911_v22 = vsel %vm1447_vm2, %v1907_v41, 0.0  ;;  %v2101_v63 = vrot.slane %v7822_v53, 2  ;;  %v1815_v26 = vadd.f32 %v1814_v29, %v1813_v59  ;;  %v7847_v53 = vpop.permute.xlu1 %2496  ;;  %3987 = vrot.lane.b32.xlu1 %v6900_v13, %s12657_s27 }
 0x261   : > { %12658 = vst [vmem:[#allocation12_spill] sm:$0xff] %v7831_v47  ;;  %v1836_v50 = vadd.f32 %v1835_v49, %v1834_v42  ;;  %v1912_v43 = vrot.slane %v1911_v22, 4  ;;  %vm12659_vm10 = vcmask 326656   ;;  %vm12003_vm15 = vcmp.lt.s32.totalorder %v12578_v21, 24  ;;  %v12662_v42 = vld [vmem:[#allocation105_spill] sm:$0xff]  ;;  %3993 = vrot.lane.b32.xlu0 %v12536_v36, %s12657_s27 }
 0x262   : > { %v1973_v5 = vsel %vm12659_vm10, %v7157_v12, %v7687_v11  ;;  %v2028_v30 = vrot.slane %v2027_v28, 2  ;;  %v1934_v27 = vadd.f32 %v1933_v7, %v1932_v39  ;;  %v2109_v41 = vmul.f32 %v2101_v63, %v12615_v45  ;;  %vm12661_vm11 = vmmov %vm12659_vm10 }
 0x263   : > { %v1978_v6 = vsel %vm12661_vm11, %v7687_v11, %v12660_v48  ;;  %v1816_v49 = vrot.slane %v1815_v26, 1  ;;  %v1837_v29 = vrot.slane %v1836_v50, 1  ;;  %v1913_v59 = vadd.f32 %v1912_v43, %v1911_v22 }
 0x264   : > { %v7852_v12 = vsel %vm11989_vm3, %v12662_v42, %v1978_v6  ;;  %vm12014_vm10 = vcmp.lt.s32.totalorder %v12622_v33, 32  ;;  %vm12012_vm9 = vcmp.lt.s32.totalorder %v12620_v31, 32  ;;  %v2029_v39 = vadd.f32 %v2028_v30, %v2027_v28  ;;  %v7870_v42 = vpop.permute.xlu0 %2732  ;;  %3991 = vrot.lane.b32.xlu1 %v12537_v46, %s12657_s27 }
 0x265   : > { %12663 = vst [vmem:[#allocation11_spill] sm:$0xff] %v7852_v12  ;;  %v1935_v7 = vrot.slane %v1934_v27, 2  ;;  %v2125_v11 = vsel %vm1447_vm2, %v2109_v41, 0.0  ;;  %v7861_v63 = vsel %vm11984_vm13, %v1960_v0, %v1973_v5  ;;  %v7865_v43 = vadd.f32 %v1816_v49, %v1815_v26  ;;  %v7874_v5 = vpop.permute.xlu1 %2644  ;;  %3997 = vrot.lane.b32.xlu0 %v6935_v38, %s12657_s27 }
 0x266   : > { %12664 = vst [vmem:[#allocation105_spill] sm:$0xff] %v7861_v63  ;;  %v7867_v22 = vadd.f32 %v1837_v29, %v1836_v50  ;;  %v1914_v48 = vrot.slane %v1913_v59, 2  ;;  %v2126_v6 = vrot.slane %v2125_v11, 4  ;;  %vm11999_vm11 = vcmp.lt.s32.totalorder %v12578_v21, 16  ;;  %v12667_v50 = vld [vmem:[#allocation15_spill] sm:$0xff] }
 0x267   : > { %12665 = vst [vmem:[#allocation169_spill] sm:$0xff] %v7865_v43  ;;  %v2030_v28 = vrot.slane %v2029_v39, 1  ;;  %v1936_v30 = vadd.f32 %v1935_v7, %v1934_v27  ;;  %v1999_v41 = vrot.slane %v7852_v12, 2  ;;  %v2002_v0 = vrot.slane %v7861_v63, 2 }
 0x268   : > { %12666 = vst [vmem:[#allocation170_spill] sm:$0xff] %v7867_v22  ;;  %v1618_v26 = vmax.f32 %v7759_v14, %v7831_v47  ;;  %v1915_v49 = vadd.f32 %v1914_v48, %v1913_v59  ;;  %vm12668_vm13 = vcmask 785408   ;;  %v2127_v8 = vadd.f32 %v2126_v6, %v2125_v11  ;;  %v12671_v48 = vld [vmem:[#allocation122_spill] sm:$0xff]  ;;  %3995 = vrot.lane.b32.xlu1 %v6931_v9, %s12657_s27 }
 0x269   : > { %v2060_v29 = vsel %vm12668_vm13, %v7685_v52, %v12667_v50  ;;  %v12669_v27 = vmax.f32 %v7325_v1, %v7731_v40  ;;  %v1937_v63 = vrot.slane %v1936_v30, 1  ;;  %v2007_v12 = vmul.f32 %v1999_v41, %v12618_v62  ;;  %v7898_v50 = vpop.permute.xlu0 %2832  ;;  %v7913_v1 = vpop.permute.xlu1 %2744  ;;  %4019 = vrot.lane.b32.xlu0 %v6935_v38, %s12362_s13 }
 0x26a   : > { %v2010_v14 = vmul.f32 %v2002_v0, %v12616_v25  ;;  %v7893_v59 = vadd.f32 %v2030_v28, %v2029_v39  ;;  %v1916_v52 = vrot.slane %v1915_v49, 1  ;;  %v2128_v11 = vrot.slane %v2127_v8, 2  ;;  %v12674_v39 = vld [vmem:[#allocation19_spill] sm:$0xff] }
 0x26b   : > { %v7887_v7 = vmax.f32 %v12669_v27, %v7865_v43  ;;  %vm12672_vm13 = vcmask 719872   ;;  %v12673_v27 = vmax.f32 %v7714_v44, %v7318_v4  ;;  %v2011_v0 = vsel %vm1447_vm2, %v2007_v12, 0.0 }
 0x26c   : > { %12670 = vst [vmem:[#allocation15_spill] sm:$0xff] %v7893_v59  ;;  %v2154_v6 = vsel %vm12672_vm13, %v12671_v48, %v7708_v15  ;;  %v2032_v47 = vsel %vm1447_vm2, %v2010_v14, 0.0  ;;  %vm12675_vm3 = vmmov %vm12672_vm13  ;;  %v7915_v48 = vadd.f32 %v1937_v63, %v1936_v30  ;;  %v2129_v40 = vadd.f32 %v2128_v11, %v2127_v8  ;;  %v12680_v63 = vld [vmem:[#allocation14_spill] sm:$0xff]  ;;  %4017 = vrot.lane.b32.xlu1 %v6925_v2, %s12362_s13 }
 0x26d   : > { %v7904_v41 = vmax.f32 %v12673_v27, %v7867_v22  ;;  %v7911_v28 = vsel %vm12675_vm3, %v7708_v15, %v12674_v39  ;;  %v2012_v43 = vrot.slane %v2011_v0, 4  ;;  %v2033_v19 = vrot.slane %v2032_v47, 4  ;;  %v7939_v27 = vpop.permute.xlu0 %2932  ;;  %v7954_v39 = vpop.permute.xlu1 %2844  ;;  %4025 = vrot.lane.b32.xlu0 %v12563_v56, %s12362_s13 }
 0x26e   : > { %12676 = vst [vmem:[#allocation122_spill] sm:$0xff] %v7915_v48  ;;  %vm12009_vm13 = vcmp.lt.s32.totalorder %v12622_v33, 24  ;;  %vm12005_vm4 = vcmp.lt.s32.totalorder %v12620_v31, 24  ;;  %v7921_v12 = vadd.f32 %v1916_v52, %v1915_v49  ;;  %v7926_v15 = vsel %vm12003_vm15, %v2154_v6, %v7480_v51  ;;  %v12682_v6 = vld [vmem:[#allocation106_spill] sm:$0xff] }
 0x26f   : > { %12678 = vst [vmem:[#allocation171_spill] sm:$0xff] %v7926_v15  ;;  %vm12679_vm3 = vcmask 261120   ;;  %v7937_v14 = vmax.f32 %v1618_v26, %v7893_v59  ;;  %v2130_v49 = vrot.slane %v2129_v40, 1  ;;  %v2013_v52 = vadd.f32 %v2012_v43, %v2011_v0 }
 0x270   : > { %12677 = vst [vmem:[#allocation19_spill] sm:$0xff] %v7921_v12  ;;  %v2073_v8 = vsel %vm12679_vm3, %v7214_v18, %v7710_v60  ;;  %vm12681_vm7 = vmmov %vm12679_vm3  ;;  %v2034_v11 = vadd.f32 %v2033_v19, %v2032_v47  ;;  %v2201_v51 = vrot.slane %v7926_v15, 2  ;;  %v1583_v19 = vmax.f32 %v7904_v41, %v7915_v48  ;;  %4023 = vrot.lane.b32.xlu1 %v12565_v61, %s12362_s13 }
 0x271   : > { %v2078_v30 = vsel %vm12681_vm7, %v7710_v60, %v12680_v63  ;;  %v7949_v60 = vsel %vm12012_vm9, %v2060_v29, %v2073_v8  ;;  %vm12685_vm7 = vcmask 654336   ;;  %v2014_v47 = vrot.slane %v2013_v52, 2  ;;  %v7976_v15 = vpop.permute.xlu0 %3032  ;;  %4029 = vrot.lane.b32.xlu0 %v12537_v46, %s12362_s13 }
 0x272   : > { %v7945_v18 = vsel %vm12014_vm10, %v12682_v6, %v2078_v30  ;;  %12684 = vst [vmem:[#allocation106_spill] sm:$0xff] %v7949_v60  ;;  %v2254_v26 = vsel %vm12685_vm7, %v7291_v34, %v7748_v23  ;;  %v2035_v43 = vrot.slane %v2034_v11, 2  ;;  %v1688_v29 = vmax.f32 %v7887_v7, %v7921_v12  ;;  %v12694_v12 = vld [vmem:[#allocation108_spill] sm:$0xff] }
 0x273   : > { %12683 = vst [vmem:[#allocation14_spill] sm:$0xff] %v7945_v18  ;;  %v2099_v0 = vrot.slane %v7945_v18, 2  ;;  %v2209_v8 = vmul.f32 %v2201_v51, %v12615_v45  ;;  %v2102_v63 = vrot.slane %v7949_v60, 2  ;;  %v7968_v34 = vsel %vm11999_vm11, %v2254_v26, %v7505_v16  ;;  %v7984_v18 = vpop.permute.xlu1 %2944 }
 0x274   : > { %12686 = vst [vmem:[#allocation172_spill] sm:$0xff] %v7968_v34  ;;  %vm12008_vm3 = vcmp.lt.s32.totalorder %v12578_v21, 8  ;;  %v7973_v41 = vadd.f32 %v2130_v49, %v2129_v40  ;;  %v2015_v30 = vadd.f32 %v2014_v47, %v2013_v52  ;;  %v2036_v6 = vadd.f32 %v2035_v43, %v2034_v11  ;;  %4027 = vrot.lane.b32.xlu1 %v6900_v13, %s12362_s13 }
 0x275   : > { %v2107_v7 = vmul.f32 %v2099_v0, %v12618_v62  ;;  %v2225_v51 = vsel %vm1447_vm2, %v2209_v8, 0.0  ;;  %v2110_v60 = vmul.f32 %v2102_v63, %v12616_v25  ;;  %v2300_v16 = vrot.slane %v7968_v34, 2  ;;  %v12689_v8 = vld [vmem:[#allocation18_spill] sm:$0xff]  ;;  %4033 = vrot.lane.b32.xlu0 %v6931_v9, %s12362_s13 }
 0x276   : > { %12687 = vst [vmem:[#allocation173_spill] sm:$0xff] %v7973_v41  ;;  %vm12688_vm7 = vcmask 195584   ;;  %v2016_v40 = vrot.slane %v2015_v30, 1  ;;  %v2037_v49 = vrot.slane %v2036_v6, 1  ;;  %v2226_v52 = vrot.slane %v2225_v51, 4 }
 0x277   : > { %v2173_v26 = vsel %vm12688_vm7, %v7254_v55, %v7750_v20  ;;  %v2111_v11 = vsel %vm1447_vm2, %v2107_v7, 0.0  ;;  %v2132_v43 = vsel %vm1447_vm2, %v2110_v60, 0.0  ;;  %v2308_v0 = vmul.f32 %v2300_v16, %v12615_v45  ;;  %vm12690_vm11 = vmmov %vm12688_vm7  ;;  %v12692_v7 = vld [vmem:[#allocation21_spill] sm:$0xff] }
 0x278   : > { %v2112_v47 = vrot.slane %v2111_v11, 4  ;;  %v2178_v63 = vsel %vm12690_vm11, %v7750_v20, %v12689_v8  ;;  %v7996_v55 = vadd.f32 %v2016_v40, %v2015_v30  ;;  %v2227_v34 = vadd.f32 %v2226_v52, %v2225_v51  ;;  %v8016_v51 = vpop.permute.xlu0 %3132  ;;  %4031 = vrot.lane.b32.xlu1 %v12536_v36, %s12362_s13  ;;  %s12707_s13 = smov 88  }
 0x279   : > { %v2133_v59 = vrot.slane %v2132_v43, 4  ;;  %vm12693_vm7 = vcmask 654336   ;;  %vm2278_vm15 = vcmp.lt.s32.totalorder %v12622_v33, 16  ;;  %v2324_v16 = vsel %vm1447_vm2, %v2308_v0, 0.0  ;;  %4137 = vrot.lane.b32.xlu0 %v12563_v56, %s12707_s13 }
 0x27a   : > { %12691 = vst [vmem:[#allocation18_spill] sm:$0xff] %v7996_v55  ;;  %v8001_v48 = vsel %vm12693_vm7, %v7748_v23, %v12692_v7  ;;  %v2113_v60 = vadd.f32 %v2112_v47, %v2111_v11  ;;  %v8008_v20 = vsel %vm12009_vm13, %v12694_v12, %v2178_v63  ;;  %v8013_v30 = vsel %vm12005_vm4, %v7911_v28, %v2173_v26  ;;  %v8018_v23 = vpop.permute.xlu1 %3044 }
 0x27b   : > { %12695 = vst [vmem:[#allocation21_spill] sm:$0xff] %v8008_v20  ;;  %12696 = vst [vmem:[#allocation108_spill] sm:$0xff] %v8013_v30  ;;  %vm2281_vm11 = vcmp.lt.s32.totalorder %v12620_v31, 16  ;;  %v1690_v40 = vmax.f32 %v7937_v14, %v7973_v41  ;;  %v8022_v52 = vadd.f32 %v2037_v49, %v2036_v6  ;;  %v2228_v11 = vrot.slane %v2227_v34, 2 }
 0x27c   : > { %v2134_v47 = vadd.f32 %v2133_v59, %v2132_v43  ;;  %v2114_v12 = vrot.slane %v2113_v60, 2  ;;  %v2325_v0 = vrot.slane %v2324_v16, 4  ;;  %v2199_v28 = vrot.slane %v8008_v20, 2  ;;  %4135 = vrot.lane.b32.xlu1 %v12565_v61, %s12707_s13 }
 0x27d   : > { %12697 = vst [vmem:[#allocation174_spill] sm:$0xff] %v8022_v52  ;;  %v2202_v26 = vrot.slane %v8013_v30, 2  ;;  %v8031_v8 = vmax.f32 %v1688_v29, %v7996_v55  ;;  %v2229_v14 = vadd.f32 %v2228_v11, %v2227_v34  ;;  %vm12698_vm7 = vcmask 588800   ;;  %4141 = vrot.lane.b32.xlu0 %v6925_v2, %s12707_s13 }
 0x27e   : > { %v2135_v6 = vrot.slane %v2134_v47, 2  ;;  %v2353_v59 = vsel %vm12698_vm7, %v7329_v35, %v7789_v58  ;;  %v2115_v49 = vadd.f32 %v2114_v12, %v2113_v60  ;;  %v2326_v43 = vadd.f32 %v2325_v0, %v2324_v16  ;;  %v8051_v12 = vpop.permute.xlu0 %1434 }
 0x27f   : > { %v2207_v63 = vmul.f32 %v2199_v28, %v12618_v62  ;;  %v2210_v7 = vmul.f32 %v2202_v26, %v12616_v25  ;;  %vm12018_vm4 = vcmp.lt.s32.totalorder %v7361_v3, 7  ;;  %v8040_v30 = vmax.f32 %v1583_v19, %v8022_v52  ;;  %v8053_v19 = vpop.permute.xlu1 %3144  ;;  %v12705_v52 = vld [vmem:[#allocation25_spill] sm:$0xff] }
 0x280   : > { %v2230_v20 = vrot.slane %v2229_v14, 1  ;;  %v2136_v29 = vadd.f32 %v2135_v6, %v2134_v47  ;;  %v8045_v34 = vsel %vm12008_vm3, %v2353_v59, %v7520_v17  ;;  %v2116_v35 = vrot.slane %v2115_v49, 1  ;;  %4139 = vrot.lane.b32.xlu1 %v6900_v13, %s12707_s13 }
 0x281   : > { %12699 = vst [vmem:[#allocation175_spill] sm:$0xff] %v8045_v34  ;;  %v2327_v60 = vrot.slane %v2326_v43, 2  ;;  %v2211_v16 = vsel %vm1447_vm2, %v2207_v63, 0.0  ;;  %v2232_v11 = vsel %vm1447_vm2, %v2210_v7, 0.0  ;;  %vm12027_vm7 = vcmp.lt.s32.totalorder %v12620_v31, 8  ;;  %v12702_v63 = vld [vmem:[#allocation20_spill] sm:$0xff]  ;;  %4145 = vrot.lane.b32.xlu0 %v12536_v36, %s12707_s13 }
 0x282   : > { %v8057_v47 = vadd.f32 %v2230_v20, %v2229_v14  ;;  %v2137_v17 = vrot.slane %v2136_v29, 1  ;;  %v2212_v0 = vrot.slane %v2211_v16, 4  ;;  %v2233_v28 = vrot.slane %v2232_v11, 4 }
 0x283   : > { %v2328_v26 = vadd.f32 %v2327_v60, %v2326_v43  ;;  %v2400_v6 = vrot.slane %v8045_v34, 2  ;;  %vm12701_vm3 = vcmask 130048   ;;  %v8067_v41 = vadd.f32 %v2116_v35, %v2115_v49  ;;  %v12709_v34 = vld [vmem:[#allocation44_spill] sm:$0xff] }
 0x284   : > { %12700 = vst [vmem:[#allocation176_spill] sm:$0xff] %v8057_v47  ;;  %v2272_v59 = vsel %vm12701_vm3, %v12566_v10, %v7791_v37  ;;  %vm12703_vm13 = vmmov %vm12701_vm3  ;;  %v2213_v20 = vadd.f32 %v2212_v0, %v2211_v16  ;;  %v2234_v14 = vadd.f32 %v2233_v28, %v2232_v11  ;;  %vm12706_vm9 = vcmask 588800   ;;  %v8100_v0 = vpop.permute.xlu1 %3531  ;;  %4143 = vrot.lane.b32.xlu1 %v12537_v46, %s12707_s13 }
 0x285   : > { %v2277_v7 = vsel %vm12703_vm13, %v7791_v37, %v12702_v63  ;;  %12704 = vst [vmem:[#allocation20_spill] sm:$0xff] %v8067_v41  ;;  %v2359_v55 = vsel %vm12706_vm9, %v7789_v58, %v12705_v52  ;;  %vm12035_vm10 = vcmp.lt.s32.totalorder %v12622_v33, 8  ;;  %v8075_v43 = vadd.f32 %v2137_v17, %v2136_v29  ;;  %v8098_v17 = vpop.permute.xlu0 %3533  ;;  %v12713_v63 = vld [vmem:[#allocation142_spill] sm:$0xff]  ;;  %4149 = vrot.lane.b32.xlu0 %v6935_v38, %s12707_s13 }
 0x286   : > { %v2329_v10 = vrot.slane %v2328_v26, 1  ;;  %v2408_v60 = vmul.f32 %v2400_v6, %v12615_v45  ;;  %v8081_v37 = vsel %vm2278_vm15, %v12709_v34, %v2277_v7  ;;  %v8086_v58 = vmax.f32 %v1690_v40, %v8057_v47  ;;  %v12724_v47 = vld [vmem:[#allocation17_spill] sm:$0xff] }
 0x287   : > { %12708 = vst [vmem:[#allocation25_spill] sm:$0xff] %v8075_v43  ;;  %12710 = vst [vmem:[#allocation44_spill] sm:$0xff] %v8081_v37  ;;  %v2214_v52 = vrot.slane %v2213_v20, 2  ;;  %v2235_v49 = vrot.slane %v2234_v14, 2  ;;  %v8091_v29 = vsel %vm2281_vm11, %v8001_v48, %v2272_v59  ;;  %v2298_v34 = vrot.slane %v8081_v37, 2 }
 0x288   : > { %12711 = vst [vmem:[#allocation177_spill] sm:$0xff] %v8091_v29  ;;  %v8093_v35 = vadd.f32 %v2329_v10, %v2328_v26  ;;  %v2424_v16 = vsel %vm1447_vm2, %v2408_v60, 0.0  ;;  %v2301_v11 = vrot.slane %v8091_v29, 2  ;;  %vm12714_vm9 = vcmask 1039360   ;;  %v12719_v29 = vld [vmem:[#allocation146_spill] sm:$0xff]  ;;  %4147 = vrot.lane.b32.xlu1 %v6931_v9, %s12707_s13 }
 0x289   : > { %v2215_v40 = vadd.f32 %v2214_v52, %v2213_v20  ;;  %v2236_v28 = vadd.f32 %v2235_v49, %v2234_v14  ;;  %v2425_v6 = vrot.slane %v2424_v16, 4  ;;  %v2489_v48 = vsel %vm12714_vm9, %v12713_v63, %v7815_v54  ;;  %v12715_v52 = vld [vmem:[#allocation120_spill] sm:$0xff]  ;;  %4171 = vrot.lane.b32.xlu0 %v6935_v38, %s12366_s12 }
 0x28a   : > { %12712 = vst [vmem:[#allocation178_spill] sm:$0xff] %v8093_v35  ;;  %vm12033_vm13 = vcmp.lt.s32.totalorder %v7361_v3, 6  ;;  %v1939_v26 = vmax.f32 %v8031_v8, %v8067_v41  ;;  %v1655_v59 = vmax.f32 %v8040_v30, %v8075_v43  ;;  %v2306_v7 = vmul.f32 %v2298_v34, %v12618_v62  ;;  %v12717_v34 = vld [vmem:[#allocation135_spill] sm:$0xff]  ;;  %v12726_v41 = vld [vmem:[#allocation29_spill] sm:$0xff] }
 0x28b   : > { %v2309_v20 = vmul.f32 %v2301_v11, %v12616_v25  ;;  %v2216_v14 = vrot.slane %v2215_v40, 1  ;;  %v2237_v10 = vrot.slane %v2236_v28, 1  ;;  %v2426_v60 = vadd.f32 %v2425_v6, %v2424_v16 }
 0x28c   : > { %v8119_v49 = vsel %vm12018_vm4, %v2489_v48, %v12715_v52  ;;  %v2310_v8 = vsel %vm1447_vm2, %v2306_v7, 0.0  ;;  %vm12718_vm3 = vcmask 64512   ;;  %vm12036_vm9 = vcmp.lt.s32.totalorder %v12719_v29, 7  ;;  %v12721_v52 = vld [vmem:[#allocation24_spill] sm:$0xff]  ;;  %4169 = vrot.lane.b32.xlu1 %v6925_v2, %s12366_s12 }
 0x28d   : > { %12716 = vst [vmem:[#allocation142_spill] sm:$0xff] %v8119_v49  ;;  %v2331_v63 = vsel %vm1447_vm2, %v2309_v20, 0.0  ;;  %v2584_v30 = vrot.slane %v8119_v49, 2  ;;  %v2372_v11 = vsel %vm12718_vm3, %v12717_v34, %v7824_v24  ;;  %v8130_v6 = vadd.f32 %v2216_v14, %v2215_v40  ;;  %vm12722_vm4 = vmmov %vm12718_vm3  ;;  %v8143_v40 = vpop.permute.xlu0 %3577  ;;  %v8145_v14 = vpop.permute.xlu1 %3571  ;;  %4177 = vrot.lane.b32.xlu0 %v12563_v56, %s12366_s12 }
 0x28e   : > { %v2427_v37 = vrot.slane %v2426_v60, 2  ;;  %v2311_v48 = vrot.slane %v2310_v8, 4  ;;  %v2332_v7 = vrot.slane %v2331_v63, 4  ;;  %v2377_v49 = vsel %vm12722_vm4, %v7824_v24, %v12721_v52 }
 0x28f   : > { %12720 = vst [vmem:[#allocation120_spill] sm:$0xff] %v8130_v6  ;;  %v2592_v20 = vmul.f32 %v2584_v30, %v12615_v45  ;;  %v8140_v34 = vsel %vm12027_vm7, %v2359_v55, %v2372_v11  ;;  %vm12039_vm3 = vcmp.lt.s32.totalorder %v12724_v47, 7  ;;  %v8149_v16 = vadd.f32 %v2237_v10, %v2236_v28  ;;  %v12728_v11 = vld [vmem:[#allocation45_spill] sm:$0xff] }
 0x290   : > { %12723 = vst [vmem:[#allocation135_spill] sm:$0xff] %v8140_v34  ;;  %v2428_v30 = vadd.f32 %v2427_v37, %v2426_v60  ;;  %v2312_v43 = vadd.f32 %v2311_v48, %v2310_v8  ;;  %vm12727_vm4 = vcmask 1039360   ;;  %v2333_v52 = vadd.f32 %v2332_v7, %v2331_v63  ;;  %v12730_v60 = vld [vmem:[#allocation145_spill] sm:$0xff]  ;;  %4175 = vrot.lane.b32.xlu1 %v12565_v61, %s12366_s12 }
 0x291   : > { %12725 = vst [vmem:[#allocation24_spill] sm:$0xff] %v8149_v16  ;;  %v2495_v24 = vsel %vm12727_vm4, %v7815_v54, %v12726_v41  ;;  %v2608_v55 = vsel %vm1447_vm2, %v2592_v20, 0.0  ;;  %v8158_v4 = vsel %vm12035_vm10, %v12728_v11, %v2377_v49  ;;  %v2401_v44 = vrot.slane %v8140_v34, 2  ;;  %4181 = vrot.lane.b32.xlu0 %v12537_v46, %s12366_s12 }
 0x292   : > { %12729 = vst [vmem:[#allocation29_spill] sm:$0xff] %v8158_v4  ;;  %v2429_v22 = vrot.slane %v2428_v30, 1  ;;  %v2313_v31 = vrot.slane %v2312_v43, 2  ;;  %v2609_v28 = vrot.slane %v2608_v55, 4  ;;  %v2398_v37 = vrot.slane %v8158_v4, 2 }
 0x293   : > { %v8165_v54 = vmax.f32 %v1939_v26, %v8130_v6  ;;  %v2334_v41 = vrot.slane %v2333_v52, 2  ;;  %v2409_v10 = vmul.f32 %v2401_v44, %v12616_v25  ;;  %vm12731_vm4 = vcmask 1031168   ;;  %v12732_v44 = vld [vmem:[#allocation59_spill] sm:$0xff] }
 0x294   : > { %v2637_v49 = vsel %vm12731_vm4, %v12730_v60, %v7841_v32  ;;  %v8174_v8 = vmax.f32 %v1655_v59, %v8149_v16  ;;  %v2314_v63 = vadd.f32 %v2313_v31, %v2312_v43  ;;  %v2610_v48 = vadd.f32 %v2609_v28, %v2608_v55  ;;  %v12734_v60 = vld [vmem:[#allocation141_spill] sm:$0xff]  ;;  %v8187_v59 = vpop.permute.xlu0 %3541  ;;  %v8189_v31 = vpop.permute.xlu1 %3561  ;;  %4179 = vrot.lane.b32.xlu1 %v6900_v13, %s12366_s12 }
 0x295   : > { %v2406_v7 = vmul.f32 %v2398_v37, %v12618_v62  ;;  %vm12040_vm7 = vcmp.lt.s32.totalorder %v7361_v3, 5  ;;  %v2335_v26 = vadd.f32 %v2334_v41, %v2333_v52  ;;  %v2431_v20 = vsel %vm1447_vm2, %v2409_v10, 0.0  ;;  %4185 = vrot.lane.b32.xlu0 %v6931_v9, %s12366_s12 }
 0x296   : > { %v8182_v11 = vsel %vm12033_vm13, %v2637_v49, %v12732_v44  ;;  %v2508_v34 = vsel %vm12044_vm0, %v12734_v60, %v7847_v53  ;;  %v8191_v43 = vadd.f32 %v2429_v22, %v2428_v30  ;;  %v2315_v55 = vrot.slane %v2314_v63, 1  ;;  %v12737_v30 = vld [vmem:[#allocation28_spill] sm:$0xff] }
 0x297   : > { %12733 = vst [vmem:[#allocation45_spill] sm:$0xff] %v8182_v11  ;;  %v2611_v28 = vrot.slane %v2610_v48, 2  ;;  %v2410_v52 = vsel %vm1447_vm2, %v2406_v7, 0.0  ;;  %v2336_v37 = vrot.slane %v2335_v26, 1  ;;  %v2432_v10 = vrot.slane %v2431_v20, 4 }
 0x298   : > { %12735 = vst [vmem:[#allocation145_spill] sm:$0xff] %v8191_v43  ;;  %v2411_v41 = vrot.slane %v2410_v52, 4  ;;  %v2684_v49 = vrot.slane %v8182_v11, 2  ;;  %vm2665_vm4 = vcmp.lt.s32.totalorder %v12719_v29, 6  ;;  %v8200_v44 = vadd.f32 %v2315_v55, %v2314_v63  ;;  %v12740_v63 = vld [vmem:[#allocation31_spill] sm:$0xff]  ;;  %v12742_v55 = vld [vmem:[#allocation49_spill] sm:$0xff]  ;;  %4183 = vrot.lane.b32.xlu1 %v12536_v36, %s12366_s12 }
 0x299   : > { %v2612_v22 = vadd.f32 %v2611_v28, %v2610_v48  ;;  %v2513_v7 = vsel %vm12044_vm0, %v7847_v53, %v12737_v30  ;;  %v8207_v60 = vsel %vm12036_vm9, %v2495_v24, %v2508_v34  ;;  %v8209_v4 = vadd.f32 %v2336_v37, %v2335_v26  ;;  %v8233_v37 = vpop.permute.xlu1 %3287  ;;  %4289 = vrot.lane.b32.xlu0 %v12563_v56, %s12365_s15 }
 0x29a   : > { %12736 = vst [vmem:[#allocation59_spill] sm:$0xff] %v8200_v44  ;;  %12738 = vst [vmem:[#allocation141_spill] sm:$0xff] %v8207_v60  ;;  %v2412_v16 = vadd.f32 %v2411_v41, %v2410_v52  ;;  %v2433_v11 = vadd.f32 %v2432_v10, %v2431_v20  ;;  %v2692_v6 = vmul.f32 %v2684_v49, %v12615_v45  ;;  %vm2662_vm13 = vcmp.lt.s32.totalorder %v12724_v47, 6  ;;  %v8231_v52 = vpop.permute.xlu0 %3563 }
 0x29b   : > { %12739 = vst [vmem:[#allocation28_spill] sm:$0xff] %v8209_v4  ;;  %v2613_v33 = vrot.slane %v2612_v22, 1  ;;  %vm12741_vm10 = vcmask 1031168   ;;  %v8219_v53 = vsel %vm12039_vm3, %v12742_v55, %v2513_v7  ;;  %v2585_v34 = vrot.slane %v8207_v60, 2 }
 0x29c   : > { %v2643_v48 = vsel %vm12741_vm10, %v7841_v32, %v12740_v63  ;;  %12743 = vst [vmem:[#allocation31_spill] sm:$0xff] %v8219_v53  ;;  %v12744_v24 = vmax.f32 %v8086_v58, %v8093_v35  ;;  %v2413_v20 = vrot.slane %v2412_v16, 2  ;;  %v2434_v28 = vrot.slane %v2433_v11, 2  ;;  %v12745_v63 = vld [vmem:[#allocation151_spill] sm:$0xff]  ;;  %4287 = vrot.lane.b32.xlu1 %v12565_v61, %s12365_s15  ;;  %v12767_v35 = vld [vmem:[#allocation32_spill] sm:$0xff] }
 0x29d   : > { %v2708_v32 = vsel %vm1447_vm2, %v2692_v6, 0.0  ;;  %v2139_v41 = vmax.f32 %v8165_v54, %v8200_v44  ;;  %v2582_v49 = vrot.slane %v8219_v53, 2  ;;  %v2593_v58 = vmul.f32 %v2585_v34, %v12616_v25  ;;  %4293 = vrot.lane.b32.xlu0 %v6925_v2, %s12365_s15 }
 0x29e   : > { %v8228_v26 = vmax.f32 %v12744_v24, %v8191_v43  ;;  %v2709_v10 = vrot.slane %v2708_v32, 4  ;;  %v1842_v30 = vmax.f32 %v8174_v8, %v8209_v4  ;;  %v2414_v7 = vadd.f32 %v2413_v20, %v2412_v16  ;;  %v8273_v43 = vpop.permute.xlu1 %3539  ;;  %v12754_v4 = vld [vmem:[#allocation30_spill] sm:$0xff] }
 0x29f   : > { %v2435_v6 = vadd.f32 %v2434_v28, %v2433_v11  ;;  %vm12746_vm10 = vcmask 1022976   ;;  %vm12051_vm9 = vcmp.lt.s32.totalorder %v7361_v3, 4  ;;  %v8247_v24 = vadd.f32 %v2613_v33, %v2612_v22  ;;  %v12748_v11 = vld [vmem:[#allocation56_spill] sm:$0xff] }
 0x2a0   : > { %v2737_v55 = vsel %vm12746_vm10, %v12745_v63, %v7870_v42  ;;  %v2710_v60 = vadd.f32 %v2709_v10, %v2708_v32  ;;  %v2590_v54 = vmul.f32 %v2582_v49, %v12618_v62  ;;  %v2615_v53 = vsel %vm1447_vm2, %v2593_v58, 0.0  ;;  %v12750_v32 = vld [vmem:[#allocation13_spill] sm:$0xff]  ;;  %4291 = vrot.lane.b32.xlu1 %v6900_v13, %s12365_s15 }
 0x2a1   : > { %12747 = vst [vmem:[#allocation49_spill] sm:$0xff] %v8247_v24  ;;  %v2415_v34 = vrot.slane %v2414_v7, 1  ;;  %v2436_v8 = vrot.slane %v2435_v6, 1  ;;  %v2616_v16 = vrot.slane %v2615_v53, 4  ;;  %v8256_v20 = vsel %vm12040_vm7, %v2737_v55, %v12748_v11  ;;  %v8271_v11 = vpop.permute.xlu0 %3289  ;;  %4297 = vrot.lane.b32.xlu0 %v12536_v36, %s12365_s15 }
 0x2a2   : > { %12749 = vst [vmem:[#allocation151_spill] sm:$0xff] %v8256_v20  ;;  %v2711_v33 = vrot.slane %v2710_v60, 2  ;;  %v2594_v22 = vsel %vm1447_vm2, %v2590_v54, 0.0  ;;  %v2784_v28 = vrot.slane %v8256_v20, 2  ;;  %vm12751_vm10 = vcmask 48128  }
 0x2a3   : > { %v2656_v10 = vsel %vm12751_vm10, %v12750_v32, %v7874_v5  ;;  %vm2762_vm3 = vcmp.lt.s32.totalorder %v12724_v47, 5  ;;  %v8266_v49 = vadd.f32 %v2415_v34, %v2414_v7  ;;  %v8268_v58 = vadd.f32 %v2436_v8, %v2435_v6  ;;  %v12756_v8 = vld [vmem:[#allocation33_spill] sm:$0xff] }
 0x2a4   : > { %v2595_v63 = vrot.slane %v2594_v22, 4  ;;  %v2617_v55 = vadd.f32 %v2616_v16, %v2615_v53  ;;  %vm12063_vm7 = vcmp.lt.s32.totalorder %v12719_v29, 5  ;;  %v2712_v54 = vadd.f32 %v2711_v33, %v2710_v60  ;;  %4295 = vrot.lane.b32.xlu1 %v12537_v46, %s12365_s15 }
 0x2a5   : > { %12752 = vst [vmem:[#allocation56_spill] sm:$0xff] %v8266_v49  ;;  %12753 = vst [vmem:[#allocation13_spill] sm:$0xff] %v8268_v58  ;;  %v2792_v20 = vmul.f32 %v2784_v28, %v12615_v45  ;;  %v2661_v32 = vsel %vm12751_vm10, %v7874_v5, %v12754_v4  ;;  %v8281_v7 = vsel %vm2665_vm4, %v2643_v48, %v2656_v10  ;;  %vm12757_vm0 = vcmask 1022976   ;;  %v12758_v48 = vld [vmem:[#allocation51_spill] sm:$0xff]  ;;  %4301 = vrot.lane.b32.xlu0 %v6935_v38, %s12365_s15 }
 0x2a6   : > { %12755 = vst [vmem:[#allocation30_spill] sm:$0xff] %v8281_v7  ;;  %v2141_v53 = vmax.f32 %v8228_v26, %v8247_v24  ;;  %v2596_v6 = vadd.f32 %v2595_v63, %v2594_v22  ;;  %v2618_v34 = vrot.slane %v2617_v55, 2  ;;  %v2743_v60 = vsel %vm12757_vm0, %v7870_v42, %v12756_v8 }
 0x2a7   : > { %v2713_v4 = vrot.slane %v2712_v54, 1  ;;  %v2808_v5 = vsel %vm1447_vm2, %v2792_v20, 0.0  ;;  %v8296_v16 = vsel %vm2662_vm13, %v12758_v48, %v2661_v32  ;;  %v2685_v33 = vrot.slane %v8281_v7, 2  ;;  %v12760_v32 = vld [vmem:[#allocation156_spill] sm:$0xff] }
 0x2a8   : > { %12759 = vst [vmem:[#allocation33_spill] sm:$0xff] %v8296_v16  ;;  %v2597_v26 = vrot.slane %v2596_v6, 2  ;;  %v2619_v22 = vadd.f32 %v2618_v34, %v2617_v55  ;;  %v2809_v28 = vrot.slane %v2808_v5, 4  ;;  %v2682_v10 = vrot.slane %v8296_v16, 2  ;;  %v8314_v16 = vpop.permute.xlu0 %3293  ;;  %4299 = vrot.lane.b32.xlu1 %v6931_v9, %s12365_s15 }
 0x2a9   : > { %vm12062_vm0 = vcmp.lt.s32.totalorder %v7361_v3, 3  ;;  %v8302_v42 = vmax.f32 %v2139_v41, %v8266_v49  ;;  %v8305_v63 = vmax.f32 %v1842_v30, %v8268_v58  ;;  %v2693_v20 = vmul.f32 %v2685_v33, %v12616_v25  ;;  %v8316_v41 = vpop.permute.xlu1 %3291  ;;  %v12766_v58 = vld [vmem:[#allocation150_spill] sm:$0xff]  ;;  %4323 = vrot.lane.b32.xlu0 %v6935_v38, %s12371_s19 }
 0x2aa   : > { %v2837_v8 = vsel %vm12054_vm14, %v12760_v32, %v7898_v50  ;;  %v2598_v55 = vadd.f32 %v2597_v26, %v2596_v6  ;;  %v2620_v34 = vrot.slane %v2619_v22, 1  ;;  %v2810_v48 = vadd.f32 %v2809_v28, %v2808_v5  ;;  %12761 = vst [vmem:[#allocation51_spill] sm:$0xff] %v8316_v41  ;;  %v12763_v32 = vld [vmem:[#allocation35_spill] sm:$0xff]  ;;  %v12764_v6 = vld [vmem:[#allocation58_spill] sm:$0xff] }
 0x2ab   : > { %v2690_v7 = vmul.f32 %v2682_v10, %v12618_v62  ;;  %v8320_v30 = vadd.f32 %v2713_v4, %v2712_v54  ;;  %v2715_v33 = vsel %vm1447_vm2, %v2693_v20, 0.0  ;;  %v8326_v24 = vsel %vm12054_vm14, %v7898_v50, %v12763_v32  ;;  %v12770_v32 = vld [vmem:[#allocation53_spill] sm:$0xff] }
 0x2ac   : > { %v8331_v5 = vsel %vm12051_vm9, %v2837_v8, %v12764_v6  ;;  %v2599_v26 = vrot.slane %v2598_v55, 1  ;;  %v2811_v28 = vrot.slane %v2810_v48, 2  ;;  %v2756_v54 = vsel %vm2753_vm1, %v12766_v58, %v7913_v1  ;;  %4321 = vrot.lane.b32.xlu1 %v6925_v2, %s12371_s19 }
 0x2ad   : > { %12762 = vst [vmem:[#allocation156_spill] sm:$0xff] %v8320_v30  ;;  %12765 = vst [vmem:[#allocation35_spill] sm:$0xff] %v8331_v5  ;;  %v2694_v10 = vsel %vm1447_vm2, %v2690_v7, 0.0  ;;  %v2716_v20 = vrot.slane %v2715_v33, 4  ;;  %v2884_v49 = vrot.slane %v8331_v5, 2  ;;  %v2761_v50 = vsel %vm2753_vm1, %v7913_v1, %v12767_v35  ;;  %4329 = vrot.lane.b32.xlu0 %v12563_v56, %s12371_s19 }
 0x2ae   : > { %v2695_v4 = vrot.slane %v2694_v10, 4  ;;  %vm2862_vm10 = vcmp.lt.s32.totalorder %v12724_v47, 4  ;;  %vm12070_vm9 = vcmp.lt.s32.totalorder %v12719_v29, 4  ;;  %v8345_v7 = vadd.f32 %v2599_v26, %v2598_v55  ;;  %v8366_v26 = vpop.permute.xlu0 %3685 }
 0x2af   : > { %v8347_v8 = vadd.f32 %v2620_v34, %v2619_v22  ;;  %v2812_v58 = vadd.f32 %v2811_v28, %v2810_v48  ;;  %v8352_v6 = vsel %vm2762_vm3, %v12770_v32, %v2761_v50  ;;  %v2717_v35 = vadd.f32 %v2716_v20, %v2715_v33  ;;  %12773 = vst [vmem:[#allocation179_spill] sm:$0xff] %v8366_v26  ;;  %v8368_v28 = vpop.permute.xlu1 %3683 }
 0x2b0   : > { %12768 = vst [vmem:[#allocation58_spill] sm:$0xff] %v8345_v7  ;;  %12771 = vst [vmem:[#allocation32_spill] sm:$0xff] %v8352_v6  ;;  %v2696_v1 = vadd.f32 %v2695_v4, %v2694_v10  ;;  %v2892_v5 = vmul.f32 %v2884_v49, %v12615_v45  ;;  %v8359_v44 = vsel %vm12063_vm7, %v2743_v60, %v2756_v54  ;;  %v2782_v34 = vrot.slane %v8352_v6, 2  ;;  %v12775_v4 = vld [vmem:[#allocation47_spill] sm:$0xff] }
 0x2b1   : > { %12769 = vst [vmem:[#allocation150_spill] sm:$0xff] %v8347_v8  ;;  %12772 = vst [vmem:[#allocation53_spill] sm:$0xff] %v8359_v44  ;;  %v8362_v22 = vmax.f32 %v2141_v53, %v8320_v30  ;;  %v2813_v55 = vrot.slane %v2812_v58, 1  ;;  %v2785_v48 = vrot.slane %v8359_v44, 2  ;;  %v2718_v33 = vrot.slane %v2717_v35, 2  ;;  %v12776_v44 = vld [vmem:[#allocation60_spill] sm:$0xff]  ;;  %4327 = vrot.lane.b32.xlu1 %v12565_v61, %s12371_s19  ;;  %4333 = vrot.lane.b32.xlu0 %v12537_v46, %s12371_s19 }
 0x2b2   : > { %12774 = vst [vmem:[#allocation180_spill] sm:$0xff] %v8368_v28  ;;  %v2697_v10 = vrot.slane %v2696_v1, 2  ;;  %v2908_v49 = vsel %vm1447_vm2, %v2892_v5, 0.0  ;;  %v2937_v60 = vsel %vm12065_vm5, %v12775_v4, %v7939_v27  ;;  %v2042_v53 = vmax.f32 %v8305_v63, %v8347_v8 }
 0x2b3   : > { %v2909_v54 = vrot.slane %v2908_v49, 4  ;;  %v2790_v20 = vmul.f32 %v2782_v34, %v12618_v62  ;;  %v2793_v50 = vmul.f32 %v2785_v48, %v12616_v25  ;;  %vm12067_vm14 = vcmp.lt.s32.totalorder %v7361_v3, 2 }
 0x2b4   : > { %v2338_v5 = vmax.f32 %v8302_v42, %v8345_v7  ;;  %v2698_v32 = vadd.f32 %v2697_v10, %v2696_v1  ;;  %v2719_v4 = vadd.f32 %v2718_v33, %v2717_v35  ;;  %v8388_v6 = vsel %vm12062_vm0, %v2937_v60, %v12776_v44  ;;  %v12779_v44 = vld [vmem:[#allocation155_spill] sm:$0xff]  ;;  %v12780_v35 = vld [vmem:[#allocation34_spill] sm:$0xff]  ;;  %v8403_v10 = vpop.permute.xlu0 %3689  ;;  %v8405_v33 = vpop.permute.xlu1 %3687 }
 0x2b5   : > { %12777 = vst [vmem:[#allocation47_spill] sm:$0xff] %v8388_v6  ;;  %v8390_v63 = vadd.f32 %v2813_v55, %v2812_v58  ;;  %v2910_v34 = vadd.f32 %v2909_v54, %v2908_v49  ;;  %v2794_v48 = vsel %vm1447_vm2, %v2790_v20, 0.0  ;;  %v2815_v30 = vsel %vm1447_vm2, %v2793_v50, 0.0  ;;  %12781 = vst [vmem:[#allocation155_spill] sm:$0xff] %v8403_v10  ;;  %v12784_v20 = vld [vmem:[#allocation37_spill] sm:$0xff]  ;;  %4331 = vrot.lane.b32.xlu1 %v6900_v13, %s12371_s19  ;;  %v12819_v7 = vld [vmem:[#allocation118_spill] sm:$0xff] }
 0x2b6   : > { %v2699_v8 = vrot.slane %v2698_v32, 1  ;;  %v2720_v28 = vrot.slane %v2719_v4, 1  ;;  %v2795_v26 = vrot.slane %v2794_v48, 4  ;;  %v2816_v41 = vrot.slane %v2815_v30, 4  ;;  %12782 = vst [vmem:[#allocation34_spill] sm:$0xff] %v8405_v33  ;;  %4337 = vrot.lane.b32.xlu0 %v6931_v9, %s12371_s19 }
 0x2b7   : > { %12778 = vst [vmem:[#allocation60_spill] sm:$0xff] %v8390_v63  ;;  %v2911_v42 = vrot.slane %v2910_v34, 2  ;;  %v2984_v1 = vrot.slane %v8388_v6, 2  ;;  %v2856_v58 = vsel %vm2853_vm8, %v12779_v44, %v7954_v39  ;;  %v2861_v55 = vsel %vm2853_vm8, %v7954_v39, %v12780_v35  ;;  %v12785_v35 = vld [vmem:[#allocation114_spill] sm:$0xff] }
 0x2b8   : > { %v8409_v49 = vadd.f32 %v2699_v8, %v2698_v32  ;;  %v2796_v60 = vadd.f32 %v2795_v26, %v2794_v48  ;;  %v2817_v54 = vadd.f32 %v2816_v41, %v2815_v30  ;;  %v2943_v50 = vsel %vm12065_vm5, %v7939_v27, %v12784_v20 }
 0x2b9   : > { %vm2962_vm0 = vcmp.lt.s32.totalorder %v12724_v47, 3  ;;  %vm2965_vm7 = vcmp.lt.s32.totalorder %v12719_v29, 3  ;;  %v2912_v39 = vadd.f32 %v2911_v42, %v2910_v34  ;;  %v2992_v44 = vmul.f32 %v2984_v1, %v12615_v45  ;;  %4335 = vrot.lane.b32.xlu1 %v12536_v36, %s12371_s19 }
 0x2ba   : > { %12783 = vst [vmem:[#allocation181_spill] sm:$0xff] %v8409_v49  ;;  %v8420_v6 = vsel %vm2862_vm10, %v12785_v35, %v2861_v55  ;;  %v8425_v41 = vsel %vm12070_vm9, %v8326_v24, %v2856_v58  ;;  %v2340_v27 = vmax.f32 %v8362_v22, %v8390_v63  ;;  %v8429_v30 = vadd.f32 %v2720_v28, %v2719_v4  ;;  %v12789_v28 = vld [vmem:[#allocation158_spill] sm:$0xff]  ;;  %v8449_v35 = vpop.permute.xlu0 %3693 }
 0x2bb   : > { %12786 = vst [vmem:[#allocation37_spill] sm:$0xff] %v8420_v6  ;;  %12787 = vst [vmem:[#allocation114_spill] sm:$0xff] %v8425_v41  ;;  %v2797_v8 = vrot.slane %v2796_v60, 2  ;;  %v2818_v26 = vrot.slane %v2817_v54, 2  ;;  %v2913_v32 = vrot.slane %v2912_v39, 1  ;;  %v3008_v34 = vsel %vm1447_vm2, %v2992_v44, 0.0  ;;  %4441 = vrot.lane.b32.xlu0 %v12563_v56, %s12341_s16 }
 0x2bc   : > { %12788 = vst [vmem:[#allocation182_spill] sm:$0xff] %v8429_v30  ;;  %v2882_v48 = vrot.slane %v8420_v6, 2  ;;  %v2885_v42 = vrot.slane %v8425_v41, 2  ;;  %v3009_v22 = vrot.slane %v3008_v34, 4  ;;  %v3037_v4 = vsel %vm12075_vm6, %v12789_v28, %v7976_v15  ;;  %12791 = vst [vmem:[#allocation183_spill] sm:$0xff] %v8449_v35  ;;  %v12793_v41 = vld [vmem:[#allocation62_spill] sm:$0xff] }
 0x2bd   : > { %v2798_v24 = vadd.f32 %v2797_v8, %v2796_v60  ;;  %v2819_v1 = vadd.f32 %v2818_v26, %v2817_v54  ;;  %vm12081_vm5 = vcmp.lt.s32.totalorder %v7361_v3, 1  ;;  %v8443_v58 = vmax.f32 %v2338_v5, %v8409_v49  ;;  %v8451_v60 = vpop.permute.xlu1 %3691  ;;  %v12798_v6 = vld [vmem:[#allocation36_spill] sm:$0xff]  ;;  %v12817_v3 = vld [vmem:[#allocation41_spill] sm:$0xff]  ;;  %4439 = vrot.lane.b32.xlu1 %v12565_v61, %s12341_s16 }
 0x2be   : > { %v8445_v55 = vadd.f32 %v2913_v32, %v2912_v39  ;;  %v2890_v20 = vmul.f32 %v2882_v48, %v12618_v62  ;;  %v2893_v44 = vmul.f32 %v2885_v42, %v12616_v25  ;;  %12792 = vst [vmem:[#allocation184_spill] sm:$0xff] %v8451_v60  ;;  %v3010_v26 = vadd.f32 %v3009_v22, %v3008_v34  ;;  %v12796_v22 = vld [vmem:[#allocation39_spill] sm:$0xff] }
 0x2bf   : > { %v2799_v54 = vrot.slane %v2798_v24, 1  ;;  %v2820_v8 = vrot.slane %v2819_v1, 1  ;;  %v8456_v28 = vsel %vm12067_vm14, %v3037_v4, %v12793_v41  ;;  %v8461_v5 = vmax.f32 %v2042_v53, %v8429_v30  ;;  %4445 = vrot.lane.b32.xlu0 %v6925_v2, %s12341_s16 }
 0x2c0   : > { %12790 = vst [vmem:[#allocation158_spill] sm:$0xff] %v8445_v55  ;;  %12794 = vst [vmem:[#allocation62_spill] sm:$0xff] %v8456_v28  ;;  %v2894_v39 = vsel %vm1447_vm2, %v2890_v20, 0.0  ;;  %v2915_v32 = vsel %vm1447_vm2, %v2893_v44, 0.0  ;;  %v3084_v48 = vrot.slane %v8456_v28, 2  ;;  %v3011_v42 = vrot.slane %v3010_v26, 2 }
 0x2c1   : > { %v8468_v34 = vadd.f32 %v2799_v54, %v2798_v24  ;;  %v2895_v41 = vrot.slane %v2894_v39, 4  ;;  %v3043_v4 = vsel %vm12075_vm6, %v7976_v15, %v12796_v22  ;;  %vm12118_vm14 = vcmp.lt.s32.totalorder %v12724_v47, 2  ;;  %v12797_v44 = vld [vmem:[#allocation127_spill] sm:$0xff]  ;;  %4443 = vrot.lane.b32.xlu1 %v6900_v13, %s12341_s16 }
 0x2c2   : > { %v2916_v53 = vrot.slane %v2915_v32, 4  ;;  %v3092_v20 = vmul.f32 %v3084_v48, %v12615_v45  ;;  %v2956_v28 = vsel %vm2953_vm12, %v12797_v44, %v7984_v18  ;;  %v2961_v24 = vsel %vm2953_vm12, %v7984_v18, %v12798_v6  ;;  %v12800_v44 = vld [vmem:[#allocation115_spill] sm:$0xff]  ;;  %v8499_v6 = vpop.permute.xlu0 %3715 }
 0x2c3   : > { %12795 = vst [vmem:[#allocation185_spill] sm:$0xff] %v8468_v34  ;;  %vm12116_vm9 = vcmp.lt.s32.totalorder %v12719_v29, 2  ;;  %v8483_v54 = vmax.f32 %v2340_v27, %v8445_v55  ;;  %v8485_v63 = vadd.f32 %v2820_v8, %v2819_v1  ;;  %v3012_v15 = vadd.f32 %v3011_v42, %v3010_v26  ;;  %12803 = vst [vmem:[#allocation115_spill] sm:$0xff] %v8499_v6  ;;  %v8501_v27 = vpop.permute.xlu1 %3713 }
 0x2c4   : > { %v2896_v22 = vadd.f32 %v2895_v41, %v2894_v39  ;;  %v2917_v48 = vadd.f32 %v2916_v53, %v2915_v32  ;;  %v3108_v30 = vsel %vm1447_vm2, %v3092_v20, 0.0  ;;  %v8493_v49 = vsel %vm2962_vm0, %v12800_v44, %v2961_v24  ;;  %12804 = vst [vmem:[#allocation186_spill] sm:$0xff] %v8501_v27  ;;  %4449 = vrot.lane.b32.xlu0 %v12536_v36, %s12341_s16 }
 0x2c5   : > { %12799 = vst [vmem:[#allocation39_spill] sm:$0xff] %v8485_v63  ;;  %12801 = vst [vmem:[#allocation127_spill] sm:$0xff] %v8493_v49  ;;  %v8497_v18 = vsel %vm2965_vm7, %v2943_v50, %v2956_v28  ;;  %v3013_v1 = vrot.slane %v3012_v15, 1  ;;  %v3109_v26 = vrot.slane %v3108_v30, 4  ;;  %v2982_v39 = vrot.slane %v8493_v49, 2  ;;  %v12805_v50 = vld [vmem:[#allocation161_spill] sm:$0xff]  ;;  %4447 = vrot.lane.b32.xlu1 %v12537_v46, %s12341_s16 }
 0x2c6   : > { %12802 = vst [vmem:[#allocation36_spill] sm:$0xff] %v8497_v18  ;;  %v2897_v8 = vrot.slane %v2896_v22, 2  ;;  %v2474_v32 = vmax.f32 %v8443_v58, %v8468_v34  ;;  %v2918_v42 = vrot.slane %v2917_v48, 2  ;;  %v2985_v41 = vrot.slane %v8497_v18, 2  ;;  %v12808_v18 = vld [vmem:[#allocation68_spill] sm:$0xff] }
 0x2c7   : > { %vm12806_vm6 = vcmask 990208   ;;  %v2242_v53 = vmax.f32 %v8461_v5, %v8485_v63  ;;  %v3110_v24 = vadd.f32 %v3109_v26, %v3108_v30  ;;  %v2990_v44 = vmul.f32 %v2982_v39, %v12618_v62  ;;  %v12815_v63 = vld [vmem:[#allocation38_spill] sm:$0xff] }
 0x2c8   : > { %v3137_v28 = vsel %vm12806_vm6, %v12805_v50, %v8016_v51  ;;  %v2898_v20 = vadd.f32 %v2897_v8, %v2896_v22  ;;  %v8517_v49 = vadd.f32 %v3013_v1, %v3012_v15  ;;  %v2919_v58 = vadd.f32 %v2918_v42, %v2917_v48  ;;  %v12810_v8 = vld [vmem:[#allocation52_spill] sm:$0xff]  ;;  %v8533_v42 = vpop.permute.xlu0 %3721  ;;  %4453 = vrot.lane.b32.xlu0 %v6935_v38, %s12341_s16 }
 0x2c9   : > { %v2993_v55 = vmul.f32 %v2985_v41, %v12616_v25  ;;  %v8523_v34 = vsel %vm12081_vm5, %v3137_v28, %v12808_v18  ;;  %v3111_v30 = vrot.slane %v3110_v24, 2  ;;  %v2994_v22 = vsel %vm1447_vm2, %v2990_v44, 0.0  ;;  %12812 = vst [vmem:[#allocation52_spill] sm:$0xff] %v8533_v42  ;;  %v8535_v18 = vpop.permute.xlu1 %3719  ;;  %4451 = vrot.lane.b32.xlu1 %v6931_v9, %s12341_s16 }
 0x2ca   : > { %12807 = vst [vmem:[#allocation161_spill] sm:$0xff] %v8517_v49  ;;  %12809 = vst [vmem:[#allocation68_spill] sm:$0xff] %v8523_v34  ;;  %v2899_v5 = vrot.slane %v2898_v20, 1  ;;  %vm12811_vm6 = vcmask 15360   ;;  %v2920_v1 = vrot.slane %v2919_v58, 1  ;;  %v2995_v48 = vrot.slane %v2994_v22, 4 }
 0x2cb   : > { %v3056_v15 = vsel %vm12811_vm6, %v12810_v8, %v8018_v23  ;;  %v3015_v26 = vsel %vm1447_vm2, %v2993_v55, 0.0  ;;  %v3184_v39 = vrot.slane %v8523_v34, 2  ;;  %12813 = vst [vmem:[#allocation187_spill] sm:$0xff] %v8535_v18  ;;  %v3112_v50 = vadd.f32 %v3111_v30, %v3110_v24  ;;  %vm12816_vm5 = vmmov %vm12811_vm6 }
 0x2cc   : > { %v8537_v41 = vadd.f32 %v2899_v5, %v2898_v20  ;;  %v3016_v28 = vrot.slane %v3015_v26, 4  ;;  %v3061_v44 = vsel %vm12816_vm5, %v8018_v23, %v12815_v63  ;;  %v2996_v8 = vadd.f32 %v2995_v48, %v2994_v22  ;;  %4475 = vrot.lane.b32.xlu0 %v6935_v38, %s12340_s14 }
 0x2cd   : > { %vm12818_vm6 = vcmask 990208   ;;  %v3192_v34 = vmul.f32 %v3184_v39, %v12615_v45  ;;  %v8553_v20 = vsel %vm12118_vm14, %v12819_v7, %v3061_v44  ;;  %v8557_v23 = vadd.f32 %v2920_v1, %v2919_v58  ;;  %v8578_v39 = vpop.permute.xlu0 %3725  ;;  %4473 = vrot.lane.b32.xlu1 %v6925_v2, %s12340_s14 }
 0x2ce   : > { %12814 = vst [vmem:[#allocation188_spill] sm:$0xff] %v8537_v41  ;;  %v8547_v55 = vsel %vm12818_vm6, %v8016_v51, %v12817_v3  ;;  %12820 = vst [vmem:[#allocation38_spill] sm:$0xff] %v8553_v20  ;;  %v3113_v63 = vrot.slane %v3112_v50, 1  ;;  %v3017_v24 = vadd.f32 %v3016_v28, %v3015_v26  ;;  %v8561_v5 = vsel %vm12116_vm9, %v3043_v4, %v3056_v15  ;;  %v12824_v26 = vld [vmem:[#allocation89_spill] sm:$0xff]  ;;  %v8580_v28 = vpop.permute.xlu1 %3723 }
 0x2cf   : > { %12821 = vst [vmem:[#allocation41_spill] sm:$0xff] %v8557_v23  ;;  %12822 = vst [vmem:[#allocation118_spill] sm:$0xff] %v8561_v5  ;;  %v2476_v3 = vmax.f32 %v8483_v54, %v8517_v49  ;;  %v2997_v51 = vrot.slane %v2996_v8, 2  ;;  %v3208_v30 = vsel %vm1447_vm2, %v3192_v34, 0.0  ;;  %v3082_v7 = vrot.slane %v8553_v20, 2  ;;  %v12830_v20 = vld [vmem:[#allocation42_spill] sm:$0xff] }
 0x2d0   : > { %v8568_v22 = vmax.f32 %v2474_v32, %v8537_v41  ;;  %v3018_v48 = vrot.slane %v3017_v24, 2  ;;  %v3209_v58 = vrot.slane %v3208_v30, 4  ;;  %v3085_v1 = vrot.slane %v8561_v5, 2  ;;  %12825 = vst [vmem:[#allocation89_spill] sm:$0xff] %v8578_v39  ;;  %12826 = vst [vmem:[#allocation190_spill] sm:$0xff] %v8580_v28  ;;  %4481 = vrot.lane.b32.xlu0 %v12563_v56, %s12340_s14 }
 0x2d1   : > { %v8573_v4 = vadd.f32 %v3113_v63, %v3112_v50  ;;  %v2998_v15 = vadd.f32 %v2997_v51, %v2996_v8  ;;  %v3090_v54 = vmul.f32 %v3082_v7, %v12618_v62  ;;  %v2823_v34 = vmax.f32 %v7805_v57, %v12824_v26  ;;  %v12827_v51 = vld [vmem:[#allocation162_spill] sm:$0xff]  ;;  %v12828_v57 = vld [vmem:[#allocation76_spill] sm:$0xff]  ;;  %v8616_v28 = vpop.permute.xlu0 %3729  ;;  %4479 = vrot.lane.b32.xlu1 %v12565_v61, %s12340_s14 }
 0x2d2   : > { %v8585_v32 = vmax.f32 %v2242_v53, %v8557_v23  ;;  %v3019_v44 = vadd.f32 %v3018_v48, %v3017_v24  ;;  %v3210_v5 = vadd.f32 %v3209_v58, %v3208_v30  ;;  %v3093_v50 = vmul.f32 %v3085_v1, %v12616_v25  ;;  %12834 = vst [vmem:[#allocation76_spill] sm:$0xff] %v8616_v28  ;;  %v8623_v39 = vpop.permute.xlu1 %3727 }
 0x2d3   : > { %12823 = vst [vmem:[#allocation189_spill] sm:$0xff] %v8573_v4  ;;  %v2999_v8 = vrot.slane %v2998_v15, 1  ;;  %v3094_v63 = vsel %vm1447_vm2, %v3090_v54, 0.0  ;;  %vm12829_vm5 = vcmp.lt.s32.totalorder %v12828_v57, 64  ;;  %v2624_v58 = vmax.f32 %v2476_v3, %v8573_v4  ;;  %v12832_v54 = vld [vmem:[#allocation90_spill] sm:$0xff] }
 0x2d4   : > { %v8593_v7 = vsel %vm12829_vm5, %v12827_v51, %v8051_v12  ;;  %vm12831_vm6 = vmmov %vm12829_vm5  ;;  %v3020_v53 = vrot.slane %v3019_v44, 1  ;;  %v3211_v24 = vrot.slane %v3210_v5, 2  ;;  %v3095_v30 = vrot.slane %v3094_v63, 4  ;;  %12836 = vst [vmem:[#allocation90_spill] sm:$0xff] %v8623_v39  ;;  %4485 = vrot.lane.b32.xlu0 %v12537_v46, %s12340_s14 }
 0x2d5   : > { %v8599_v49 = vsel %vm12831_vm6, %v8051_v12, %v12830_v20  ;;  %v3115_v48 = vsel %vm1447_vm2, %v3093_v50, 0.0  ;;  %v8606_v51 = vmax.f32 %v2823_v34, %v12832_v54  ;;  %v1446_v50 = vmul.f32 %v8593_v7, %v12616_v25  ;;  %v8637_v39 = vpop.permute.xlu0 %3833  ;;  %4483 = vrot.lane.b32.xlu1 %v6900_v13, %s12340_s14 }
 0x2d6   : > { %v3116_v1 = vrot.slane %v3115_v48, 4  ;;  %v1443_v23 = vmul.f32 %v8599_v49, %v12618_v62  ;;  %v8612_v12 = vadd.f32 %v3020_v53, %v3019_v44  ;;  %v3212_v20 = vadd.f32 %v3211_v24, %v3210_v5  ;;  %12839 = vst [vmem:[#allocation192_spill] sm:$0xff] %v8637_v39  ;;  %v8642_v42 = vpop.permute.xlu1 %3831  ;;  %v12846_v39 = vld [vmem:[#allocation65_spill] sm:$0xff] }
 0x2d7   : > { %v3096_v41 = vadd.f32 %v3095_v30, %v3094_v63  ;;  %v8618_v3 = vadd.f32 %v2999_v8, %v2998_v15  ;;  %v1512_v6 = vmul.f32 %v8593_v7, %v12618_v62  ;;  %v1469_v15 = vsel %vm1447_vm2, %v1446_v50, 0.0  ;;  %v12837_v8 = vld [vmem:[#allocation4_spill] sm:$0xff]  ;;  %12840 = vst [vmem:[#allocation193_spill] sm:$0xff] %v8642_v42 }
 0x2d8   : > { %12833 = vst [vmem:[#allocation162_spill] sm:$0xff] %v8612_v12  ;;  %v3117_v4 = vadd.f32 %v3116_v1, %v3115_v48  ;;  %v1448_v34 = vsel %vm1447_vm2, %v1443_v23, 0.0  ;;  %v2441_v44 = vmax.f32 %v8585_v32, %v8612_v12  ;;  %v3213_v5 = vrot.slane %v3212_v20, 1  ;;  %4489 = vrot.lane.b32.xlu0 %v6931_v9, %s12340_s14 }
 0x2d9   : > { %12835 = vst [vmem:[#allocation42_spill] sm:$0xff] %v8618_v3  ;;  %v3097_v63 = vrot.slane %v3096_v41, 2  ;;  %v1449_v53 = vrot.slane %v1448_v34, 4  ;;  %v1513_v23 = vmul.f32 %v8599_v49, %v12837_v8  ;;  %v1516_v30 = vsel %vm1447_vm2, %v1512_v6, 0.0  ;;  %4487 = vrot.lane.b32.xlu1 %v12536_v36, %s12340_s14 }
 0x2da   : > { %v3118_v24 = vrot.slane %v3117_v4, 2  ;;  %v8635_v48 = vadd.f32 %v3213_v5, %v3212_v20  ;;  %v1470_v12 = vrot.slane %v1469_v15, 4  ;;  %v1517_v27 = vrot.slane %v1516_v30, 4 }
 0x2db   : > { %v3098_v32 = vadd.f32 %v3097_v63, %v3096_v41  ;;  %v1450_v1 = vadd.f32 %v1449_v53, %v1448_v34  ;;  %v1523_v18 = vsel %vm1447_vm2, %v1513_v23, 0.0  ;;  %v1585_v50 = vmul.f32 %v8593_v7, %v12837_v8  ;;  %v12842_v53 = vld [vmem:[#allocation92_spill] sm:$0xff] }
 0x2dc   : > { %12838 = vst [vmem:[#allocation191_spill] sm:$0xff] %v8635_v48  ;;  %v3119_v28 = vadd.f32 %v3118_v24, %v3117_v4  ;;  %v2724_v6 = vmax.f32 %v2624_v58, %v8635_v48  ;;  %v1471_v20 = vadd.f32 %v1470_v12, %v1469_v15  ;;  %v1518_v34 = vadd.f32 %v1517_v27, %v1516_v30  ;;  %v8654_v48 = vpop.permute.xlu0 %3837  ;;  %v8659_v30 = vpop.permute.xlu1 %3835 }
 0x2dd   : > { %v3099_v60 = vrot.slane %v3098_v32, 1  ;;  %v1451_v35 = vrot.slane %v1450_v1, 2  ;;  %v1524_v5 = vrot.slane %v1523_v18, 4  ;;  %v1586_v4 = vmul.f32 %v8599_v49, %v12615_v45  ;;  %12843 = vst [vmem:[#allocation195_spill] sm:$0xff] %v8654_v48  ;;  %12845 = vst [vmem:[#allocation197_spill] sm:$0xff] %v8659_v30  ;;  %v12851_v30 = vld [vmem:[#allocation97_spill] sm:$0xff]  ;;  %4669 = vrot.lane.b32.xlu0 %v12563_v56, %s12343_s20  ;;  %4667 = vrot.lane.b32.xlu1 %v12565_v61, %s12343_s20 }
 0x2de   : > { %v3120_v41 = vrot.slane %v3119_v28, 1  ;;  %v2824_v24 = vmax.f32 %v2724_v6, %v12842_v53  ;;  %v1472_v23 = vrot.slane %v1471_v20, 2  ;;  %v1519_v15 = vrot.slane %v1518_v34, 2 }
 0x2df   : > { %v8651_v63 = vadd.f32 %v3099_v60, %v3098_v32  ;;  %v1452_v58 = vadd.f32 %v1451_v35, %v1450_v1  ;;  %v1525_v8 = vadd.f32 %v1524_v5, %v1523_v18  ;;  %v1595_v27 = vsel %vm1447_vm2, %v1585_v50, 0.0 }
 0x2e0   : > { %v8656_v12 = vadd.f32 %v3120_v41, %v3119_v28  ;;  %v2722_v42 = vmax.f32 %v8568_v22, %v8618_v3  ;;  %v3023_v60 = vmax.f32 %v8606_v51, %v12846_v39  ;;  %v1473_v6 = vadd.f32 %v1472_v23, %v1471_v20  ;;  %v12847_v41 = vld [vmem:[#allocation93_spill] sm:$0xff]  ;;  %v8675_v20 = vpop.permute.xlu0 %3841 }
 0x2e1   : > { %12841 = vst [vmem:[#allocation194_spill] sm:$0xff] %v8651_v63  ;;  %v1453_v32 = vrot.slane %v1452_v58, 1  ;;  %v1520_v28 = vadd.f32 %v1519_v15, %v1518_v34  ;;  %v1526_v1 = vrot.slane %v1525_v8, 2  ;;  %v1596_v18 = vrot.slane %v1595_v27, 4  ;;  %12848 = vst [vmem:[#allocation198_spill] sm:$0xff] %v8675_v20  ;;  %v12849_v23 = vld [vmem:[#allocation85_spill] sm:$0xff]  ;;  %v8678_v15 = vpop.permute.xlu1 %3839  ;;  %4673 = vrot.lane.b32.xlu0 %v6925_v2, %s12343_s20  ;;  %4671 = vrot.lane.b32.xlu1 %v6900_v13, %s12343_s20 }
 0x2e2   : > { %12844 = vst [vmem:[#allocation196_spill] sm:$0xff] %v8656_v12  ;;  %v2477_v35 = vmax.f32 %v2441_v44, %v8656_v12  ;;  %v2822_v50 = vmax.f32 %v2722_v42, %v8651_v63  ;;  %v2924_v22 = vmax.f32 %v2824_v24, %v12847_v41  ;;  %v1602_v51 = vsel %vm1447_vm2, %v1586_v4, 0.0  ;;  %12850 = vst [vmem:[#allocation85_spill] sm:$0xff] %v8678_v15  ;;  %v12852_v4 = vld [vmem:[#allocation86_spill] sm:$0xff]  ;;  %v12856_v15 = vld [vmem:[#allocation96_spill] sm:$0xff] }
 0x2e3   : > { %v8672_v5 = vadd.f32 %v1453_v32, %v1452_v58  ;;  %v1521_v39 = vrot.slane %v1520_v28, 1  ;;  %v1527_v44 = vadd.f32 %v1526_v1, %v1525_v8  ;;  %v1597_v34 = vadd.f32 %v1596_v18, %v1595_v27  ;;  %v12853_v27 = vld [vmem:[#allocation99_spill] sm:$0xff] }
 0x2e4   : > { %v2625_v3 = vmax.f32 %v2477_v35, %v12849_v23  ;;  %v1474_v12 = vrot.slane %v1473_v6, 1  ;;  %v1603_v42 = vrot.slane %v1602_v51, 4  ;;  %v1658_v24 = vmul.f32 %v8593_v7, %v12615_v45  ;;  %v8697_v45 = vpop.permute.xlu0 %3845 }
 0x2e5   : > { %v1508_v48 = vmax.f32 %v8672_v5, %v12851_v30  ;;  %v8687_v32 = vadd.f32 %v1521_v39, %v1520_v28  ;;  %v1528_v35 = vrot.slane %v1527_v44, 1  ;;  %v1598_v8 = vrot.slane %v1597_v34, 2  ;;  %12854 = vst [vmem:[#allocation97_spill] sm:$0xff] %v8697_v45  ;;  %v8701_v28 = vpop.permute.xlu1 %3843  ;;  %4677 = vrot.lane.b32.xlu0 %v12536_v36, %s12343_s20  ;;  %4675 = vrot.lane.b32.xlu1 %v12537_v46, %s12343_s20 }
 0x2e6   : > { %v2725_v58 = vmax.f32 %v2625_v3, %v12852_v4  ;;  %v8692_v1 = vmax.f32 %v2924_v22, %v12853_v27  ;;  %v1604_v18 = vadd.f32 %v1603_v42, %v1602_v51  ;;  %v1659_v63 = vmul.f32 %v8599_v49, %v12616_v25  ;;  %12855 = vst [vmem:[#allocation86_spill] sm:$0xff] %v8701_v28  ;;  %v12857_v42 = vld [vmem:[#allocation98_spill] sm:$0xff] }
 0x2e7   : > { %v1674_v7 = vsel %vm1447_vm2, %v1658_v24, 0.0  ;;  %v1529_v41 = vadd.f32 %v1528_v35, %v1527_v44  ;;  %v1544_v39 = vmax.f32 %v1508_v48, %v8687_v32  ;;  %v1599_v3 = vadd.f32 %v1598_v8, %v1597_v34 }
 0x2e8   : > { %vm12200_vm5 = vcmp.lt.s32.totalorder %v12724_v47, 1  ;;  %v2825_v20 = vmax.f32 %v2725_v58, %v12856_v15  ;;  %v1605_v22 = vrot.slane %v1604_v18, 2  ;;  %v1675_v33 = vrot.slane %v1674_v7, 4  ;;  %v12858_v58 = vld [vmem:[#allocation160_spill] sm:$0xff]  ;;  %v12872_v47 = vld [vmem:[#allocation70_spill] sm:$0xff] }
 0x2e9   : > { %v1681_v51 = vsel %vm1447_vm2, %v1659_v63, 0.0  ;;  %v3123_v49 = vmax.f32 %v3023_v60, %v1529_v41  ;;  %v1580_v24 = vmax.f32 %v1544_v39, %v12857_v42  ;;  %v1600_v44 = vrot.slane %v1599_v3, 1  ;;  %v8714_v63 = vpop.permute.xlu0 %3867  ;;  %v12861_v39 = vld [vmem:[#allocation40_spill] sm:$0xff]  ;;  %v8721_v10 = vpop.permute.xlu1 %3865  ;;  %4681 = vrot.lane.b32.xlu0 %v6935_v38, %s12343_s20  ;;  %4679 = vrot.lane.b32.xlu1 %v6931_v9, %s12343_s20 }
 0x2ea   : > { %vm12128_vm6 = vcmp.lt.s32.totalorder %v12719_v29, 1  ;;  %v1606_v48 = vadd.f32 %v1605_v22, %v1604_v18  ;;  %v1676_v34 = vadd.f32 %v1675_v33, %v1674_v7  ;;  %v1682_v35 = vrot.slane %v1681_v51, 4  ;;  %12860 = vst [vmem:[#allocation99_spill] sm:$0xff] %v8714_v63  ;;  %12863 = vst [vmem:[#allocation98_spill] sm:$0xff] %v8721_v10  ;;  %v12864_v7 = vld [vmem:[#allocation121_spill] sm:$0xff] }
 0x2eb   : > { %vm12859_vm9 = vcmask 7168   ;;  %v8716_v15 = vadd.f32 %v1474_v12, %v1473_v6  ;;  %v2922_v60 = vmax.f32 %v2822_v50, %v1580_v24  ;;  %v1601_v28 = vadd.f32 %v1600_v44, %v1599_v3 }
 0x2ec   : > { %v3156_v8 = vsel %vm12859_vm9, %v12858_v58, %v8053_v19  ;;  %vm12862_vm14 = vmmov %vm12859_vm9  ;;  %v1607_v53 = vrot.slane %v1606_v48, 1  ;;  %v1677_v18 = vrot.slane %v1676_v34, 2  ;;  %v1683_v33 = vadd.f32 %v1682_v35, %v1681_v51 }
 0x2ed   : > { %v3161_v45 = vsel %vm12862_vm14, %v8053_v19, %v12861_v39  ;;  %v2925_v12 = vmax.f32 %v2825_v20, %v8716_v15  ;;  %v8731_v6 = vmax.f32 %v3123_v49, %v1601_v28  ;;  %v8736_v19 = vsel %vm12128_vm6, %v8547_v55, %v3156_v8  ;;  %v8742_v44 = vpop.permute.xlu0 %3873  ;;  %v12867_v20 = vld [vmem:[#allocation66_spill] sm:$0xff]  ;;  %v8748_v8 = vpop.permute.xlu1 %3871  ;;  %4703 = vrot.lane.b32.xlu0 %v6935_v38, %s12378_s10 }
 0x2ee   : > { %v8726_v22 = vsel %vm12200_vm5, %v12864_v7, %v3161_v45  ;;  %v1608_v3 = vadd.f32 %v1607_v53, %v1606_v48  ;;  %v1678_v45 = vadd.f32 %v1677_v18, %v1676_v34  ;;  %v1684_v51 = vrot.slane %v1683_v33, 2  ;;  %12866 = vst [vmem:[#allocation40_spill] sm:$0xff] %v8742_v44  ;;  %12868 = vst [vmem:[#allocation121_spill] sm:$0xff] %v8748_v8  ;;  %v12869_v34 = vld [vmem:[#allocation100_spill] sm:$0xff] }
 0x2ef   : > { %12865 = vst [vmem:[#allocation160_spill] sm:$0xff] %v8731_v6  ;;  %v3182_v50 = vrot.slane %v8726_v22, 2  ;;  %v3185_v24 = vrot.slane %v8736_v19, 2  ;;  %v3022_v49 = vmax.f32 %v2922_v60, %v12867_v20  ;;  %v3352_v35 = vsub.f32 %v1529_v41, %v8731_v6  ;;  %4701 = vrot.lane.b32.xlu1 %v6925_v2, %s12378_s10 }
 0x2f0   : > { %v3416_v58 = vsub.f32 %v1601_v28, %v8731_v6  ;;  %v3124_v39 = vmax.f32 %v8692_v1, %v1608_v3  ;;  %v1679_v7 = vrot.slane %v1678_v45, 1  ;;  %v1685_v53 = vadd.f32 %v1684_v51, %v1683_v33  ;;  %v12871_v51 = vld [vmem:[#allocation64_spill] sm:$0xff] }
 0x2f1   : > { %v3190_v55 = vmul.f32 %v3182_v50, %v12618_v62  ;;  %v3193_v48 = vmul.f32 %v3185_v24, %v12616_v25  ;;  %v3025_v18 = vmax.f32 %v2925_v12, %v12869_v34  ;;  %v3357_v60 = vmul.f32 1.442695, %v3352_v35  ;;  %v8759_v33 = vpop.permute.xlu0 %3877  ;;  %v12874_v35 = vld [vmem:[#allocation147_spill] sm:$0xff]  ;;  %4709 = vrot.lane.b32.xlu0 %v12563_v56, %s12378_s10 }
 0x2f2   : > { %v3421_v29 = vmul.f32 1.442695, %v3416_v58  ;;  %v1680_v28 = vadd.f32 %v1679_v7, %v1678_v45  ;;  %v1686_v50 = vrot.slane %v1685_v53, 1  ;;  %12870 = vst [vmem:[#allocation66_spill] sm:$0xff] %v8759_v33  ;;  %v3122_v24 = vmax.f32 %v3022_v49, %v12871_v51  ;;  %v12877_v7 = vld [vmem:[#allocation69_spill] sm:$0xff]  ;;  %v12886_v33 = vld [vmem:[#allocation71_spill] sm:$0xff] }
 0x2f3   : > { %v3194_v41 = vsel %vm1447_vm2, %v3190_v55, 0.0  ;;  %v3215_v1 = vsel %vm1447_vm2, %v3193_v48, 0.0  ;;  %vm12873_vm14 = vcmask 982016   ;;  %v3512_v58 = vsub.f32 %v12874_v35, %v8731_v6  ;;  %v8767_v55 = vpop.permute.xlu1 %3875  ;;  %4707 = vrot.lane.b32.xlu1 %v12565_v61, %s12378_s10 }
 0x2f4   : > { %v3195_v62 = vrot.slane %v3194_v41, 4  ;;  %v3216_v25 = vrot.slane %v3215_v1, 4  ;;  %v3559_v12 = vsel %vm12873_vm14, %v8098_v17, %v12872_v47  ;;  %12875 = vst [vmem:[#allocation100_spill] sm:$0xff] %v8767_v55  ;;  %v8769_v63 = vmax.f32 %v3124_v39, %v1680_v28  ;;  %vm12878_vm2 = vmmov %vm12873_vm14 }
 0x2f5   : > { %5874 = vpow2.f32 %v3357_v60  ;;  %v3544_v48 = vsel %vm12878_vm2, %v12877_v7, %v8100_v0  ;;  %v8776_v49 = vadd.f32 %v1686_v50, %v1685_v53  ;;  %v3517_v51 = vmul.f32 1.442695, %v3512_v58  ;;  %vm12879_vm9 = vmmov %vm12878_vm2  ;;  %v8785_v35 = vpop.permute.xlu0 %3881  ;;  %v12881_v53 = vld [vmem:[#allocation129_spill] sm:$0xff]  ;;  %v12884_v50 = vld [vmem:[#allocation167_spill] sm:$0xff]  ;;  %4713 = vrot.lane.b32.xlu0 %v12537_v46, %s12378_s10 }
 0x2f6   : > { %12876 = vst [vmem:[#allocation70_spill] sm:$0xff] %v8769_v63  ;;  %v3196_v45 = vadd.f32 %v3195_v62, %v3194_v41  ;;  %5876 = vpow2.f32 %v3421_v29  ;;  %v3217_v47 = vadd.f32 %v3216_v25, %v3215_v1  ;;  %v3417_v39 = vsub.f32 %v1608_v3, %v8769_v63  ;;  %12880 = vst [vmem:[#allocation147_spill] sm:$0xff] %v8785_v35  ;;  %v12882_v29 = vld [vmem:[#allocation91_spill] sm:$0xff] }
 0x2f7   : > { %v3481_v60 = vsub.f32 %v1680_v28, %v8769_v63  ;;  %v3545_v41 = vsel %vm12879_vm9, %v8100_v0, %v8098_v17  ;;  %5878 = vpow2.f32 %v3517_v51  ;;  %vm12883_vm14 = vcmp.lt.s32.totalorder %v12882_v29, 56  ;;  %v8794_v3 = vpop.permute.xlu1 %3879  ;;  %4711 = vrot.lane.b32.xlu1 %v6900_v13, %s12378_s10 }
 0x2f8   : > { %v3197_v62 = vrot.slane %v3196_v45, 2  ;;  %v3218_v7 = vrot.slane %v3217_v47, 2  ;;  %v8790_v25 = vsel %vm12883_vm14, %v3544_v48, %v12881_v53  ;;  %v3513_v1 = vsub.f32 %v12884_v50, %v8769_v63  ;;  %12885 = vst [vmem:[#allocation69_spill] sm:$0xff] %v8794_v3  ;;  %v12888_v48 = vld [vmem:[#allocation95_spill] sm:$0xff] }
 0x2f9   : > { %v3423_v28 = vmul.f32 1.442695, %v3417_v39  ;;  %v3487_v58 = vmul.f32 1.442695, %v3481_v60  ;;  %vm12887_vm2 = vcmask 457728   ;;  %v3125_v0 = vmax.f32 %v3025_v18, %v8776_v49  ;;  %v12891_v39 = vld [vmem:[#allocation72_spill] sm:$0xff]  ;;  %4717 = vrot.lane.b32.xlu0 %v6931_v9, %s12378_s10 }
 0x2fa   : > { %v3198_v55 = vadd.f32 %v3197_v62, %v3196_v45  ;;  %v3580_v17 = vsel %vm12887_vm2, %v12886_v33, %v8145_v14  ;;  %v3219_v51 = vadd.f32 %v3218_v7, %v3217_v47  ;;  %vm12889_vm9 = vmmov %vm12887_vm2  ;;  %v3519_v50 = vmul.f32 1.442695, %v3513_v1  ;;  %v8815_v47 = vpop.permute.xlu0 %3985  ;;  %v12894_v7 = vld [vmem:[#allocation83_spill] sm:$0xff] }
 0x2fb   : > { %v8805_v53 = vsel %vm12889_vm9, %v12888_v48, %v8143_v40  ;;  %5880 = vpow2.f32 %v3423_v28  ;;  %vm12890_vm14 = vmmov %vm12887_vm2  ;;  %v3593_v18 = vsel %vm12887_vm2, %v8189_v31, %v12891_v39  ;;  %12892 = vst [vmem:[#allocation129_spill] sm:$0xff] %v8815_v47  ;;  %vm12893_vm9 = vcmp.lt.s32.totalorder %v12578_v21, 56  ;;  %v8824_v28 = vpop.permute.xlu1 %3983  ;;  %v12900_v39 = vld [vmem:[#allocation110_spill] sm:$0xff]  ;;  %v12912_v47 = vld [vmem:[#allocation101_spill] sm:$0xff]  ;;  %4715 = vrot.lane.b32.xlu1 %v12536_v36, %s12378_s10  ;;  %s13776_s10 = sshll.u32 %s13780_s18, 6 }
 0x2fc   : > { %v3199_v45 = vrot.slane %v3198_v55, 1  ;;  %v3581_v33 = vsel %vm12890_vm14, %v8145_v14, %v8189_v31  ;;  %5882 = vpow2.f32 %v3487_v58  ;;  %v3220_v60 = vrot.slane %v3219_v51, 1  ;;  %12896 = vst [vmem:[#allocation167_spill] sm:$0xff] %v8824_v28  ;;  %vm12897_vm14 = vmmov %vm12887_vm2  ;;  %v12898_v31 = vld [vmem:[#allocation77_spill] sm:$0xff]  ;;  %v12902_v28 = vld [vmem:[#allocation112_spill] sm:$0xff]  ;;  %s11694_s15 = scalar_lea.vmem %s11725_s4, %s13776_s10 }
 0x2fd   : > { %v8819_v62 = vsel %vm12893_vm9, %v3545_v41, %v3580_v17  ;;  %vm12895_vm6 = vcmask 982016   ;;  %5884 = vpow2.f32 %v3519_v50  ;;  %v3584_v14 = vsel %vm12897_vm14, %v8143_v40, %v8231_v52  ;;  %v12899_v17 = vld [vmem:[#allocation126_spill] sm:$0xff]  ;;  %v12904_v50 = vld [vmem:[#allocation165_spill] sm:$0xff]  ;;  %4821 = vrot.lane.b32.xlu0 %v12563_v56, %s12344_s3 }
 0x2fe   : > { %v3560_v1 = vsel %vm12895_vm6, %v8187_v59, %v12894_v7  ;;  %v3200_v48 = vadd.f32 %v3199_v45, %v3198_v55  ;;  %v3594_v58 = vsel %vm12887_vm2, %v8231_v52, %v12898_v31  ;;  %v3221_v41 = vadd.f32 %v3220_v60, %v3219_v51  ;;  %v12906_v45 = vld [vmem:[#allocation136_spill] sm:$0xff] }
 0x2ff   : > { %vm12901_vm9 = vcmp.lt.s32.totalorder %v12900_v39, 56  ;;  %vm12903_vm6 = vcmp.lt.s32.totalorder %v12902_v28, 56  ;;  %v3228_v40 = vsub.f32 %v12904_v50, %v8769_v63  ;;  %v12909_v31 = vld [vmem:[#allocation132_spill] sm:$0xff]  ;;  %v3480_v3 = vsub.f32 %v12912_v47, %v8731_v6  ;;  %v12917_v47 = vld [vmem:[#allocation166_spill] sm:$0xff]  ;;  %4819 = vrot.lane.b32.xlu1 %v12565_v61, %s12344_s3 }
 0x300   : > { %v8837_v7 = vsel %vm12901_vm9, %v12899_v17, %v3593_v18  ;;  %v8841_v55 = vsel %vm12903_vm6, %v3559_v12, %v3581_v33  ;;  %v8847_v52 = vmax.f32 %v3122_v24, %v3200_v48  ;;  %vm12907_vm14 = vmmov %vm12901_vm9  ;;  %v12908_v18 = vld [vmem:[#allocation84_spill] sm:$0xff]  ;;  %v3353_v12 = vsub.f32 %v12909_v31, %v8769_v63  ;;  %v8858_v33 = vpop.permute.xlu0 %3989 }
 0x301   : > { %v8852_v51 = vsel %vm12907_vm14, %v12906_v45, %v3594_v58  ;;  %v3321_v60 = vsub.f32 %v12908_v18, %v8769_v63  ;;  %12910 = vst [vmem:[#allocation95_spill] sm:$0xff] %v8858_v33  ;;  %v8860_v17 = vmax.f32 %v3125_v0, %v3221_v41  ;;  %vm12911_vm2 = vmmov %vm12903_vm6  ;;  %v3234_v24 = vmul.f32 1.442695, %v3228_v40  ;;  %v8868_v58 = vpop.permute.xlu1 %3987  ;;  %v12914_v18 = vld [vmem:[#allocation169_spill] sm:$0xff]  ;;  %4825 = vrot.lane.b32.xlu0 %v6925_v2, %s12344_s3 }
 0x302   : > { %12905 = vst [vmem:[#allocation71_spill] sm:$0xff] %v8847_v52  ;;  %v8864_v50 = vsel %vm12911_vm2, %v3560_v1, %v3584_v14  ;;  %12913 = vst [vmem:[#allocation72_spill] sm:$0xff] %v8868_v58  ;;  %v5563_v45 = vsub.f32 %v3200_v48, %v8847_v52  ;;  %v3511_v35 = vsub.f32 %v12914_v18, %v8847_v52  ;;  %v3359_v10 = vmul.f32 1.442695, %v3353_v12  ;;  %v8875_v0 = vpop.eup %5874  ;;  %v12916_v14 = vld [vmem:[#allocation170_spill] sm:$0xff]  ;;  %v12919_v18 = vld [vmem:[#allocation168_spill] sm:$0xff] }
 0x303   : > { %v3327_v31 = vmul.f32 1.442695, %v3321_v60  ;;  %12915 = vst [vmem:[#allocation83_spill] sm:$0xff] %v8875_v0  ;;  %v5566_v1 = vsub.f32 %v3221_v41, %v8860_v17  ;;  %v3514_v40 = vsub.f32 %v12916_v14, %v8860_v17  ;;  %5886 = vpow2.f32 %v3234_v24  ;;  %v8884_v48 = vpop.eup %5876  ;;  %v12921_v24 = vld [vmem:[#allocation88_spill] sm:$0xff]  ;;  %4823 = vrot.lane.b32.xlu1 %v6900_v13, %s12344_s3 }
 0x304   : > { %v3354_v58 = vsub.f32 %v12917_v47, %v8860_v17  ;;  %12918 = vst [vmem:[#allocation77_spill] sm:$0xff] %v8884_v48  ;;  %v5567_v60 = vmul.f32 1.442695, %v5563_v45  ;;  %v3515_v12 = vmul.f32 1.442695, %v3511_v35  ;;  %v3415_v33 = vsub.f32 %v12919_v18, %v8847_v52  ;;  %v8888_v8 = vpop.permute.xlu0 %3993  ;;  %v8898_v28 = vpop.eup %5878 }
 0x305   : > { %5888 = vpow2.f32 %v3327_v31  ;;  %12920 = vst [vmem:[#allocation126_spill] sm:$0xff] %v8888_v8  ;;  %v5573_v41 = vmul.f32 1.442695, %v5566_v1  ;;  %v3521_v44 = vmul.f32 1.442695, %v3514_v40  ;;  %vm12922_vm9 = vcmp.lt.s32.totalorder %v12828_v57, 64  ;;  %v8896_v47 = vpop.permute.xlu1 %3991  ;;  %4829 = vrot.lane.b32.xlu0 %v12536_v36, %s12344_s3 }
 0x306   : > { %v8894_v14 = vsel %vm12922_vm9, %v12921_v24, %v8233_v37  ;;  %5890 = vpow2.f32 %v3359_v10  ;;  %12923 = vst [vmem:[#allocation165_spill] sm:$0xff] %v8896_v47  ;;  %12924 = vst [vmem:[#allocation136_spill] sm:$0xff] %v8898_v28  ;;  %v3361_v35 = vmul.f32 1.442695, %v3354_v58  ;;  %v3419_v45 = vmul.f32 1.442695, %v3415_v33 }
 0x307   : > { %5892 = vpow2.f32 %v5567_v60  ;;  %v12925_v31 = vld [vmem:[#allocation82_spill] sm:$0xff]  ;;  %vm12926_vm6 = vcmask 982016   ;;  %v12927_v1 = vld [vmem:[#allocation107_spill] sm:$0xff]  ;;  %v3608_v10 = vmul.f32 %v8898_v28, %v8790_v25  ;;  %v3485_v24 = vmul.f32 1.442695, %v3480_v3  ;;  %4827 = vrot.lane.b32.xlu1 %v12537_v46, %s12344_s3 }
 0x308   : > { %v3547_v18 = vsel %vm12926_vm6, %v12925_v31, %v8273_v43  ;;  %5894 = vpow2.f32 %v5573_v41  ;;  %v3604_v40 = vmul.f32 %v8898_v28, %v12927_v1  ;;  %vm12928_vm14 = vmmov %vm12926_vm6  ;;  %v12929_v58 = vld [vmem:[#allocation143_spill] sm:$0xff]  ;;  %vm12930_vm2 = vcmp.lt.s32.totalorder %v12882_v29, 56  ;;  %v8919_v31 = vpop.permute.xlu0 %3997  ;;  %v8921_v1 = vpop.eup %5880 }
 0x309   : > { %5896 = vpow2.f32 %v3515_v12  ;;  %v3548_v33 = vsel %vm12928_vm14, %v8273_v43, %v8187_v59  ;;  %v3600_v60 = vsel %vm12930_vm2, %v3547_v18, %v12929_v58  ;;  %v3226_v41 = vsub.f32 %v8672_v5, %v8847_v52  ;;  %12931 = vst [vmem:[#allocation84_spill] sm:$0xff] %v8919_v31  ;;  %12932 = vst [vmem:[#allocation132_spill] sm:$0xff] %v8921_v1  ;;  %v8924_v47 = vpop.permute.xlu1 %3995  ;;  %v8926_v8 = vpop.eup %5882  ;;  %v12935_v59 = vld [vmem:[#allocation128_spill] sm:$0xff] }
 0x30a   : > { %v3630_v25 = vrot.slane %v3604_v40, 4  ;;  %v3631_v3 = vrot.slane %v3608_v10, 4  ;;  %5898 = vpow2.f32 %v3521_v44  ;;  %v3612_v12 = vmul.f32 %v8898_v28, %v3600_v60  ;;  %12933 = vst [vmem:[#allocation101_spill] sm:$0xff] %v8924_v47  ;;  %12934 = vst [vmem:[#allocation169_spill] sm:$0xff] %v8926_v8  ;;  %v8934_v40 = vpop.eup %5884  ;;  %v12937_v44 = vld [vmem:[#allocation94_spill] sm:$0xff]  ;;  %4833 = vrot.lane.b32.xlu0 %v6935_v38, %s12344_s3 }
 0x30b   : > { %5900 = vpow2.f32 %v3361_v35  ;;  %v3227_v43 = vsub.f32 %v12935_v59, %v8731_v6  ;;  %v3229_v5 = vsub.f32 %v8716_v15, %v8860_v17  ;;  %v3230_v18 = vmul.f32 1.442695, %v3226_v41  ;;  %12936 = vst [vmem:[#allocation170_spill] sm:$0xff] %v8934_v40  ;;  %v12939_v15 = vld [vmem:[#allocation104_spill] sm:$0xff]  ;;  %vm12944_vm2 = vmmov %vm12922_vm9  ;;  %4831 = vrot.lane.b32.xlu1 %v6931_v9, %s12344_s3 }
 0x30c   : > { %5902 = vpow2.f32 %v3419_v45  ;;  %v8940_v10 = vsel %vm12922_vm9, %v12937_v44, %v8271_v11  ;;  %vm12938_vm6 = vcmp.lt.s32.totalorder %v12578_v21, 56  ;;  %v3641_v58 = vrot.slane %v3612_v12, 4  ;;  %v8952_v59 = vpop.permute.xlu0 %4019 }
 0x30d   : > { %v3601_v35 = vsel %vm12938_vm6, %v3548_v33, %v8805_v53  ;;  %v3605_v60 = vmul.f32 %v8934_v40, %v12939_v15  ;;  %v3609_v45 = vmul.f32 %v8934_v40, %v8819_v62  ;;  %5904 = vpow2.f32 %v3485_v24  ;;  %12940 = vst [vmem:[#allocation166_spill] sm:$0xff] %v8952_v59  ;;  %v8957_v12 = vpop.permute.xlu1 %4017  ;;  %vm12950_vm6 = vmmov %vm12944_vm2 }
 0x30e   : > { %v3613_v41 = vmul.f32 %v8934_v40, %v3601_v35  ;;  %vm12941_vm14 = vcmask 1043456   ;;  %5906 = vpow2.f32 %v3230_v18  ;;  %v3232_v53 = vmul.f32 1.442695, %v3227_v43  ;;  %12943 = vst [vmem:[#allocation88_spill] sm:$0xff] %v8957_v12  ;;  %v12949_v35 = vld [vmem:[#allocation87_spill] sm:$0xff]  ;;  %4855 = vrot.lane.b32.xlu0 %v6935_v38, %s6092_s25 }
 0x30f   : > { %v8955_v44 = vsel %vm12941_vm14, %v3630_v25, %v3631_v3  ;;  %v3236_v33 = vmul.f32 1.442695, %v3229_v5  ;;  %v3633_v28 = vrot.slane %v3605_v60, 4  ;;  %v3634_v47 = vrot.slane %v3609_v45, 4  ;;  %v12945_v25 = vld [vmem:[#allocation63_spill] sm:$0xff]  ;;  %vm12947_vm9 = vmmov %vm12941_vm14  ;;  %4853 = vrot.lane.b32.xlu1 %v6925_v2, %s6092_s25 }
 0x310   : > { %12942 = vst [vmem:[#allocation168_spill] sm:$0xff] %v8955_v44  ;;  %v3643_v31 = vrot.slane %v3613_v41, 4  ;;  %v8963_v62 = vsel %vm12944_vm2, %v8271_v11, %v8314_v16  ;;  %5908 = vpow2.f32 %v3232_v53  ;;  %v3319_v24 = vsub.f32 %v12851_v30, %v8847_v52  ;;  %v8975_v18 = vpop.eup %5886  ;;  %v8988_v60 = vpop.permute.xlu0 %4025  ;;  %vm12955_vm14 = vmmov %vm12947_vm9 }
 0x311   : > { %v3320_v43 = vsub.f32 %v12945_v25, %v8731_v6  ;;  %v3322_v5 = vsub.f32 %v12849_v23, %v8860_v17  ;;  %12946 = vst [vmem:[#allocation82_spill] sm:$0xff] %v8975_v18  ;;  %v8978_v11 = vsel %vm12947_vm9, %v3631_v3, %v3641_v58  ;;  %5910 = vpow2.f32 %v3236_v33  ;;  %12951 = vst [vmem:[#allocation143_spill] sm:$0xff] %v8988_v60  ;;  %v8996_v53 = vpop.permute.xlu1 %4023 }
 0x312   : > { %12948 = vst [vmem:[#allocation107_spill] sm:$0xff] %v8978_v11  ;;  %v8984_v30 = vsel %vm12950_vm6, %v8314_v16, %v12949_v35  ;;  %v3351_v15 = vsub.f32 %v8687_v32, %v8847_v52  ;;  %v8990_v23 = vpop.eup %5888  ;;  %v3305_v45 = vmul.f32 %v8975_v18, %v8894_v14  ;;  %v3309_v3 = vmul.f32 %v8975_v18, %v8940_v10  ;;  %v12957_v32 = vld [vmem:[#allocation23_spill] sm:$0xff]  ;;  %v12958_v35 = vld [vmem:[#allocation26_spill] sm:$0xff]  ;;  %vm12961_vm2 = vmmov %vm12947_vm9 }
 0x313   : > { %12952 = vst [vmem:[#allocation128_spill] sm:$0xff] %v8990_v23  ;;  %v3323_v58 = vmul.f32 1.442695, %v3319_v24  ;;  %v3325_v41 = vmul.f32 1.442695, %v3320_v43  ;;  %12953 = vst [vmem:[#allocation94_spill] sm:$0xff] %v8996_v53  ;;  %v8998_v33 = vpop.eup %5890  ;;  %v9001_v16 = vsel %vm12955_vm14, %v3633_v28, %v3634_v47  ;;  %v3337_v25 = vmul.f32 %v8990_v23, %v12957_v32  ;;  %4861 = vrot.lane.b32.xlu0 %v12563_v56, %s6092_s25 }
 0x314   : > { %12954 = vst [vmem:[#allocation104_spill] sm:$0xff] %v8998_v33  ;;  %12956 = vst [vmem:[#allocation63_spill] sm:$0xff] %v9001_v16  ;;  %v3341_v40 = vmul.f32 %v8990_v23, %v12958_v35  ;;  %v3329_v59 = vmul.f32 1.442695, %v3322_v5  ;;  %v9009_v18 = vpop.eup %5892  ;;  %v12960_v24 = vld [vmem:[#allocation137_spill] sm:$0xff]  ;;  %v9014_v12 = vsel %vm12961_vm2, %v3634_v47, %v3643_v31  ;;  %v12964_v23 = vld [vmem:[#allocation140_spill] sm:$0xff]  ;;  %v9028_v11 = vmul.f32 %v8875_v0, %v8984_v30  ;;  %v9030_v47 = vpop.permute.xlu0 %4029 }
 0x315   : > { %12959 = vst [vmem:[#allocation87_spill] sm:$0xff] %v9009_v18  ;;  %v3369_v43 = vmul.f32 %v8998_v33, %v12960_v24  ;;  %5912 = vpow2.f32 %v3323_v58  ;;  %v3355_v28 = vmul.f32 1.442695, %v3351_v15  ;;  %v9018_v53 = vpop.eup %5894  ;;  %v9022_v5 = vmul.f32 %v9009_v18, %v8726_v22  ;;  %12965 = vst [vmem:[#allocation137_spill] sm:$0xff] %v9030_v47  ;;  %v9038_v22 = vpop.permute.xlu1 %4027  ;;  %4859 = vrot.lane.b32.xlu1 %v12565_v61, %s6092_s25 }
 0x316   : > { %12962 = vst [vmem:[#allocation23_spill] sm:$0xff] %v9018_v53  ;;  %v3373_v60 = vmul.f32 %v8998_v33, %v12964_v23  ;;  %5914 = vpow2.f32 %v3325_v41  ;;  %v9032_v31 = vpop.eup %5896  ;;  %v9036_v15 = vmul.f32 %v9018_v53, %v8736_v19  ;;  %v3345_v58 = vadd.f32 %v3337_v25, %v3305_v45  ;;  %12968 = vst [vmem:[#allocation200_spill] sm:$0xff] %v9038_v22  ;;  %v12970_v41 = vld [vmem:[#allocation10_spill] sm:$0xff] }
 0x317   : > { %12963 = vst [vmem:[#allocation26_spill] sm:$0xff] %v9022_v5  ;;  %12966 = vst [vmem:[#allocation140_spill] sm:$0xff] %v9032_v31  ;;  %v3349_v21 = vadd.f32 %v3341_v40, %v3309_v3  ;;  %5916 = vpow2.f32 %v3329_v59  ;;  %v9040_v5 = vpop.eup %5898  ;;  %v3603_v18 = vmul.f32 %v9032_v31, %v12970_v41  ;;  %v3607_v33 = vmul.f32 %v9032_v31, %v8837_v7  ;;  %v12972_v59 = vld [vmem:[#allocation7_spill] sm:$0xff] }
 0x318   : > { %12967 = vst [vmem:[#allocation199_spill] sm:$0xff] %v9036_v15  ;;  %12969 = vst [vmem:[#allocation201_spill] sm:$0xff] %v9040_v5  ;;  %v3611_v47 = vmul.f32 %v9032_v31, %v8852_v51  ;;  %v3383_v19 = vsub.f32 %v12857_v42, %v8847_v52  ;;  %v9052_v40 = vpop.eup %5900  ;;  %v3606_v45 = vmul.f32 %v9040_v5, %v12972_v59  ;;  %v9070_v15 = vpop.permute.xlu0 %4033  ;;  %5918 = vpow2.f32 %v3355_v28 }
 0x319   : > { %12971 = vst [vmem:[#allocation10_spill] sm:$0xff] %v9052_v40  ;;  %v3610_v3 = vmul.f32 %v9040_v5, %v8841_v55  ;;  %v3614_v7 = vmul.f32 %v9040_v5, %v8864_v50  ;;  %v3384_v51 = vsub.f32 %v12824_v26, %v8731_v6  ;;  %v9064_v42 = vpop.eup %5902  ;;  %v3627_v25 = vrot.slane %v3603_v18, 4  ;;  %12974 = vst [vmem:[#allocation202_spill] sm:$0xff] %v9070_v15  ;;  %v9076_v22 = vpop.permute.xlu1 %4031 }
 0x31a   : > { %12973 = vst [vmem:[#allocation7_spill] sm:$0xff] %v9064_v42  ;;  %v3628_v41 = vrot.slane %v3607_v33, 4  ;;  %v3639_v53 = vrot.slane %v3611_v47, 4  ;;  %v9068_v59 = vmul.f32 %v9052_v40, %v8894_v14  ;;  %v9072_v55 = vpop.eup %5904  ;;  %v3636_v50 = vrot.slane %v3606_v45, 4  ;;  %12976 = vst [vmem:[#allocation204_spill] sm:$0xff] %v9076_v22  ;;  %4865 = vrot.lane.b32.xlu0 %v12537_v46, %s6092_s25  ;;  %4863 = vrot.lane.b32.xlu1 %v6900_v13, %s6092_s25 }
 0x31b   : > { %12975 = vst [vmem:[#allocation203_spill] sm:$0xff] %v9072_v55  ;;  %v3637_v5 = vrot.slane %v3610_v3, 4  ;;  %v3645_v31 = vrot.slane %v3614_v7, 4  ;;  %v9074_v26 = vadd.f32 %v3369_v43, %v3345_v58  ;;  %v9078_v29 = vpop.eup %5906  ;;  %vm12978_vm9 = vmmov %vm12961_vm2  ;;  %v9088_v47 = vmul.f32 %v9064_v42, %v8894_v14 }
 0x31c   : > { %12977 = vst [vmem:[#allocation205_spill] sm:$0xff] %v9078_v29  ;;  %v9081_v18 = vsel %vm12978_vm9, %v3627_v25, %v3628_v41  ;;  %vm12980_vm6 = vmmov %vm12961_vm2  ;;  %v9092_v45 = vmul.f32 %v9072_v55, %v8894_v14  ;;  %v9106_v3 = vadd.f32 %v3373_v60, %v3349_v21  ;;  %v9114_v7 = vmul.f32 %v9064_v42, %v8940_v10  ;;  %v12988_v42 = vld [vmem:[#allocation133_spill] sm:$0xff] }
 0x31d   : > { %12979 = vst [vmem:[#allocation206_spill] sm:$0xff] %v9081_v18  ;;  %v9084_v33 = vsel %vm12980_vm6, %v3628_v41, %v3639_v53  ;;  %vm12982_vm14 = vmmov %vm12961_vm2  ;;  %v9100_v58 = vsel %vm12961_vm2, %v3637_v5, %v3645_v31  ;;  %v9104_v53 = vmul.f32 %v9052_v40, %v8940_v10  ;;  %v9110_v14 = vpop.eup %5908  ;;  %v9118_v25 = vmul.f32 %v9072_v55, %v8940_v10  ;;  %v9122_v31 = vpop.permute.xlu0 %4137  ;;  %v12993_v18 = vld [vmem:[#allocation92_spill] sm:$0xff] }
 0x31e   : > { %12981 = vst [vmem:[#allocation207_spill] sm:$0xff] %v9084_v33  ;;  %v9097_v43 = vsel %vm12982_vm14, %v3636_v50, %v3637_v5  ;;  %12984 = vst [vmem:[#allocation209_spill] sm:$0xff] %v9110_v14  ;;  %v3307_v5 = vmul.f32 %v9078_v29, %v8984_v30  ;;  %v9124_v21 = vpop.eup %5910  ;;  %v3308_v60 = vmul.f32 %v9110_v14, %v12964_v23  ;;  %v3387_v40 = vmul.f32 1.442695, %v3383_v19  ;;  %v9132_v10 = vpop.permute.xlu1 %4135 }
 0x31f   : > { %12983 = vst [vmem:[#allocation208_spill] sm:$0xff] %v9097_v43  ;;  %12985 = vst [vmem:[#allocation210_spill] sm:$0xff] %v9122_v31  ;;  %v3385_v41 = vsub.f32 %v12853_v27, %v8769_v63  ;;  %v3386_v50 = vsub.f32 %v12852_v4, %v8860_v17  ;;  %v3310_v55 = vmul.f32 %v9124_v21, %v8963_v62  ;;  %v3389_v28 = vmul.f32 1.442695, %v3384_v51  ;;  %v12996_v43 = vld [vmem:[#allocation22_spill] sm:$0xff] }
 0x320   : > { %12986 = vst [vmem:[#allocation211_spill] sm:$0xff] %v9124_v21  ;;  %12987 = vst [vmem:[#allocation212_spill] sm:$0xff] %v9132_v10  ;;  %v3418_v31 = vsub.f32 %v12988_v42, %v8860_v17  ;;  %v9140_v22 = vmul.f32 %v8884_v48, %v8963_v62  ;;  %5920 = vpow2.f32 %v3387_v40  ;;  %v9146_v19 = vmul.f32 %v8921_v1, %v8984_v30 }
 0x321   : > { %v3391_v27 = vmul.f32 1.442695, %v3385_v41  ;;  %v3393_v4 = vmul.f32 1.442695, %v3386_v50  ;;  %5922 = vpow2.f32 %v3389_v28  ;;  %v3447_v10 = vsub.f32 %v12867_v20, %v8847_v52  ;;  %v9156_v40 = vpop.permute.xlu0 %4141  ;;  %v12992_v50 = vld [vmem:[#allocation81_spill] sm:$0xff]  ;;  %4869 = vrot.lane.b32.xlu0 %v6931_v9, %s6092_s25  ;;  %4867 = vrot.lane.b32.xlu1 %v12536_v36, %s6092_s25 }
 0x322   : > { %v9150_v51 = vpop.eup %5912  ;;  %v3425_v42 = vmul.f32 1.442695, %v3418_v31  ;;  %v3448_v15 = vsub.f32 %v12832_v54, %v8731_v6  ;;  %12990 = vst [vmem:[#allocation213_spill] sm:$0xff] %v9156_v40  ;;  %v3449_v39 = vsub.f32 %v12993_v18, %v8769_v63  ;;  %v3450_v31 = vsub.f32 %v12869_v34, %v8860_v17  ;;  %v9166_v28 = vpop.permute.xlu1 %4139 }
 0x323   : > { %12989 = vst [vmem:[#allocation133_spill] sm:$0xff] %v9150_v51  ;;  %v9158_v41 = vpop.eup %5914  ;;  %v3339_v33 = vmul.f32 %v9150_v51, %v12992_v50  ;;  %5924 = vpow2.f32 %v3391_v27  ;;  %12994 = vst [vmem:[#allocation81_spill] sm:$0xff] %v9166_v28  ;;  %v3451_v40 = vmul.f32 1.442695, %v3447_v10  ;;  %v12997_v27 = vld [vmem:[#allocation80_spill] sm:$0xff]  ;;  %v9184_v6 = vmul.f32 %v8926_v8, %v8963_v62 }
 0x324   : > { %12991 = vst [vmem:[#allocation214_spill] sm:$0xff] %v9158_v41  ;;  %v9168_v20 = vpop.eup %5916  ;;  %v3340_v54 = vmul.f32 %v9158_v41, %v12996_v43  ;;  %5926 = vpow2.f32 %v3393_v4  ;;  %v3453_v16 = vmul.f32 1.442695, %v3448_v15  ;;  %v3455_v63 = vmul.f32 1.442695, %v3449_v39 }
 0x325   : > { %12995 = vst [vmem:[#allocation92_spill] sm:$0xff] %v9168_v20  ;;  %v3342_v44 = vmul.f32 %v9168_v20, %v12997_v27  ;;  %v3347_v18 = vadd.f32 %v3339_v33, %v3307_v5  ;;  %5928 = vpow2.f32 %v3425_v42  ;;  %v3457_v28 = vmul.f32 1.442695, %v3450_v31  ;;  %v9180_v10 = vpop.permute.xlu0 %4145  ;;  %v12999_v33 = vld [vmem:[#allocation51_spill] sm:$0xff]  ;;  %4973 = vrot.lane.b32.xlu0 %v12563_v56, %s12345_s23  ;;  %4971 = vrot.lane.b32.xlu1 %v12565_v61, %s12345_s23 }
 0x326   : > { %v3348_v34 = vadd.f32 %v3340_v54, %v3308_v60  ;;  %5930 = vpow2.f32 %v3451_v40  ;;  %v3482_v4 = vsub.f32 %v8776_v49, %v8860_v17  ;;  %12998 = vst [vmem:[#allocation22_spill] sm:$0xff] %v9180_v10  ;;  %vm13000_vm9 = vcmp.lt.s32.totalorder %v12828_v57, 64  ;;  %v9190_v5 = vpop.permute.xlu1 %4143  ;;  %v13002_v49 = vld [vmem:[#allocation78_spill] sm:$0xff]  ;;  %v13005_v40 = vld [vmem:[#allocation16_spill] sm:$0xff]  ;;  %v13008_v54 = vld [vmem:[#allocation73_spill] sm:$0xff] }
 0x327   : > { %v3350_v15 = vadd.f32 %v3342_v44, %v3310_v55  ;;  %5932 = vpow2.f32 %v3453_v16  ;;  %v3295_v39 = vsel %vm13000_vm9, %v8233_v37, %v12999_v33  ;;  %13001 = vst [vmem:[#allocation80_spill] sm:$0xff] %v9190_v5  ;;  %vm13003_vm6 = vmmov %vm13000_vm9  ;;  %vm13012_vm14 = vcmask 916480  }
 0x328   : > { %v3380_v60 = vadd.f32 %v9028_v11, %v3348_v34  ;;  %5934 = vpow2.f32 %v3455_v63  ;;  %v3489_v42 = vmul.f32 1.442695, %v3482_v4  ;;  %v9197_v44 = vsel %vm13003_vm6, %v12999_v33, %v13002_v49  ;;  %v13004_v11 = vld [vmem:[#allocation79_spill] sm:$0xff]  ;;  %vm13015_vm2 = vmmov %vm13012_vm14 }
 0x329   : > { %v9202_v16 = vadd.f32 %v9104_v53, %v3350_v15  ;;  %5936 = vpow2.f32 %v3457_v28  ;;  %v3303_v37 = vmul.f32 %v9078_v29, %v9197_v44  ;;  %v3304_v63 = vmul.f32 %v9110_v14, %v12960_v24  ;;  %v9215_v31 = vpop.permute.xlu0 %4149  ;;  %v9217_v28 = vpop.eup %5918  ;;  %v13013_v29 = vld [vmem:[#allocation180_spill] sm:$0xff]  ;;  %vm13017_vm9 = vmmov %vm13015_vm2  ;;  %4977 = vrot.lane.b32.xlu0 %v6925_v2, %s12345_s23  ;;  %4975 = vrot.lane.b32.xlu1 %v6900_v13, %s12345_s23 }
 0x32a   : > { %5938 = vpow2.f32 %v3489_v42  ;;  %v3306_v57 = vmul.f32 %v9124_v21, %v3295_v39  ;;  %v3335_v55 = vmul.f32 %v9150_v51, %v13004_v11  ;;  %v3336_v53 = vmul.f32 %v9158_v41, %v13005_v40  ;;  %13006 = vst [vmem:[#allocation51_spill] sm:$0xff] %v9215_v31  ;;  %13007 = vst [vmem:[#allocation78_spill] sm:$0xff] %v9217_v28  ;;  %v9230_v42 = vpop.permute.xlu1 %4147  ;;  %v13011_v51 = vld [vmem:[#allocation179_spill] sm:$0xff] }
 0x32b   : > { %v3338_v34 = vmul.f32 %v9168_v20, %v13008_v54  ;;  %v3368_v4 = vmul.f32 %v8875_v0, %v9197_v44  ;;  %v9224_v15 = vmul.f32 %v8884_v48, %v3295_v39  ;;  %v9228_v33 = vmul.f32 %v8921_v1, %v9197_v44  ;;  %13009 = vst [vmem:[#allocation79_spill] sm:$0xff] %v9230_v42  ;;  %v13010_v0 = vld [vmem:[#allocation75_spill] sm:$0xff]  ;;  %v13014_v42 = vld [vmem:[#allocation74_spill] sm:$0xff]  ;;  %vm13022_vm6 = vmmov %vm13015_vm2 }
 0x32c   : > { %v3371_v49 = vmul.f32 %v9217_v28, %v8963_v62  ;;  %v3343_v21 = vadd.f32 %v3335_v55, %v3303_v37  ;;  %v3344_v41 = vadd.f32 %v3336_v53, %v3304_v63  ;;  %v3367_v14 = vmul.f32 %v9217_v28, %v3295_v39 }
 0x32d   : > { %v3346_v20 = vadd.f32 %v3338_v34, %v3306_v57  ;;  %v9238_v48 = vmul.f32 %v8926_v8, %v3295_v39  ;;  %v9243_v1 = vsel %vm13012_vm14, %v13011_v51, %v13010_v0  ;;  %v9248_v62 = vsel %vm13015_vm2, %v13014_v42, %v13013_v29  ;;  %v9252_v37 = vpop.eup %5920  ;;  %v9259_v0 = vpop.permute.xlu0 %4171  ;;  %vm13026_vm14 = vmmov %vm13015_vm2  ;;  %4981 = vrot.lane.b32.xlu0 %v12536_v36, %s12345_s23 }
 0x32e   : > { %13016 = vst [vmem:[#allocation16_spill] sm:$0xff] %v9252_v37  ;;  %v3379_v63 = vadd.f32 %v3371_v49, %v3347_v18  ;;  %v3375_v57 = vadd.f32 %v3367_v14, %v3343_v21  ;;  %v3376_v55 = vadd.f32 %v3368_v4, %v3344_v41  ;;  %v9257_v39 = vsel %vm13017_vm9, %v13013_v29, %v13011_v51  ;;  %v9261_v53 = vpop.eup %5922  ;;  %v13020_v18 = vld [vmem:[#allocation155_spill] sm:$0xff]  ;;  %v13021_v14 = vld [vmem:[#allocation34_spill] sm:$0xff]  ;;  %v9273_v41 = vpop.permute.xlu1 %4169  ;;  %v13027_v49 = vld [vmem:[#allocation184_spill] sm:$0xff] }
 0x32f   : > { %13018 = vst [vmem:[#allocation73_spill] sm:$0xff] %v9259_v0  ;;  %13019 = vst [vmem:[#allocation75_spill] sm:$0xff] %v9261_v53  ;;  %v3403_v34 = vmul.f32 %v9252_v37, %v12997_v27  ;;  %v3378_v42 = vadd.f32 %v9068_v59, %v3346_v20  ;;  %v3399_v8 = vmul.f32 %v9252_v37, %v13008_v54  ;;  %v13025_v59 = vld [vmem:[#allocation183_spill] sm:$0xff]  ;;  %4979 = vrot.lane.b32.xlu1 %v12537_v46, %s12345_s23 }
 0x330   : > { %v9271_v21 = vsel %vm13022_vm6, %v13021_v14, %v13020_v18  ;;  %13023 = vst [vmem:[#allocation179_spill] sm:$0xff] %v9273_v41  ;;  %v9275_v29 = vpop.eup %5924  ;;  %v3404_v51 = vmul.f32 %v9261_v53, %v12992_v50  ;;  %v3400_v4 = vmul.f32 %v9261_v53, %v13004_v11  ;;  %v9284_v20 = vsel %vm13026_vm14, %v13025_v59, %v13021_v14  ;;  %vm13037_vm9 = vmmov %vm13015_vm2 }
 0x331   : > { %13024 = vst [vmem:[#allocation180_spill] sm:$0xff] %v9275_v29  ;;  %v9289_v37 = vsel %vm13015_vm2, %v13020_v18, %v13027_v49  ;;  %v9293_v28 = vpop.eup %5926  ;;  %v3405_v0 = vmul.f32 %v9275_v29, %v12996_v43  ;;  %v3411_v41 = vadd.f32 %v3403_v34, %v3379_v63  ;;  %v3401_v53 = vmul.f32 %v9275_v29, %v13005_v40  ;;  %v9307_v56 = vpop.permute.xlu0 %4177 }
 0x332   : > { %13028 = vst [vmem:[#allocation74_spill] sm:$0xff] %v9289_v37  ;;  %13029 = vst [vmem:[#allocation155_spill] sm:$0xff] %v9293_v28  ;;  %v3407_v31 = vadd.f32 %v3399_v8, %v3375_v57  ;;  %v9301_v14 = vpop.eup %5928  ;;  %v3406_v18 = vmul.f32 %v9293_v28, %v12958_v35  ;;  %v3412_v5 = vadd.f32 %v3404_v51, %v3380_v60  ;;  %v9316_v61 = vpop.permute.xlu1 %4175  ;;  %4985 = vrot.lane.b32.xlu0 %v6935_v38, %s12345_s23  ;;  %vm13046_vm6 = vcmask 392192  }
 0x333   : > { %13030 = vst [vmem:[#allocation34_spill] sm:$0xff] %v9301_v14  ;;  %v3402_v10 = vmul.f32 %v9293_v28, %v12957_v32  ;;  %v3408_v37 = vadd.f32 %v3400_v4, %v3376_v55  ;;  %v9309_v63 = vpop.eup %5930  ;;  %v3413_v34 = vadd.f32 %v3405_v0, %v9106_v3  ;;  %v3438_v8 = vmul.f32 %v9301_v14, %v12964_v23  ;;  %vm13051_vm14 = vmmov %vm13046_vm6 }
 0x334   : > { %13031 = vst [vmem:[#allocation183_spill] sm:$0xff] %v9309_v63  ;;  %v3443_v57 = vadd.f32 %v9114_v7, %v3411_v41  ;;  %v3409_v29 = vadd.f32 %v3401_v53, %v9074_v26  ;;  %v9318_v60 = vpop.eup %5932  ;;  %v3414_v51 = vadd.f32 %v3406_v18, %v9202_v16  ;;  %v3444_v55 = vadd.f32 %v9140_v22, %v3412_v5 }
 0x335   : > { %13032 = vst [vmem:[#allocation184_spill] sm:$0xff] %v9318_v60  ;;  %v3467_v4 = vmul.f32 %v9309_v63, %v12958_v35  ;;  %v3410_v28 = vadd.f32 %v3402_v10, %v3378_v42  ;;  %v9326_v3 = vpop.eup %5934  ;;  %v3445_v7 = vadd.f32 %v9146_v19, %v3413_v34  ;;  %v3468_v26 = vmul.f32 %v9318_v60, %v12997_v27  ;;  %v9343_v53 = vpop.permute.xlu0 %4181 }
 0x336   : > { %13033 = vst [vmem:[#allocation215_spill] sm:$0xff] %v9326_v3  ;;  %v3434_v0 = vmul.f32 %v9301_v14, %v12960_v24  ;;  %v3439_v16 = vadd.f32 %v9088_v47, %v3407_v31  ;;  %v9336_v35 = vpop.eup %5936  ;;  %v3446_v22 = vadd.f32 %v3438_v8, %v3414_v51  ;;  %v3469_v10 = vmul.f32 %v9326_v3, %v12992_v50  ;;  %v9350_v18 = vpop.permute.xlu1 %4179 }
 0x337   : > { %13034 = vst [vmem:[#allocation216_spill] sm:$0xff] %v9336_v35  ;;  %v9340_v5 = vadd.f32 %v3467_v4, %v3443_v57  ;;  %v3440_v19 = vadd.f32 %v9224_v15, %v3408_v37  ;;  %v9345_v27 = vpop.eup %5938  ;;  %v3470_v47 = vmul.f32 %v9336_v35, %v12996_v43  ;;  %v3476_v31 = vadd.f32 %v3468_v26, %v3444_v55 }
 0x338   : > { %13035 = vst [vmem:[#allocation217_spill] sm:$0xff] %v9345_v27  ;;  %v3441_v42 = vadd.f32 %v9228_v33, %v3409_v29  ;;  %v3442_v41 = vadd.f32 %v3434_v0, %v3410_v28  ;;  %v3477_v34 = vadd.f32 %v3469_v10, %v3445_v7  ;;  %v3502_v50 = vmul.f32 %v9345_v27, %v8984_v30  ;;  %v13039_v7 = vld [vmem:[#allocation134_spill] sm:$0xff] }
 0x339   : > { %v3463_v15 = vmul.f32 %v9309_v63, %v12957_v32  ;;  %v3464_v37 = vmul.f32 %v9318_v60, %v13008_v54  ;;  %v3478_v43 = vadd.f32 %v3470_v47, %v3446_v22  ;;  %v3508_v8 = vadd.f32 %v9118_v25, %v3476_v31  ;;  %v9372_v57 = vpop.permute.xlu0 %4185  ;;  %v13041_v22 = vld [vmem:[#allocation160_spill] sm:$0xff]  ;;  %4983 = vrot.lane.b32.xlu1 %v6931_v9, %s12345_s23  ;;  %v13104_v63 = vld [vmem:[#allocation121_spill] sm:$0xff] }
 0x33a   : > { %v3465_v28 = vmul.f32 %v9326_v3, %v13004_v11  ;;  %v3466_v33 = vmul.f32 %v9336_v35, %v13005_v40  ;;  %v3509_v30 = vadd.f32 %v9184_v6, %v3477_v34  ;;  %v3498_v29 = vmul.f32 %v9345_v27, %v9197_v44  ;;  %13036 = vst [vmem:[#allocation218_spill] sm:$0xff] %v9372_v57  ;;  %v9377_v40 = vpop.permute.xlu1 %4183  ;;  %v13040_v44 = vld [vmem:[#allocation19_spill] sm:$0xff]  ;;  %v13098_v27 = vld [vmem:[#allocation86_spill] sm:$0xff]  ;;  %v13102_v3 = vld [vmem:[#allocation152_spill] sm:$0xff] }
 0x33b   : > { %v9368_v32 = vadd.f32 %v3463_v15, %v3439_v16  ;;  %v3472_v54 = vadd.f32 %v3464_v37, %v3440_v19  ;;  %v3510_v25 = vadd.f32 %v3502_v50, %v3478_v43  ;;  %v3700_v11 = vsel %vm13037_vm9, %v13027_v49, %v13025_v59  ;;  %13038 = vst [vmem:[#allocation219_spill] sm:$0xff] %v9377_v40  ;;  %v13043_v19 = vld [vmem:[#allocation168_spill] sm:$0xff]  ;;  %v13048_v50 = vld [vmem:[#allocation63_spill] sm:$0xff] }
 0x33c   : > { %v3473_v51 = vadd.f32 %v3465_v28, %v3441_v42  ;;  %v3474_v55 = vadd.f32 %v3466_v33, %v3442_v41  ;;  %v9380_v4 = vadd.f32 %v9014_v12, %v3509_v30  ;;  %v3479_v26 = vsub.f32 %v13039_v7, %v8847_v52  ;;  %v13042_v12 = vld [vmem:[#allocation149_spill] sm:$0xff]  ;;  %v13044_v42 = vld [vmem:[#allocation52_spill] sm:$0xff]  ;;  %v13045_v41 = vld [vmem:[#allocation187_spill] sm:$0xff]  ;;  %5007 = vrot.lane.b32.xlu0 %v6935_v38, %s12298_s22 }
 0x33d   : > { %v3504_v6 = vadd.f32 %v9092_v45, %v3472_v54  ;;  %v3663_v0 = vsub.f32 %v13040_v44, %v8847_v52  ;;  %v9390_v16 = vadd.f32 %v9100_v58, %v3510_v25  ;;  %v3664_v10 = vsub.f32 %v13042_v12, %v13041_v22  ;;  %v9403_v58 = vpop.permute.xlu0 %4289  ;;  %v13049_v15 = vld [vmem:[#allocation208_spill] sm:$0xff]  ;;  %v13050_v28 = vld [vmem:[#allocation186_spill] sm:$0xff]  ;;  %v13059_v7 = vld [vmem:[#allocation115_spill] sm:$0xff]  ;;  %5005 = vrot.lane.b32.xlu1 %v6925_v2, %s12298_s22 }
 0x33e   : > { %v3505_v59 = vadd.f32 %v9238_v48, %v3473_v51  ;;  %v3506_v49 = vadd.f32 %v3498_v29, %v3474_v55  ;;  %v3483_v45 = vmul.f32 1.442695, %v3479_v26  ;;  %v3731_v34 = vsel %vm13046_vm6, %v13045_v41, %v13044_v42  ;;  %13047 = vst [vmem:[#allocation134_spill] sm:$0xff] %v9403_v58  ;;  %v9414_v30 = vpop.permute.xlu1 %4287  ;;  %v13053_v54 = vld [vmem:[#allocation130_spill] sm:$0xff]  ;;  %v13056_v51 = vld [vmem:[#allocation91_spill] sm:$0xff]  ;;  %v13103_v60 = vld [vmem:[#allocation40_spill] sm:$0xff] }
 0x33f   : > { %v9398_v47 = vadd.f32 %v13043_v19, %v3504_v6  ;;  %v3667_v31 = vmul.f32 1.442695, %v3663_v0  ;;  %v3669_v43 = vmul.f32 1.442695, %v3664_v10  ;;  %v3745_v33 = vsel %vm13051_vm14, %v13050_v28, %v13045_v41  ;;  %13052 = vst [vmem:[#allocation19_spill] sm:$0xff] %v9414_v30  ;;  %v13054_v29 = vld [vmem:[#allocation110_spill] sm:$0xff] }
 0x340   : > { %v9406_v48 = vadd.f32 %v13048_v50, %v3505_v59  ;;  %v9409_v37 = vadd.f32 %v13049_v15, %v3506_v49  ;;  %5940 = vpow2.f32 %v3483_v45  ;;  %vm13055_vm2 = vcmp.lt.s32.totalorder %v13054_v29, 48  ;;  %v13058_v6 = vld [vmem:[#allocation89_spill] sm:$0xff]  ;;  %v13061_v0 = vld [vmem:[#allocation70_spill] sm:$0xff]  ;;  %v13062_v59 = vld [vmem:[#allocation12_spill] sm:$0xff] }
 0x341   : > { %v9419_v25 = vsel %vm13055_vm2, %v13053_v54, %v3745_v33  ;;  %vm13057_vm9 = vcmp.lt.s32.totalorder %v13056_v51, 48  ;;  %v3746_v26 = vsel %vm13046_vm6, %v13059_v7, %v13058_v6  ;;  %5942 = vpow2.f32 %v3667_v31  ;;  %vm13060_vm14 = vmmov %vm13055_vm2  ;;  %v13063_v12 = vld [vmem:[#allocation122_spill] sm:$0xff]  ;;  %v9451_v41 = vpop.permute.xlu0 %4293  ;;  %v13070_v15 = vld [vmem:[#allocation109_spill] sm:$0xff] }
 0x342   : > { %v9424_v55 = vsel %vm13057_vm9, %v9248_v62, %v3731_v34  ;;  %v9434_v44 = vsel %vm13060_vm14, %v9271_v21, %v3746_v26  ;;  %v3665_v49 = vsub.f32 %v13062_v59, %v13061_v0  ;;  %v3666_v62 = vsub.f32 %v13063_v12, %v8860_v17  ;;  %v13064_v10 = vld [vmem:[#allocation190_spill] sm:$0xff]  ;;  %vm13065_vm2 = vmmov %vm13046_vm6  ;;  %v13067_v21 = vld [vmem:[#allocation76_spill] sm:$0xff]  ;;  %13069 = vst [vmem:[#allocation149_spill] sm:$0xff] %v9451_v41  ;;  %v9463_v54 = vpop.permute.xlu1 %4291 }
 0x343   : > { %5944 = vpow2.f32 %v3669_v43  ;;  %v3732_v45 = vsel %vm13065_vm2, %v13044_v42, %v13064_v10  ;;  %vm13066_vm9 = vmmov %vm13065_vm2  ;;  %vm13071_vm14 = vcmp.lt.s32.totalorder %v13070_v15, 48  ;;  %v13072_v33 = vld [vmem:[#allocation112_spill] sm:$0xff]  ;;  %13074 = vst [vmem:[#allocation168_spill] sm:$0xff] %v9463_v54  ;;  %v13077_v59 = vld [vmem:[#allocation90_spill] sm:$0xff]  ;;  %v3816_v14 = vsub.f32 %v13102_v3, %v13041_v22 }
 0x344   : > { %v3733_v19 = vsel %vm13066_vm9, %v13064_v10, %v13050_v28  ;;  %vm13068_vm6 = vmmov %vm13065_vm2  ;;  %v3671_v34 = vmul.f32 1.442695, %v3665_v49  ;;  %v3673_v50 = vmul.f32 1.442695, %v3666_v62  ;;  %v9456_v43 = vsel %vm13071_vm14, %v9257_v39, %v3732_v45  ;;  %v13080_v12 = vld [vmem:[#allocation74_spill] sm:$0xff]  ;;  %v13083_v62 = vld [vmem:[#allocation192_spill] sm:$0xff] }
 0x345   : > { %v3736_v31 = vsel %vm13068_vm6, %v13067_v21, %v13059_v7  ;;  %vm13073_vm2 = vcmp.lt.s32.totalorder %v13072_v33, 48  ;;  %v13076_v7 = vld [vmem:[#allocation107_spill] sm:$0xff]  ;;  %v3734_v39 = vsel %vm13068_vm6, %v13058_v6, %v13077_v59  ;;  %vm13078_vm14 = vmmov %vm13068_vm6  ;;  %v13084_v10 = vld [vmem:[#allocation193_spill] sm:$0xff]  ;;  %vm13085_vm6 = vcmask 850944  }
 0x346   : > { %v9461_v42 = vsel %vm13073_vm2, %v9243_v1, %v3733_v19  ;;  %vm13075_vm9 = vmmov %vm13073_vm2  ;;  %v9471_v26 = vadd.f32 %v13076_v7, %v3508_v8  ;;  %v3735_v49 = vsel %vm13078_vm14, %v13077_v59, %v13067_v21  ;;  %v13079_v1 = vld [vmem:[#allocation6_spill] sm:$0xff]  ;;  %5946 = vpow2.f32 %v3671_v34  ;;  %v13086_v45 = vld [vmem:[#allocation5_spill] sm:$0xff]  ;;  %v9504_v7 = vpop.permute.xlu0 %4297 }
 0x347   : > { %v9468_v28 = vsel %vm13075_vm9, %v9284_v20, %v3736_v31  ;;  %5013 = vrot.lane.b32.xlu0 %v13079_v1, %s12298_s22  ;;  %vm13081_vm2 = vcmp.lt.s32.totalorder %v13056_v51, 48  ;;  %vm13082_vm9 = vcmp.lt.s32.totalorder %v13070_v15, 48  ;;  %v3847_v6 = vsel %vm13085_vm6, %v13084_v10, %v13083_v62  ;;  %5011 = vrot.lane.b32.xlu1 %v13086_v45, %s12298_s22  ;;  %v13087_v19 = vld [vmem:[#allocation195_spill] sm:$0xff]  ;;  %vm13088_vm14 = vmmov %vm13085_vm6  ;;  %v13089_v31 = vld [vmem:[#allocation197_spill] sm:$0xff]  ;;  %13092 = vst [vmem:[#allocation52_spill] sm:$0xff] %v9504_v7 }
 0x348   : > { %v9484_v20 = vsel %vm13081_vm2, %v13080_v12, %v3734_v39  ;;  %v9488_v8 = vsel %vm13082_vm9, %v3700_v11, %v3735_v49  ;;  %5948 = vpow2.f32 %v3673_v50  ;;  %v3863_v21 = vsel %vm13088_vm14, %v13087_v19, %v13084_v10  ;;  %vm13090_vm2 = vmmov %vm13085_vm6  ;;  %v13093_v59 = vld [vmem:[#allocation198_spill] sm:$0xff]  ;;  %v13094_v39 = vld [vmem:[#allocation85_spill] sm:$0xff] }
 0x349   : > { %v3848_v34 = vsel %vm13090_vm2, %v13083_v62, %v13089_v31  ;;  %vm13091_vm9 = vmmov %vm13090_vm2  ;;  %v13096_v50 = vld [vmem:[#allocation97_spill] sm:$0xff]  ;;  %v13106_v7 = vld [vmem:[#allocation98_spill] sm:$0xff]  ;;  %v3821_v30 = vmul.f32 1.442695, %v3816_v14 }
 0x34a   : > { %v3849_v11 = vsel %vm13091_vm9, %v13089_v31, %v13087_v19  ;;  %vm13095_vm6 = vmmov %vm13090_vm2  ;;  %v9518_v62 = vsel %vm13090_vm2, %v13098_v27, %v13096_v50  ;;  %v9520_v19 = vpop.permute.xlu1 %4295  ;;  %v13101_v31 = vld [vmem:[#allocation18_spill] sm:$0xff]  ;;  %v13113_v54 = vld [vmem:[#allocation15_spill] sm:$0xff] }
 0x34b   : > { %v3850_v49 = vsel %vm13095_vm6, %v13094_v39, %v13093_v59  ;;  %vm13097_vm5 = vmmov %vm13090_vm2  ;;  %13100 = vst [vmem:[#allocation187_spill] sm:$0xff] %v9520_v19  ;;  %v3815_v35 = vsub.f32 %v13101_v31, %v8847_v52  ;;  %5017 = vrot.lane.b32.xlu0 %v12537_v46, %s12298_s22  ;;  %vm13108_vm6 = vcmp.lt.s32.totalorder %v13054_v29, 40  ;;  %v13110_v3 = vld [vmem:[#allocation66_spill] sm:$0xff]  ;;  %v13111_v31 = vld [vmem:[#allocation99_spill] sm:$0xff]  ;;  %v3817_v41 = vsub.f32 %v13113_v54, %v13061_v0 }
 0x34c   : > { %v3864_v12 = vsel %vm13097_vm5, %v13096_v50, %v13094_v39  ;;  %vm13099_vm14 = vmmov %vm13090_vm2  ;;  %vm13105_vm5 = vcmask 326656   ;;  %5015 = vrot.lane.b32.xlu1 %v6900_v13, %s12298_s22  ;;  %v13116_v40 = vld [vmem:[#allocation100_spill] sm:$0xff]  ;;  %v13119_v14 = vld [vmem:[#allocation147_spill] sm:$0xff] }
 0x34d   : > { %v3851_v10 = vsel %vm13099_vm14, %v13093_v59, %v13098_v27  ;;  %v3883_v39 = vsel %vm13105_vm5, %v13104_v63, %v13103_v60  ;;  %vm13107_vm9 = vmmov %vm13105_vm5  ;;  %vm13109_vm14 = vcmp.lt.s32.totalorder %v13056_v51, 40  ;;  %v3823_v58 = vmul.f32 1.442695, %v3817_v41 }
 0x34e   : > { %v3897_v59 = vsel %vm13107_vm9, %v13106_v7, %v13104_v63  ;;  %v9540_v50 = vsel %vm13109_vm14, %v3848_v34, %v3883_v39  ;;  %vm13112_vm2 = vmmov %vm13105_vm5  ;;  %v3819_v63 = vmul.f32 1.442695, %v3815_v35  ;;  %v9555_v39 = vpop.permute.xlu0 %4301 }
 0x34f   : > { %v9536_v27 = vsel %vm13108_vm6, %v3847_v6, %v3897_v59  ;;  %v3898_v19 = vsel %vm13112_vm2, %v13111_v31, %v13110_v3  ;;  %vm13114_vm5 = vmmov %vm13108_vm6  ;;  %v13115_v59 = vld [vmem:[#allocation174_spill] sm:$0xff]  ;;  %5021 = vrot.lane.b32.xlu0 %v6931_v9, %s12298_s22 }
 0x350   : > { %v9551_v6 = vsel %vm13114_vm5, %v3850_v49, %v3898_v19  ;;  %v3818_v34 = vsub.f32 %v13115_v59, %v8860_v17  ;;  %vm13117_vm9 = vmmov %vm13112_vm2  ;;  %v9566_v49 = vpop.permute.xlu1 %4299  ;;  %5950 = vpow2.f32 %v3819_v63  ;;  %vm13122_vm5 = vcmp.lt.s32.totalorder %v13072_v33, 40  ;;  %5019 = vrot.lane.b32.xlu1 %v12536_v36, %s12298_s22 }
 0x351   : > { %v3884_v57 = vsel %vm13117_vm9, %v13103_v60, %v13116_v40  ;;  %vm13118_vm6 = vmmov %vm13112_vm2  ;;  %v9578_v60 = vpop.eup %5940  ;;  %5952 = vpow2.f32 %v3821_v30 }
 0x352   : > { %v3885_v54 = vsel %vm13118_vm6, %v13116_v40, %v13106_v7  ;;  %vm13120_vm14 = vmmov %vm13112_vm2  ;;  %v3825_v19 = vmul.f32 1.442695, %v3818_v34  ;;  %vm13121_vm2 = vcmp.lt.s32.totalorder %v13070_v15, 40  ;;  %13123 = vst [vmem:[#allocation63_spill] sm:$0xff] %v9578_v60  ;;  %v13125_v7 = vld [vmem:[#allocation69_spill] sm:$0xff]  ;;  %v3495_v30 = vmul.f32 %v9578_v60, %v12960_v24  ;;  %v13131_v34 = vld [vmem:[#allocation102_spill] sm:$0xff] }
 0x353   : > { %v3888_v35 = vsel %vm13120_vm14, %v13119_v14, %v13111_v31  ;;  %v9570_v59 = vsel %vm13121_vm2, %v3849_v11, %v3884_v57  ;;  %v9574_v41 = vsel %vm13122_vm5, %v3863_v21, %v3885_v54  ;;  %vm13124_vm9 = vmmov %vm13122_vm5  ;;  %v3886_v31 = vsel %vm13118_vm6, %v13110_v3, %v13125_v7  ;;  %v9592_v21 = vpop.eup %5942  ;;  %v9602_v3 = vpop.permute.xlu0 %4323  ;;  %5125 = vrot.lane.b32.xlu0 %v13079_v1, %s6097_s5 }
 0x354   : > { %v9582_v40 = vsel %vm13124_vm9, %v3864_v12, %v3888_v35  ;;  %vm13126_vm14 = vmmov %vm13118_vm6  ;;  %13127 = vst [vmem:[#allocation208_spill] sm:$0xff] %v9592_v21  ;;  %v3499_v11 = vmul.f32 %v9578_v60, %v12964_v23  ;;  %5954 = vpow2.f32 %v3823_v58  ;;  %vm13128_vm2 = vcmp.lt.s32.totalorder %v13056_v51, 40  ;;  %v9604_v63 = vpop.eup %5944  ;;  %v9612_v23 = vpop.permute.xlu1 %4321  ;;  %5123 = vrot.lane.b32.xlu1 %v13086_v45, %s6097_s5 }
 0x355   : > { %v3887_v57 = vsel %vm13126_vm14, %v13125_v7, %v13119_v14  ;;  %v9600_v12 = vsel %vm13128_vm2, %v3851_v10, %v3886_v31  ;;  %13129 = vst [vmem:[#allocation186_spill] sm:$0xff] %v9602_v3  ;;  %13130 = vst [vmem:[#allocation130_spill] sm:$0xff] %v9604_v63  ;;  %v3755_v54 = vmul.f32 %v9592_v21, %v13131_v34  ;;  %5956 = vpow2.f32 %v3825_v19  ;;  %v13133_v10 = vld [vmem:[#allocation46_spill] sm:$0xff] }
 0x356   : > { %v3759_v14 = vmul.f32 %v9592_v21, %v9419_v25  ;;  %v3763_v24 = vmul.f32 %v9592_v21, %v9434_v44  ;;  %13132 = vst [vmem:[#allocation110_spill] sm:$0xff] %v9612_v23  ;;  %v3503_v58 = vadd.f32 %v3495_v30, %v9368_v32  ;;  %v3756_v35 = vmul.f32 %v9604_v63, %v13133_v10  ;;  %v9626_v32 = vpop.eup %5946  ;;  %v13135_v19 = vld [vmem:[#allocation206_spill] sm:$0xff]  ;;  %v13136_v21 = vld [vmem:[#allocation207_spill] sm:$0xff] }
 0x357   : > { %v3760_v7 = vmul.f32 %v9604_v63, %v9424_v55  ;;  %v3507_v31 = vadd.f32 %v3499_v11, %v9340_v5  ;;  %v3779_v25 = vrot.slane %v3755_v54, 4  ;;  %v3764_v44 = vmul.f32 %v9604_v63, %v9484_v20  ;;  %13134 = vst [vmem:[#allocation91_spill] sm:$0xff] %v9626_v32  ;;  %v9630_v11 = vpop.permute.xlu0 %4329  ;;  %v9632_v3 = vpop.eup %5948  ;;  %v13140_v20 = vld [vmem:[#allocation164_spill] sm:$0xff]  ;;  %5129 = vrot.lane.b32.xlu0 %v6925_v2, %s6097_s5 }
 0x358   : > { %v3780_v34 = vrot.slane %v3759_v14, 4  ;;  %v3791_v60 = vrot.slane %v3763_v24, 4  ;;  %v3655_v30 = vadd.f32 %v13135_v19, %v3503_v58  ;;  %v3782_v10 = vrot.slane %v3756_v35, 4  ;;  %13137 = vst [vmem:[#allocation89_spill] sm:$0xff] %v9632_v3  ;;  %v9640_v23 = vpop.permute.xlu1 %4327  ;;  %5127 = vrot.lane.b32.xlu1 %v6900_v13, %s6097_s5 }
 0x359   : > { %v3783_v55 = vrot.slane %v3760_v7, 4  ;;  %v3659_v5 = vadd.f32 %v13136_v21, %v3507_v31  ;;  %vm13138_vm5 = vcmask 1043456   ;;  %v3757_v24 = vmul.f32 %v9626_v32, %v13140_v20  ;;  %v13142_v7 = vld [vmem:[#allocation9_spill] sm:$0xff]  ;;  %v13146_v20 = vld [vmem:[#allocation167_spill] sm:$0xff] }
 0x35a   : > { %v3781_v54 = vsel %vm13138_vm5, %v3779_v25, %v3780_v34  ;;  %vm13139_vm9 = vmmov %vm13138_vm5  ;;  %v3761_v63 = vmul.f32 %v9626_v32, %v9456_v43  ;;  %v3758_v31 = vmul.f32 %v9632_v3, %v13142_v7  ;;  %v3762_v43 = vmul.f32 %v9632_v3, %v9461_v42 }
 0x35b   : > { %v3792_v14 = vsel %vm13139_vm9, %v3780_v34, %v3791_v60  ;;  %vm13141_vm6 = vmmov %vm13138_vm5  ;;  %v9643_v35 = vadd.f32 %v3781_v54, %v3655_v30  ;;  %v3785_v25 = vrot.slane %v3757_v24, 4  ;;  %v3766_v30 = vmul.f32 %v9632_v3, %v9468_v28  ;;  %v9662_v54 = vpop.permute.xlu0 %4333  ;;  %5133 = vrot.lane.b32.xlu0 %v12536_v36, %s6097_s5 }
 0x35c   : > { %v3784_v58 = vsel %vm13141_vm6, %v3782_v10, %v3783_v55  ;;  %v9645_v21 = vadd.f32 %v3792_v14, %v3659_v5  ;;  %v3786_v34 = vrot.slane %v3761_v63, 4  ;;  %v3788_v19 = vrot.slane %v3758_v31, 4  ;;  %vm13143_vm14 = vmmov %vm13138_vm5  ;;  %v13145_v63 = vld [vmem:[#allocation129_spill] sm:$0xff]  ;;  %5131 = vrot.lane.b32.xlu1 %v12537_v46, %s6097_s5 }
 0x35d   : > { %v9652_v60 = vadd.f32 %v3784_v58, %v9398_v47  ;;  %v3765_v10 = vmul.f32 %v9626_v32, %v9488_v8  ;;  %v3793_v5 = vrot.slane %v3764_v44, 4  ;;  %v3789_v14 = vrot.slane %v3762_v43, 4  ;;  %v9673_v58 = vpop.permute.xlu1 %4331  ;;  %vm13149_vm9 = vmmov %vm13141_vm6  ;;  %v9679_v31 = vpop.eup %5950  ;;  %v13151_v43 = vld [vmem:[#allocation95_spill] sm:$0xff]  ;;  %v13161_v32 = vld [vmem:[#allocation113_spill] sm:$0xff] }
 0x35e   : > { %v3787_v47 = vsel %vm13143_vm14, %v3785_v25, %v3786_v34  ;;  %vm13144_vm2 = vcmp.lt.s32.totalorder %v13070_v15, 40  ;;  %vm13147_vm5 = vcmask 785408   ;;  %13148 = vst [vmem:[#allocation115_spill] sm:$0xff] %v9673_v58  ;;  %v3797_v8 = vrot.slane %v3766_v30, 4  ;;  %13150 = vst [vmem:[#allocation12_spill] sm:$0xff] %v9679_v31  ;;  %v9697_v30 = vpop.eup %5952 }
 0x35f   : > { %v3905_v42 = vsel %vm13144_vm2, %v9518_v62, %v3887_v57  ;;  %v9671_v24 = vsel %vm13147_vm5, %v13146_v20, %v13145_v63  ;;  %v3809_v28 = vadd.f32 %v3787_v47, %v9406_v48  ;;  %v3794_v44 = vsel %vm13149_vm9, %v3783_v55, %v3793_v5  ;;  %vm13152_vm14 = vmmov %vm13147_vm5  ;;  %v13153_v48 = vld [vmem:[#allocation72_spill] sm:$0xff]  ;;  %13155 = vst [vmem:[#allocation122_spill] sm:$0xff] %v9697_v30  ;;  %v13158_v5 = vld [vmem:[#allocation11_spill] sm:$0xff] }
 0x360   : > { %v3795_v7 = vrot.slane %v3765_v10, 4  ;;  %v3790_v62 = vsel %vm13141_vm6, %v3788_v19, %v3789_v14  ;;  %v9683_v57 = vadd.f32 %v3794_v44, %v9471_v26  ;;  %v9688_v25 = vsel %vm13152_vm14, %v13151_v43, %v13146_v20  ;;  %vm13154_vm2 = vmmov %vm13147_vm5  ;;  %v9704_v20 = vpop.permute.xlu0 %4337  ;;  %5137 = vrot.lane.b32.xlu0 %v6935_v38, %s6097_s5  ;;  %5135 = vrot.lane.b32.xlu1 %v6931_v9, %s6097_s5 }
 0x361   : > { %v9693_v55 = vsel %vm13154_vm2, %v13145_v63, %v13153_v48  ;;  %v3810_v19 = vadd.f32 %v3790_v62, %v9409_v37  ;;  %vm13156_vm5 = vmmov %vm13141_vm6  ;;  %v3907_v47 = vmul.f32 %v9679_v31, %v13158_v5  ;;  %13159 = vst [vmem:[#allocation190_spill] sm:$0xff] %v9704_v20  ;;  %v9706_v44 = vpop.eup %5954  ;;  %v3908_v58 = vmul.f32 %v9697_v30, %v13161_v32 }
 0x362   : > { %v3798_v26 = vsel %vm13156_vm5, %v3789_v14, %v3797_v8  ;;  %vm13157_vm9 = vmmov %vm13156_vm5  ;;  %13160 = vst [vmem:[#allocation76_spill] sm:$0xff] %v9706_v44  ;;  %v3911_v37 = vmul.f32 %v9679_v31, %v9536_v27  ;;  %v9714_v14 = vpop.permute.xlu1 %4335  ;;  %v3912_v8 = vmul.f32 %v9697_v30, %v9540_v50  ;;  %v3915_v62 = vmul.f32 %v9679_v31, %v9551_v6  ;;  %v13165_v27 = vld [vmem:[#allocation105_spill] sm:$0xff] }
 0x363   : > { %v3796_v10 = vsel %vm13157_vm9, %v3786_v34, %v3795_v7  ;;  %v3814_v63 = vadd.f32 %v3798_v26, %v9390_v16  ;;  %13162 = vst [vmem:[#allocation107_spill] sm:$0xff] %v9714_v14  ;;  %v9716_v34 = vpop.eup %5956  ;;  %v3931_v7 = vrot.slane %v3907_v47, 4  ;;  %v13164_v16 = vld [vmem:[#allocation111_spill] sm:$0xff]  ;;  %v3934_v26 = vrot.slane %v3908_v58, 4  ;;  %vm13167_vm6 = vmmov %vm13156_vm5 }
 0x364   : > { %v3813_v3 = vadd.f32 %v3796_v10, %v9380_v4  ;;  %13163 = vst [vmem:[#allocation90_spill] sm:$0xff] %v9716_v34  ;;  %v3909_v4 = vmul.f32 %v9706_v44, %v13164_v16  ;;  %v3932_v32 = vrot.slane %v3911_v37, 4  ;;  %v3910_v10 = vmul.f32 %v9716_v34, %v13165_v27  ;;  %v9734_v31 = vpop.permute.xlu0 %4441  ;;  %vm13169_vm14 = vmmov %vm13156_vm5  ;;  %5159 = vrot.lane.b32.xlu0 %v6935_v38, %s12300_s21 }
 0x365   : > { %v3913_v5 = vmul.f32 %v9706_v44, %v9570_v59  ;;  %v3935_v50 = vrot.slane %v3912_v8, 4  ;;  %v3943_v47 = vrot.slane %v3915_v62, 4  ;;  %v3914_v6 = vmul.f32 %v9716_v34, %v9574_v41  ;;  %13166 = vst [vmem:[#allocation6_spill] sm:$0xff] %v9734_v31  ;;  %vm13170_vm2 = vmmov %vm13156_vm5  ;;  %5157 = vrot.lane.b32.xlu1 %v6925_v2, %s12300_s21 }
 0x366   : > { %v3937_v16 = vrot.slane %v3909_v4, 4  ;;  %v3933_v37 = vsel %vm13167_vm6, %v3931_v7, %v3932_v32  ;;  %v3940_v14 = vrot.slane %v3910_v10, 4  ;;  %v3918_v27 = vmul.f32 %v9716_v34, %v9582_v40  ;;  %v9739_v20 = vpop.permute.xlu1 %4439  ;;  %vm13171_vm5 = vmmov %vm13170_vm2 }
 0x367   : > { %v3938_v58 = vrot.slane %v3913_v5, 4  ;;  %13168 = vst [vmem:[#allocation74_spill] sm:$0xff] %v9739_v20  ;;  %v3936_v59 = vsel %vm13169_vm14, %v3934_v26, %v3935_v50  ;;  %v9743_v8 = vadd.f32 %v3933_v37, %v9643_v35  ;;  %v3944_v62 = vsel %vm13170_vm2, %v3932_v32, %v3943_v47  ;;  %vm13172_vm9 = vmmov %vm13170_vm2  ;;  %v13177_v37 = vld [vmem:[#allocation165_spill] sm:$0xff] }
 0x368   : > { %v3941_v41 = vrot.slane %v3914_v6, 4  ;;  %v9749_v7 = vadd.f32 %v3936_v59, %v9652_v60  ;;  %v9752_v4 = vadd.f32 %v3944_v62, %v9645_v21  ;;  %v3949_v10 = vrot.slane %v3918_v27, 4  ;;  %v9763_v60 = vpop.permute.xlu0 %4445  ;;  %vm13174_vm6 = vmmov %vm13170_vm2  ;;  %v13180_v59 = vld [vmem:[#allocation84_spill] sm:$0xff]  ;;  %5165 = vrot.lane.b32.xlu0 %v13079_v1, %s12300_s21  ;;  %v13182_v62 = vld [vmem:[#allocation101_spill] sm:$0xff] }
 0x369   : > { %v3939_v40 = vsel %vm13171_vm5, %v3937_v16, %v3938_v58  ;;  %v3916_v32 = vmul.f32 %v9697_v30, %v9600_v12  ;;  %v3917_v5 = vmul.f32 %v9706_v44, %v3905_v42  ;;  %13173 = vst [vmem:[#allocation192_spill] sm:$0xff] %v9763_v60  ;;  %vm13175_vm14 = vcmask 785408   ;;  %v13176_v16 = vld [vmem:[#allocation126_spill] sm:$0xff]  ;;  %5163 = vrot.lane.b32.xlu1 %v13086_v45, %s12300_s21 }
 0x36a   : > { %v3942_v35 = vsel %vm13172_vm9, %v3940_v14, %v3941_v41  ;;  %v9758_v26 = vadd.f32 %v3939_v40, %v3809_v28  ;;  %v3950_v21 = vsel %vm13174_vm6, %v3941_v41, %v3949_v10  ;;  %v4001_v6 = vsel %vm13175_vm14, %v13153_v48, %v13151_v43  ;;  %vm13178_vm2 = vmmov %vm13175_vm14  ;;  %v9774_v14 = vpop.permute.xlu1 %4443  ;;  %v13186_v40 = vld [vmem:[#allocation154_spill] sm:$0xff] }
 0x36b   : > { %v9765_v47 = vadd.f32 %v3942_v35, %v3810_v19  ;;  %v4002_v28 = vsel %vm13178_vm2, %v13177_v37, %v13176_v16  ;;  %13179 = vst [vmem:[#allocation193_spill] sm:$0xff] %v9774_v14  ;;  %v9776_v27 = vadd.f32 %v3950_v21, %v3814_v63  ;;  %v3945_v12 = vrot.slane %v3916_v32, 4  ;;  %vm13181_vm5 = vmmov %vm13178_vm2  ;;  %v13185_v63 = vld [vmem:[#allocation20_spill] sm:$0xff]  ;;  %v13190_v21 = vld [vmem:[#allocation94_spill] sm:$0xff] }
 0x36c   : > { %v3947_v42 = vrot.slane %v3917_v5, 4  ;;  %v4016_v19 = vsel %vm13181_vm5, %v13180_v59, %v13177_v37  ;;  %vm13183_vm9 = vmmov %vm13178_vm2  ;;  %v3967_v41 = vsub.f32 %v13185_v63, %v8847_v52  ;;  %v3968_v10 = vsub.f32 %v13186_v40, %v13041_v22  ;;  %v13189_v5 = vld [vmem:[#allocation143_spill] sm:$0xff]  ;;  %v13192_v37 = vld [vmem:[#allocation88_spill] sm:$0xff]  ;;  %5169 = vrot.lane.b32.xlu0 %v12537_v46, %s12300_s21 }
 0x36d   : > { %v4003_v43 = vsel %vm13183_vm9, %v13176_v16, %v13182_v62  ;;  %vm13184_vm6 = vmmov %vm13178_vm2  ;;  %vm13187_vm14 = vcmask 1043456   ;;  %vm13191_vm5 = vcmask 261120   ;;  %5167 = vrot.lane.b32.xlu1 %v6900_v13, %s12300_s21 }
 0x36e   : > { %v4004_v48 = vsel %vm13184_vm6, %v13182_v62, %v13180_v59  ;;  %v3946_v35 = vsel %vm13187_vm14, %v3935_v50, %v3945_v12  ;;  %vm13188_vm2 = vmmov %vm13187_vm14  ;;  %v4035_v16 = vsel %vm13191_vm5, %v13190_v21, %v13189_v5  ;;  %v9803_v62 = vpop.permute.xlu0 %4449  ;;  %v3971_v34 = vmul.f32 1.442695, %v3967_v41  ;;  %v9810_v50 = vpop.permute.xlu1 %4447 }
 0x36f   : > { %v3948_v32 = vsel %vm13188_vm2, %v3938_v58, %v3947_v42  ;;  %vm13193_vm9 = vmmov %vm13191_vm5  ;;  %13194 = vst [vmem:[#allocation5_spill] sm:$0xff] %v9803_v62  ;;  %v9806_v63 = vadd.f32 %v3946_v35, %v9683_v57  ;;  %v3973_v44 = vmul.f32 1.442695, %v3968_v10  ;;  %vm13196_vm6 = vcmp.lt.s32.totalorder %v13054_v29, 32  ;;  %v13198_v42 = vld [vmem:[#allocation137_spill] sm:$0xff] }
 0x370   : > { %v4049_v59 = vsel %vm13193_vm9, %v13192_v37, %v13190_v21  ;;  %v9808_v40 = vadd.f32 %v3948_v32, %v3813_v3  ;;  %13195 = vst [vmem:[#allocation195_spill] sm:$0xff] %v9810_v50  ;;  %vm13197_vm14 = vcmp.lt.s32.totalorder %v13056_v51, 32  ;;  %v13199_v21 = vld [vmem:[#allocation166_spill] sm:$0xff]  ;;  %vm13200_vm2 = vmmov %vm13191_vm5  ;;  %v13201_v3 = vld [vmem:[#allocation173_spill] sm:$0xff]  ;;  %5958 = vpow2.f32 %v3971_v34  ;;  %5173 = vrot.lane.b32.xlu0 %v6931_v9, %s12300_s21 }
 0x371   : > { %v9815_v58 = vsel %vm13196_vm6, %v9671_v24, %v4049_v59  ;;  %v9820_v12 = vsel %vm13197_vm14, %v9693_v55, %v4035_v16  ;;  %v4050_v57 = vsel %vm13200_vm2, %v13199_v21, %v13198_v42  ;;  %v3969_v41 = vsub.f32 %v13201_v3, %v13061_v0  ;;  %vm13202_vm5 = vmmov %vm13196_vm6  ;;  %v13203_v10 = vld [vmem:[#allocation25_spill] sm:$0xff]  ;;  %v13204_v55 = vld [vmem:[#allocation200_spill] sm:$0xff]  ;;  %5171 = vrot.lane.b32.xlu1 %v12536_v36, %s12300_s21 }
 0x372   : > { %v9831_v24 = vsel %vm13202_vm5, %v4002_v28, %v4050_v57  ;;  %v3970_v35 = vsub.f32 %v13203_v10, %v8860_v17  ;;  %vm13205_vm9 = vmmov %vm13200_vm2  ;;  %5960 = vpow2.f32 %v3973_v44  ;;  %vm13207_vm14 = vcmp.lt.s32.totalorder %v13070_v15, 32  ;;  %v9847_v59 = vpop.permute.xlu0 %4453  ;;  %v13210_v3 = vld [vmem:[#allocation202_spill] sm:$0xff]  ;;  %v9860_v10 = vpop.permute.xlu1 %4451  ;;  %v13242_v62 = vld [vmem:[#allocation73_spill] sm:$0xff] }
 0x373   : > { %v4036_v32 = vsel %vm13205_vm9, %v13189_v5, %v13204_v55  ;;  %v3975_v16 = vmul.f32 1.442695, %v3969_v41  ;;  %vm13206_vm6 = vmmov %vm13200_vm2  ;;  %13208 = vst [vmem:[#allocation197_spill] sm:$0xff] %v9847_v59  ;;  %vm13209_vm2 = vcmp.lt.s32.totalorder %v13072_v33, 32  ;;  %v13212_v41 = vld [vmem:[#allocation204_spill] sm:$0xff] }
 0x374   : > { %v4037_v34 = vsel %vm13206_vm6, %v13204_v55, %v13192_v37  ;;  %v9845_v28 = vsel %vm13207_vm14, %v4001_v6, %v4036_v32  ;;  %v3977_v57 = vmul.f32 1.442695, %v3970_v35  ;;  %vm13211_vm5 = vmmov %vm13206_vm6  ;;  %13214 = vst [vmem:[#allocation198_spill] sm:$0xff] %v9860_v10  ;;  %v13220_v55 = vld [vmem:[#allocation212_spill] sm:$0xff]  ;;  %v13222_v32 = vld [vmem:[#allocation213_spill] sm:$0xff]  ;;  %5277 = vrot.lane.b32.xlu0 %v13079_v1, %s12299_s24 }
 0x375   : > { %v9852_v5 = vsel %vm13209_vm2, %v9688_v25, %v4037_v34  ;;  %v4040_v44 = vsel %vm13211_vm5, %v13210_v3, %v13199_v21  ;;  %vm13213_vm9 = vmmov %vm13211_vm5  ;;  %5962 = vpow2.f32 %v3975_v16  ;;  %v13219_v21 = vld [vmem:[#allocation210_spill] sm:$0xff]  ;;  %v13237_v10 = vld [vmem:[#allocation117_spill] sm:$0xff]  ;;  %5275 = vrot.lane.b32.xlu1 %v13086_v45, %s12299_s24 }
 0x376   : > { %v4038_v37 = vsel %vm13213_vm9, %v13198_v42, %v13212_v41  ;;  %vm13215_vm6 = vmmov %vm13209_vm2  ;;  %vm13217_vm2 = vcmp.lt.s32.totalorder %v13056_v51, 32  ;;  %5964 = vpow2.f32 %v3977_v57  ;;  %vm13221_vm9 = vcmask 719872   ;;  %v13227_v57 = vld [vmem:[#allocation22_spill] sm:$0xff]  ;;  %v9909_v50 = vpop.permute.xlu1 %4473 }
 0x377   : > { %v9864_v6 = vsel %vm13215_vm6, %v4016_v19, %v4040_v44  ;;  %vm13216_vm14 = vmmov %vm13211_vm5  ;;  %v4056_v35 = vsel %vm13217_vm2, %v4003_v43, %v4038_v37  ;;  %vm13218_vm5 = vcmp.lt.s32.totalorder %v13070_v15, 32  ;;  %v4151_v19 = vsel %vm13221_vm9, %v13220_v55, %v13219_v21  ;;  %v13224_v43 = vld [vmem:[#allocation81_spill] sm:$0xff]  ;;  %13238 = vst [vmem:[#allocation97_spill] sm:$0xff] %v9909_v50 }
 0x378   : > { %v4039_v25 = vsel %vm13216_vm14, %v13212_v41, %v13210_v3  ;;  %vm13223_vm6 = vmmov %vm13221_vm9  ;;  %v13228_v3 = vld [vmem:[#allocation80_spill] sm:$0xff]  ;;  %v13230_v41 = vld [vmem:[#allocation51_spill] sm:$0xff]  ;;  %v4120_v59 = vsub.f32 %v13237_v10, %v13041_v22  ;;  %5281 = vrot.lane.b32.xlu0 %v6925_v2, %s12299_s24 }
 0x379   : > { %v9875_v42 = vsel %vm13218_vm5, %v4004_v48, %v4039_v25  ;;  %v4167_v16 = vsel %vm13223_vm6, %v13222_v32, %v13220_v55  ;;  %vm13225_vm14 = vmmov %vm13223_vm6  ;;  %v9897_v25 = vpop.permute.xlu0 %4475  ;;  %v13233_v55 = vld [vmem:[#allocation79_spill] sm:$0xff]  ;;  %5279 = vrot.lane.b32.xlu1 %v6900_v13, %s12299_s24 }
 0x37a   : > { %v4152_v34 = vsel %vm13225_vm14, %v13219_v21, %v13224_v43  ;;  %vm13226_vm2 = vmmov %vm13223_vm6  ;;  %13232 = vst [vmem:[#allocation85_spill] sm:$0xff] %v9897_v25  ;;  %v13240_v25 = vld [vmem:[#allocation179_spill] sm:$0xff]  ;;  %v4125_v50 = vmul.f32 1.442695, %v4120_v59 }
 0x37b   : > { %v4153_v48 = vsel %vm13226_vm2, %v13224_v43, %v13222_v32  ;;  %vm13229_vm5 = vmmov %vm13226_vm2  ;;  %v13236_v32 = vld [vmem:[#allocation120_spill] sm:$0xff] }
 0x37c   : > { %v4154_v44 = vsel %vm13229_vm5, %v13228_v3, %v13227_v57  ;;  %vm13231_vm9 = vmmov %vm13226_vm2  ;;  %v4119_v43 = vsub.f32 %v13236_v32, %v8847_v52  ;;  %5285 = vrot.lane.b32.xlu0 %v12536_v36, %s12299_s24 }
 0x37d   : > { %v4168_v37 = vsel %vm13231_vm9, %v13230_v41, %v13228_v3  ;;  %vm13234_vm6 = vmmov %vm13226_vm2  ;;  %5283 = vrot.lane.b32.xlu1 %v12537_v46, %s12299_s24 }
 0x37e   : > { %v4155_v30 = vsel %vm13234_vm6, %v13227_v57, %v13233_v55  ;;  %vm13235_vm14 = vmmov %vm13226_vm2  ;;  %vm13239_vm2 = vcmask 195584   ;;  %v4123_v10 = vmul.f32 1.442695, %v4119_v43  ;;  %vm13245_vm6 = vcmp.lt.s32.totalorder %v13054_v29, 24 }
 0x37f   : > { %v4156_v21 = vsel %vm13235_vm14, %v13233_v55, %v13230_v41  ;;  %v4187_v3 = vsel %vm13239_vm2, %v9316_v61, %v9307_v56  ;;  %vm13241_vm5 = vmmov %vm13239_vm2  ;;  %v13244_v55 = vld [vmem:[#allocation176_spill] sm:$0xff]  ;;  %vm13246_vm14 = vcmp.lt.s32.totalorder %v13056_v51, 24 }
 0x380   : > { %v4201_v57 = vsel %vm13241_vm5, %v13240_v25, %v9316_v61  ;;  %vm13243_vm9 = vmmov %vm13239_vm2  ;;  %v4121_v32 = vsub.f32 %v13244_v55, %v13061_v0  ;;  %v9930_v60 = vsel %vm13246_vm14, %v4152_v34, %v4187_v3  ;;  %v13248_v55 = vld [vmem:[#allocation24_spill] sm:$0xff]  ;;  %v4188_v59 = vsel %vm13241_vm5, %v9307_v56, %v9350_v18  ;;  %5289 = vrot.lane.b32.xlu0 %v6935_v38, %s12299_s24 }
 0x381   : > { %v4202_v41 = vsel %vm13243_vm9, %v13242_v62, %v9343_v53  ;;  %v9926_v14 = vsel %vm13245_vm6, %v4151_v19, %v4201_v57  ;;  %vm13247_vm2 = vmmov %vm13245_vm6  ;;  %v4122_v20 = vsub.f32 %v13248_v55, %v8860_v17  ;;  %v9943_v19 = vpop.permute.xlu0 %4481  ;;  %5966 = vpow2.f32 %v4123_v10  ;;  %v13265_v55 = vld [vmem:[#allocation149_spill] sm:$0xff]  ;;  %5287 = vrot.lane.b32.xlu1 %v6931_v9, %s12299_s24 }
 0x382   : > { %v9936_v61 = vsel %vm13247_vm2, %v4154_v44, %v4202_v41  ;;  %v4127_v43 = vmul.f32 1.442695, %v4121_v32  ;;  %13249 = vst [vmem:[#allocation86_spill] sm:$0xff] %v9943_v19  ;;  %vm13250_vm9 = vmmov %vm13241_vm5  ;;  %vm13251_vm6 = vcmp.lt.s32.totalorder %v13070_v15, 24  ;;  %v13252_v44 = vld [vmem:[#allocation218_spill] sm:$0xff]  ;;  %v9955_v41 = vpop.permute.xlu1 %4479  ;;  %5968 = vpow2.f32 %v4125_v50 }
 0x383   : > { %v4189_v34 = vsel %vm13250_vm9, %v9350_v18, %v13240_v25  ;;  %v9950_v3 = vsel %vm13251_vm6, %v4153_v48, %v4188_v59  ;;  %vm13253_vm14 = vmmov %vm13241_vm5  ;;  %13254 = vst [vmem:[#allocation18_spill] sm:$0xff] %v9955_v41  ;;  %v4129_v32 = vmul.f32 1.442695, %v4122_v20  ;;  %vm13255_vm2 = vcmp.lt.s32.totalorder %v13072_v33, 24  ;;  %v13257_v18 = vld [vmem:[#allocation219_spill] sm:$0xff]  ;;  %v13259_v50 = vld [vmem:[#allocation134_spill] sm:$0xff] }
 0x384   : > { %v4192_v57 = vsel %vm13253_vm14, %v13252_v44, %v13242_v62  ;;  %v9959_v56 = vsel %vm13255_vm2, %v4167_v16, %v4189_v34  ;;  %vm13256_vm5 = vmmov %vm13255_vm2  ;;  %5970 = vpow2.f32 %v4127_v43  ;;  %v4190_v62 = vsel %vm13250_vm9, %v9343_v53, %v13257_v18  ;;  %v13260_v48 = vld [vmem:[#allocation19_spill] sm:$0xff]  ;;  %v13278_v41 = vld [vmem:[#allocation52_spill] sm:$0xff]  ;;  %5311 = vrot.lane.b32.xlu0 %v6935_v38, %s12301_s26 }
 0x385   : > { %v9963_v10 = vsel %vm13256_vm5, %v4168_v37, %v4192_v57  ;;  %vm13258_vm6 = vmmov %vm13250_vm9  ;;  %vm13261_vm14 = vcmask 654336   ;;  %v9980_v37 = vpop.eup %5958  ;;  %5972 = vpow2.f32 %v4129_v32  ;;  %vm13263_vm2 = vcmp.lt.s32.totalorder %v13056_v51, 24  ;;  %v9995_v59 = vpop.permute.xlu0 %4485  ;;  %v13285_v33 = vld [vmem:[#allocation106_spill] sm:$0xff]  ;;  %5309 = vrot.lane.b32.xlu1 %v6925_v2, %s12301_s26 }
 0x386   : > { %v4191_v20 = vsel %vm13258_vm6, %v13257_v18, %v13252_v44  ;;  %v9976_v16 = vsel %vm13261_vm14, %v13260_v48, %v13259_v50  ;;  %13262 = vst [vmem:[#allocation152_spill] sm:$0xff] %v9980_v37  ;;  %v9984_v25 = vsel %vm13263_vm2, %v4155_v30, %v4190_v62  ;;  %vm13264_vm5 = vcmp.lt.s32.totalorder %v13070_v15, 24  ;;  %vm13266_vm9 = vmmov %vm13261_vm14  ;;  %v9997_v34 = vpop.eup %5960  ;;  %v13270_v44 = vld [vmem:[#allocation14_spill] sm:$0xff]  ;;  %v10010_v62 = vpop.permute.xlu1 %4483 }
 0x387   : > { %v9988_v53 = vsel %vm13264_vm5, %v4156_v21, %v4191_v20  ;;  %v9993_v43 = vsel %vm13266_vm9, %v13265_v55, %v13260_v48  ;;  %13268 = vst [vmem:[#allocation121_spill] sm:$0xff] %v9995_v59  ;;  %13269 = vst [vmem:[#allocation98_spill] sm:$0xff] %v9997_v34  ;;  %v4059_v57 = vmul.f32 %v9980_v37, %v13270_v44  ;;  %v13271_v21 = vld [vmem:[#allocation168_spill] sm:$0xff]  ;;  %v13274_v20 = vld [vmem:[#allocation119_spill] sm:$0xff]  ;;  %vm13283_vm5 = vcmask 1043456  }
 0x388   : > { %13267 = vst [vmem:[#allocation40_spill] sm:$0xff] %v9993_v43  ;;  %v4063_v30 = vmul.f32 %v9980_v37, %v9815_v58  ;;  %v4067_v32 = vmul.f32 %v9980_v37, %v9831_v24  ;;  %vm13272_vm6 = vmmov %vm13266_vm9  ;;  %v4060_v48 = vmul.f32 %v9997_v34, %v13274_v20  ;;  %v4064_v59 = vmul.f32 %v9997_v34, %v9820_v12  ;;  %v10024_v24 = vpop.eup %5962  ;;  %v13279_v20 = vld [vmem:[#allocation187_spill] sm:$0xff] }
 0x389   : > { %v10008_v18 = vsel %vm13272_vm6, %v13259_v50, %v13271_v21  ;;  %13273 = vst [vmem:[#allocation66_spill] sm:$0xff] %v10010_v62  ;;  %v4068_v44 = vmul.f32 %v9997_v34, %v4056_v35  ;;  %vm13275_vm14 = vmmov %vm13272_vm6  ;;  %v4083_v50 = vrot.slane %v4059_v57, 4  ;;  %v10033_v12 = vpop.eup %5964  ;;  %v4065_v57 = vmul.f32 %v10024_v24, %v9845_v28  ;;  %5317 = vrot.lane.b32.xlu0 %v13079_v1, %s12301_s26 }
 0x38a   : > { %v10020_v58 = vsel %vm13275_vm14, %v13271_v21, %v13265_v55  ;;  %13277 = vst [vmem:[#allocation15_spill] sm:$0xff] %v10024_v24  ;;  %v4084_v37 = vrot.slane %v4063_v30, 4  ;;  %v4095_v62 = vrot.slane %v4067_v32, 4  ;;  %vm13280_vm2 = vmmov %vm13272_vm6  ;;  %v4086_v35 = vrot.slane %v4060_v48, 4  ;;  %v13282_v21 = vld [vmem:[#allocation116_spill] sm:$0xff]  ;;  %v10039_v30 = vpop.permute.xlu0 %4489  ;;  %v10047_v48 = vpop.permute.xlu1 %4487  ;;  %5315 = vrot.lane.b32.xlu1 %v13086_v45, %s12301_s26 }
 0x38b   : > { %13276 = vst [vmem:[#allocation99_spill] sm:$0xff] %v10020_v58  ;;  %v10029_v19 = vsel %vm13280_vm2, %v13279_v20, %v13278_v41  ;;  %13281 = vst [vmem:[#allocation174_spill] sm:$0xff] %v10033_v12  ;;  %v4087_v55 = vrot.slane %v4064_v59, 4  ;;  %v4061_v34 = vmul.f32 %v10024_v24, %v13282_v21  ;;  %v4062_v43 = vmul.f32 %v10033_v12, %v13285_v33 }
 0x38c   : > { %v4085_v32 = vsel %vm13283_vm5, %v4083_v50, %v4084_v37  ;;  %vm13284_vm9 = vmmov %vm13283_vm5  ;;  %v4066_v15 = vmul.f32 %v10033_v12, %v9852_v5  ;;  %v4070_v5 = vmul.f32 %v10033_v12, %v9864_v6 }
 0x38d   : > { %v4096_v31 = vsel %vm13284_vm9, %v4084_v37, %v4095_v62  ;;  %vm13286_vm6 = vmmov %vm13283_vm5  ;;  %v4111_v21 = vadd.f32 %v4085_v32, %v9743_v8  ;;  %v4089_v58 = vrot.slane %v4061_v34, 4  ;;  %v4090_v62 = vrot.slane %v4065_v57, 4  ;;  %5321 = vrot.lane.b32.xlu0 %v12537_v46, %s12301_s26 }
 0x38e   : > { %v4088_v59 = vsel %vm13286_vm6, %v4086_v35, %v4087_v55  ;;  %v4115_v28 = vadd.f32 %v4096_v31, %v9752_v4  ;;  %v4092_v50 = vrot.slane %v4062_v43, 4  ;;  %v4093_v33 = vrot.slane %v4066_v15, 4  ;;  %vm13287_vm14 = vmmov %vm13280_vm2  ;;  %v10066_v4 = vpop.permute.xlu0 %4669  ;;  %v10082_v34 = vpop.eup %5966  ;;  %5319 = vrot.lane.b32.xlu1 %v6900_v13, %s12301_s26 }
 0x38f   : > { %v4112_v37 = vadd.f32 %v4088_v59, %v9749_v7  ;;  %v4069_v8 = vmul.f32 %v10024_v24, %v9875_v42  ;;  %v4097_v35 = vrot.slane %v4068_v44, 4  ;;  %v10064_v31 = vsel %vm13287_vm14, %v9555_v39, %v13279_v20  ;;  %vm13288_vm2 = vmmov %vm13283_vm5  ;;  %v10080_v42 = vpop.permute.xlu1 %4667  ;;  %13292 = vst [vmem:[#allocation100_spill] sm:$0xff] %v10082_v34  ;;  %v13301_v24 = vld [vmem:[#allocation171_spill] sm:$0xff] }
 0x390   : > { %v4091_v7 = vsel %vm13288_vm2, %v4089_v58, %v4090_v62  ;;  %vm13289_vm5 = vmmov %vm13288_vm2  ;;  %v4101_v20 = vrot.slane %v4070_v5, 4 }
 0x391   : > { %v4094_v15 = vsel %vm13289_vm5, %v4092_v50, %v4093_v33  ;;  %vm13290_vm9 = vmmov %vm13287_vm14  ;;  %v4113_v44 = vadd.f32 %v4091_v7, %v9758_v26  ;;  %v4099_v32 = vrot.slane %v4069_v8, 4  ;;  %v4215_v26 = vmul.f32 %v10082_v34, %v9926_v14  ;;  %v13297_v50 = vld [vmem:[#allocation125_spill] sm:$0xff]  ;;  %5325 = vrot.lane.b32.xlu0 %v6931_v9, %s12301_s26 }
 0x392   : > { %v10073_v43 = vsel %vm13290_vm9, %v13278_v41, %v9566_v49  ;;  %vm13291_vm6 = vmmov %vm13290_vm9  ;;  %v4114_v58 = vadd.f32 %v4094_v15, %v9765_v47  ;;  %v10089_v41 = vpop.eup %5968  ;;  %v4219_v8 = vmul.f32 %v10082_v34, %v9936_v61  ;;  %5323 = vrot.lane.b32.xlu1 %v12536_v36, %s12301_s26 }
 0x393   : > { %v10078_v6 = vsel %vm13291_vm6, %v9566_v49, %v9555_v39  ;;  %vm13293_vm14 = vmmov %vm13288_vm2  ;;  %13294 = vst [vmem:[#allocation147_spill] sm:$0xff] %v10089_v41  ;;  %v13295_v49 = vld [vmem:[#allocation21_spill] sm:$0xff]  ;;  %v10100_v47 = vpop.eup %5970  ;;  %v4212_v5 = vmul.f32 %v10089_v41, %v13297_v50 }
 0x394   : > { %v4098_v57 = vsel %vm13293_vm14, %v4087_v55, %v4097_v35  ;;  %v4211_v59 = vmul.f32 %v10082_v34, %v13295_v49  ;;  %13296 = vst [vmem:[#allocation69_spill] sm:$0xff] %v10100_v47  ;;  %v4102_v55 = vsel %vm13288_vm2, %v4093_v33, %v4101_v20  ;;  %v10109_v35 = vpop.permute.xlu0 %4673  ;;  %v10111_v7 = vpop.eup %5972  ;;  %vm13299_vm5 = vmmov %vm13288_vm2  ;;  %v4236_v49 = vrot.slane %v4215_v26, 4 }
 0x395   : > { %v10092_v39 = vadd.f32 %v4098_v57, %v9806_v63  ;;  %v4216_v63 = vmul.f32 %v10089_v41, %v9930_v60  ;;  %13298 = vst [vmem:[#allocation102_spill] sm:$0xff] %v10111_v7  ;;  %v4118_v14 = vadd.f32 %v4102_v55, %v9776_v27  ;;  %v4100_v15 = vsel %vm13299_vm5, %v4090_v62, %v4099_v32  ;;  %v10115_v33 = vpop.permute.xlu1 %4671  ;;  %vm13300_vm9 = vmmov %vm13288_vm2  ;;  %v13302_v27 = vld [vmem:[#allocation108_spill] sm:$0xff] }
 0x396   : > { %v4235_v57 = vrot.slane %v4211_v59, 4  ;;  %v4117_v20 = vadd.f32 %v4100_v15, %v9808_v40  ;;  %v4238_v50 = vrot.slane %v4212_v5, 4  ;;  %v4247_v60 = vrot.slane %v4219_v8, 4  ;;  %vm13303_vm6 = vmmov %vm13288_vm2  ;;  %5429 = vrot.lane.b32.xlu0 %v13079_v1, %s6101_s30  ;;  %5427 = vrot.lane.b32.xlu1 %v13086_v45, %s6101_s30 }
 0x397   : > { %v4239_v12 = vrot.slane %v4216_v63, 4  ;;  %v4213_v34 = vmul.f32 %v10100_v47, %v13301_v24  ;;  %v4214_v62 = vmul.f32 %v10111_v7, %v13302_v27  ;;  %v4217_v32 = vmul.f32 %v10100_v47, %v9950_v3  ;;  %vm13304_vm14 = vmmov %vm13288_vm2 }
 0x398   : > { %v4237_v61 = vsel %vm13300_vm9, %v4235_v57, %v4236_v49  ;;  %v4248_v26 = vsel %vm13304_vm14, %v4236_v49, %v4247_v60  ;;  %v4218_v55 = vmul.f32 %v10111_v7, %v9959_v56  ;;  %v10135_v5 = vpop.permute.xlu0 %4677  ;;  %v4220_v49 = vmul.f32 %v10089_v41, %v9984_v25  ;;  %vm13307_vm5 = vmmov %vm13288_vm2 }
 0x399   : > { %v4240_v40 = vsel %vm13303_vm6, %v4238_v50, %v4239_v12  ;;  %v10130_v59 = vadd.f32 %v4237_v61, %v4111_v21  ;;  %v10139_v63 = vadd.f32 %v4248_v26, %v4115_v28  ;;  %v4241_v8 = vrot.slane %v4213_v34, 4  ;;  %v10141_v15 = vpop.permute.xlu1 %4675  ;;  %v13306_v50 = vld [vmem:[#allocation157_spill] sm:$0xff]  ;;  %vm13310_vm9 = vmmov %vm13288_vm2 }
 0x39a   : > { %v10137_v24 = vadd.f32 %v4240_v40, %v4112_v37  ;;  %v4242_v3 = vrot.slane %v4217_v32, 4  ;;  %v4244_v57 = vrot.slane %v4214_v62, 4  ;;  %v4245_v27 = vrot.slane %v4218_v55, 4  ;;  %v13305_v37 = vld [vmem:[#allocation59_spill] sm:$0xff]  ;;  %vm13311_vm6 = vmmov %vm13288_vm2  ;;  %5433 = vrot.lane.b32.xlu0 %v6925_v2, %s6101_s30  ;;  %5431 = vrot.lane.b32.xlu1 %v6900_v13, %s6101_s30 }
 0x39b   : > { %v4222_v21 = vmul.f32 %v10111_v7, %v9963_v10  ;;  %v4221_v28 = vmul.f32 %v10100_v47, %v9988_v53  ;;  %v4271_v34 = vsub.f32 %v13305_v37, %v8847_v52  ;;  %v4272_v60 = vsub.f32 %v13306_v50, %v13041_v22  ;;  %v13355_v47 = vld [vmem:[#allocation18_spill] sm:$0xff] }
 0x39c   : > { %v4243_v56 = vsel %vm13288_vm2, %v4241_v8, %v4242_v3  ;;  %v4246_v10 = vsel %vm13307_vm5, %v4244_v57, %v4245_v27  ;;  %v4249_v62 = vrot.slane %v4220_v49, 4  ;;  %v10161_v32 = vpop.permute.xlu0 %4681  ;;  %vm13312_vm14 = vcmask 130048   ;;  %v13313_v57 = vld [vmem:[#allocation110_spill] sm:$0xff] }
 0x39d   : > { %v10159_v25 = vadd.f32 %v4243_v56, %v4113_v44  ;;  %v4253_v61 = vrot.slane %v4222_v21, 4  ;;  %13308 = vst [vmem:[#allocation46_spill] sm:$0xff] %v10161_v32  ;;  %v10163_v40 = vadd.f32 %v4246_v10, %v4114_v58  ;;  %v4251_v53 = vrot.slane %v4221_v28, 4  ;;  %v10165_v8 = vpop.permute.xlu1 %4679  ;;  %vm13314_vm2 = vmmov %vm13312_vm14  ;;  %v13321_v10 = vld [vmem:[#allocation115_spill] sm:$0xff] }
 0x39e   : > { %v4275_v26 = vmul.f32 1.442695, %v4271_v34  ;;  %v4277_v55 = vmul.f32 1.442695, %v4272_v60  ;;  %13309 = vst [vmem:[#allocation206_spill] sm:$0xff] %v10165_v8  ;;  %v4250_v50 = vsel %vm13311_vm6, %v4239_v12, %v4249_v62  ;;  %v4339_v44 = vsel %vm13312_vm14, %v9640_v23, %v9630_v11  ;;  %vm13318_vm6 = vmmov %vm13314_vm2  ;;  %v13320_v34 = vld [vmem:[#allocation28_spill] sm:$0xff]  ;;  %5437 = vrot.lane.b32.xlu0 %v12536_v36, %s6101_s30  ;;  %5435 = vrot.lane.b32.xlu1 %v12537_v46, %s6101_s30 }
 0x39f   : > { %v4254_v37 = vsel %vm13310_vm9, %v4245_v27, %v4253_v61  ;;  %v4353_v21 = vsel %vm13314_vm2, %v13313_v57, %v9640_v23  ;;  %v4252_v49 = vsel %vm13307_vm5, %v4242_v3, %v4251_v53  ;;  %v10181_v56 = vadd.f32 %v4250_v50, %v10092_v39  ;;  %v13317_v39 = vld [vmem:[#allocation186_spill] sm:$0xff]  ;;  %vm13322_vm14 = vmmov %vm13314_vm2  ;;  %v13324_v53 = vld [vmem:[#allocation99_spill] sm:$0xff] }
 0x3a0   : > { %v10177_v58 = vadd.f32 %v4254_v37, %v4118_v14  ;;  %5974 = vpow2.f32 %v4275_v26  ;;  %v10185_v12 = vadd.f32 %v4252_v49, %v4117_v20  ;;  %v10190_v23 = vsel %vm2278_vm15, %v9976_v16, %v4353_v21  ;;  %v10197_v3 = vpop.permute.xlu0 %4703  ;;  %v13319_v20 = vld [vmem:[#allocation178_spill] sm:$0xff]  ;;  %v13325_v26 = vld [vmem:[#allocation109_spill] sm:$0xff]  ;;  %v13329_v21 = vld [vmem:[#allocation40_spill] sm:$0xff] }
 0x3a1   : > { %5976 = vpow2.f32 %v4277_v55  ;;  %vm13315_vm9 = vcmp.lt.s32.totalorder %v13056_v51, 16  ;;  %13316 = vst [vmem:[#allocation207_spill] sm:$0xff] %v10197_v3  ;;  %v4354_v27 = vsel %vm13318_vm6, %v13317_v39, %v9662_v54  ;;  %v4273_v28 = vsub.f32 %v13319_v20, %v13061_v0  ;;  %v10209_v61 = vpop.permute.xlu1 %4701  ;;  %v13327_v37 = vld [vmem:[#allocation190_spill] sm:$0xff]  ;;  %vm13333_vm6 = vmmov %vm13314_vm2  ;;  %v13357_v3 = vld [vmem:[#allocation97_spill] sm:$0xff] }
 0x3a2   : > { %v10195_v14 = vsel %vm13315_vm9, %v10008_v18, %v4339_v44  ;;  %v4274_v60 = vsub.f32 %v13320_v34, %v8860_v17  ;;  %v4340_v16 = vsel %vm13322_vm14, %v9630_v11, %v13321_v10  ;;  %13323 = vst [vmem:[#allocation164_spill] sm:$0xff] %v10209_v61  ;;  %v4359_v18 = vsel %vm2278_vm15, %v10029_v19, %v4354_v27  ;;  %vm13328_vm9 = vmmov %vm13314_vm2  ;;  %v13330_v19 = vld [vmem:[#allocation112_spill] sm:$0xff]  ;;  %v13331_v27 = vld [vmem:[#allocation107_spill] sm:$0xff] }
 0x3a3   : > { %v4341_v62 = vsel %vm13314_vm2, %v13321_v10, %v13313_v57  ;;  %vm13326_vm5 = vcmp.lt.s32.totalorder %v13325_v26, 16  ;;  %v4344_v50 = vsel %vm13328_vm9, %v13327_v37, %v13317_v39  ;;  %v4279_v11 = vmul.f32 1.442695, %v4273_v28  ;;  %vm13332_vm15 = vmmov %vm13314_vm2  ;;  %v13334_v28 = vld [vmem:[#allocation6_spill] sm:$0xff]  ;;  %v13337_v10 = vld [vmem:[#allocation192_spill] sm:$0xff]  ;;  %5441 = vrot.lane.b32.xlu0 %v6935_v38, %s6101_s30  ;;  %5439 = vrot.lane.b32.xlu1 %v6931_v9, %s6101_s30 }
 0x3a4   : > { %v10220_v55 = vsel %vm13326_vm5, %v13324_v53, %v4340_v16  ;;  %v4281_v44 = vmul.f32 1.442695, %v4274_v60  ;;  %v10230_v49 = vsel %vm2281_vm11, %v13329_v21, %v4341_v62  ;;  %v10235_v57 = vsel %vm2281_vm11, %v10064_v31, %v4344_v50  ;;  %v13335_v34 = vld [vmem:[#allocation74_spill] sm:$0xff]  ;;  %v10251_v16 = vpop.permute.xlu0 %4709  ;;  %v13341_v53 = vld [vmem:[#allocation193_spill] sm:$0xff] }
 0x3a5   : > { %v4342_v39 = vsel %vm13332_vm15, %v9662_v54, %v13331_v27  ;;  %v4343_v20 = vsel %vm13333_vm6, %v13331_v27, %v13327_v37  ;;  %vm13336_vm14 = vcmask 588800   ;;  %13339 = vst [vmem:[#allocation9_spill] sm:$0xff] %v10251_v16  ;;  %5978 = vpow2.f32 %v4279_v11  ;;  %v10264_v50 = vpop.permute.xlu1 %4707  ;;  %v13345_v21 = vld [vmem:[#allocation5_spill] sm:$0xff]  ;;  %v13346_v27 = vld [vmem:[#allocation195_spill] sm:$0xff] }
 0x3a6   : > { %v4455_v60 = vsel %vm13336_vm14, %v13335_v34, %v13334_v28  ;;  %vm13338_vm2 = vmmov %vm13336_vm14  ;;  %vm13340_vm11 = vcmp.lt.s32.totalorder %v13056_v51, 16  ;;  %v10259_v54 = vsel %vm13326_vm5, %v10078_v6, %v4343_v20  ;;  %13343 = vst [vmem:[#allocation129_spill] sm:$0xff] %v10264_v50  ;;  %5980 = vpow2.f32 %v4281_v44  ;;  %v13350_v20 = vld [vmem:[#allocation198_spill] sm:$0xff]  ;;  %v13359_v61 = vld [vmem:[#allocation121_spill] sm:$0xff] }
 0x3a7   : > { %v4471_v31 = vsel %vm13338_vm2, %v13337_v10, %v13335_v34  ;;  %v4360_v62 = vsel %vm13340_vm11, %v10073_v43, %v4342_v39  ;;  %vm13342_vm9 = vmmov %vm13338_vm2  ;;  %v13348_v39 = vld [vmem:[#allocation197_spill] sm:$0xff]  ;;  %v13352_v34 = vld [vmem:[#allocation56_spill] sm:$0xff]  ;;  %vm13356_vm5 = vcmask 64512   ;;  %5463 = vrot.lane.b32.xlu0 %v6935_v38, %s12302_s29  ;;  %5461 = vrot.lane.b32.xlu1 %v6925_v2, %s12302_s29 }
 0x3a8   : > { %v4456_v37 = vsel %vm13342_vm9, %v13334_v28, %v13341_v53  ;;  %vm13344_vm15 = vmmov %vm13338_vm2  ;;  %v4459_v28 = vsel %vm13338_vm2, %v13345_v21, %v13350_v20  ;;  %v13360_v50 = vld [vmem:[#allocation85_spill] sm:$0xff]  ;;  %v10300_v16 = vpop.permute.xlu0 %4713 }
 0x3a9   : > { %v4457_v11 = vsel %vm13344_vm15, %v13341_v53, %v13337_v10  ;;  %vm13347_vm6 = vmmov %vm13338_vm2  ;;  %v4423_v10 = vsub.f32 %v13352_v34, %v8847_v52  ;;  %v13353_v53 = vld [vmem:[#allocation50_spill] sm:$0xff]  ;;  %13363 = vst [vmem:[#allocation167_spill] sm:$0xff] %v10300_v16 }
 0x3aa   : > { %v4458_v43 = vsel %vm13347_vm6, %v13346_v27, %v13345_v21  ;;  %vm13349_vm14 = vmmov %vm13338_vm2  ;;  %v4424_v7 = vsub.f32 %v13353_v53, %v13041_v22  ;;  %vm13364_vm6 = vcmp.lt.s32.totalorder %v13054_v29, 8 }
 0x3ab   : > { %v4472_v6 = vsel %vm13349_vm14, %v13348_v39, %v13346_v27  ;;  %vm13351_vm11 = vmmov %vm13338_vm2  ;;  %v13354_v27 = vld [vmem:[#allocation86_spill] sm:$0xff]  ;;  %v4427_v53 = vmul.f32 1.442695, %v4423_v10  ;;  %vm13365_vm14 = vcmp.lt.s32.totalorder %v13056_v51, 8  ;;  %5469 = vrot.lane.b32.xlu0 %v13079_v1, %s12302_s29  ;;  %5467 = vrot.lane.b32.xlu1 %v13086_v45, %s12302_s29 }
 0x3ac   : > { %v4460_v44 = vsel %vm13351_vm11, %v13350_v20, %v13348_v39  ;;  %v4491_v41 = vsel %vm13356_vm5, %v13355_v47, %v13354_v27  ;;  %vm13358_vm9 = vmmov %vm13356_vm5  ;;  %v13362_v20 = vld [vmem:[#allocation145_spill] sm:$0xff]  ;;  %v4429_v22 = vmul.f32 1.442695, %v4424_v7  ;;  %v13368_v10 = vld [vmem:[#allocation66_spill] sm:$0xff] }
 0x3ad   : > { %v4505_v21 = vsel %vm13358_vm9, %v13357_v3, %v13355_v47  ;;  %vm13361_vm15 = vmmov %vm13356_vm5  ;;  %v4425_v34 = vsub.f32 %v13362_v20, %v13061_v0  ;;  %v10308_v8 = vsel %vm13365_vm14, %v4456_v37, %v4491_v41  ;;  %v10310_v47 = vpop.permute.xlu1 %4711  ;;  %v13367_v20 = vld [vmem:[#allocation13_spill] sm:$0xff]  ;;  %5982 = vpow2.f32 %v4427_v53  ;;  %v10335_v37 = vpop.eup %5974 }
 0x3ae   : > { %v4506_v39 = vsel %vm13361_vm15, %v13360_v50, %v13359_v61  ;;  %v10304_v52 = vsel %vm13364_vm6, %v4455_v60, %v4505_v21  ;;  %vm13366_vm2 = vmmov %vm13364_vm6  ;;  %v4426_v0 = vsub.f32 %v13367_v20, %v8860_v17  ;;  %v4493_v41 = vsel %vm13356_vm5, %v13368_v10, %v13357_v3  ;;  %13372 = vst [vmem:[#allocation95_spill] sm:$0xff] %v10335_v37  ;;  %v10347_v21 = vpop.eup %5976 }
 0x3af   : > { %v10314_v32 = vsel %vm13366_vm2, %v4458_v43, %v4506_v39  ;;  %v4431_v16 = vmul.f32 1.442695, %v4425_v34  ;;  %vm13369_vm11 = vmmov %vm13356_vm5  ;;  %vm13370_vm9 = vcmp.lt.s32.totalorder %v13325_v26, 8  ;;  %5984 = vpow2.f32 %v4429_v22  ;;  %13375 = vst [vmem:[#allocation72_spill] sm:$0xff] %v10347_v21  ;;  %5473 = vrot.lane.b32.xlu0 %v12537_v46, %s12302_s29  ;;  %5471 = vrot.lane.b32.xlu1 %v6900_v13, %s12302_s29 }
 0x3b0   : > { %v4492_v7 = vsel %vm13369_vm11, %v13354_v27, %v13368_v10  ;;  %vm13371_vm15 = vmmov %vm13356_vm5  ;;  %v4433_v43 = vmul.f32 1.442695, %v4426_v0  ;;  %vm13373_vm6 = vcmp.lt.s32.totalorder %v13330_v19, 8  ;;  %v4367_v34 = vmul.f32 %v10335_v37, %v10190_v23 }
 0x3b1   : > { %v10328_v29 = vsel %vm13370_vm9, %v4457_v11, %v4492_v7  ;;  %v4496_v60 = vsel %vm13371_vm15, %v10039_v30, %v13360_v50  ;;  %v10339_v27 = vsel %vm13373_vm6, %v4471_v31, %v4493_v41  ;;  %vm13374_vm14 = vmmov %vm13373_vm6  ;;  %v10345_v11 = vpop.permute.xlu0 %4717  ;;  %v13376_v50 = vld [vmem:[#allocation44_spill] sm:$0xff]  ;;  %v4371_v22 = vmul.f32 %v10335_v37, %v4359_v18  ;;  %v10354_v0 = vpop.permute.xlu1 %4715  ;;  %v13377_v31 = vld [vmem:[#allocation131_spill] sm:$0xff] }
 0x3b2   : > { %v10343_v3 = vsel %vm13374_vm14, %v4472_v6, %v4496_v60  ;;  %v4363_v39 = vmul.f32 %v10335_v37, %v13376_v50  ;;  %5986 = vpow2.f32 %v4431_v16  ;;  %v4364_v19 = vmul.f32 %v10347_v21, %v13377_v31  ;;  %vm13378_vm2 = vmmov %vm13356_vm5  ;;  %v13443_v37 = vld [vmem:[#allocation139_spill] sm:$0xff] }
 0x3b3   : > { %v4368_v6 = vmul.f32 %v10347_v21, %v10195_v14  ;;  %v4372_v53 = vmul.f32 %v10347_v21, %v4360_v62  ;;  %5988 = vpow2.f32 %v4433_v43  ;;  %v4388_v10 = vrot.slane %v4367_v34, 4  ;;  %vm13379_vm11 = vmmov %vm13378_vm2  ;;  %v10383_v34 = vpop.eup %5978  ;;  %5477 = vrot.lane.b32.xlu0 %v6931_v9, %s12302_s29  ;;  %5475 = vrot.lane.b32.xlu1 %v12536_v36, %s12302_s29 }
 0x3b4   : > { %v4387_v20 = vrot.slane %v4363_v39, 4  ;;  %v4399_v23 = vrot.slane %v4371_v22, 4  ;;  %v4494_v18 = vsel %vm13378_vm2, %v13359_v61, %v10047_v48  ;;  %v4390_v16 = vrot.slane %v4364_v19, 4  ;;  %13384 = vst [vmem:[#allocation11_spill] sm:$0xff] %v10383_v34  ;;  %v13389_v19 = vld [vmem:[#allocation177_spill] sm:$0xff] }
 0x3b5   : > { %v4391_v7 = vrot.slane %v4368_v6, 4  ;;  %v4401_v41 = vrot.slane %v4372_v53, 4  ;;  %v4495_v14 = vsel %vm13379_vm11, %v10047_v48, %v10039_v30  ;;  %v10371_v62 = vpop.permute.xlu0 %4821  ;;  %vm13380_vm5 = vcmask 1043456   ;;  %v10381_v39 = vpop.permute.xlu1 %4819 }
 0x3b6   : > { %v4389_v60 = vsel %vm13380_vm5, %v4387_v20, %v4388_v10  ;;  %vm13381_vm9 = vmmov %vm13380_vm5  ;;  %vm13382_vm15 = vcmp.lt.s32.totalorder %v13056_v51, 8  ;;  %vm13383_vm6 = vcmp.lt.s32.totalorder %v13325_v26, 8  ;;  %v10395_v51 = vpop.eup %5980  ;;  %vm13390_vm11 = vcmask 1039360  }
 0x3b7   : > { %v4400_v43 = vsel %vm13381_vm9, %v4388_v10, %v4399_v23  ;;  %v4512_v50 = vsel %vm13382_vm15, %v4459_v28, %v4494_v18  ;;  %v10379_v61 = vsel %vm13383_vm6, %v4460_v44, %v4495_v14  ;;  %vm13385_vm14 = vmmov %vm13380_vm5  ;;  %v10387_v30 = vadd.f32 %v4389_v60, %v10130_v59  ;;  %13387 = vst [vmem:[#allocation113_spill] sm:$0xff] %v10395_v51  ;;  %v13388_v28 = vld [vmem:[#allocation172_spill] sm:$0xff] }
 0x3b8   : > { %v4392_v22 = vsel %vm13385_vm14, %v4390_v16, %v4391_v7  ;;  %v10390_v48 = vadd.f32 %v4400_v43, %v10139_v63  ;;  %vm13386_vm2 = vmmov %vm13380_vm5  ;;  %v4365_v44 = vmul.f32 %v10383_v34, %v13388_v28  ;;  %v4369_v59 = vmul.f32 %v10383_v34, %v10220_v55  ;;  %5581 = vrot.lane.b32.xlu0 %v13079_v1, %s6103_s28 }
 0x3b9   : > { %v4402_v31 = vsel %vm13386_vm2, %v4391_v7, %v4401_v41  ;;  %v10398_v26 = vadd.f32 %v4392_v22, %v10137_v24  ;;  %v4373_v63 = vmul.f32 %v10383_v34, %v10259_v54  ;;  %v4366_v6 = vmul.f32 %v10395_v51, %v13389_v19  ;;  %v10417_v10 = vpop.permute.xlu0 %4825  ;;  %v10424_v16 = vpop.permute.xlu1 %4823  ;;  %vm13391_vm5 = vmmov %vm13390_vm11  ;;  %5579 = vrot.lane.b32.xlu1 %v13086_v45, %s6103_s28 }
 0x3ba   : > { %v4370_v53 = vmul.f32 %v10395_v51, %v10230_v49  ;;  %v4374_v24 = vmul.f32 %v10395_v51, %v10235_v57  ;;  %v10415_v20 = vadd.f32 %v4402_v31, %v10181_v56  ;;  %v4393_v55 = vrot.slane %v4365_v44, 4  ;;  %vm13392_vm9 = vmmov %vm13386_vm2 }
 0x3bb   : > { %v4394_v23 = vrot.slane %v4369_v59, 4  ;;  %v4403_v54 = vrot.slane %v4373_v63, 4  ;;  %v10422_v18 = vsel %vm13390_vm11, %v10080_v42, %v10066_v4  ;;  %v4396_v7 = vrot.slane %v4366_v6, 4  ;;  %vm13393_vm15 = vmmov %vm13386_vm2  ;;  %v13399_v63 = vld [vmem:[#allocation29_spill] sm:$0xff] }
 0x3bc   : > { %v4397_v49 = vrot.slane %v4370_v53, 4  ;;  %v4405_v41 = vrot.slane %v4374_v24, 4  ;;  %v10429_v56 = vsel %vm13391_vm5, %v10109_v35, %v10080_v42  ;;  %vm13394_vm6 = vmmov %vm13391_vm5  ;;  %v10447_v42 = vpop.eup %5982  ;;  %5585 = vrot.lane.b32.xlu0 %v6925_v2, %s6103_s28 }
 0x3bd   : > { %v4395_v57 = vsel %vm13392_vm9, %v4393_v55, %v4394_v23  ;;  %v4404_v14 = vsel %vm13393_vm15, %v4394_v23, %v4403_v54  ;;  %v10438_v60 = vsel %vm13394_vm6, %v10066_v4, %v10115_v33  ;;  %vm13395_vm14 = vmmov %vm13391_vm5  ;;  %13396 = vst [vmem:[#allocation111_spill] sm:$0xff] %v10447_v42  ;;  %v10455_v4 = vpop.permute.xlu0 %4829  ;;  %v10457_v59 = vpop.eup %5984  ;;  %v4515_v19 = vmul.f32 %v10447_v42, %v13399_v63 }
 0x3be   : > { %v10443_v43 = vsel %vm13395_vm14, %v10115_v33, %v10109_v35  ;;  %v4398_v22 = vsel %vm13386_vm2, %v4396_v7, %v4397_v49  ;;  %v4417_v31 = vadd.f32 %v4395_v57, %v10159_v25  ;;  %vm13397_vm11 = vmmov %vm13386_vm2  ;;  %v10453_v44 = vadd.f32 %v4404_v14, %v10185_v12  ;;  %13398 = vst [vmem:[#allocation105_spill] sm:$0xff] %v10457_v59  ;;  %v10465_v25 = vpop.permute.xlu1 %4827  ;;  %v13401_v12 = vld [vmem:[#allocation138_spill] sm:$0xff]  ;;  %v13403_v7 = vld [vmem:[#allocation175_spill] sm:$0xff] }
 0x3bf   : > { %v4406_v28 = vsel %vm13397_vm11, %v4397_v49, %v4405_v41  ;;  %v4418_v35 = vadd.f32 %v4398_v22, %v10163_v40  ;;  %v4519_v6 = vmul.f32 %v10447_v42, %v10304_v52  ;;  %v10467_v53 = vpop.eup %5986  ;;  %v4516_v24 = vmul.f32 %v10457_v59, %v13401_v12  ;;  %vm13405_vm5 = vmmov %vm13386_vm2  ;;  %5583 = vrot.lane.b32.xlu1 %v6900_v13, %s6103_s28 }
 0x3c0   : > { %v4422_v33 = vadd.f32 %v4406_v28, %v10177_v58  ;;  %13400 = vst [vmem:[#allocation126_spill] sm:$0xff] %v10467_v53  ;;  %v4520_v55 = vmul.f32 %v10457_v59, %v10308_v8  ;;  %v4523_v40 = vmul.f32 %v10447_v42, %v10314_v32  ;;  %v4524_v58 = vmul.f32 %v10457_v59, %v4512_v50  ;;  %v10478_v23 = vpop.eup %5988  ;;  %v13404_v50 = vld [vmem:[#allocation135_spill] sm:$0xff]  ;;  %vm13406_vm9 = vmmov %vm13386_vm2  ;;  %v13441_v42 = vld [vmem:[#allocation150_spill] sm:$0xff] }
 0x3c1   : > { %13402 = vst [vmem:[#allocation165_spill] sm:$0xff] %v10478_v23  ;;  %v4539_v52 = vrot.slane %v4515_v19, 4  ;;  %v4540_v54 = vrot.slane %v4519_v6, 4  ;;  %v4517_v49 = vmul.f32 %v10467_v53, %v13403_v7  ;;  %v4521_v41 = vmul.f32 %v10467_v53, %v10328_v29  ;;  %v10488_v22 = vpop.permute.xlu0 %4833  ;;  %vm13407_vm15 = vmmov %vm13386_vm2  ;;  %5589 = vrot.lane.b32.xlu0 %v12536_v36, %s6103_s28 }
 0x3c2   : > { %v4542_v8 = vrot.slane %v4516_v24, 4  ;;  %v4543_v32 = vrot.slane %v4520_v55, 4  ;;  %v4551_v57 = vrot.slane %v4523_v40, 4  ;;  %v4518_v14 = vmul.f32 %v10478_v23, %v13404_v50  ;;  %v10493_v12 = vpop.permute.xlu1 %4831  ;;  %vm13408_vm6 = vmmov %vm13386_vm2  ;;  %v13411_v50 = vld [vmem:[#allocation46_spill] sm:$0xff] }
 0x3c3   : > { %v4541_v28 = vsel %vm13405_vm5, %v4539_v52, %v4540_v54  ;;  %v4522_v63 = vmul.f32 %v10478_v23, %v10339_v27  ;;  %v4545_v19 = vrot.slane %v4517_v49, 4  ;;  %v4546_v6 = vrot.slane %v4521_v41, 4  ;;  %vm13409_vm14 = vmmov %vm13386_vm2  ;;  %5587 = vrot.lane.b32.xlu1 %v12537_v46, %s6103_s28 }
 0x3c4   : > { %v4544_v29 = vsel %vm13406_vm9, %v4542_v8, %v4543_v32  ;;  %v10497_v24 = vadd.f32 %v4541_v28, %v10387_v30  ;;  %v4552_v55 = vsel %vm13407_vm15, %v4540_v54, %v4551_v57  ;;  %v4548_v40 = vrot.slane %v4518_v14, 4  ;;  %v13413_v14 = vld [vmem:[#allocation206_spill] sm:$0xff]  ;;  %vm13415_vm9 = vmmov %vm13408_vm6 }
 0x3c5   : > { %v10503_v52 = vadd.f32 %v4544_v29, %v10398_v26  ;;  %v10506_v27 = vadd.f32 %v4552_v55, %v10390_v48  ;;  %v4547_v7 = vsel %vm13408_vm6, %v4545_v19, %v4546_v6  ;;  %v4549_v49 = vrot.slane %v4522_v63, 4  ;;  %v10517_v26 = vpop.permute.xlu0 %4855  ;;  %v13417_v55 = vld [vmem:[#allocation71_spill] sm:$0xff]  ;;  %5593 = vrot.lane.b32.xlu0 %v6935_v38, %s6103_s28 }
 0x3c6   : > { %v10511_v30 = vadd.f32 %v4547_v7, %v4417_v31  ;;  %v4526_v54 = vmul.f32 %v10478_v23, %v10343_v3  ;;  %v4525_v41 = vmul.f32 %v10467_v53, %v10379_v61  ;;  %v4553_v8 = vrot.slane %v4524_v58, 4  ;;  %v10529_v28 = vpop.permute.xlu1 %4853  ;;  %v13419_v7 = vld [vmem:[#allocation160_spill] sm:$0xff] }
 0x3c7   : > { %v4550_v48 = vsel %vm13409_vm14, %v4548_v40, %v4549_v49  ;;  %vm13410_vm2 = vcmask 1039360   ;;  %vm13421_vm14 = vmmov %vm13408_vm6  ;;  %v4654_v21 = vsub.f32 %v13441_v42, %v8860_v17  ;;  %5591 = vrot.lane.b32.xlu1 %v6931_v9, %s6103_s28  ;;  %s11649_s28 = sld [smem:[#allocation2]] }
 0x3c8   : > { %v4686_v57 = vsel %vm13410_vm2, %v10141_v15, %v10135_v5  ;;  %vm13412_vm11 = vmmov %vm13410_vm2  ;;  %v10531_v61 = vadd.f32 %v4550_v48, %v4418_v35  ;;  %v4557_v58 = vrot.slane %v4526_v54, 4  ;;  %v4554_v63 = vsel %vm13415_vm9, %v4543_v32, %v4553_v8  ;;  %v13420_v35 = vld [vmem:[#allocation65_spill] sm:$0xff]  ;;  %v13423_v8 = vld [vmem:[#allocation159_spill] sm:$0xff] }
 0x3c9   : > { %v4700_v31 = vsel %vm13412_vm11, %v13411_v50, %v10141_v15  ;;  %vm13414_vm5 = vmmov %vm13410_vm2  ;;  %v4555_v19 = vrot.slane %v4525_v41, 4  ;;  %v10537_v29 = vadd.f32 %v4554_v63, %v10415_v20  ;;  %v4576_v48 = vsub.f32 %v13420_v35, %v13419_v7  ;;  %v13422_v20 = vld [vmem:[#allocation58_spill] sm:$0xff]  ;;  %5615 = vrot.lane.b32.xlu0 %v6935_v38, %s6102_s6 }
 0x3ca   : > { %v4687_v3 = vsel %vm13414_vm5, %v10135_v5, %v13413_v14  ;;  %vm13416_vm15 = vmmov %vm13410_vm2  ;;  %v13418_v5 = vld [vmem:[#allocation64_spill] sm:$0xff]  ;;  %v4558_v32 = vsel %vm13408_vm6, %v4549_v49, %v4557_v58  ;;  %v4651_v41 = vsub.f32 %v13422_v20, %v13417_v55  ;;  %v4652_v63 = vsub.f32 %v13423_v8, %v13419_v7  ;;  %v4860_v53 = vpop.permute.xlu1 %4859  ;;  %v13424_v58 = vld [vmem:[#allocation9_spill] sm:$0xff] }
 0x3cb   : > { %v4688_v15 = vsel %vm13416_vm15, %v13413_v14, %v13411_v50  ;;  %v4575_v40 = vsub.f32 %v13418_v5, %v13417_v55  ;;  %v4556_v54 = vsel %vm13421_vm14, %v4546_v6, %v4555_v19  ;;  %v10554_v50 = vpop.permute.xlu0 %4861  ;;  %v10556_v14 = vadd.f32 %v4558_v32, %v4422_v33  ;;  %v13425_v6 = vld [vmem:[#allocation129_spill] sm:$0xff]  ;;  %v13427_v20 = vld [vmem:[#allocation164_spill] sm:$0xff]  ;;  %v13433_v32 = vld [vmem:[#allocation167_spill] sm:$0xff]  ;;  %5613 = vrot.lane.b32.xlu1 %v6925_v2, %s6102_s6 }
 0x3cc   : > { %v10559_v5 = vadd.f32 %v4556_v54, %v10453_v44  ;;  %v4581_v23 = vmul.f32 1.442695, %v4576_v48  ;;  %v4655_v51 = vmul.f32 1.442695, %v4651_v41  ;;  %v4657_v49 = vmul.f32 1.442695, %v4652_v63 }
 0x3cd   : > { %v4579_v35 = vmul.f32 1.442695, %v4575_v40  ;;  %vm13426_vm2 = vcmask 56320   ;;  %v13429_v44 = vld [vmem:[#allocation17_spill] sm:$0xff]  ;;  %v13431_v40 = vld [vmem:[#allocation103_spill] sm:$0xff]  ;;  %5621 = vrot.lane.b32.xlu0 %v13079_v1, %s6102_s6 }
 0x3ce   : > { %v4719_v19 = vsel %vm13426_vm2, %v13425_v6, %v13424_v58  ;;  %vm13428_vm11 = vmmov %vm13426_vm2  ;;  %vm13430_vm5 = vcmp.lt.s32.totalorder %v13429_v44, 7  ;;  %vm13432_vm9 = vcmp.lt.s32.totalorder %v13431_v40, 7  ;;  %v13434_v54 = vld [vmem:[#allocation207_spill] sm:$0xff] }
 0x3cf   : > { %v4733_v8 = vsel %vm13428_vm11, %v13427_v20, %v13425_v6  ;;  %5990 = vpow2.f32 %v4579_v35  ;;  %v10577_v48 = vsel %vm13432_vm9, %v10438_v60, %v4719_v19  ;;  %vm13435_vm15 = vmmov %vm13426_vm2  ;;  %v13437_v35 = vld [vmem:[#allocation70_spill] sm:$0xff]  ;;  %v10592_v60 = vpop.permute.xlu0 %4865  ;;  %v13440_v19 = vld [vmem:[#allocation49_spill] sm:$0xff]  ;;  %vm13444_vm11 = vcmp.lt.s32.totalorder %v13443_v37, 7  ;;  %5619 = vrot.lane.b32.xlu1 %v13086_v45, %s6102_s6 }
 0x3d0   : > { %v10572_v33 = vsel %vm13430_vm5, %v10422_v18, %v4733_v8  ;;  %v4734_v41 = vsel %vm13435_vm15, %v13434_v54, %v13433_v32  ;;  %5992 = vpow2.f32 %v4581_v23  ;;  %vm13436_vm6 = vmmov %vm13430_vm5  ;;  %v13438_v18 = vld [vmem:[#allocation93_spill] sm:$0xff]  ;;  %v13439_v8 = vld [vmem:[#allocation96_spill] sm:$0xff]  ;;  %v4653_v59 = vsub.f32 %v13440_v19, %v13437_v35 }
 0x3d1   : > { %v10586_v63 = vsel %vm13436_vm6, %v4686_v57, %v4734_v41  ;;  %v4577_v6 = vsub.f32 %v13438_v18, %v13437_v35  ;;  %v4578_v34 = vsub.f32 %v13439_v8, %v8860_v17  ;;  %5994 = vpow2.f32 %v4655_v51  ;;  %vm13442_vm14 = vmmov %vm13426_vm2  ;;  %v4864_v57 = vpop.permute.xlu1 %4863  ;;  %5625 = vrot.lane.b32.xlu0 %v12537_v46, %s6102_s6 }
 0x3d2   : > { %v4720_v23 = vsel %vm13442_vm14, %v13424_v58, %v10310_v47  ;;  %5996 = vpow2.f32 %v4657_v49  ;;  %v4721_v8 = vsel %vm13426_vm2, %v10310_v47, %v13427_v20  ;;  %v4659_v51 = vmul.f32 1.442695, %v4653_v59  ;;  %v13445_v58 = vld [vmem:[#allocation146_spill] sm:$0xff]  ;;  %vm13447_vm9 = vmmov %vm13426_vm2 }
 0x3d3   : > { %v4583_v41 = vmul.f32 1.442695, %v4577_v6  ;;  %v4585_v18 = vmul.f32 1.442695, %v4578_v34  ;;  %v4661_v19 = vmul.f32 1.442695, %v4654_v21  ;;  %v10609_v42 = vsel %vm13444_vm11, %v10443_v43, %v4720_v23  ;;  %vm13448_vm15 = vmmov %vm13426_vm2  ;;  %v10627_v43 = vpop.permute.xlu0 %4869  ;;  %5623 = vrot.lane.b32.xlu1 %v6900_v13, %s6102_s6 }
 0x3d4   : > { %vm13446_vm5 = vcmp.lt.s32.totalorder %v13445_v58, 7  ;;  %v4724_v47 = vsel %vm13447_vm9, %v10345_v11, %v13434_v54  ;;  %v4722_v21 = vsel %vm13448_vm15, %v13433_v32, %v10354_v0  ;;  %vm13449_vm6 = vmmov %vm13426_vm2  ;;  %vm13451_vm2 = vcmp.lt.s32.totalorder %v13431_v40, 7  ;;  %v13461_v6 = vld [vmem:[#allocation123_spill] sm:$0xff] }
 0x3d5   : > { %v10614_v49 = vsel %vm13446_vm5, %v10429_v56, %v4721_v8  ;;  %5998 = vpow2.f32 %v4583_v41  ;;  %v4723_v34 = vsel %vm13449_vm6, %v10354_v0, %v10345_v11  ;;  %vm13450_vm14 = vmmov %vm13446_vm5  ;;  %v10635_v59 = vsel %vm13451_vm2, %v4687_v3, %v4722_v21  ;;  %v10641_v32 = vpop.permute.xlu1 %4867  ;;  %5629 = vrot.lane.b32.xlu0 %v6931_v9, %s6102_s6 }
 0x3d6   : > { %6000 = vpow2.f32 %v4585_v18  ;;  %v10631_v56 = vsel %vm13450_vm14, %v4700_v31, %v4724_v47  ;;  %v10639_v20 = vsel %vm13444_vm11, %v4688_v15, %v4723_v34  ;;  %vm13452_vm5 = vcmask 1031168   ;;  %v13467_v34 = vld [vmem:[#allocation182_spill] sm:$0xff] }
 0x3d7   : > { %6002 = vpow2.f32 %v4659_v51  ;;  %v4835_v11 = vsel %vm13452_vm5, %v10381_v39, %v10371_v62  ;;  %vm13453_vm9 = vmmov %vm13452_vm5  ;;  %v10683_v23 = vpop.permute.xlu0 %4973  ;;  %5627 = vrot.lane.b32.xlu1 %v12536_v36, %s6102_s6 }
 0x3d8   : > { %v10649_v0 = vsel %vm13453_vm9, %v10417_v10, %v10381_v39  ;;  %vm13454_vm15 = vmmov %vm13452_vm5  ;;  %6004 = vpow2.f32 %v4661_v19  ;;  %vm13462_vm9 = vcmask 48128  }
 0x3d9   : > { %v4836_v31 = vsel %vm13454_vm15, %v10371_v62, %v10424_v16  ;;  %vm13455_vm6 = vmmov %vm13452_vm5  ;;  %v4871_v41 = vsel %vm13462_vm9, %v4860_v53, %v10554_v50  ;;  %v10694_v8 = vpop.permute.xlu1 %4971 }
 0x3da   : > { %v4837_v3 = vsel %vm13455_vm6, %v10424_v16, %v10417_v10  ;;  %vm13456_vm14 = vmmov %vm13452_vm5  ;;  %v13460_v16 = vld [vmem:[#allocation181_spill] sm:$0xff] }
 0x3db   : > { %v4838_v15 = vsel %vm13456_vm14, %v10465_v25, %v10455_v4  ;;  %vm13457_vm2 = vmmov %vm13452_vm5  ;;  %v4803_v54 = vsub.f32 %v13460_v16, %v13417_v55  ;;  %vm13466_vm14 = vcmp.lt.s32.totalorder %v13431_v40, 6 }
 0x3dc   : > { %v10665_v39 = vsel %vm13457_vm2, %v10488_v22, %v10465_v25  ;;  %vm13458_vm11 = vmmov %vm13457_vm2  ;;  %v4804_v25 = vsub.f32 %v13461_v6, %v13419_v7  ;;  %v10702_v21 = vsel %vm13466_vm14, %v4836_v31, %v4871_v41 }
 0x3dd   : > { %v10672_v62 = vsel %vm13458_vm11, %v10455_v4, %v10493_v12  ;;  %vm13459_vm5 = vmmov %vm13457_vm2  ;;  %v4807_v51 = vmul.f32 1.442695, %v4803_v54 }
 0x3de   : > { %v10677_v10 = vsel %vm13459_vm5, %v10493_v12, %v10488_v22  ;;  %vm13463_vm15 = vmmov %vm13462_vm9  ;;  %v13465_v22 = vld [vmem:[#allocation156_spill] sm:$0xff]  ;;  %v4809_v19 = vmul.f32 1.442695, %v4804_v25 }
 0x3df   : > { %v4885_v4 = vsel %vm13463_vm15, %v10529_v28, %v4860_v53  ;;  %vm13464_vm6 = vmmov %vm13462_vm9  ;;  %v4805_v12 = vsub.f32 %v13465_v22, %v13437_v35  ;;  %6006 = vpow2.f32 %v4807_v51  ;;  %vm13483_vm9 = vcmask 1043456  }
 0x3e0   : > { %v4886_v18 = vsel %vm13464_vm6, %v10517_v26, %v10592_v60  ;;  %v10698_v47 = vsel %vm2662_vm13, %v4835_v11, %v4885_v4  ;;  %vm13468_vm2 = vmmov %vm13464_vm6  ;;  %v10716_v11 = vpop.eup %5990  ;;  %v13475_v4 = vld [vmem:[#allocation3_spill] sm:$0xff]  ;;  %6008 = vpow2.f32 %v4809_v19 }
 0x3e1   : > { %v10708_v53 = vsel %vm2662_vm13, %v4838_v15, %v4886_v18  ;;  %v4811_v54 = vmul.f32 1.442695, %v4805_v12  ;;  %v4872_v6 = vsel %vm13468_vm2, %v10554_v50, %v4864_v57  ;;  %13469 = vst [vmem:[#allocation84_spill] sm:$0xff] %v10716_v11  ;;  %vm13470_vm11 = vmmov %vm13468_vm2  ;;  %vm13471_vm13 = vcmp.lt.s32.totalorder %v13443_v37, 6  ;;  %v10731_v50 = vpop.permute.xlu0 %4977  ;;  %v10733_v41 = vpop.eup %5992 }
 0x3e2   : > { %v10720_v31 = vsel %vm13470_vm11, %v4864_v57, %v10529_v28  ;;  %v10724_v15 = vsel %vm13471_vm13, %v4837_v3, %v4872_v6  ;;  %vm13472_vm5 = vmmov %vm13468_vm2  ;;  %13473 = vst [vmem:[#allocation101_spill] sm:$0xff] %v10731_v50  ;;  %v4591_v18 = vmul.f32 %v10716_v11, %v13475_v4  ;;  %v4595_v28 = vmul.f32 %v10716_v11, %v13086_v45  ;;  %v10741_v3 = vpop.permute.xlu1 %4975  ;;  %v10743_v22 = vpop.eup %5994 }
 0x3e3   : > { %v10729_v25 = vsel %vm13472_vm5, %v10627_v43, %v10517_v26  ;;  %13474 = vst [vmem:[#allocation20_spill] sm:$0xff] %v10733_v41  ;;  %v4599_v57 = vmul.f32 %v10716_v11, %v12537_v46  ;;  %13476 = vst [vmem:[#allocation154_spill] sm:$0xff] %v10741_v3  ;;  %v13478_v26 = vld [vmem:[#allocation4_spill] sm:$0xff]  ;;  %v10749_v51 = vmul.f32 %v10733_v41, %v13079_v1  ;;  %6010 = vpow2.f32 %v4811_v54  ;;  %v10757_v19 = vpop.eup %5996  ;;  %v13479_v11 = vld [vmem:[#allocation31_spill] sm:$0xff] }
 0x3e4   : > { %13477 = vst [vmem:[#allocation143_spill] sm:$0xff] %v10743_v22  ;;  %v4592_v12 = vmul.f32 %v10733_v41, %v13478_v26  ;;  %v10753_v6 = vmul.f32 %v10733_v41, %v12536_v36  ;;  %v4615_v4 = vrot.slane %v4591_v18, 4  ;;  %v4616_v16 = vrot.slane %v4595_v28, 4  ;;  %v13480_v54 = vld [vmem:[#allocation144_spill] sm:$0xff]  ;;  %v10774_v28 = vpop.eup %5998  ;;  %vm13486_vm15 = vmmov %vm13483_vm9 }
 0x3e5   : > { %v4743_v35 = vmul.f32 %v10743_v22, %v13479_v11  ;;  %v4747_v26 = vmul.f32 %v10743_v22, %v10572_v33  ;;  %v12282_v41 = vrot.slane %v10749_v51, 4  ;;  %v4744_v7 = vmul.f32 %v10757_v19, %v13480_v54  ;;  %v10772_v18 = vpop.permute.xlu0 %4981  ;;  %13482 = vst [vmem:[#allocation88_spill] sm:$0xff] %v10774_v28  ;;  %vm13488_vm6 = vmmov %vm13483_vm9 }
 0x3e6   : > { %v4618_v44 = vrot.slane %v4592_v12, 4  ;;  %v10770_v1 = vmul.f32 %v10757_v19, %v10577_v48  ;;  %13481 = vst [vmem:[#allocation94_spill] sm:$0xff] %v10772_v18  ;;  %v4617_v11 = vsel %vm13483_vm9, %v4615_v4, %v4616_v16  ;;  %v4627_v3 = vrot.slane %v4599_v57, 4  ;;  %v10777_v45 = vpop.permute.xlu1 %4979  ;;  %v10779_v12 = vpop.eup %6000  ;;  %vm13489_vm14 = vmmov %vm13488_vm6 }
 0x3e7   : > { %v4767_v33 = vrot.slane %v4743_v35, 4  ;;  %v4768_v55 = vrot.slane %v4747_v26, 4  ;;  %13484 = vst [vmem:[#allocation137_spill] sm:$0xff] %v10777_v45  ;;  %13485 = vst [vmem:[#allocation166_spill] sm:$0xff] %v10779_v12  ;;  %v4643_v48 = vadd.f32 %v4617_v11, %v10497_v24  ;;  %v4770_v50 = vrot.slane %v4744_v7, 4  ;;  %v10788_v4 = vpop.eup %6002 }
 0x3e8   : > { %v4620_v54 = vsel %vm13486_vm15, %v4618_v44, %v12282_v41  ;;  %v12284_v18 = vrot.slane %v10770_v1, 4  ;;  %13487 = vst [vmem:[#allocation173_spill] sm:$0xff] %v10788_v4  ;;  %v4628_v26 = vsel %vm13489_vm14, %v4616_v16, %v4627_v3  ;;  %v4751_v45 = vmul.f32 %v10743_v22, %v10586_v63  ;;  %v10797_v24 = vpop.eup %6004  ;;  %vm13491_vm2 = vmmov %vm13488_vm6  ;;  %v13492_v44 = vld [vmem:[#allocation27_spill] sm:$0xff] }
 0x3e9   : > { %v4644_v35 = vadd.f32 %v4620_v54, %v10503_v52  ;;  %v4769_v57 = vsel %vm13488_vm6, %v4767_v33, %v4768_v55  ;;  %13490 = vst [vmem:[#allocation25_spill] sm:$0xff] %v10797_v24  ;;  %v4647_v52 = vadd.f32 %v4628_v26, %v10506_v27  ;;  %v4593_v11 = vmul.f32 %v10774_v28, %v13492_v44  ;;  %v10807_v16 = vpop.permute.xlu0 %4985  ;;  %v13493_v33 = vld [vmem:[#allocation48_spill] sm:$0xff]  ;;  %v13495_v26 = vld [vmem:[#allocation141_spill] sm:$0xff]  ;;  %vm13496_vm11 = vmmov %vm13491_vm2 }
 0x3ea   : > { %v4772_v46 = vsel %vm13491_vm2, %v4770_v50, %v12284_v18  ;;  %v10802_v7 = vadd.f32 %v4769_v57, %v4643_v48  ;;  %v4779_v63 = vrot.slane %v4751_v45, 4  ;;  %v4594_v54 = vmul.f32 %v10779_v12, %v13493_v33  ;;  %v10815_v22 = vpop.permute.xlu1 %4983  ;;  %v13494_v48 = vld [vmem:[#allocation142_spill] sm:$0xff]  ;;  %vm13498_vm13 = vmmov %vm13491_vm2 }
 0x3eb   : > { %v10809_v3 = vadd.f32 %v4772_v46, %v4644_v35  ;;  %v4597_v41 = vmul.f32 %v10774_v28, %v6900_v13  ;;  %v4598_v50 = vmul.f32 %v10779_v12, %v6925_v2  ;;  %v4621_v27 = vrot.slane %v4593_v11, 4  ;;  %vm13500_vm5 = vmmov %vm13491_vm2 }
 0x3ec   : > { %v4745_v57 = vmul.f32 %v10788_v4, %v13494_v48  ;;  %v4746_v35 = vmul.f32 %v10797_v24, %v13495_v26  ;;  %v4780_v45 = vsel %vm13496_vm11, %v4768_v55, %v4779_v63  ;;  %v4624_v44 = vrot.slane %v4594_v54, 4  ;;  %v10836_v18 = vpop.eup %6006  ;;  %vm13502_vm9 = vmmov %vm13491_vm2 }
 0x3ed   : > { %v4622_v46 = vrot.slane %v4597_v41, 4  ;;  %v4749_v13 = vmul.f32 %v10788_v4, %v10609_v42  ;;  %v10830_v2 = vadd.f32 %v4780_v45, %v4647_v52  ;;  %v4625_v11 = vrot.slane %v4598_v50, 4  ;;  %v10834_v26 = vpop.permute.xlu0 %5007  ;;  %v10843_v36 = vpop.eup %6008  ;;  %vm13503_vm15 = vmmov %vm13491_vm2 }
 0x3ee   : > { %v4750_v33 = vmul.f32 %v10797_v24, %v10614_v49  ;;  %v4773_v48 = vrot.slane %v4745_v57, 4  ;;  %13497 = vst [vmem:[#allocation200_spill] sm:$0xff] %v10834_v26  ;;  %v4776_v63 = vrot.slane %v4746_v35, 4  ;;  %v4602_v42 = vmul.f32 %v10779_v12, %v6935_v38  ;;  %v10841_v54 = vpop.permute.xlu1 %5005  ;;  %13499 = vst [vmem:[#allocation202_spill] sm:$0xff] %v10843_v36 }
 0x3ef   : > { %v4623_v55 = vsel %vm13498_vm13, %v4621_v27, %v4622_v46  ;;  %v4774_v41 = vrot.slane %v4749_v13, 4  ;;  %v4626_v52 = vsel %vm13500_vm5, %v4624_v44, %v4625_v11  ;;  %v4754_v57 = vmul.f32 %v10797_v24, %v10631_v56  ;;  %vm13504_vm6 = vmmov %vm13491_vm2 }
 0x3f0   : > { %v4645_v49 = vadd.f32 %v4623_v55, %v10511_v30  ;;  %v4777_v50 = vrot.slane %v4750_v33, 4  ;;  %v10849_v45 = vpop.eup %6010  ;;  %v4646_v27 = vadd.f32 %v4626_v52, %v10531_v61  ;;  %v4633_v13 = vrot.slane %v4602_v42, 4  ;;  %vm13505_vm14 = vmmov %vm13491_vm2 }
 0x3f1   : > { %13501 = vst [vmem:[#allocation204_spill] sm:$0xff] %v10849_v45  ;;  %v4775_v35 = vsel %vm13502_vm9, %v4773_v48, %v4774_v41  ;;  %v4601_v38 = vmul.f32 %v10774_v28, %v6931_v9  ;;  %v4785_v44 = vrot.slane %v4754_v57, 4  ;;  %v4629_v30 = vrot.slane %v10753_v6, 4  ;;  %v10859_v33 = vpop.permute.xlu0 %5013  ;;  %vm13507_vm11 = vmmov %vm13491_vm2 }
 0x3f2   : > { %v4778_v12 = vsel %vm13503_vm15, %v4776_v63, %v4777_v50  ;;  %v10856_v26 = vadd.f32 %v4775_v35, %v4645_v49  ;;  %v4634_v55 = vsel %vm13504_vm6, %v4625_v11, %v4633_v13  ;;  %v4752_v48 = vmul.f32 %v10757_v19, %v10635_v59  ;;  %v10866_v42 = vpop.permute.xlu1 %5011  ;;  %v13509_v13 = vld [vmem:[#allocation148_spill] sm:$0xff]  ;;  %vm13511_vm13 = vmmov %vm13491_vm2 }
 0x3f3   : > { %v10861_v56 = vadd.f32 %v4778_v12, %v4646_v27  ;;  %v4631_v61 = vrot.slane %v4601_v38, 4  ;;  %v4650_v9 = vadd.f32 %v4634_v55, %v10556_v14  ;;  %v4786_v63 = vsel %vm13505_vm14, %v4777_v50, %v4785_v44  ;;  %v13508_v27 = vld [vmem:[#allocation33_spill] sm:$0xff]  ;;  %vm13512_vm5 = vmmov %vm13491_vm2 }
 0x3f4   : > { %v13506_v52 = vrot.slane %v10749_v51, 4  ;;  %v4753_v12 = vmul.f32 %v10788_v4, %v10639_v20  ;;  %v4781_v57 = vrot.slane %v4752_v48, 4  ;;  %v4895_v59 = vmul.f32 %v10836_v18, %v13508_v27  ;;  %vm13515_vm9 = vmmov %vm13491_vm2 }
 0x3f5   : > { %v4632_v49 = vsel %vm13507_vm11, %v4622_v46, %v4631_v61  ;;  %v10879_v35 = vadd.f32 %v4786_v63, %v4650_v9  ;;  %v4896_v51 = vmul.f32 %v10843_v36, %v13509_v13  ;;  %v10884_v38 = vpop.permute.xlu0 %5017  ;;  %v13510_v20 = vrot.slane %v10770_v1, 4  ;;  %vm13516_vm15 = vmmov %vm13491_vm2 }
 0x3f6   : > { %v4630_v6 = vsel %vm13491_vm2, %v13506_v52, %v4629_v30  ;;  %v4649_v14 = vadd.f32 %v4632_v49, %v10559_v5  ;;  %v4783_v50 = vrot.slane %v4753_v12, 4  ;;  %v4900_v44 = vmul.f32 %v10843_v36, %v10702_v21  ;;  %v10893_v55 = vpop.permute.xlu1 %5015  ;;  %vm13517_vm6 = vmmov %vm13491_vm2 }
 0x3f7   : > { %v4648_v11 = vadd.f32 %v4630_v6, %v10537_v29  ;;  %v4782_v46 = vsel %vm13511_vm13, %v13510_v20, %v4781_v57  ;;  %v4899_v29 = vmul.f32 %v10836_v18, %v10698_v47  ;;  %v4919_v30 = vrot.slane %v4895_v59, 4 }
 0x3f8   : > { %v4784_v5 = vsel %vm13512_vm5, %v4774_v41, %v4783_v50  ;;  %v4922_v48 = vrot.slane %v4896_v51, 4  ;;  %v4903_v9 = vmul.f32 %v10836_v18, %v10708_v53  ;;  %v4923_v52 = vrot.slane %v4900_v44, 4  ;;  %v13514_v41 = vld [vmem:[#allocation45_spill] sm:$0xff] }
 0x3f9   : > { %v4800_v61 = vadd.f32 %v4782_v46, %v4648_v11  ;;  %v4801_v63 = vadd.f32 %v4784_v5, %v4649_v14  ;;  %v4920_v1 = vrot.slane %v4899_v29, 4  ;;  %v13513_v6 = vsub.f32 %v13467_v34, %v8860_v17  ;;  %v10911_v11 = vpop.permute.xlu0 %5021  ;;  %v13530_v5 = vld [vmem:[#allocation137_spill] sm:$0xff] }
 0x3fa   : > { %v4931_v12 = vrot.slane %v4903_v9, 4  ;;  %v10905_v21 = vsel %vm2665_vm4, %v10649_v0, %v10720_v31  ;;  %v4897_v49 = vmul.f32 %v10849_v45, %v13514_v41  ;;  %v4901_v53 = vmul.f32 %v10849_v45, %v10724_v15  ;;  %v5020_v0 = vpop.permute.xlu1 %5019 }
 0x3fb   : > { %v4813_v47 = vmul.f32 1.442695, %v13513_v6  ;;  %v4921_v57 = vsel %vm13515_vm9, %v4919_v30, %v4920_v1  ;;  %v4924_v34 = vsel %vm13516_vm15, %v4922_v48, %v4923_v52  ;;  %v10919_v27 = vsel %vm2665_vm4, %v10665_v39, %v10729_v25  ;;  %vm13525_vm9 = vmmov %vm13517_vm6 }
 0x3fc   : > { %v10922_v31 = vadd.f32 %v4921_v57, %v10802_v7  ;;  %v10925_v59 = vadd.f32 %v4924_v34, %v10809_v3  ;;  %v4932_v15 = vsel %vm13517_vm6, %v4920_v1, %v4931_v12  ;;  %v4925_v14 = vrot.slane %v4897_v49, 4  ;;  %v13536_v12 = vld [vmem:[#allocation185_spill] sm:$0xff]  ;;  %v13537_v49 = vld [vmem:[#allocation160_spill] sm:$0xff] }
 0x3fd   : > { %6012 = vpow2.f32 %v4813_v47  ;;  %v10929_v50 = vadd.f32 %v4932_v15, %v10830_v2  ;;  %v4926_v13 = vrot.slane %v4901_v53, 4  ;;  %vm13518_vm14 = vcmask 48128   ;;  %v13523_v2 = vld [vmem:[#allocation101_spill] sm:$0xff]  ;;  %v5126_v20 = vpop.permute.xlu0 %5125  ;;  %v13535_v47 = vld [vmem:[#allocation71_spill] sm:$0xff] }
 0x3fe   : > { %v4874_v51 = vsel %vm13518_vm14, %v10592_v60, %v10641_v32  ;;  %vm13519_vm4 = vmmov %vm13518_vm14  ;;  %vm13520_vm2 = vcmp.lt.s32.totalorder %v13431_v40, 6  ;;  %vm13521_vm11 = vcmp.lt.s32.totalorder %v13443_v37, 6  ;;  %vm13522_vm13 = vcmask 1022976   ;;  %v13538_v53 = vld [vmem:[#allocation61_spill] sm:$0xff] }
 0x3ff   : > { %v4875_v39 = vsel %vm13519_vm4, %v10641_v32, %v10627_v43  ;;  %v4892_v25 = vsel %vm13520_vm2, %v10672_v62, %v4874_v51  ;;  %v4987_v3 = vsel %vm13522_vm13, %v10694_v8, %v10683_v23  ;;  %vm13524_vm5 = vmmov %vm13522_vm13  ;;  %v4927_v46 = vsel %vm13525_vm9, %v4925_v14, %v4926_v13  ;;  %v13526_v62 = vld [vmem:[#allocation154_spill] sm:$0xff] }
 0x400   : > { %v4893_v7 = vsel %vm13521_vm11, %v10677_v10, %v4875_v39  ;;  %v5003_v60 = vsel %vm13524_vm5, %v13523_v2, %v10694_v8  ;;  %v4904_v43 = vmul.f32 %v10843_v36, %v4892_v25  ;;  %vm13527_vm15 = vmmov %vm13524_vm5  ;;  %v5124_v10 = vpop.permute.xlu1 %5123  ;;  %v10956_v44 = vadd.f32 %v4927_v46, %v10856_v26  ;;  %v13529_v8 = vld [vmem:[#allocation94_spill] sm:$0xff] }
 0x401   : > { %v4905_v32 = vmul.f32 %v10849_v45, %v4893_v7  ;;  %v4988_v29 = vsel %vm13527_vm15, %v10683_v23, %v13526_v62  ;;  %vm13528_vm6 = vmmov %vm13524_vm5  ;;  %v4955_v41 = vsub.f32 %v13536_v12, %v13535_v47  ;;  %v4956_v57 = vsub.f32 %v13538_v53, %v13537_v49  ;;  %v5130_v14 = vpop.permute.xlu0 %5129 }
 0x402   : > { %v4989_v30 = vsel %vm13528_vm6, %v13526_v62, %v13523_v2  ;;  %vm13531_vm14 = vmmov %vm13524_vm5  ;;  %v4933_v1 = vrot.slane %v4904_v43, 4  ;;  %v5023_v34 = vsel %vm2753_vm1, %v10866_v42, %v10859_v33  ;;  %v5037_v15 = vsel %vm2753_vm1, %v10841_v54, %v10866_v42  ;;  %v13545_v62 = vld [vmem:[#allocation60_spill] sm:$0xff] }
 0x403   : > { %v4990_v48 = vsel %vm13531_vm14, %v13530_v5, %v13529_v8  ;;  %vm13532_vm4 = vmmov %vm13524_vm5  ;;  %v4935_v6 = vrot.slane %v4905_v32, 4  ;;  %v4959_v43 = vmul.f32 1.442695, %v4955_v41  ;;  %v4961_v42 = vmul.f32 1.442695, %v4956_v57  ;;  %v13543_v32 = vld [vmem:[#allocation200_spill] sm:$0xff] }
 0x404   : > { %v5004_v9 = vsel %vm13532_vm4, %v10807_v16, %v13530_v5  ;;  %vm13533_vm2 = vmmov %vm13532_vm4  ;;  %v5128_v7 = vpop.permute.xlu1 %5127  ;;  %vm13547_vm15 = vcmp.lt.s32.totalorder %v13443_v37, 5  ;;  %vm13548_vm6 = vcmp.lt.s32.totalorder %v13445_v58, 5 }
 0x405   : > { %v4991_v23 = vsel %vm13533_vm2, %v13529_v8, %v10815_v22  ;;  %vm13534_vm11 = vmmov %vm13533_vm2  ;;  %6014 = vpow2.f32 %v4959_v43 }
 0x406   : > { %v4992_v26 = vsel %vm13534_vm11, %v10815_v22, %v10807_v16  ;;  %vm13539_vm13 = vmmov %vm13525_vm9  ;;  %v13541_v22 = vld [vmem:[#allocation17_spill] sm:$0xff]  ;;  %v10987_v16 = vsel %vm2762_vm3, %v4987_v3, %v5037_v15  ;;  %v13546_v3 = vld [vmem:[#allocation39_spill] sm:$0xff]  ;;  %6016 = vpow2.f32 %v4961_v42 }
 0x407   : > { %v4934_v51 = vsel %vm13539_vm13, %v4923_v52, %v4933_v1  ;;  %vm13540_vm5 = vmmov %vm13525_vm9  ;;  %vm13542_vm9 = vcmp.lt.s32.totalorder %v13431_v40, 5  ;;  %v5038_v52 = vsel %vm2753_vm1, %v13543_v32, %v10884_v38  ;;  %v4958_v5 = vsub.f32 %v13546_v3, %v8860_v17 }
 0x408   : > { %v4936_v39 = vsel %vm13540_vm5, %v4926_v13, %v4935_v6  ;;  %v10991_v25 = vsel %vm13542_vm9, %v4988_v29, %v5023_v34  ;;  %v10993_v2 = vadd.f32 %v4934_v51, %v4800_v61  ;;  %v13544_v13 = vld [vmem:[#allocation70_spill] sm:$0xff]  ;;  %v5024_v29 = vsel %vm2753_vm1, %v10859_v33, %v10893_v55  ;;  %v5134_v6 = vpop.permute.xlu0 %5133  ;;  %v5132_v53 = vpop.permute.xlu1 %5131  ;;  %vm13552_vm14 = vmmov %vm13548_vm6 }
 0x409   : > { %v10995_v46 = vadd.f32 %v4936_v39, %v4801_v63  ;;  %v4957_v8 = vsub.f32 %v13545_v62, %v13544_v13  ;;  %v11009_v61 = vsel %vm2762_vm3, %v4990_v48, %v5038_v52  ;;  %v5025_v63 = vsel %vm2753_vm1, %v10893_v55, %v10841_v54  ;;  %v13551_v34 = vld [vmem:[#allocation30_spill] sm:$0xff]  ;;  %vm13553_vm4 = vmmov %vm13542_vm9 }
 0x40a   : > { %v11016_v1 = vsel %vm13547_vm15, %v4989_v30, %v5024_v29  ;;  %v4965_v41 = vmul.f32 1.442695, %v4958_v5  ;;  %v11020_v33 = vsel %vm13548_vm6, %v5003_v60, %v5025_v63  ;;  %v11022_v57 = vpop.eup %6012  ;;  %v5028_v48 = vsel %vm2753_vm1, %v10911_v11, %v13543_v32  ;;  %v13564_v5 = vld [vmem:[#allocation188_spill] sm:$0xff]  ;;  %v13565_v63 = vld [vmem:[#allocation67_spill] sm:$0xff] }
 0x40b   : > { %v4963_v12 = vmul.f32 1.442695, %v4957_v8  ;;  %13549 = vst [vmem:[#allocation210_spill] sm:$0xff] %v11022_v57  ;;  %v5026_v54 = vsel %vm2753_vm1, %v10884_v38, %v5020_v0  ;;  %v5027_v55 = vsel %vm2753_vm1, %v5020_v0, %v10911_v11  ;;  %vm13550_vm3 = vcmask 1014784   ;;  %vm13554_vm1 = vmmov %vm13547_vm15 }
 0x40c   : > { %v5139_v30 = vsel %vm13550_vm3, %v5124_v10, %v5126_v20  ;;  %v4898_v15 = vmul.f32 %v11022_v57, %v13551_v34  ;;  %v4902_v60 = vmul.f32 %v11022_v57, %v10905_v21  ;;  %v4906_v51 = vmul.f32 %v11022_v57, %v10919_v27  ;;  %v5138_v0 = vpop.permute.xlu0 %5137  ;;  %vm13555_vm2 = vmmov %vm13550_vm3  ;;  %v5136_v27 = vpop.permute.xlu1 %5135 }
 0x40d   : > { %6018 = vpow2.f32 %v4963_v12  ;;  %v11040_v39 = vsel %vm13552_vm14, %v5004_v9, %v5028_v48  ;;  %v5044_v38 = vsel %vm13553_vm4, %v4991_v23, %v5026_v54  ;;  %v11046_v11 = vsel %vm13554_vm1, %v4992_v26, %v5027_v55  ;;  %vm13556_vm11 = vmmov %vm13555_vm2  ;;  %v13567_v48 = vld [vmem:[#allocation41_spill] sm:$0xff]  ;;  %v13568_v54 = vld [vmem:[#allocation42_spill] sm:$0xff] }
 0x40e   : > { %6020 = vpow2.f32 %v4965_v41  ;;  %v4928_v43 = vrot.slane %v4898_v15, 4  ;;  %v4929_v42 = vrot.slane %v4902_v60, 4  ;;  %v4937_v21 = vrot.slane %v4906_v51, 4  ;;  %vm13557_vm13 = vmmov %vm13555_vm2  ;;  %v13569_v55 = vld [vmem:[#allocation8_spill] sm:$0xff]  ;;  %v13570_v51 = vld [vmem:[#allocation161_spill] sm:$0xff] }
 0x40f   : > { %v11049_v32 = vsel %vm13555_vm2, %v5130_v14, %v5124_v10  ;;  %v11052_v52 = vsel %vm13556_vm11, %v5126_v20, %v5128_v7  ;;  %v11055_v9 = vsel %vm13557_vm13, %v5128_v7, %v5130_v14  ;;  %vm13558_vm5 = vmmov %vm13555_vm2  ;;  %vm13560_vm15 = vcmask 1043456  }
 0x410   : > { %v11058_v23 = vsel %vm13558_vm5, %v5132_v53, %v5134_v6  ;;  %vm13559_vm9 = vmmov %vm13555_vm2  ;;  %v4930_v62 = vsel %vm13560_vm15, %v4928_v43, %v4929_v42  ;;  %v11077_v7 = vpop.permute.xlu0 %5159  ;;  %v5107_v29 = vsub.f32 %v13564_v5, %v13535_v47  ;;  %v5108_v12 = vsub.f32 %v13565_v63, %v13537_v49  ;;  %v11083_v41 = vpop.permute.xlu1 %5157  ;;  %v13571_v43 = vld [vmem:[#allocation162_spill] sm:$0xff] }
 0x411   : > { %v11061_v26 = vsel %vm13559_vm9, %v5138_v0, %v5132_v53  ;;  %vm13561_vm6 = vmmov %vm13560_vm15  ;;  %v11072_v20 = vadd.f32 %v4930_v62, %v10861_v56  ;;  %v5110_v56 = vsub.f32 %v13567_v48, %v8860_v17  ;;  %v5260_v34 = vsub.f32 %v13569_v55, %v13537_v49 }
 0x412   : > { %v4938_v8 = vsel %vm13561_vm6, %v4929_v42, %v4937_v21  ;;  %vm13562_vm3 = vmmov %vm13555_vm2  ;;  %v5111_v15 = vmul.f32 1.442695, %v5107_v29  ;;  %v5113_v60 = vmul.f32 1.442695, %v5108_v12  ;;  %v5262_v42 = vsub.f32 %v13571_v43, %v8860_v17  ;;  %v11101_v5 = vpop.eup %6014 }
 0x413   : > { %v11066_v10 = vsel %vm13562_vm3, %v5134_v6, %v5136_v27  ;;  %vm13563_vm14 = vmmov %vm13555_vm2  ;;  %v11075_v14 = vadd.f32 %v4938_v8, %v10879_v35  ;;  %v13566_v6 = vld [vmem:[#allocation158_spill] sm:$0xff]  ;;  %v5259_v35 = vsub.f32 %v13568_v54, %v13535_v47  ;;  %v5117_v62 = vmul.f32 1.442695, %v5110_v56  ;;  %13572 = vst [vmem:[#allocation212_spill] sm:$0xff] %v11101_v5  ;;  %v11109_v48 = vpop.eup %6016  ;;  %v13574_v54 = vld [vmem:[#allocation32_spill] sm:$0xff] }
 0x414   : > { %v11069_v3 = vsel %vm13563_vm14, %v5136_v27, %v5138_v0  ;;  %v5109_v53 = vsub.f32 %v13566_v6, %v13544_v13  ;;  %v5261_v0 = vsub.f32 %v13570_v51, %v13544_v13  ;;  %v11097_v21 = vpop.permute.xlu0 %5165  ;;  %6022 = vpow2.f32 %v5111_v15  ;;  %v5164_v63 = vpop.permute.xlu1 %5163  ;;  %13573 = vst [vmem:[#allocation213_spill] sm:$0xff] %v11109_v48  ;;  %vm13577_vm4 = vmmov %vm13561_vm6 }
 0x415   : > { %v11099_v8 = vmul.f32 1.442695, %v5259_v35  ;;  %6024 = vpow2.f32 %v5113_v60  ;;  %v11103_v6 = vmul.f32 1.442695, %v5260_v34  ;;  %v11107_v12 = vmul.f32 1.442695, %v5262_v42  ;;  %vm13578_vm1 = vmmov %vm13577_vm4 }
 0x416   : > { %v5115_v27 = vmul.f32 1.442695, %v5109_v53  ;;  %v11105_v29 = vmul.f32 1.442695, %v5261_v0  ;;  %v5047_v55 = vmul.f32 %v11101_v5, %v13574_v54  ;;  %v5051_v53 = vmul.f32 %v11101_v5, %v10987_v16  ;;  %v13575_v34 = vld [vmem:[#allocation153_spill] sm:$0xff]  ;;  %vm13580_vm2 = vmmov %vm13578_vm1 }
 0x417   : > { %v5055_v56 = vmul.f32 %v11101_v5, %v11009_v61  ;;  %v5175_v35 = vsel %vm2853_vm8, %v5164_v63, %v11097_v21  ;;  %v5048_v15 = vmul.f32 %v11109_v48, %v13575_v34  ;;  %v5052_v60 = vmul.f32 %v11109_v48, %v10991_v25  ;;  %v13576_v25 = vld [vmem:[#allocation151_spill] sm:$0xff]  ;;  %vm13582_vm13 = vmmov %vm13578_vm1 }
 0x418   : > { %v5056_v51 = vmul.f32 %v11109_v48, %v5044_v38  ;;  %v5189_v0 = vsel %vm2853_vm8, %v11083_v41, %v5164_v63  ;;  %v5071_v16 = vrot.slane %v5047_v55, 4  ;;  %v5072_v42 = vrot.slane %v5051_v53, 4  ;;  %v11130_v57 = vpop.permute.xlu0 %5169  ;;  %v5168_v4 = vpop.permute.xlu1 %5167  ;;  %vm13583_vm5 = vmmov %vm13578_vm1 }
 0x419   : > { %v5083_v54 = vrot.slane %v5055_v56, 4  ;;  %v5191_v61 = vsel %vm2862_vm10, %v5139_v30, %v5189_v0  ;;  %v5074_v34 = vrot.slane %v5048_v15, 4  ;;  %v5075_v24 = vrot.slane %v5052_v60, 4  ;;  %v13579_v56 = vld [vmem:[#allocation53_spill] sm:$0xff]  ;;  %vm13584_vm9 = vmmov %vm13578_vm1 }
 0x41a   : > { %v11126_v43 = vpop.eup %6018  ;;  %v5073_v55 = vsel %vm13577_vm4, %v5071_v16, %v5072_v42  ;;  %vm13581_vm11 = vcmp.lt.s32.totalorder %v13431_v40, 4  ;;  %6026 = vpow2.f32 %v5115_v27  ;;  %vm13585_vm15 = vmmov %vm13578_vm1  ;;  %v5177_v27 = vsel %vm2853_vm8, %v5168_v4, %v11083_v41 }
 0x41b   : > { %v11132_v45 = vpop.eup %6020  ;;  %v5049_v38 = vmul.f32 %v11126_v43, %v13576_v25  ;;  %v5053_v63 = vmul.f32 %v11126_v43, %v11016_v1  ;;  %v5084_v53 = vsel %vm13578_vm1, %v5072_v42, %v5083_v54  ;;  %v5076_v15 = vsel %vm13580_vm2, %v5074_v34, %v5075_v24  ;;  %vm13592_vm4 = vmmov %vm13578_vm1 }
 0x41c   : > { %v5050_v30 = vmul.f32 %v11132_v45, %v13579_v56  ;;  %v5054_v0 = vmul.f32 %v11132_v45, %v11020_v33  ;;  %v5099_v60 = vadd.f32 %v5073_v55, %v10922_v31  ;;  %v5103_v25 = vadd.f32 %v5084_v53, %v10929_v50  ;;  %v5174_v36 = vpop.permute.xlu0 %5173  ;;  %v5172_v34 = vpop.permute.xlu1 %5171  ;;  %v13587_v56 = vld [vmem:[#allocation37_spill] sm:$0xff] }
 0x41d   : > { %v5077_v28 = vrot.slane %v5049_v38, 4  ;;  %v5100_v1 = vadd.f32 %v5076_v15, %v10925_v59  ;;  %v5078_v48 = vrot.slane %v5053_v63, 4  ;;  %v5058_v42 = vmul.f32 %v11132_v45, %v11040_v39 }
 0x41e   : > { %v5080_v5 = vrot.slane %v5050_v30, 4  ;;  %v5081_v16 = vrot.slane %v5054_v0, 4  ;;  %v5057_v54 = vmul.f32 %v11126_v43, %v11046_v11  ;;  %v5085_v33 = vrot.slane %v5056_v51, 4 }
 0x41f   : > { %v5192_v31 = vsel %vm13581_vm11, %v11052_v52, %v5175_v35  ;;  %v5079_v50 = vsel %vm13582_vm13, %v5077_v28, %v5078_v48  ;;  %v5190_v38 = vsel %vm2853_vm8, %v11077_v7, %v11130_v57  ;;  %v5089_v51 = vrot.slane %v5058_v42, 4  ;;  %vm13594_vm11 = vmmov %vm13580_vm2 }
 0x420   : > { %v5082_v59 = vsel %vm13583_vm5, %v5080_v5, %v5081_v16  ;;  %v11161_v39 = vadd.f32 %v5079_v50, %v10956_v44  ;;  %v5086_v63 = vsel %vm13584_vm9, %v5075_v24, %v5085_v33  ;;  %v5087_v52 = vrot.slane %v5057_v54, 4  ;;  %v5278_v5 = vpop.permute.xlu0 %5277 }
 0x421   : > { %v11164_v11 = vadd.f32 %v5082_v59, %v11072_v20  ;;  %v5104_v35 = vadd.f32 %v5086_v63, %v10993_v2  ;;  %v5195_v28 = vsel %vm2862_vm10, %v11058_v23, %v5190_v38  ;;  %6028 = vpow2.f32 %v5117_v62  ;;  %v11171_v55 = vpop.eup %6022  ;;  %v5276_v2 = vpop.permute.xlu1 %5275  ;;  %vm13586_vm10 = vmmov %vm13578_vm1 }
 0x422   : > { %v5090_v44 = vsel %vm13585_vm15, %v5081_v16, %v5089_v51  ;;  %v5176_v20 = vsel %vm2853_vm8, %v11097_v21, %v5168_v4  ;;  %v5180_v24 = vsel %vm2853_vm8, %v5174_v36, %v11077_v7  ;;  %v11180_v53 = vpop.eup %6024  ;;  %v5088_v62 = vsel %vm13586_vm10, %v5078_v48, %v5087_v52  ;;  %v13588_v4 = vld [vmem:[#allocation55_spill] sm:$0xff] }
 0x423   : > { %v11183_v23 = vadd.f32 %v5090_v44, %v11075_v14  ;;  %v5199_v30 = vmul.f32 %v11171_v55, %v13587_v56  ;;  %v5203_v0 = vmul.f32 %v11171_v55, %v5191_v61  ;;  %v11190_v21 = vadd.f32 %v5088_v62, %v10995_v46  ;;  %v13603_v56 = vld [vmem:[#allocation189_spill] sm:$0xff] }
 0x424   : > { %v5200_v41 = vmul.f32 %v11180_v53, %v13588_v4  ;;  %v5204_v7 = vmul.f32 %v11180_v53, %v5192_v31  ;;  %v5207_v15 = vmul.f32 %v11171_v55, %v5195_v28  ;;  %vm13589_vm6 = vcmp.lt.s32.totalorder %v13443_v37, 4  ;;  %v5282_v42 = vpop.permute.xlu0 %5281 }
 0x425   : > { %v5223_v16 = vrot.slane %v5199_v30, 4  ;;  %v5224_v14 = vrot.slane %v5203_v0, 4  ;;  %v5193_v48 = vsel %vm13589_vm6, %v11055_v9, %v5176_v20  ;;  %vm13590_vm3 = vcmp.lt.s32.totalorder %v13445_v58, 4  ;;  %v5280_v50 = vpop.permute.xlu1 %5279 }
 0x426   : > { %v5194_v61 = vsel %vm13590_vm3, %v11049_v32, %v5177_v27  ;;  %v5226_v46 = vrot.slane %v5200_v41, 4  ;;  %v5227_v54 = vrot.slane %v5204_v7, 4  ;;  %v5235_v33 = vrot.slane %v5207_v15, 4  ;;  %vm13591_vm14 = vmmov %vm13590_vm3 }
 0x427   : > { %v5198_v31 = vsel %vm13591_vm14, %v11061_v26, %v5180_v24  ;;  %v5225_v59 = vsel %vm13592_vm4, %v5223_v16, %v5224_v14  ;;  %v5178_v38 = vsel %vm2853_vm8, %v11130_v57, %v5172_v34  ;;  %v5179_v9 = vsel %vm2853_vm8, %v5172_v34, %v5174_v36  ;;  %vm13596_vm8 = vmmov %vm13589_vm6  ;;  %v13601_v24 = vld [vmem:[#allocation194_spill] sm:$0xff] }
 0x428   : > { %vm13593_vm1 = vcmask 1006592   ;;  %v5228_v32 = vsel %vm13580_vm2, %v5226_v46, %v5227_v54  ;;  %v11213_v63 = vadd.f32 %v5225_v59, %v5099_v60  ;;  %v5236_v52 = vsel %vm13594_vm11, %v5224_v14, %v5235_v33  ;;  %v5286_v34 = vpop.permute.xlu0 %5285  ;;  %vm13605_vm6 = vmmov %vm13580_vm2  ;;  %v13607_v14 = vld [vmem:[#allocation196_spill] sm:$0xff]  ;;  %v13608_v46 = vld [vmem:[#allocation114_spill] sm:$0xff] }
 0x429   : > { %v11210_v51 = vsel %vm13593_vm1, %v5276_v2, %v5278_v5  ;;  %vm13595_vm13 = vcmp.lt.s32.totalorder %v13431_v40, 4  ;;  %v11219_v28 = vadd.f32 %v5228_v32, %v5100_v1  ;;  %v11221_v44 = vadd.f32 %v5236_v52, %v5103_v25  ;;  %vm13597_vm5 = vmmov %vm13593_vm1 }
 0x42a   : > { %v5196_v26 = vsel %vm13595_vm13, %v11066_v10, %v5178_v38  ;;  %v5197_v36 = vsel %vm13596_vm8, %v11069_v3, %v5179_v9  ;;  %v11228_v60 = vsel %vm13597_vm5, %v5282_v42, %v5276_v2  ;;  %vm13598_vm9 = vmmov %vm13593_vm1  ;;  %v5284_v10 = vpop.permute.xlu1 %5283  ;;  %6030 = vpow2.f32 %v11099_v8  ;;  %v11241_v3 = vpop.eup %6026  ;;  %v13602_v2 = vld [vmem:[#allocation43_spill] sm:$0xff] }
 0x42b   : > { %v5208_v57 = vmul.f32 %v11180_v53, %v5196_v26  ;;  %v11231_v20 = vsel %vm13598_vm9, %v5278_v5, %v5280_v50  ;;  %vm13599_vm15 = vmmov %vm13593_vm1  ;;  %6032 = vpow2.f32 %v11103_v6  ;;  %v5411_v5 = vsub.f32 %v13601_v24, %v13535_v47  ;;  %v13604_v8 = vld [vmem:[#allocation35_spill] sm:$0xff] }
 0x42c   : > { %v11234_v27 = vsel %vm13599_vm15, %v5280_v50, %v5282_v42  ;;  %vm13600_vm10 = vmmov %vm13593_vm1  ;;  %6034 = vpow2.f32 %v11105_v29  ;;  %v5412_v62 = vsub.f32 %v13602_v2, %v13537_v49  ;;  %v5413_v30 = vsub.f32 %v13603_v56, %v13544_v13  ;;  %v5290_v7 = vpop.permute.xlu0 %5289  ;;  %v13614_v2 = vld [vmem:[#allocation205_spill] sm:$0xff] }
 0x42d   : > { %v5237_v25 = vrot.slane %v5208_v57, 4  ;;  %v11238_v1 = vsel %vm13600_vm10, %v5284_v10, %v5286_v34  ;;  %v5201_v0 = vmul.f32 %v11241_v3, %v13604_v8  ;;  %v5205_v4 = vmul.f32 %v11241_v3, %v5193_v48  ;;  %vm13606_vm3 = vmmov %vm13593_vm1  ;;  %v13615_v56 = vld [vmem:[#allocation133_spill] sm:$0xff] }
 0x42e   : > { %v5209_v6 = vmul.f32 %v11241_v3, %v5197_v36  ;;  %v11255_v29 = vpop.eup %6028  ;;  %v11260_v47 = vsel %vm13606_vm3, %v5290_v7, %v5284_v10  ;;  %v5288_v16 = vpop.permute.xlu1 %5287  ;;  %6036 = vpow2.f32 %v11107_v12  ;;  %v5414_v42 = vsub.f32 %v13607_v14, %v8860_v17  ;;  %vm13609_vm14 = vmmov %vm13593_vm1  ;;  %v13620_v14 = vld [vmem:[#allocation83_spill] sm:$0xff] }
 0x42f   : > { %v5238_v41 = vsel %vm13605_vm6, %v5227_v54, %v5237_v25  ;;  %v5202_v48 = vmul.f32 %v11255_v29, %v13608_v46  ;;  %v5206_v33 = vmul.f32 %v11255_v29, %v5194_v61  ;;  %v5229_v54 = vrot.slane %v5201_v0, 4  ;;  %vm13610_vm4 = vmmov %vm13593_vm1 }
 0x430   : > { %v11257_v15 = vadd.f32 %v5238_v41, %v5104_v35  ;;  %v5230_v50 = vrot.slane %v5205_v4, 4  ;;  %v5210_v59 = vmul.f32 %v11255_v29, %v5198_v31  ;;  %v5239_v35 = vrot.slane %v5209_v6, 4  ;;  %vm13611_vm1 = vmmov %vm13580_vm2  ;;  %v11276_v52 = vpop.permute.xlu0 %5311  ;;  %v13617_v4 = vld [vmem:[#allocation209_spill] sm:$0xff]  ;;  %v13618_v6 = vld [vmem:[#allocation214_spill] sm:$0xff] }
 0x431   : > { %v11270_v38 = vsel %vm13609_vm14, %v5286_v34, %v5288_v16  ;;  %v11273_v9 = vsel %vm13610_vm4, %v5288_v16, %v5290_v7  ;;  %v5232_v32 = vrot.slane %v5202_v48, 4  ;;  %v5233_v17 = vrot.slane %v5206_v33, 4  ;;  %vm13612_vm2 = vmmov %vm13611_vm1 }
 0x432   : > { %v5231_v12 = vsel %vm13611_vm1, %v5229_v54, %v5230_v50  ;;  %v5415_v26 = vmul.f32 1.442695, %v5411_v5  ;;  %v5241_v36 = vrot.slane %v5210_v59, 4  ;;  %v5240_v31 = vsel %vm13612_vm2, %v5230_v50, %v5239_v35  ;;  %v5310_v57 = vpop.permute.xlu1 %5309  ;;  %vm13613_vm11 = vmmov %vm13611_vm1  ;;  %v13622_v50 = vld [vmem:[#allocation127_spill] sm:$0xff] }
 0x433   : > { %v11279_v61 = vadd.f32 %v5231_v12, %v11161_v39  ;;  %v5417_v10 = vmul.f32 1.442695, %v5412_v62  ;;  %v5234_v34 = vsel %vm13613_vm11, %v5232_v32, %v5233_v17  ;;  %v11284_v25 = vadd.f32 %v5240_v31, %v11190_v21  ;;  %vm13616_vm13 = vmmov %vm13611_vm1  ;;  %v13619_v21 = vld [vmem:[#allocation78_spill] sm:$0xff]  ;;  %v13623_v12 = vld [vmem:[#allocation57_spill] sm:$0xff] }
 0x434   : > { %v5419_v24 = vmul.f32 1.442695, %v5413_v30  ;;  %v3331_v8 = vadd.f32 %v13615_v56, %v13614_v2  ;;  %v11289_v0 = vadd.f32 %v5234_v34, %v11164_v11  ;;  %v5242_v39 = vsel %vm13616_vm13, %v5233_v17, %v5241_v36  ;;  %v5318_v7 = vpop.permute.xlu0 %5317  ;;  %v13626_v56 = vld [vmem:[#allocation75_spill] sm:$0xff]  ;;  %vm13629_vm5 = vmmov %vm13611_vm1 }
 0x435   : > { %v5421_v5 = vmul.f32 1.442695, %v5414_v42  ;;  %v3332_v41 = vadd.f32 %v13618_v6, %v13617_v4  ;;  %v11295_v62 = vadd.f32 %v5242_v39, %v11183_v23  ;;  %6038 = vpow2.f32 %v5415_v26  ;;  %vm13630_vm9 = vmmov %vm13611_vm1 }
 0x436   : > { %v3363_v16 = vadd.f32 %v13619_v21, %v3331_v8  ;;  %v5316_v30 = vpop.permute.xlu1 %5315  ;;  %6040 = vpow2.f32 %v5417_v10  ;;  %vm13621_vm8 = vcmp.lt.s32.totalorder %v13431_v40, 3  ;;  %vm13631_vm15 = vcmp.lt.s32.totalorder %v13443_v37, 3 }
 0x437   : > { %v3364_v46 = vadd.f32 %v13620_v14, %v3332_v41  ;;  %v11299_v48 = vpop.eup %6030  ;;  %v5327_v11 = vsel %vm2953_vm12, %v5316_v30, %v5318_v7  ;;  %v5341_v42 = vsel %vm2953_vm12, %v5310_v57, %v5316_v30  ;;  %6042 = vpow2.f32 %v5419_v24  ;;  %v13625_v24 = vld [vmem:[#allocation47_spill] sm:$0xff]  ;;  %v13628_v14 = vld [vmem:[#allocation36_spill] sm:$0xff]  ;;  %vm13634_vm6 = vmmov %vm13621_vm8 }
 0x438   : > { %v11303_v33 = vpop.eup %6032  ;;  %v5343_v23 = vsel %vm2962_vm0, %v11210_v51, %v5341_v42  ;;  %v5344_v54 = vsel %vm13621_vm8, %v11231_v20, %v5327_v11  ;;  %v5351_v59 = vmul.f32 %v11299_v48, %v13622_v50  ;;  %6044 = vpow2.f32 %v5421_v5  ;;  %v5322_v36 = vpop.permute.xlu0 %5321  ;;  %v13624_v51 = vld [vmem:[#allocation16_spill] sm:$0xff] }
 0x439   : > { %v11313_v35 = vpop.eup %6034  ;;  %v5352_v32 = vmul.f32 %v11303_v33, %v13623_v12  ;;  %v5355_v17 = vmul.f32 %v11299_v48, %v5343_v23  ;;  %v11319_v26 = vmul.f32 %v11303_v33, %v5344_v54  ;;  %v3395_v31 = vadd.f32 %v13624_v51, %v3363_v16 }
 0x43a   : > { %v5375_v10 = vrot.slane %v5351_v59, 4  ;;  %v5342_v20 = vsel %vm2953_vm12, %v11276_v52, %v5322_v36  ;;  %v5320_v34 = vpop.permute.xlu1 %5319  ;;  %v5353_v2 = vmul.f32 %v11313_v35, %v13625_v24  ;;  %v3396_v8 = vadd.f32 %v13626_v56, %v3364_v46 }
 0x43b   : > { %v11327_v39 = vpop.eup %6036  ;;  %v5376_v5 = vrot.slane %v5355_v17, 4  ;;  %v5378_v4 = vrot.slane %v5352_v32, 4  ;;  %v5379_v6 = vrot.slane %v11319_v26, 4  ;;  %v5347_v41 = vsel %vm2962_vm0, %v11238_v1, %v5342_v20  ;;  %vm13632_vm0 = vmmov %vm13611_vm1 }
 0x43c   : > { %13627 = vst [vmem:[#allocation81_spill] sm:$0xff] %v11327_v39  ;;  %v5359_v21 = vmul.f32 %v11299_v48, %v5347_v41  ;;  %v5328_v16 = vsel %vm2953_vm12, %v5318_v7, %v5320_v34  ;;  %v5329_v30 = vsel %vm2953_vm12, %v5320_v34, %v5310_v57  ;;  %v5354_v11 = vmul.f32 %v11327_v39, %v13628_v14  ;;  %v5326_v54 = vpop.permute.xlu0 %5325  ;;  %vm13633_vm10 = vmmov %vm13632_vm0 }
 0x43d   : > { %v5377_v46 = vsel %vm13629_vm5, %v5375_v10, %v5376_v5  ;;  %v5380_v42 = vsel %vm13630_vm9, %v5378_v4, %v5379_v6  ;;  %v5345_v23 = vsel %vm13631_vm15, %v11234_v27, %v5328_v16  ;;  %v5346_v1 = vsel %vm2965_vm7, %v11228_v60, %v5329_v30  ;;  %vm13636_vm3 = vmmov %vm13632_vm0 }
 0x43e   : > { %v11347_v7 = vadd.f32 %v5377_v46, %v11213_v63  ;;  %v11350_v57 = vadd.f32 %v5380_v42, %v11219_v28  ;;  %v5387_v50 = vrot.slane %v5359_v21, 4  ;;  %v5357_v59 = vmul.f32 %v11313_v35, %v5345_v23  ;;  %v5324_v12 = vpop.permute.xlu1 %5323  ;;  %vm13645_vm4 = vmmov %vm13632_vm0 }
 0x43f   : > { %v5358_v32 = vmul.f32 %v11327_v39, %v5346_v1  ;;  %v5381_v17 = vrot.slane %v5353_v2, 4  ;;  %v5384_v26 = vrot.slane %v5354_v11, 4  ;;  %v5332_v27 = vsel %vm2953_vm12, %v5326_v54, %v11276_v52  ;;  %v13637_v11 = vld [vmem:[#allocation7_spill] sm:$0xff]  ;;  %vm13646_vm1 = vmmov %vm13632_vm0 }
 0x440   : > { %v5388_v60 = vsel %vm13632_vm0, %v5376_v5, %v5387_v50  ;;  %v5382_v51 = vrot.slane %v5357_v59, 4  ;;  %v5350_v63 = vsel %vm2965_vm7, %v11260_v47, %v5332_v27  ;;  %v5330_v28 = vsel %vm2953_vm12, %v5322_v36, %v5324_v12  ;;  %v11366_v2 = vpop.permute.xlu0 %5429  ;;  %vm13635_vm7 = vmmov %vm13631_vm15  ;;  %v13640_v50 = vld [vmem:[#allocation82_spill] sm:$0xff]  ;;  %v13641_v59 = vld [vmem:[#allocation128_spill] sm:$0xff] }
 0x441   : > { %v11362_v10 = vadd.f32 %v5388_v60, %v11221_v44  ;;  %v5385_v20 = vrot.slane %v5358_v32, 4  ;;  %v5362_v34 = vmul.f32 %v11327_v39, %v5350_v63  ;;  %v5331_v24 = vsel %vm2953_vm12, %v5324_v12, %v5326_v54  ;;  %vm13638_vm12 = vmmov %vm13632_vm0  ;;  %v13644_v27 = vld [vmem:[#allocation92_spill] sm:$0xff] }
 0x442   : > { %v11368_v52 = vpop.eup %6038  ;;  %v5383_v56 = vsel %vm13633_vm10, %v5381_v17, %v5382_v51  ;;  %v5348_v47 = vsel %vm13634_vm6, %v11270_v38, %v5330_v28  ;;  %v5349_v44 = vsel %vm13635_vm7, %v11273_v9, %v5331_v24  ;;  %v5428_v36 = vpop.permute.xlu1 %5427  ;;  %v3427_v9 = vadd.f32 %v13637_v11, %v3395_v31  ;;  %v13643_v31 = vld [vmem:[#allocation211_spill] sm:$0xff]  ;;  %v13651_v11 = vld [vmem:[#allocation10_spill] sm:$0xff] }
 0x443   : > { %v11377_v5 = vpop.eup %6040  ;;  %v5386_v4 = vsel %vm13636_vm3, %v5384_v26, %v5385_v20  ;;  %v11381_v41 = vadd.f32 %v5383_v56, %v11279_v61  ;;  %v5393_v21 = vrot.slane %v5362_v34, 4  ;;  %v5360_v16 = vmul.f32 %v11303_v33, %v5348_v47  ;;  %v13639_v61 = vld [vmem:[#allocation77_spill] sm:$0xff]  ;;  %v13648_v56 = vld [vmem:[#allocation184_spill] sm:$0xff] }
 0x444   : > { %v11384_v30 = vpop.eup %6042  ;;  %v11387_v14 = vadd.f32 %v5386_v4, %v11289_v0  ;;  %v5361_v38 = vmul.f32 %v11313_v35, %v5349_v44  ;;  %v5434_v1 = vpop.permute.xlu0 %5433  ;;  %v3428_v54 = vadd.f32 %v13639_v61, %v3396_v8  ;;  %v3333_v12 = vadd.f32 %v13641_v59, %v13640_v50  ;;  %v13649_v4 = vld [vmem:[#allocation63_spill] sm:$0xff]  ;;  %v13654_v61 = vld [vmem:[#allocation180_spill] sm:$0xff] }
 0x445   : > { %v11391_v46 = vpop.eup %6044  ;;  %v5394_v42 = vsel %vm13638_vm12, %v5385_v20, %v5393_v21  ;;  %v5389_v23 = vrot.slane %v5360_v16, 4  ;;  %vm13642_vm14 = vcmask 998400   ;;  %v3334_v60 = vadd.f32 %v13644_v27, %v13643_v31  ;;  %v13647_v20 = vld [vmem:[#allocation183_spill] sm:$0xff]  ;;  %v13650_v16 = vld [vmem:[#allocation104_spill] sm:$0xff] }
 0x446   : > { %v11398_v32 = vadd.f32 %v5394_v42, %v11295_v62  ;;  %v5391_v0 = vrot.slane %v5361_v38, 4  ;;  %v11401_v17 = vsel %vm13642_vm14, %v5434_v1, %v5428_v36  ;;  %v5432_v26 = vpop.permute.xlu1 %5431  ;;  %v3459_v34 = vadd.f32 %v13647_v20, %v3427_v9  ;;  %v13652_v42 = vld [vmem:[#allocation203_spill] sm:$0xff]  ;;  %vm13670_vm2 = vmmov %vm13642_vm14 }
 0x447   : > { %v5390_v63 = vsel %vm13645_vm4, %v5379_v6, %v5389_v23  ;;  %v3460_v47 = vadd.f32 %v13648_v56, %v3428_v54  ;;  %v3365_v38 = vadd.f32 %v13650_v16, %v3333_v12  ;;  %v3366_v6 = vadd.f32 %v13651_v11, %v3334_v60  ;;  %v13653_v23 = vld [vmem:[#allocation140_spill] sm:$0xff]  ;;  %v13655_v9 = vld [vmem:[#allocation155_spill] sm:$0xff]  ;;  %v13659_v60 = vld [vmem:[#allocation54_spill] sm:$0xff] }
 0x448   : > { %v5392_v28 = vsel %vm13646_vm1, %v5382_v51, %v5391_v0  ;;  %v11408_v8 = vadd.f32 %v5390_v63, %v11257_v15  ;;  %v5438_v24 = vpop.permute.xlu0 %5437  ;;  %v3491_v21 = vadd.f32 %v13649_v4, %v3459_v34  ;;  %v13656_v0 = vld [vmem:[#allocation38_spill] sm:$0xff]  ;;  %v13657_v54 = vld [vmem:[#allocation136_spill] sm:$0xff]  ;;  %v13658_v63 = vld [vmem:[#allocation163_spill] sm:$0xff]  ;;  %v11431_v20 = vmul.f32 %v11377_v5, %v13659_v60 }
 0x449   : > { %v11412_v62 = vadd.f32 %v5392_v28, %v11284_v25  ;;  %v3492_v51 = vadd.f32 %v13652_v42, %v3460_v47  ;;  %v3397_v50 = vadd.f32 %v13654_v61, %v3365_v38  ;;  %v3398_v59 = vadd.f32 %v13655_v9, %v3366_v6  ;;  %v13660_v34 = vld [vmem:[#allocation208_spill] sm:$0xff]  ;;  %v13663_v38 = vld [vmem:[#allocation62_spill] sm:$0xff]  ;;  %vm13675_vm11 = vmmov %vm13670_vm2 }
 0x44a   : > { %v5436_v44 = vpop.permute.xlu1 %5435  ;;  %v3523_v15 = vadd.f32 %v13653_v23, %v3491_v21  ;;  %v11424_v31 = vmul.f32 %v11368_v52, %v13656_v0  ;;  %v5564_v12 = vsub.f32 %v13658_v63, %v13537_v49  ;;  %v13661_v47 = vld [vmem:[#allocation132_spill] sm:$0xff]  ;;  %v13662_v21 = vld [vmem:[#allocation34_spill] sm:$0xff]  ;;  %v11438_v11 = vmul.f32 %v11384_v30, %v13663_v38  ;;  %vm13676_vm13 = vmmov %vm13670_vm2 }
 0x44b   : > { %v3524_v27 = vadd.f32 %v13657_v54, %v3492_v51  ;;  %v3429_v4 = vadd.f32 %v13661_v47, %v3397_v50  ;;  %v3430_v16 = vadd.f32 %v13662_v21, %v3398_v59  ;;  %v13664_v6 = vld [vmem:[#allocation130_spill] sm:$0xff]  ;;  %v13665_v51 = vld [vmem:[#allocation191_spill] sm:$0xff]  ;;  %v13667_v9 = vld [vmem:[#allocation12_spill] sm:$0xff]  ;;  %v5443_v59 = vsel %vm13670_vm2, %v5428_v36, %v11366_v2 }
 0x44c   : > { %v5442_v25 = vpop.permute.xlu0 %5441  ;;  %v3675_v56 = vadd.f32 %v13660_v34, %v3523_v15  ;;  %v5565_v49 = vsub.f32 %v13665_v51, %v13544_v13  ;;  %v13666_v23 = vld [vmem:[#allocation118_spill] sm:$0xff]  ;;  %v13668_v15 = vld [vmem:[#allocation215_spill] sm:$0xff]  ;;  %v13669_v50 = vld [vmem:[#allocation216_spill] sm:$0xff]  ;;  %v5569_v13 = vmul.f32 1.442695, %v5564_v12  ;;  %v5530_v38 = vrot.slane %v11431_v20, 4 }
 0x44d   : > { %v3676_v42 = vadd.f32 %v13664_v6, %v3524_v27  ;;  %v11445_v61 = vmul.f32 %v11391_v46, %v13666_v23  ;;  %v3461_v54 = vadd.f32 %v13668_v15, %v3429_v4  ;;  %v3462_v63 = vadd.f32 %v13669_v50, %v3430_v16  ;;  %v13671_v34 = vld [vmem:[#allocation122_spill] sm:$0xff]  ;;  %v13672_v6 = vld [vmem:[#allocation152_spill] sm:$0xff]  ;;  %v13674_v4 = vld [vmem:[#allocation217_spill] sm:$0xff] }
 0x44e   : > { %v5440_v28 = vpop.permute.xlu1 %5439  ;;  %v3827_v0 = vadd.f32 %v13667_v9, %v3675_v56  ;;  %v5527_v27 = vrot.slane %v11424_v31, 4  ;;  %v13673_v56 = vld [vmem:[#allocation169_spill] sm:$0xff]  ;;  %v5444_v16 = vsel %vm13675_vm11, %v11366_v2, %v5432_v26  ;;  %v5445_v36 = vsel %vm13676_vm13, %v5432_v26, %v5434_v1  ;;  %v13677_v31 = vld [vmem:[#allocation98_spill] sm:$0xff]  ;;  %vm13681_vm8 = vmmov %vm13670_vm2 }
 0x44f   : > { %v3828_v47 = vadd.f32 %v13671_v34, %v3676_v42  ;;  %v3493_v23 = vadd.f32 %v13673_v56, %v3461_v54  ;;  %v3494_v9 = vadd.f32 %v13674_v4, %v3462_v63  ;;  %v5533_v15 = vrot.slane %v11438_v11, 4  ;;  %v13678_v42 = vld [vmem:[#allocation100_spill] sm:$0xff]  ;;  %v13679_v20 = vld [vmem:[#allocation170_spill] sm:$0xff]  ;;  %v13682_v56 = vld [vmem:[#allocation147_spill] sm:$0xff] }
 0x450   : > { %v11452_v60 = vpop.permute.xlu0 %5463  ;;  %v3979_v51 = vadd.f32 %v13672_v6, %v3827_v0  ;;  %v13680_v0 = vld [vmem:[#allocation201_spill] sm:$0xff]  ;;  %v5446_v54 = vsel %vm13681_vm8, %v5436_v44, %v5438_v24  ;;  %6046 = vpow2.f32 %v5569_v13  ;;  %v11471_v2 = vmul.f32 1.442695, %v5565_v49  ;;  %vm13683_vm5 = vmmov %vm13670_vm2  ;;  %v13684_v11 = vld [vmem:[#allocation95_spill] sm:$0xff] }
 0x451   : > { %v3980_v50 = vadd.f32 %v13677_v31, %v3828_v47  ;;  %v3525_v39 = vadd.f32 %v13679_v20, %v3493_v23  ;;  %v3526_v6 = vadd.f32 %v13680_v0, %v3494_v9  ;;  %v5460_v1 = vsel %vm13683_vm5, %v5442_v25, %v5436_v44  ;;  %v13685_v31 = vld [vmem:[#allocation91_spill] sm:$0xff]  ;;  %vm13687_vm9 = vmmov %vm13670_vm2  ;;  %v13690_v0 = vld [vmem:[#allocation72_spill] sm:$0xff] }
 0x452   : > { %v5462_v21 = vpop.permute.xlu1 %5461  ;;  %v4131_v34 = vadd.f32 %v13678_v42, %v3979_v51  ;;  %v13686_v51 = vld [vmem:[#allocation89_spill] sm:$0xff]  ;;  %v5447_v23 = vsel %vm13687_vm9, %v5438_v24, %v5440_v28  ;;  %vm13688_vm15 = vcmask 15360   ;;  %vm13691_vm10 = vcmp.lt.s32.totalorder %v13541_v22, 2  ;;  %v13693_v13 = vld [vmem:[#allocation111_spill] sm:$0xff]  ;;  %vm13695_vm7 = vmmov %vm13670_vm2 }
 0x453   : > { %v4132_v4 = vadd.f32 %v13682_v56, %v3980_v50  ;;  %v3677_v12 = vadd.f32 %v13685_v31, %v3525_v39  ;;  %v3678_v42 = vadd.f32 %v13686_v51, %v3526_v6  ;;  %vm13689_vm0 = vmmov %vm13688_vm15  ;;  %vm13692_vm6 = vcmp.lt.s32.totalorder %v13431_v40, 2  ;;  %v13694_v56 = vld [vmem:[#allocation76_spill] sm:$0xff] }
 0x454   : > { %v5470_v63 = vpop.permute.xlu0 %5469  ;;  %v4283_v47 = vadd.f32 %v13684_v11, %v4131_v34  ;;  %v5448_v6 = vsel %vm13695_vm7, %v5440_v28, %v5442_v25  ;;  %vm13697_vm3 = vmmov %vm13689_vm0  ;;  %vm13704_vm1 = vcmp.lt.s32.totalorder %v13443_v37, 2  ;;  %vm13706_vm2 = vcmask 1043456  }
 0x455   : > { %v4284_v50 = vadd.f32 %v13690_v0, %v4132_v4  ;;  %v3829_v39 = vadd.f32 %v13694_v56, %v3677_v12  ;;  %vm13701_vm12 = vmmov %vm13691_vm10  ;;  %vm13708_vm13 = vcmp.lt.s32.totalorder %v13445_v58, 2  ;;  %6048 = vpow2.f32 %v11471_v2 }
 0x456   : > { %v5468_v26 = vpop.permute.xlu1 %5467  ;;  %v4435_v34 = vadd.f32 %v13693_v13, %v4283_v47  ;;  %v13700_v47 = vld [vmem:[#allocation15_spill] sm:$0xff]  ;;  %vm13702_vm14 = vmmov %vm13689_vm0 }
 0x457   : > { %v5479_v9 = vsel %vm13688_vm15, %v5468_v26, %v5470_v63  ;;  %v5493_v20 = vsel %vm13689_vm0, %v5462_v21, %v5468_v26  ;;  %v13696_v26 = vld [vmem:[#allocation105_spill] sm:$0xff]  ;;  %v3981_v13 = vadd.f32 %v13700_v47, %v3829_v39  ;;  %vm13703_vm4 = vmmov %vm13689_vm0 }
 0x458   : > { %v5495_v49 = vsel %vm13691_vm10, %v5443_v59, %v5493_v20  ;;  %v5496_v44 = vsel %vm13692_vm6, %v5444_v16, %v5479_v9  ;;  %v5474_v31 = vpop.permute.xlu0 %5473  ;;  %v4436_v51 = vadd.f32 %v13696_v26, %v4284_v50  ;;  %v13698_v20 = vld [vmem:[#allocation84_spill] sm:$0xff]  ;;  %v13699_v16 = vld [vmem:[#allocation90_spill] sm:$0xff]  ;;  %vm13707_vm11 = vmmov %vm13706_vm2 }
 0x459   : > { %v5507_v24 = vmul.f32 %v11368_v52, %v5495_v49  ;;  %v5508_v11 = vmul.f32 %v11377_v5, %v5496_v44  ;;  %v5494_v4 = vsel %vm13697_vm3, %v11452_v60, %v5474_v31  ;;  %v4587_v0 = vadd.f32 %v13698_v20, %v4435_v34  ;;  %v13705_v26 = vld [vmem:[#allocation20_spill] sm:$0xff]  ;;  %vm13709_vm8 = vmmov %vm13689_vm0 }
 0x45a   : > { %v5472_v59 = vpop.permute.xlu1 %5471  ;;  %v3830_v9 = vadd.f32 %v13699_v16, %v3678_v42  ;;  %v5499_v25 = vsel %vm13701_vm12, %v5446_v54, %v5494_v4  ;;  %v4588_v34 = vadd.f32 %v13705_v26, %v4436_v51  ;;  %vm13710_vm5 = vmmov %vm13689_vm0  ;;  %v13719_v26 = vld [vmem:[#allocation143_spill] sm:$0xff] }
 0x45b   : > { %v5528_v12 = vrot.slane %v5507_v24, 4  ;;  %v5531_v56 = vrot.slane %v5508_v11, 4  ;;  %v5480_v28 = vsel %vm13702_vm14, %v5470_v63, %v5472_v59  ;;  %v5511_v49 = vmul.f32 %v11368_v52, %v5499_v25  ;;  %vm13711_vm9 = vmmov %vm13689_vm0 }
 0x45c   : > { %v5481_v50 = vsel %vm13703_vm4, %v5472_v59, %v5462_v21  ;;  %v5497_v44 = vsel %vm13704_vm1, %v5445_v36, %v5480_v28  ;;  %v5478_v63 = vpop.permute.xlu0 %5477  ;;  %vm13712_vm15 = vmmov %vm13706_vm2 }
 0x45d   : > { %v5529_v42 = vsel %vm13706_vm2, %v5527_v27, %v5528_v12  ;;  %v5532_v39 = vsel %vm13707_vm11, %v5530_v38, %v5531_v56  ;;  %v5498_v24 = vsel %vm13708_vm13, %v11401_v17, %v5481_v50  ;;  %v5509_v54 = vmul.f32 %v11384_v30, %v5497_v44  ;;  %vm13713_vm0 = vmmov %vm13708_vm13 }
 0x45e   : > { %v11511_v11 = vadd.f32 %v5529_v42, %v11347_v7  ;;  %v11514_v21 = vadd.f32 %v5532_v39, %v11350_v57  ;;  %v5539_v36 = vrot.slane %v5511_v49, 4  ;;  %v5510_v51 = vmul.f32 %v11391_v46, %v5498_v24  ;;  %v5476_v4 = vpop.permute.xlu1 %5475  ;;  %vm13714_vm10 = vmmov %vm13692_vm6 }
 0x45f   : > { %v5534_v27 = vrot.slane %v5509_v54, 4  ;;  %v5484_v38 = vsel %vm13709_vm8, %v5478_v63, %v11452_v60  ;;  %v5482_v59 = vsel %vm13710_vm5, %v5474_v31, %v5476_v4  ;;  %v5483_v17 = vsel %vm13711_vm9, %v5476_v4, %v5478_v63  ;;  %vm13715_vm6 = vmmov %vm13706_vm2  ;;  %v13720_v54 = vld [vmem:[#allocation174_spill] sm:$0xff]  ;;  %v13722_v4 = vld [vmem:[#allocation69_spill] sm:$0xff] }
 0x460   : > { %v5540_v20 = vsel %vm13712_vm15, %v5528_v12, %v5539_v36  ;;  %v5537_v16 = vrot.slane %v5510_v51, 4  ;;  %v5502_v7 = vsel %vm13713_vm0, %v5460_v1, %v5484_v38  ;;  %v5500_v57 = vsel %vm13714_vm10, %v5447_v23, %v5482_v59  ;;  %vm13716_vm7 = vmmov %vm13704_vm1  ;;  %v11533_v28 = vpop.permute.xlu0 %5581  ;;  %v11535_v12 = vpop.eup %6046 }
 0x461   : > { %v11527_v47 = vadd.f32 %v5540_v20, %v11362_v10  ;;  %v5535_v25 = vsel %vm13715_vm6, %v5533_v15, %v5534_v27  ;;  %v5514_v60 = vmul.f32 %v11391_v46, %v5502_v7  ;;  %v5501_v31 = vsel %vm13716_vm7, %v5448_v6, %v5483_v17  ;;  %vm13718_vm3 = vmmov %vm13706_vm2  ;;  %v13726_v20 = vld [vmem:[#allocation212_spill] sm:$0xff]  ;;  %v13728_v7 = vld [vmem:[#allocation11_spill] sm:$0xff] }
 0x462   : > { %v13717_v49 = vrot.slane %v11445_v61, 4  ;;  %v11541_v23 = vadd.f32 %v5535_v25, %v11381_v41  ;;  %v5512_v10 = vmul.f32 %v11377_v5, %v5500_v57  ;;  %v5513_v15 = vmul.f32 %v11384_v30, %v5501_v31  ;;  %v5580_v50 = vpop.permute.xlu1 %5579  ;;  %vm13721_vm12 = vmmov %vm13706_vm2  ;;  %v13730_v31 = vld [vmem:[#allocation113_spill] sm:$0xff] }
 0x463   : > { %v5545_v6 = vrot.slane %v5514_v60, 4  ;;  %v4663_v42 = vadd.f32 %v13719_v26, %v4587_v0  ;;  %v4664_v24 = vadd.f32 %v10757_v19, %v4588_v34  ;;  %v3982_v41 = vadd.f32 %v13720_v54, %v3830_v9  ;;  %vm13723_vm14 = vmmov %vm13706_vm2  ;;  %v13725_v9 = vld [vmem:[#allocation202_spill] sm:$0xff]  ;;  %v13733_v26 = vld [vmem:[#allocation88_spill] sm:$0xff] }
 0x464   : > { %v5538_v1 = vsel %vm13718_vm3, %v13717_v49, %v5537_v16  ;;  %v5541_v39 = vrot.slane %v5512_v10, 4  ;;  %v5543_v61 = vrot.slane %v5513_v15, 4  ;;  %v5586_v36 = vpop.permute.xlu0 %5585  ;;  %v4133_v38 = vadd.f32 %v13722_v4, %v3981_v13  ;;  %vm13724_vm4 = vmmov %vm13706_vm2  ;;  %v13731_v49 = vld [vmem:[#allocation126_spill] sm:$0xff]  ;;  %v13732_v15 = vld [vmem:[#allocation165_spill] sm:$0xff]  ;;  %v11582_v4 = vpop.eup %6048 }
 0x465   : > { %v11546_v44 = vadd.f32 %v5538_v1, %v11387_v14  ;;  %v5546_v63 = vsel %vm13721_vm12, %v5537_v16, %v5545_v6  ;;  %v4815_v51 = vadd.f32 %v10836_v18, %v4663_v42  ;;  %v4816_v34 = vadd.f32 %v13725_v9, %v4664_v24  ;;  %v13727_v16 = vld [vmem:[#allocation102_spill] sm:$0xff] }
 0x466   : > { %v11556_v14 = vadd.f32 %v5546_v63, %v11398_v32  ;;  %v5542_v0 = vsel %vm13723_vm14, %v5531_v56, %v5541_v39  ;;  %v5544_v2 = vsel %vm13724_vm4, %v5534_v27, %v5543_v61  ;;  %v5584_v59 = vpop.permute.xlu1 %5583  ;;  %v4134_v13 = vadd.f32 %v13727_v16, %v3982_v41  ;;  %v13729_v56 = vld [vmem:[#allocation213_spill] sm:$0xff]  ;;  %v13734_v41 = vld [vmem:[#allocation166_spill] sm:$0xff] }
 0x467   : > { %v11561_v17 = vadd.f32 %v5542_v0, %v11408_v8  ;;  %v11564_v19 = vadd.f32 %v5544_v2, %v11412_v62  ;;  %v4967_v18 = vadd.f32 %v13726_v20, %v4815_v51  ;;  %v4285_v32 = vadd.f32 %v13728_v7, %v4133_v38  ;;  %v13735_v63 = vld [vmem:[#allocation173_spill] sm:$0xff]  ;;  %v13736_v38 = vld [vmem:[#allocation87_spill] sm:$0xff]  ;;  %v13739_v20 = vld [vmem:[#allocation204_spill] sm:$0xff] }
 0x468   : > { %v5590_v57 = vpop.permute.xlu0 %5589  ;;  %v4968_v60 = vadd.f32 %v13729_v56, %v4816_v34  ;;  %v4286_v8 = vadd.f32 %v13730_v31, %v4134_v13  ;;  %v13737_v0 = vld [vmem:[#allocation25_spill] sm:$0xff]  ;;  %v13738_v34 = vld [vmem:[#allocation124_spill] sm:$0xff]  ;;  %v13740_v13 = vld [vmem:[#allocation210_spill] sm:$0xff]  ;;  %vm13744_vm1 = vcmask 990208   ;;  %vm13748_vm8 = vcmask 7168  }
 0x469   : > { %v5119_v27 = vadd.f32 %v11171_v55, %v4967_v18  ;;  %v4437_v1 = vadd.f32 %v13731_v49, %v4285_v32  ;;  %v13741_v32 = vld [vmem:[#allocation68_spill] sm:$0xff]  ;;  %vm13745_vm2 = vmmov %vm13744_vm1  ;;  %vm13751_vm15 = vcmp.lt.s32.totalorder %v13541_v22, 1  ;;  %vm13752_vm0 = vcmp.lt.s32.totalorder %v13431_v40, 1 }
 0x46a   : > { %v5588_v25 = vpop.permute.xlu1 %5587  ;;  %v5120_v62 = vadd.f32 %v11180_v53, %v4968_v60  ;;  %v4438_v6 = vadd.f32 %v13732_v15, %v4286_v8  ;;  %v11602_v56 = vmul.f32 %v11582_v4, %v13741_v32  ;;  %v13742_v60 = vld [vmem:[#allocation26_spill] sm:$0xff]  ;;  %v13743_v8 = vld [vmem:[#allocation199_spill] sm:$0xff]  ;;  %vm13746_vm11 = vmmov %vm13744_vm1 }
 0x46b   : > { %v5271_v10 = vadd.f32 %v11299_v48, %v5119_v27  ;;  %v4589_v42 = vadd.f32 %v13733_v26, %v4437_v1  ;;  %v5679_v27 = vrot.slane %v13742_v60, 4  ;;  %v5688_v49 = vrot.slane %v13743_v8, 4  ;;  %vm13747_vm13 = vmmov %vm13744_vm1 }
 0x46c   : > { %v5594_v39 = vpop.permute.xlu0 %5593  ;;  %v5272_v24 = vadd.f32 %v11303_v33, %v5120_v62  ;;  %v4590_v55 = vadd.f32 %v13734_v41, %v4438_v6  ;;  %v5656_v33 = vmul.f32 %v11535_v12, %v13738_v34  ;;  %v5595_v1 = vsel %vm13744_vm1, %v5580_v50, %v11533_v28  ;;  %vm13749_vm5 = vmmov %vm13748_vm8 }
 0x46d   : > { %v5423_v54 = vadd.f32 %v11368_v52, %v5271_v10  ;;  %v4665_v51 = vadd.f32 %v13735_v63, %v4589_v42  ;;  %v5596_v6 = vsel %vm13746_vm11, %v11533_v28, %v5584_v59  ;;  %v5597_v26 = vsel %vm13747_vm13, %v5584_v59, %v5586_v36  ;;  %vm13750_vm9 = vmmov %vm13744_vm1 }
 0x46e   : > { %v5592_v61 = vpop.permute.xlu1 %5591  ;;  %v5424_v53 = vadd.f32 %v11377_v5, %v5272_v24  ;;  %v4666_v2 = vadd.f32 %v13737_v0, %v4590_v55  ;;  %v5682_v10 = vrot.slane %v5656_v33, 4  ;;  %v5685_v55 = vrot.slane %v11602_v56, 4  ;;  %vm13754_vm10 = vmmov %vm13744_vm1 }
 0x46f   : > { %v11586_v48 = vadd.f32 %v13736_v38, %v5423_v54  ;;  %v4817_v52 = vadd.f32 %v13739_v20, %v4665_v51  ;;  %vm13755_vm6 = vmmov %vm13744_vm1  ;;  %vm13764_vm11 = vcmp.lt.s32.totalorder %v13443_v37, 1  ;;  %vm13765_vm13 = vcmp.lt.s32.totalorder %v13445_v58, 1 }
 0x470   : > { %v11589_v9 = vpop.permute.xlu0 %5615  ;;  %v11595_v16 = vadd.f32 %v11535_v12, %v5424_v53  ;;  %v4818_v5 = vadd.f32 %v13740_v13, %v4666_v2  ;;  %v5599_v0 = vsel %vm13755_vm6, %v5590_v57, %v5592_v61  ;;  %vm13756_vm7 = vmmov %vm13744_vm1  ;;  %vm13762_vm1 = vcmask 1043456  }
 0x471   : > { %6050 = vrcp.f32 %v11586_v48  ;;  %v4969_v7 = vadd.f32 %v11126_v43, %v4817_v52  ;;  %v5611_v43 = vsel %vm13745_vm2, %v5586_v36, %v5580_v50  ;;  %v13753_v36 = vld [vmem:[#allocation81_spill] sm:$0xff]  ;;  %v5600_v2 = vsel %vm13756_vm7, %v5592_v61, %v5594_v39  ;;  %vm13757_vm3 = vmmov %vm13749_vm5 }
 0x472   : > { %v5614_v18 = vpop.permute.xlu1 %5613  ;;  %6052 = vrcp.f32 %v11595_v16  ;;  %v4970_v31 = vadd.f32 %v11132_v45, %v4818_v5  ;;  %vm13758_vm12 = vmmov %vm13751_vm15  ;;  %vm13773_vm7 = vcmp.lt.s32.totalorder %v13431_v40, 1 }
 0x473   : > { %v5121_v15 = vadd.f32 %v11241_v3, %v4969_v7  ;;  %v5598_v3 = vsel %vm13750_vm9, %v5588_v25, %v5590_v57  ;;  %v13759_v57 = vld [vmem:[#allocation23_spill] sm:$0xff]  ;;  %vm13760_vm14 = vmmov %vm13757_vm3 }
 0x474   : > { %v5622_v62 = vpop.permute.xlu0 %5621  ;;  %v5122_v24 = vadd.f32 %v11255_v29, %v4970_v31  ;;  %v5612_v29 = vsel %vm13754_vm10, %v5594_v39, %v5588_v25  ;;  %vm13761_vm4 = vmmov %vm13757_vm3 }
 0x475   : > { %v5273_v41 = vadd.f32 %v11313_v35, %v5121_v15  ;;  %vm13763_vm2 = vmmov %vm13762_vm1 }
 0x476   : > { %v5620_v42 = vpop.permute.xlu1 %5619  ;;  %v5274_v59 = vadd.f32 %v13753_v36, %v5122_v24  ;;  %vm13768_vm9 = vmmov %vm13762_vm1 }
 0x477   : > { %v5631_v45 = vsel %vm13748_vm8, %v5620_v42, %v5622_v62  ;;  %v5645_v54 = vsel %vm13749_vm5, %v5614_v18, %v5620_v42  ;;  %v5425_v53 = vadd.f32 %v11384_v30, %v5273_v41  ;;  %vm13766_vm8 = vmmov %vm13757_vm3 }
 0x478   : > { %v5647_v50 = vsel %vm13751_vm15, %v5595_v1, %v5645_v54  ;;  %v5648_v28 = vsel %vm13752_vm0, %v5596_v6, %v5631_v45  ;;  %v5626_v35 = vpop.permute.xlu0 %5625  ;;  %v5426_v20 = vadd.f32 %v11391_v46, %v5274_v59  ;;  %vm13767_vm5 = vmmov %vm13757_vm3 }
 0x479   : > { %v5659_v63 = vmul.f32 %v13736_v38, %v5647_v50  ;;  %v11629_v51 = vmul.f32 %v11535_v12, %v5648_v28  ;;  %v5646_v34 = vsel %vm13757_vm3, %v11589_v9, %v5626_v35  ;;  %v11641_v5 = vadd.f32 %v11582_v4, %v5425_v53  ;;  %vm13769_vm15 = vmmov %vm13765_vm13 }
 0x47a   : > { %v5624_v33 = vpop.permute.xlu1 %5623  ;;  %v5651_v13 = vsel %vm13758_vm12, %v5598_v3, %v5646_v34  ;;  %v11645_v7 = vadd.f32 %v13759_v57, %v5426_v20  ;;  %vm13770_vm0 = vmmov %vm13757_vm3  ;;  %v6058_v34 = vld [vmem:[%s6184_s7] sm:$0xff] }
 0x47b   : > { %v5680_v52 = vrot.slane %v5659_v63, 4  ;;  %v5683_v25 = vrot.slane %v11629_v51, 4  ;;  %v5663_v30 = vmul.f32 %v13736_v38, %v5651_v13  ;;  %v5632_v39 = vsel %vm13760_vm14, %v5622_v62, %v5624_v33  ;;  %vm13771_vm10 = vmmov %vm13762_vm1  ;;  %v6059_v20 = vld [vmem:[%s6184_s7 + $0x20] sm:$0xff] }
 0x47c   : > { %v5633_v61 = vsel %vm13761_vm4, %v5624_v33, %v5614_v18  ;;  %v5649_v22 = vsel %vm13764_vm11, %v5597_v26, %v5632_v39  ;;  %v5630_v38 = vpop.permute.xlu0 %5629  ;;  %6054 = vrcp.f32 %v11641_v5  ;;  %vm13772_vm6 = vmmov %vm13762_vm1  ;;  %v6060_v39 = vld [vmem:[%s6184_s7 + $0x8] sm:$0xff] }
 0x47d   : > { %v5681_v46 = vsel %vm13762_vm1, %v5679_v27, %v5680_v52  ;;  %v5684_v32 = vsel %vm13763_vm2, %v5682_v10, %v5683_v25  ;;  %v5650_v56 = vsel %vm13765_vm13, %v5611_v43, %v5633_v61  ;;  %v5691_v1 = vrot.slane %v5663_v30, 4  ;;  %vm13774_vm3 = vmmov %vm13764_vm11 }
 0x47e   : > { %v5707_v60 = vadd.f32 %v5681_v46, %v11511_v11  ;;  %v5708_v31 = vadd.f32 %v5684_v32, %v11514_v21  ;;  %v5661_v18 = vmul.f32 %v11582_v4, %v5649_v22  ;;  %v5628_v62 = vpop.permute.xlu1 %5627  ;;  %v6051_v15 = vpop.eup %6050  ;;  %v5662_v27 = vmul.f32 %v13759_v57, %v5650_v56  ;;  %vm13775_vm12 = vmmov %vm13762_vm1 }
 0x47f   : > { %v5636_v10 = vsel %vm13766_vm8, %v5630_v38, %v11589_v9  ;;  %v5634_v6 = vsel %vm13767_vm5, %v5626_v35, %v5628_v62  ;;  %v5719_v43 = vmul.f32 %v6051_v15, %v11586_v48  ;;  %v5692_v11 = vsel %vm13768_vm9, %v5680_v52, %v5691_v1  ;;  %v6053_v21 = vpop.eup %6052  ;;  %vm13777_vm14 = vmmov %vm13762_vm1 }
 0x480   : > { %v5686_v26 = vrot.slane %v5661_v18, 4  ;;  %6056 = vrcp.f32 %v11645_v7  ;;  %v5711_v42 = vadd.f32 %v5692_v11, %v11527_v47  ;;  %v5689_v24 = vrot.slane %v5662_v27, 4  ;;  %vm13778_vm4 = vmmov %vm13762_vm1 }
 0x481   : > { %v5654_v45 = vsel %vm13769_vm15, %v5612_v29, %v5636_v10  ;;  %v5635_v54 = vsel %vm13770_vm0, %v5628_v62, %v5630_v38  ;;  %v5720_v9 = vmul.f32 %v6053_v21, %v11595_v16  ;;  %v5723_v41 = vsub.f32 2.0, %v5719_v43  ;;  %v6062_v43 = vld [vmem:[%s6184_s7 + $0x10] sm:$0xff] }
 0x482   : > { %v5687_v48 = vsel %vm13771_vm10, %v5685_v55, %v5686_v26  ;;  %v5666_v3 = vmul.f32 %v13759_v57, %v5654_v45  ;;  %v5690_v50 = vsel %vm13772_vm6, %v5688_v49, %v5689_v24  ;;  %v5652_v28 = vsel %vm13773_vm7, %v5599_v0, %v5634_v6  ;;  %v6065_v45 = vld [vmem:[%s6184_s7 + $0x38] sm:$0xff] }
 0x483   : > { %v5709_v47 = vadd.f32 %v5687_v48, %v11541_v23  ;;  %v5653_v58 = vsel %vm13774_vm3, %v5600_v2, %v5635_v54  ;;  %v5724_v36 = vsub.f32 2.0, %v5720_v9  ;;  %v5727_v59 = vmul.f32 %v6051_v15, %v5723_v41 }
 0x484   : > { %v5710_v16 = vadd.f32 %v5690_v50, %v11546_v44  ;;  %v5697_v55 = vrot.slane %v5666_v3, 4  ;;  %v5740_v29 = vstv %s11649_s28  ;;  %v5664_v63 = vmul.f32 %v11535_v12, %v5652_v28 }
 0x485   : > { %v5665_v8 = vmul.f32 %v11582_v4, %v5653_v58  ;;  %v5728_v49 = vmul.f32 %v6053_v21, %v5724_v36  ;;  %v5732_v23 = vmul.f32 %v5727_v59, %v5707_v60  ;;  %v5736_v40 = vmul.f32 %v5727_v59, %v5711_v42  ;;  %v6064_v42 = vld [vmem:[%s6184_s7 + $0x18] sm:$0xff] }
 0x486   : > { %v5698_v51 = vsel %vm13775_vm12, %v5689_v24, %v5697_v55  ;;  %v5693_v35 = vrot.slane %v5664_v63, 4 }
 0x487   : > { %v5714_v37 = vadd.f32 %v5698_v51, %v11556_v14  ;;  %v5695_v53 = vrot.slane %v5665_v8, 4  ;;  %v5733_v0 = vmul.f32 %v5728_v49, %v5708_v31  ;;  %v5741_v44 = vmul.f32 %v5740_v29, %v5732_v23 }
 0x488   : > { %v5745_v2 = vmul.f32 %v5740_v29, %v5736_v40  ;;  %v5694_v12 = vsel %vm13777_vm14, %v5683_v25, %v5693_v35 }
 0x489   : > { %v5696_v4 = vsel %vm13778_vm4, %v5686_v26, %v5695_v53  ;;  %v5742_v14 = vmul.f32 %v5740_v29, %v5733_v0  ;;  %v5749_v33 = vadd.f32 %v6058_v34, %v5741_v44  ;;  %v5712_v13 = vadd.f32 %v5694_v12, %v11561_v17  ;;  %v6055_v57 = vpop.eup %6054  ;;  %v6061_v17 = vld [vmem:[%s6184_s7 + $0x28] sm:$0xff]  ;;  %v6063_v26 = vld [vmem:[%s6184_s7 + $0x30] sm:$0xff] }
 0x48a   : > { %v5753_v52 = vadd.f32 %v6059_v20, %v5745_v2  ;;  %v5713_v30 = vadd.f32 %v5696_v4, %v11564_v19  ;;  %v5721_v32 = vmul.f32 %v6055_v57, %v11641_v5 }
 0x48b   : > { %v5750_v61 = vadd.f32 %v6060_v39, %v5742_v14  ;;  %5757 = vst [vmem:[%s11694_s15] sm:$0xff] %v5749_v33  ;;  %v5737_v25 = vmul.f32 %v5728_v49, %v5712_v13 }
 0x48c   : > { %5761 = vst [vmem:[%s11694_s15 + $0x20] sm:$0xff] %v5753_v52  ;;  %v5725_v38 = vsub.f32 2.0, %v5721_v32 }
 0x48d   : > { %v6057_v46 = vpop.eup %6056  ;;  %5758 = vst [vmem:[%s11694_s15 + $0x8] sm:$0xff] %v5750_v61  ;;  %v5746_v56 = vmul.f32 %v5740_v29, %v5737_v25 }
 0x48e   : > { %v5722_v22 = vmul.f32 %v6057_v46, %v11645_v7  ;;  %v5729_v31 = vmul.f32 %v6055_v57, %v5725_v38 }
 0x48f   : > { %v5754_v19 = vadd.f32 %v6061_v17, %v5746_v56 }
 0x490   : > { %v5726_v60 = vsub.f32 2.0, %v5722_v22  ;;  %v5734_v18 = vmul.f32 %v5729_v31, %v5709_v47  ;;  %v5738_v62 = vmul.f32 %v5729_v31, %v5713_v30 }
 0x491   : > { %5762 = vst [vmem:[%s11694_s15 + $0x28] sm:$0xff] %v5754_v19 }
 0x492   : > { %v5730_v1 = vmul.f32 %v6057_v46, %v5726_v60  ;;  %v5743_v7 = vmul.f32 %v5740_v29, %v5734_v18  ;;  %v5747_v27 = vmul.f32 %v5740_v29, %v5738_v62 }
 0x494   : > { %v5735_v5 = vmul.f32 %v5730_v1, %v5710_v16  ;;  %v5739_v15 = vmul.f32 %v5730_v1, %v5714_v37  ;;  %v5751_v11 = vadd.f32 %v6062_v43, %v5743_v7  ;;  %v5755_v21 = vadd.f32 %v6063_v26, %v5747_v27 }
 0x496   : > { %v5744_v10 = vmul.f32 %v5740_v29, %v5735_v5  ;;  %v5748_v6 = vmul.f32 %v5740_v29, %v5739_v15  ;;  %5759 = vst [vmem:[%s11694_s15 + $0x10] sm:$0xff] %v5751_v11  ;;  %5763 = vst [vmem:[%s11694_s15 + $0x30] sm:$0xff] %v5755_v21 }
 0x498   : > { %v5752_v24 = vadd.f32 %v6064_v42, %v5744_v10  ;;  %v5756_v54 = vadd.f32 %v6065_v45, %v5748_v6 }
 0x49a   : > { %5760 = vst [vmem:[%s11694_s15 + $0x18] sm:$0xff] %v5752_v24  ;;  %5764 = vst [vmem:[%s11694_s15 + $0x38] sm:$0xff] %v5756_v54 }
 0x49b PF: > { %s15_s17 = sadd.s32 1, %s6072_s17  }
 0x49c   : > { %p12_p4 = scmp.ge.s32.totalorder %s15_s17, 4  }
 0x49e   :  { %14 = sbr.rel (!%p12_p4) target bundleno = 2 (0x2), region = 66 }

</bundles_post_ra>
